<compile_context>
chip_gen: v7x
topology: tpu7x:2x2x1
jax: 0.10.0
libtpu: 0.0.40
codegen_flags: <defaults>
</compile_context>

<pallas_src>
import functools

import jax
import jax.numpy as jnp
from jax.experimental import pallas as pl
from jax.experimental.pallas import tpu as pltpu


def _round_up(x, m):
    return ((x + m - 1) // m) * m


def _pick_row_tile(M, pref=512):
    """Row tile for the parallel output axis (M is a multiple of 256)."""
    t = min(pref, M)
    while M % t:
        t //= 2
    # v7x megacore: keep >= 2 blocks on the parallel row axis when possible.
    if t == M and M >= 512:
        t = M // 2
    return t


def _pick_red_tile(K, pref=1024):
    """Reduction tile (K is a multiple of 256)."""
    t = min(pref, K)
    while K % t:
        t //= 2
    return t


# ---------------------------------------------------------------------------
# Kernel 1: one GCN propagation step, fused with the running-sum update.
#   emb = tanh(op(A) @ B)  (bf16 out),  sum_out = sum_in + emb  (f32)
# op(A) = A (user update) or A^T (item update, contracted in place, no R.T).
# ---------------------------------------------------------------------------
def _prop_kernel_nn(a_ref, b_ref, s_ref, emb_ref, sum_ref, acc_ref):
    k = pl.program_id(2)

    @pl.when(k == 0)
    def _():
        acc_ref[...] = jnp.zeros_like(acc_ref)

    acc_ref[...] += jnp.dot(a_ref[...], b_ref[...],
                            preferred_element_type=jnp.float32)

    @pl.when(k == pl.num_programs(2) - 1)
    def _():
        e = jnp.tanh(acc_ref[...])
        emb_ref[...] = e.astype(emb_ref.dtype)
        sum_ref[...] = s_ref[...] + e


def _prop_kernel_tn(a_ref, b_ref, s_ref, emb_ref, sum_ref, acc_ref):
    k = pl.program_id(2)

    @pl.when(k == 0)
    def _():
        acc_ref[...] = jnp.zeros_like(acc_ref)

    # Contract over A's row axis: acc += A[kblk, iblk]^T @ B[kblk, jblk]
    acc_ref[...] += jax.lax.dot_general(
        a_ref[...], b_ref[...],
        dimension_numbers=(((0,), (0,)), ((), ())),
        preferred_element_type=jnp.float32)

    @pl.when(k == pl.num_programs(2) - 1)
    def _():
        e = jnp.tanh(acc_ref[...])
        emb_ref[...] = e.astype(emb_ref.dtype)
        sum_ref[...] = s_ref[...] + e


def _propagate(A, B, S, *, transpose_a):
    """Returns (tanh(op(A)@B) in bf16, S + tanh(op(A)@B) in f32)."""
    if transpose_a:
        K, M = A.shape
    else:
        M, K = A.shape
    KB, N = B.shape
    assert KB == K and S.shape == (M, N)
    assert A.dtype == jnp.bfloat16 and B.dtype == jnp.bfloat16

    tn = 256 if N % 256 == 0 else 128
    tm = _pick_row_tile(M)
    tk = _pick_red_tile(K)
    assert M % tm == 0 and K % tk == 0 and N % tn == 0

    grid = (M // tm, N // tn, K // tk)
    out_spec = pl.BlockSpec((tm, tn), lambda i, j, k: (i, j))
    if transpose_a:
        a_spec = pl.BlockSpec((tk, tm), lambda i, j, k: (k, i))
        kernel = _prop_kernel_tn
    else:
        a_spec = pl.BlockSpec((tm, tk), lambda i, j, k: (i, k))
        kernel = _prop_kernel_nn

    emb, new_sum = pl.pallas_call(
        kernel,
        out_shape=(jax.ShapeDtypeStruct((M, N), jnp.bfloat16),
                   jax.ShapeDtypeStruct((M, N), jnp.float32)),
        grid_spec=pltpu.PrefetchScalarGridSpec(
            num_scalar_prefetch=0,
            grid=grid,
            in_specs=[a_spec,
                      pl.BlockSpec((tk, tn), lambda i, j, k: (k, j)),
                      out_spec],
            out_specs=(out_spec, out_spec),
            scratch_shapes=[pltpu.VMEM((tm, tn), jnp.float32)],
        ),
        input_output_aliases={2: 1},     # running sum accumulates in place
        compiler_params=pltpu.CompilerParams(
            dimension_semantics=("parallel", "parallel", "arbitrary"),
            vmem_limit_bytes=32 * 1024 * 1024),
    )(A, B, S)
    return emb, new_sum


# ---------------------------------------------------------------------------
# Kernel 2: BPR / reg / SSL(InfoNCE) losses, row-block-tiled over the batch,
# with a leading parallel axis so v7x can use both TensorCores.
# ---------------------------------------------------------------------------
def _make_loss_kernel(reg_lambda, ssl_lambda, temperature, batch, bp, tb, nb2):
    inv_b = 1.0 / float(batch)
    inv_t = 1.0 / float(temperature)
    reg_lambda = float(reg_lambda)
    ssl_lambda = float(ssl_lambda)
    NEG_BIG = -1e30   # masked-out LSE columns (finite => no inf arithmetic)

    def _softplus(x):  # numerically stable softplus
        return jnp.log(1.0 + jnp.exp(-jnp.abs(x))) + jnp.maximum(x, 0.0)

    def _lse_rows(sim):  # (tb, Bp) -> (tb, 1) logsumexp over last dim
        m = jnp.max(sim, axis=-1, keepdims=True)
        return jnp.log(jnp.sum(jnp.exp(sim - m), axis=-1, keepdims=True)) + m

    def kernel(u_ref, p_ref, n_ref, ep_ref, en_ref, out_ref,
               un_bd, pn_bd, un_db, pn_db):
        pi = pl.program_id(0)
        j = pl.program_id(1)

        # Normalize u / p ONCE (per core) into VMEM scratch, in both (B,D) and
        # pre-transposed (D,B) layouts; reused by every sequential grid step.
        @pl.when(j == 0)
        def _():
            u_all = u_ref[...]
            p_all = p_ref[...]
            un = u_all * jax.lax.rsqrt(
                jnp.sum(u_all * u_all, axis=-1, keepdims=True) + 1e-12)
            pn = p_all * jax.lax.rsqrt(
                jnp.sum(p_all * p_all, axis=-1, keepdims=True) + 1e-12)
            un_bd[...] = un
            pn_bd[...] = pn
            un_db[...] = un.T      # one-time XLU transpose
            pn_db[...] = pn.T
            out_ref[...] = jnp.zeros_like(out_ref)

        row = pl.multiple_of((pi * nb2 + j) * tb, tb)

        # Validity masks: padded rows / padded LSE columns contribute nothing.
        rloc = jax.lax.broadcasted_iota(jnp.int32, (tb, 1), 0)
        rmask = ((rloc + row) < batch).astype(jnp.float32)
        cvalid = jax.lax.broadcasted_iota(jnp.int32, (1, bp), 1) < batch

        u = u_ref[pl.ds(row, tb), :]
        p = p_ref[pl.ds(row, tb), :]
        n = n_ref[...]

        # --- BPR loss: mean(softplus(neg - pos)) ---
        pos_s = jnp.sum(u * p, axis=-1, keepdims=True)        # (tb,1)
        neg_s = jnp.sum(u * n, axis=-1, keepdims=True)        # (tb,1)
        bpr = jnp.sum(_softplus(neg_s - pos_s) * rmask, axis=0,
                      keepdims=True) * inv_b

        # --- L2 regularization on ego item embeddings ---
        ep = ep_ref[...]
        en = en_ref[...]
        reg_rows = 0.5 * (jnp.sum(ep * ep, axis=-1, keepdims=True)
                          + jnp.sum(en * en, axis=-1, keepdims=True))
        reg = reg_lambda * jnp.sum(reg_rows * rmask, axis=0,
                                   keepdims=True) * inv_b

        # --- SSL (InfoNCE), tiled logsumexp over the full batch columns ---
        un = un_bd[pl.ds(row, tb), :]
        pn = pn_bd[pl.ds(row, tb), :]
        un_all_t = un_db[...]
        pn_all_t = pn_db[...]

        def lse(lhs, rhs_t):
            sim = jnp.dot(lhs, rhs_t, preferred_element_type=jnp.float32) * inv_t
            sim = jnp.where(cvalid, sim, NEG_BIG)
            return _lse_rows(sim)

        # Positives follow F.normalize semantics: cos(x,x)=0 for zero rows.
        pos_uu = jnp.sum(un * un, axis=-1, keepdims=True) * inv_t
        pos_pp = jnp.sum(pn * pn, axis=-1, keepdims=True) * inv_t
        pos_up = jnp.sum(un * pn, axis=-1, keepdims=True) * inv_t

        l_uu = lse(un, un_all_t) - pos_uu
        l_pp = lse(pn, pn_all_t) - pos_pp
        l_up = lse(un, pn_all_t) - pos_up

        ssl = ssl_lambda * jnp.sum((l_uu + l_pp + l_up) * rmask, axis=0,
                                   keepdims=True) * inv_b

        # Pack the three scalars into one lane-dense (1,128) accumulator row.
        lane = jax.lax.broadcasted_iota(jnp.int32, (1, 128), 1)
        out_ref[...] += (jnp.where(lane == 0, 1.0, 0.0) * bpr
                         + jnp.where(lane == 1, 1.0, 0.0) * reg
                         + jnp.where(lane == 2, 1.0, 0.0) * ssl)

    return kernel


def egcf_losses(u_e, p_e, n_e, ego_p, ego_n,
                reg_lambda, ssl_lambda, temperature):
    B, D = u_e.shape
    assert D % 128 == 0

    # Pad batch to a multiple of 128 (masked inside the kernel).
    Bp = max(128, _round_up(B, 128))
    tb = 128
    nb = Bp // tb
    P = 2 if (nb >= 2 and nb % 2 == 0) else 1   # v7x: 2 TCs; no-op on v5e/v6e
    nb2 = nb // P

    def pad_rows(x):
        x = x.astype(jnp.float32)
        if x.shape[0] == Bp:
            return x
        return jnp.zeros((Bp, x.shape[1]), jnp.float32).at[:x.shape[0]].set(x)

    u_p, p_p, n_p, ep_p, en_p = (pad_rows(a) for a in
                                 (u_e, p_e, n_e, ego_p, ego_n))

    kernel = _make_loss_kernel(reg_lambda, ssl_lambda, temperature,
                               B, Bp, tb, nb2)
    full_spec = pl.BlockSpec((Bp, D), lambda p, j: (0, 0))
    blk_spec = pl.BlockSpec((tb, D), lambda p, j: (p * nb2 + j, 0))

    packed = pl.pallas_call(
        kernel,
        out_shape=jax.ShapeDtypeStruct((P, 128), jnp.float32),
        grid_spec=pltpu.PrefetchScalarGridSpec(
            num_scalar_prefetch=0,
            grid=(P, nb2),
            in_specs=[full_spec, full_spec, blk_spec, blk_spec, blk_spec],
            out_specs=pl.BlockSpec((1, 128), lambda p, j: (p, 0)),
            scratch_shapes=[pltpu.VMEM((Bp, D), jnp.float32),
                            pltpu.VMEM((Bp, D), jnp.float32),
                            pltpu.VMEM((D, Bp), jnp.float32),
                            pltpu.VMEM((D, Bp), jnp.float32)],
        ),
        compiler_params=pltpu.CompilerParams(
            dimension_semantics=("parallel", "arbitrary"),
            vmem_limit_bytes=32 * 1024 * 1024),
    )(u_p, p_p, n_p, ep_p, en_p)

    totals = jnp.sum(packed, axis=0)
    return totals[0], totals[1], totals[2]


# ---------------------------------------------------------------------------
# EGCF forward (alternating_aggregate mode)
# ---------------------------------------------------------------------------
@functools.partial(jax.jit, static_argnums=(5, 6, 7, 8))
def egcf_forward(R, item_embedding, user, positive, negative,
                 n_layers, reg_lambda, ssl_lambda, temperature):
    num_users, num_items = R.shape
    emb_dim = item_embedding.shape[1]

    ROW_PAD = 256
    Dp = _round_up(emb_dim, 128)          # lane-dense embedding dim
    Up = _round_up(num_users, ROW_PAD)    # padded user count
    Ip = _round_up(num_items, ROW_PAD)    # padded item count

    # Zero padding is exact: pad rows/cols of R are 0, tanh(0) = 0.
    R_p = jnp.zeros((Up, Ip), jnp.bfloat16).at[:num_users, :num_items].set(
        R.astype(jnp.bfloat16))
    # Layer embeddings travel in bf16 (MXU input); running sums stay f32.
    ie0 = jnp.zeros((Ip, Dp), jnp.bfloat16).at[:num_items, :emb_dim].set(
        item_embedding.astype(jnp.bfloat16))

    u_sum = jnp.zeros((Up, Dp), jnp.float32)
    i_sum = jnp.zeros((Ip, Dp), jnp.float32)

    ie = ie0
    for _ in range(n_layers):
        # user = tanh(R @ item), fused u_sum += user
        ue, u_sum = _propagate(R_p, ie, u_sum, transpose_a=False)
        # item = tanh(R^T @ user), fused i_sum += item (no materialized R.T)
        ie, i_sum = _propagate(R_p, ue, i_sum, transpose_a=True)

    # Batch row gathers stay in XLA (glue).
    u_e = u_sum[user]
    p_e = i_sum[positive]
    n_e = i_sum[negative]

    # Ego item embeddings for the reg loss stay in f32; pad columns to Dp.
    batch = user.shape[0]
    ego_p = jnp.zeros((batch, Dp), jnp.float32).at[:, :emb_dim].set(
        item_embedding[positive])
    ego_n = jnp.zeros((batch, Dp), jnp.float32).at[:, :emb_dim].set(
        item_embedding[negative])

    return egcf_losses(u_e, p_e, n_e, ego_p, ego_n,
                       reg_lambda, ssl_lambda, temperature)


if __name__ == "__main__":
    key = jax.random.PRNGKey(0)
    num_users, num_items, emb_dim = 256, 384, 32
    n_layers = 2
    batch = 16
    reg_lambda, ssl_lambda, temperature = 1e-4, 0.1, 0.2

    k1, k2, k3, k4, k5 = jax.random.split(key, 5)

    # item_embedding ~ xavier_uniform (gain=1), deterministic
    limit = (6.0 / (num_items + emb_dim)) ** 0.5
    item_embedding = jax.random.uniform(
        k1, (num_items, emb_dim), jnp.float32, -limit, limit)

    # synthetic symmetric-normalized user-item adjacency (dense stand-in)
    mask = (jax.random.uniform(k2, (num_users, num_items)) < 0.05).astype(
        jnp.float32)
    deg_u = jnp.maximum(jnp.sum(mask, axis=1, keepdims=True), 1.0)
    deg_i = jnp.maximum(jnp.sum(mask, axis=0, keepdims=True), 1.0)
    R = mask / jnp.sqrt(deg_u) / jnp.sqrt(deg_i)

    user = jax.random.randint(k3, (batch,), 0, num_users)
    positive = jax.random.randint(k4, (batch,), 0, num_items)
    negative = jax.random.randint(k5, (batch,), 0, num_items)

    bpr_loss, reg_loss, ssl_loss = egcf_forward(
        R, item_embedding, user, positive, negative,
        n_layers, reg_lambda, ssl_lambda, temperature)
    jax.block_until_ready((bpr_loss, reg_loss, ssl_loss))
    print("KERNEL_OK")
</pallas_src>

<mosaic_0001>
module attributes {stable_mosaic.version = 11 : i64} {
  func.func @_prop_kernel_nn(%arg0: i32, %arg1: i32, %arg2: i32, %arg3: memref<256x512xbf16, #tpu.memory_space<vmem>>, %arg4: memref<512x128xbf16, #tpu.memory_space<vmem>>, %arg5: memref<256x128xf32, #tpu.memory_space<vmem>>, %arg6: memref<256x128xbf16, #tpu.memory_space<vmem>>, %arg7: memref<256x128xf32, #tpu.memory_space<vmem>>, %arg8: memref<256x128xf32, #tpu.memory_space<vmem>>) attributes {dimension_semantics = [#tpu.dimension_semantics<parallel>, #tpu.dimension_semantics<parallel>, #tpu.dimension_semantics<arbitrary>], iteration_bounds = array<i64: 1, 1, 1>, scalar_prefetch = 0 : i64, scratch_operands = 1 : i64, tpu.core_type = #tpu.core_type<tc>, window_params = [{transform_indices = @transform_0, window_bounds = array<i64: 256, 512>}, {transform_indices = @transform_1, window_bounds = array<i64: 512, 128>}, {transform_indices = @transform_2, window_bounds = array<i64: 256, 128>}, {transform_indices = @transform_3, window_bounds = array<i64: 256, 128>}, {transform_indices = @transform_4, window_bounds = array<i64: 256, 128>}]} {
    %c0_i32 = arith.constant 0 : i32
    %0 = arith.cmpi eq, %arg2, %c0_i32 : i32
    %1 = arith.extui %0 : i1 to i32
    %c0_i32_0 = arith.constant 0 : i32
    %2 = arith.cmpi ne, %1, %c0_i32_0 : i32
    scf.if %2 {
      %cst_10 = arith.constant 0.000000e+00 : f32
      %12 = vector.broadcast %cst_10 : f32 to vector<256x128xf32>
      %c0_11 = arith.constant 0 : index
      %c0_12 = arith.constant 0 : index
      %13 = vector.load %arg8[%c0_11, %c0_12] : memref<256x128xf32, #tpu.memory_space<vmem>>, vector<256x128xf32>
      tpu.vector_store %arg8[%c0_11, %c0_12], %12 {strides = array<i32>} : memref<256x128xf32, #tpu.memory_space<vmem>>, vector<256x128xf32>,
    } else {
    }
    %c0 = arith.constant 0 : index
    %c0_1 = arith.constant 0 : index
    %3 = vector.load %arg8[%c0, %c0_1] : memref<256x128xf32, #tpu.memory_space<vmem>>, vector<256x128xf32>
    %c0_2 = arith.constant 0 : index
    %c0_3 = arith.constant 0 : index
    %4 = vector.load %arg3[%c0_2, %c0_3] : memref<256x512xbf16, #tpu.memory_space<vmem>>, vector<256x512xbf16>
    %c0_4 = arith.constant 0 : index
    %c0_5 = arith.constant 0 : index
    %5 = vector.load %arg4[%c0_4, %c0_5] : memref<512x128xbf16, #tpu.memory_space<vmem>>, vector<512x128xbf16>
    %cst = arith.constant dense<0.000000e+00> : vector<256x128xf32>
    %6 = tpu.matmul %4, %5, %cst {dimension_numbers = #tpu.dot_dimension_numbers<[1], [0], [0], [1], [0, 0, 1, 1], [], []>} : vector<256x512xbf16>, vector<512x128xbf16>, vector<256x128xf32> -> vector<256x128xf32>
    %7 = arith.addf %3, %6 : vector<256x128xf32>
    %c0_6 = arith.constant 0 : index
    %c0_7 = arith.constant 0 : index
    %8 = vector.load %arg8[%c0_6, %c0_7] : memref<256x128xf32, #tpu.memory_space<vmem>>, vector<256x128xf32>
    tpu.vector_store %arg8[%c0_6, %c0_7], %7 {strides = array<i32>} : memref<256x128xf32, #tpu.memory_space<vmem>>, vector<256x128xf32>,
    %c0_i32_8 = arith.constant 0 : i32
    %9 = arith.cmpi eq, %arg2, %c0_i32_8 : i32
    %10 = arith.extui %9 : i1 to i32
    %c0_i32_9 = arith.constant 0 : i32
    %11 = arith.cmpi ne, %10, %c0_i32_9 : i32
    scf.if %11 {
      %c0_10 = arith.constant 0 : index
      %c0_11 = arith.constant 0 : index
      %12 = vector.load %arg8[%c0_10, %c0_11] : memref<256x128xf32, #tpu.memory_space<vmem>>, vector<256x128xf32>
      %13 = math.tanh %12 : vector<256x128xf32>
      %14 = arith.truncf %13 : vector<256x128xf32> to vector<256x128xbf16>
      %c0_12 = arith.constant 0 : index
      %c0_13 = arith.constant 0 : index
      %15 = vector.load %arg6[%c0_12, %c0_13] : memref<256x128xbf16, #tpu.memory_space<vmem>>, vector<256x128xbf16>
      tpu.vector_store %arg6[%c0_12, %c0_13], %14 {strides = array<i32>} : memref<256x128xbf16, #tpu.memory_space<vmem>>, vector<256x128xbf16>,
      %c0_14 = arith.constant 0 : index
      %c0_15 = arith.constant 0 : index
      %16 = vector.load %arg5[%c0_14, %c0_15] : memref<256x128xf32, #tpu.memory_space<vmem>>, vector<256x128xf32>
      %17 = arith.addf %16, %13 : vector<256x128xf32>
      %c0_16 = arith.constant 0 : index
      %c0_17 = arith.constant 0 : index
      %18 = vector.load %arg7[%c0_16, %c0_17] : memref<256x128xf32, #tpu.memory_space<vmem>>, vector<256x128xf32>
      tpu.vector_store %arg7[%c0_16, %c0_17], %17 {strides = array<i32>} : memref<256x128xf32, #tpu.memory_space<vmem>>, vector<256x128xf32>,
    } else {
    }
    return
  }
  func.func @transform_0(%arg0: i32, %arg1: i32, %arg2: i32) -> (i32, i32) {
    %c0_i32 = arith.constant 0 : i32
    return %arg0, %arg2 : i32, i32
  }
  func.func @transform_1(%arg0: i32, %arg1: i32, %arg2: i32) -> (i32, i32) {
    %c0_i32 = arith.constant 0 : i32
    return %arg2, %arg1 : i32, i32
  }
  func.func @transform_2(%arg0: i32, %arg1: i32, %arg2: i32) -> (i32, i32) {
    %c0_i32 = arith.constant 0 : i32
    return %arg0, %arg1 : i32, i32
  }
  func.func @transform_3(%arg0: i32, %arg1: i32, %arg2: i32) -> (i32, i32) {
    %c0_i32 = arith.constant 0 : i32
    return %arg0, %arg1 : i32, i32
  }
  func.func @transform_4(%arg0: i32, %arg1: i32, %arg2: i32) -> (i32, i32) {
    %c0_i32 = arith.constant 0 : i32
    return %arg0, %arg1 : i32, i32
  }
}

module attributes {stable_mosaic.version = 11 : i64} {
  func.func @_prop_kernel_tn(%arg0: i32, %arg1: i32, %arg2: i32, %arg3: memref<256x256xbf16, #tpu.memory_space<vmem>>, %arg4: memref<256x128xbf16, #tpu.memory_space<vmem>>, %arg5: memref<256x128xf32, #tpu.memory_space<vmem>>, %arg6: memref<256x128xbf16, #tpu.memory_space<vmem>>, %arg7: memref<256x128xf32, #tpu.memory_space<vmem>>, %arg8: memref<256x128xf32, #tpu.memory_space<vmem>>) attributes {dimension_semantics = [#tpu.dimension_semantics<parallel>, #tpu.dimension_semantics<parallel>, #tpu.dimension_semantics<arbitrary>], iteration_bounds = array<i64: 2, 1, 1>, scalar_prefetch = 0 : i64, scratch_operands = 1 : i64, tpu.core_type = #tpu.core_type<tc>, window_params = [{transform_indices = @transform_0, window_bounds = array<i64: 256, 256>}, {transform_indices = @transform_1, window_bounds = array<i64: 256, 128>}, {transform_indices = @transform_2, window_bounds = array<i64: 256, 128>}, {transform_indices = @transform_3, window_bounds = array<i64: 256, 128>}, {transform_indices = @transform_4, window_bounds = array<i64: 256, 128>}]} {
    %c0_i32 = arith.constant 0 : i32
    %0 = arith.cmpi eq, %arg2, %c0_i32 : i32
    %1 = arith.extui %0 : i1 to i32
    %c0_i32_0 = arith.constant 0 : i32
    %2 = arith.cmpi ne, %1, %c0_i32_0 : i32
    scf.if %2 {
      %cst_10 = arith.constant 0.000000e+00 : f32
      %12 = vector.broadcast %cst_10 : f32 to vector<256x128xf32>
      %c0_11 = arith.constant 0 : index
      %c0_12 = arith.constant 0 : index
      %13 = vector.load %arg8[%c0_11, %c0_12] : memref<256x128xf32, #tpu.memory_space<vmem>>, vector<256x128xf32>
      tpu.vector_store %arg8[%c0_11, %c0_12], %12 {strides = array<i32>} : memref<256x128xf32, #tpu.memory_space<vmem>>, vector<256x128xf32>,
    } else {
    }
    %c0 = arith.constant 0 : index
    %c0_1 = arith.constant 0 : index
    %3 = vector.load %arg8[%c0, %c0_1] : memref<256x128xf32, #tpu.memory_space<vmem>>, vector<256x128xf32>
    %c0_2 = arith.constant 0 : index
    %c0_3 = arith.constant 0 : index
    %4 = vector.load %arg3[%c0_2, %c0_3] : memref<256x256xbf16, #tpu.memory_space<vmem>>, vector<256x256xbf16>
    %c0_4 = arith.constant 0 : index
    %c0_5 = arith.constant 0 : index
    %5 = vector.load %arg4[%c0_4, %c0_5] : memref<256x128xbf16, #tpu.memory_space<vmem>>, vector<256x128xbf16>
    %cst = arith.constant dense<0.000000e+00> : vector<256x128xf32>
    %6 = tpu.matmul %4, %5, %cst {dimension_numbers = #tpu.dot_dimension_numbers<[0], [0], [1], [1], [0, 1, 1, 1], [], []>} : vector<256x256xbf16>, vector<256x128xbf16>, vector<256x128xf32> -> vector<256x128xf32>
    %7 = arith.addf %3, %6 : vector<256x128xf32>
    %c0_6 = arith.constant 0 : index
    %c0_7 = arith.constant 0 : index
    %8 = vector.load %arg8[%c0_6, %c0_7] : memref<256x128xf32, #tpu.memory_space<vmem>>, vector<256x128xf32>
    tpu.vector_store %arg8[%c0_6, %c0_7], %7 {strides = array<i32>} : memref<256x128xf32, #tpu.memory_space<vmem>>, vector<256x128xf32>,
    %c0_i32_8 = arith.constant 0 : i32
    %9 = arith.cmpi eq, %arg2, %c0_i32_8 : i32
    %10 = arith.extui %9 : i1 to i32
    %c0_i32_9 = arith.constant 0 : i32
    %11 = arith.cmpi ne, %10, %c0_i32_9 : i32
    scf.if %11 {
      %c0_10 = arith.constant 0 : index
      %c0_11 = arith.constant 0 : index
      %12 = vector.load %arg8[%c0_10, %c0_11] : memref<256x128xf32, #tpu.memory_space<vmem>>, vector<256x128xf32>
      %13 = math.tanh %12 : vector<256x128xf32>
      %14 = arith.truncf %13 : vector<256x128xf32> to vector<256x128xbf16>
      %c0_12 = arith.constant 0 : index
      %c0_13 = arith.constant 0 : index
      %15 = vector.load %arg6[%c0_12, %c0_13] : memref<256x128xbf16, #tpu.memory_space<vmem>>, vector<256x128xbf16>
      tpu.vector_store %arg6[%c0_12, %c0_13], %14 {strides = array<i32>} : memref<256x128xbf16, #tpu.memory_space<vmem>>, vector<256x128xbf16>,
      %c0_14 = arith.constant 0 : index
      %c0_15 = arith.constant 0 : index
      %16 = vector.load %arg5[%c0_14, %c0_15] : memref<256x128xf32, #tpu.memory_space<vmem>>, vector<256x128xf32>
      %17 = arith.addf %16, %13 : vector<256x128xf32>
      %c0_16 = arith.constant 0 : index
      %c0_17 = arith.constant 0 : index
      %18 = vector.load %arg7[%c0_16, %c0_17] : memref<256x128xf32, #tpu.memory_space<vmem>>, vector<256x128xf32>
      tpu.vector_store %arg7[%c0_16, %c0_17], %17 {strides = array<i32>} : memref<256x128xf32, #tpu.memory_space<vmem>>, vector<256x128xf32>,
    } else {
    }
    return
  }
  func.func @transform_0(%arg0: i32, %arg1: i32, %arg2: i32) -> (i32, i32) {
    %c0_i32 = arith.constant 0 : i32
    return %arg2, %arg0 : i32, i32
  }
  func.func @transform_1(%arg0: i32, %arg1: i32, %arg2: i32) -> (i32, i32) {
    %c0_i32 = arith.constant 0 : i32
    return %arg2, %arg1 : i32, i32
  }
  func.func @transform_2(%arg0: i32, %arg1: i32, %arg2: i32) -> (i32, i32) {
    %c0_i32 = arith.constant 0 : i32
    return %arg0, %arg1 : i32, i32
  }
  func.func @transform_3(%arg0: i32, %arg1: i32, %arg2: i32) -> (i32, i32) {
    %c0_i32 = arith.constant 0 : i32
    return %arg0, %arg1 : i32, i32
  }
  func.func @transform_4(%arg0: i32, %arg1: i32, %arg2: i32) -> (i32, i32) {
    %c0_i32 = arith.constant 0 : i32
    return %arg0, %arg1 : i32, i32
  }
}

module attributes {stable_mosaic.version = 11 : i64} {
  func.func @_prop_kernel_tn(%arg0: i32, %arg1: i32, %arg2: i32, %arg3: memref<256x256xbf16, #tpu.memory_space<vmem>>, %arg4: memref<256x128xbf16, #tpu.memory_space<vmem>>, %arg5: memref<256x128xf32, #tpu.memory_space<vmem>>, %arg6: memref<256x128xbf16, #tpu.memory_space<vmem>>, %arg7: memref<256x128xf32, #tpu.memory_space<vmem>>, %arg8: memref<256x128xf32, #tpu.memory_space<vmem>>) attributes {dimension_semantics = [#tpu.dimension_semantics<parallel>, #tpu.dimension_semantics<parallel>, #tpu.dimension_semantics<arbitrary>], iteration_bounds = array<i64: 2, 1, 1>, scalar_prefetch = 0 : i64, scratch_operands = 1 : i64, tpu.core_type = #tpu.core_type<tc>, window_params = [{transform_indices = @transform_0, window_bounds = array<i64: 256, 256>}, {transform_indices = @transform_1, window_bounds = array<i64: 256, 128>}, {transform_indices = @transform_2, window_bounds = array<i64: 256, 128>}, {transform_indices = @transform_3, window_bounds = array<i64: 256, 128>}, {transform_indices = @transform_4, window_bounds = array<i64: 256, 128>}]} {
    %c0_i32 = arith.constant 0 : i32
    %0 = arith.cmpi eq, %arg2, %c0_i32 : i32
    %1 = arith.extui %0 : i1 to i32
    %c0_i32_0 = arith.constant 0 : i32
    %2 = arith.cmpi ne, %1, %c0_i32_0 : i32
    scf.if %2 {
      %cst_10 = arith.constant 0.000000e+00 : f32
      %12 = vector.broadcast %cst_10 : f32 to vector<256x128xf32>
      %c0_11 = arith.constant 0 : index
      %c0_12 = arith.constant 0 : index
      %13 = vector.load %arg8[%c0_11, %c0_12] : memref<256x128xf32, #tpu.memory_space<vmem>>, vector<256x128xf32>
      tpu.vector_store %arg8[%c0_11, %c0_12], %12 {strides = array<i32>} : memref<256x128xf32, #tpu.memory_space<vmem>>, vector<256x128xf32>,
    } else {
    }
    %c0 = arith.constant 0 : index
    %c0_1 = arith.constant 0 : index
    %3 = vector.load %arg8[%c0, %c0_1] : memref<256x128xf32, #tpu.memory_space<vmem>>, vector<256x128xf32>
    %c0_2 = arith.constant 0 : index
    %c0_3 = arith.constant 0 : index
    %4 = vector.load %arg3[%c0_2, %c0_3] : memref<256x256xbf16, #tpu.memory_space<vmem>>, vector<256x256xbf16>
    %c0_4 = arith.constant 0 : index
    %c0_5 = arith.constant 0 : index
    %5 = vector.load %arg4[%c0_4, %c0_5] : memref<256x128xbf16, #tpu.memory_space<vmem>>, vector<256x128xbf16>
    %cst = arith.constant dense<0.000000e+00> : vector<256x128xf32>
    %6 = tpu.matmul %4, %5, %cst {dimension_numbers = #tpu.dot_dimension_numbers<[0], [0], [1], [1], [0, 1, 1, 1], [], []>} : vector<256x256xbf16>, vector<256x128xbf16>, vector<256x128xf32> -> vector<256x128xf32>
    %7 = arith.addf %3, %6 : vector<256x128xf32>
    %c0_6 = arith.constant 0 : index
    %c0_7 = arith.constant 0 : index
    %8 = vector.load %arg8[%c0_6, %c0_7] : memref<256x128xf32, #tpu.memory_space<vmem>>, vector<256x128xf32>
    tpu.vector_store %arg8[%c0_6, %c0_7], %7 {strides = array<i32>} : memref<256x128xf32, #tpu.memory_space<vmem>>, vector<256x128xf32>,
    %c0_i32_8 = arith.constant 0 : i32
    %9 = arith.cmpi eq, %arg2, %c0_i32_8 : i32
    %10 = arith.extui %9 : i1 to i32
    %c0_i32_9 = arith.constant 0 : i32
    %11 = arith.cmpi ne, %10, %c0_i32_9 : i32
    scf.if %11 {
      %c0_10 = arith.constant 0 : index
      %c0_11 = arith.constant 0 : index
      %12 = vector.load %arg8[%c0_10, %c0_11] : memref<256x128xf32, #tpu.memory_space<vmem>>, vector<256x128xf32>
      %13 = math.tanh %12 : vector<256x128xf32>
      %14 = arith.truncf %13 : vector<256x128xf32> to vector<256x128xbf16>
      %c0_12 = arith.constant 0 : index
      %c0_13 = arith.constant 0 : index
      %15 = vector.load %arg6[%c0_12, %c0_13] : memref<256x128xbf16, #tpu.memory_space<vmem>>, vector<256x128xbf16>
      tpu.vector_store %arg6[%c0_12, %c0_13], %14 {strides = array<i32>} : memref<256x128xbf16, #tpu.memory_space<vmem>>, vector<256x128xbf16>,
      %c0_14 = arith.constant 0 : index
      %c0_15 = arith.constant 0 : index
      %16 = vector.load %arg5[%c0_14, %c0_15] : memref<256x128xf32, #tpu.memory_space<vmem>>, vector<256x128xf32>
      %17 = arith.addf %16, %13 : vector<256x128xf32>
      %c0_16 = arith.constant 0 : index
      %c0_17 = arith.constant 0 : index
      %18 = vector.load %arg7[%c0_16, %c0_17] : memref<256x128xf32, #tpu.memory_space<vmem>>, vector<256x128xf32>
      tpu.vector_store %arg7[%c0_16, %c0_17], %17 {strides = array<i32>} : memref<256x128xf32, #tpu.memory_space<vmem>>, vector<256x128xf32>,
    } else {
    }
    return
  }
  func.func @transform_0(%arg0: i32, %arg1: i32, %arg2: i32) -> (i32, i32) {
    %c0_i32 = arith.constant 0 : i32
    return %arg2, %arg0 : i32, i32
  }
  func.func @transform_1(%arg0: i32, %arg1: i32, %arg2: i32) -> (i32, i32) {
    %c0_i32 = arith.constant 0 : i32
    return %arg2, %arg1 : i32, i32
  }
  func.func @transform_2(%arg0: i32, %arg1: i32, %arg2: i32) -> (i32, i32) {
    %c0_i32 = arith.constant 0 : i32
    return %arg0, %arg1 : i32, i32
  }
  func.func @transform_3(%arg0: i32, %arg1: i32, %arg2: i32) -> (i32, i32) {
    %c0_i32 = arith.constant 0 : i32
    return %arg0, %arg1 : i32, i32
  }
  func.func @transform_4(%arg0: i32, %arg1: i32, %arg2: i32) -> (i32, i32) {
    %c0_i32 = arith.constant 0 : i32
    return %arg0, %arg1 : i32, i32
  }
}

module attributes {stable_mosaic.version = 11 : i64} {
  func.func @kernel(%arg0: i32, %arg1: i32, %arg2: memref<128x128xf32, #tpu.memory_space<vmem>>, %arg3: memref<128x128xf32, #tpu.memory_space<vmem>>, %arg4: memref<128x128xf32, #tpu.memory_space<vmem>>, %arg5: memref<128x128xf32, #tpu.memory_space<vmem>>, %arg6: memref<128x128xf32, #tpu.memory_space<vmem>>, %arg7: memref<1x128xf32, #tpu.memory_space<vmem>>, %arg8: memref<128x128xf32, #tpu.memory_space<vmem>>, %arg9: memref<128x128xf32, #tpu.memory_space<vmem>>, %arg10: memref<128x128xf32, #tpu.memory_space<vmem>>, %arg11: memref<128x128xf32, #tpu.memory_space<vmem>>) attributes {dimension_semantics = [#tpu.dimension_semantics<parallel>, #tpu.dimension_semantics<arbitrary>], iteration_bounds = array<i64: 1, 1>, scalar_prefetch = 0 : i64, scratch_operands = 4 : i64, tpu.core_type = #tpu.core_type<tc>, window_params = [{pipeline_mode = #tpu.pipeline_mode<synchronous>, transform_indices = @transform_0, window_bounds = array<i64: 128, 128>}, {pipeline_mode = #tpu.pipeline_mode<synchronous>, transform_indices = @transform_1, window_bounds = array<i64: 128, 128>}, {transform_indices = @transform_2, window_bounds = array<i64: 128, 128>}, {transform_indices = @transform_3, window_bounds = array<i64: 128, 128>}, {transform_indices = @transform_4, window_bounds = array<i64: 128, 128>}, {transform_indices = @transform_5, window_bounds = array<i64: 1, 128>}]} {
    %c0_i32 = arith.constant 0 : i32
    %0 = arith.cmpi eq, %arg1, %c0_i32 : i32
    %1 = arith.extui %0 : i1 to i32
    %c0_i32_0 = arith.constant 0 : i32
    %2 = arith.cmpi ne, %1, %c0_i32_0 : i32
    scf.if %2 {
      %c0_63 = arith.constant 0 : index
      %c0_64 = arith.constant 0 : index
      %170 = vector.load %arg2[%c0_63, %c0_64] : memref<128x128xf32, #tpu.memory_space<vmem>>, vector<128x128xf32>
      %c0_65 = arith.constant 0 : index
      %c0_66 = arith.constant 0 : index
      %171 = vector.load %arg3[%c0_65, %c0_66] : memref<128x128xf32, #tpu.memory_space<vmem>>, vector<128x128xf32>
      %172 = arith.mulf %170, %170 : vector<128x128xf32>
      %cst_67 = arith.constant dense<0.000000e+00> : vector<128xf32>
      %173 = vector.multi_reduction <add>, %172, %cst_67 [1] : vector<128x128xf32> to vector<128xf32>
      %174 = vector.shape_cast %173 : vector<128xf32> to vector<128x1xf32>
      %cst_68 = arith.constant 9.99999996E-13 : f32
      %175 = vector.broadcast %cst_68 : f32 to vector<128x1xf32>
      %176 = arith.addf %174, %175 : vector<128x1xf32>
      %177 = math.rsqrt %176 : vector<128x1xf32>
      %178 = vector.broadcast %177 : vector<128x1xf32> to vector<128x128xf32>
      %179 = arith.mulf %170, %178 : vector<128x128xf32>
      %180 = arith.mulf %171, %171 : vector<128x128xf32>
      %cst_69 = arith.constant dense<0.000000e+00> : vector<128xf32>
      %181 = vector.multi_reduction <add>, %180, %cst_69 [1] : vector<128x128xf32> to vector<128xf32>
      %182 = vector.shape_cast %181 : vector<128xf32> to vector<128x1xf32>
      %cst_70 = arith.constant 9.99999996E-13 : f32
      %183 = vector.broadcast %cst_70 : f32 to vector<128x1xf32>
      %184 = arith.addf %182, %183 : vector<128x1xf32>
      %185 = math.rsqrt %184 : vector<128x1xf32>
      %186 = vector.broadcast %185 : vector<128x1xf32> to vector<128x128xf32>
      %187 = arith.mulf %171, %186 : vector<128x128xf32>
      %c0_71 = arith.constant 0 : index
      %c0_72 = arith.constant 0 : index
      %188 = vector.load %arg8[%c0_71, %c0_72] : memref<128x128xf32, #tpu.memory_space<vmem>>, vector<128x128xf32>
      tpu.vector_store %arg8[%c0_71, %c0_72], %179 {strides = array<i32>} : memref<128x128xf32, #tpu.memory_space<vmem>>, vector<128x128xf32>,
      %c0_73 = arith.constant 0 : index
      %c0_74 = arith.constant 0 : index
      %189 = vector.load %arg9[%c0_73, %c0_74] : memref<128x128xf32, #tpu.memory_space<vmem>>, vector<128x128xf32>
      tpu.vector_store %arg9[%c0_73, %c0_74], %187 {strides = array<i32>} : memref<128x128xf32, #tpu.memory_space<vmem>>, vector<128x128xf32>,
      %190 = tpu.transpose %179, [1, 0] : vector<128x128xf32> -> vector<128x128xf32>
      %c0_75 = arith.constant 0 : index
      %c0_76 = arith.constant 0 : index
      %191 = vector.load %arg10[%c0_75, %c0_76] : memref<128x128xf32, #tpu.memory_space<vmem>>, vector<128x128xf32>
      tpu.vector_store %arg10[%c0_75, %c0_76], %190 {strides = array<i32>} : memref<128x128xf32, #tpu.memory_space<vmem>>, vector<128x128xf32>,
      %192 = tpu.transpose %187, [1, 0] : vector<128x128xf32> -> vector<128x128xf32>
      %c0_77 = arith.constant 0 : index
      %c0_78 = arith.constant 0 : index
      %193 = vector.load %arg11[%c0_77, %c0_78] : memref<128x128xf32, #tpu.memory_space<vmem>>, vector<128x128xf32>
      tpu.vector_store %arg11[%c0_77, %c0_78], %192 {strides = array<i32>} : memref<128x128xf32, #tpu.memory_space<vmem>>, vector<128x128xf32>,
      %cst_79 = arith.constant 0.000000e+00 : f32
      %194 = vector.broadcast %cst_79 : f32 to vector<1x128xf32>
      %c0_80 = arith.constant 0 : index
      %c0_81 = arith.constant 0 : index
      %195 = vector.load %arg7[%c0_80, %c0_81] : memref<1x128xf32, #tpu.memory_space<vmem>>, vector<1x128xf32>
      tpu.vector_store %arg7[%c0_80, %c0_81], %194 {strides = array<i32>} : memref<1x128xf32, #tpu.memory_space<vmem>>, vector<1x128xf32>,
    } else {
    }
    %c1_i32 = arith.constant 1 : i32
    %3 = arith.muli %arg0, %c1_i32 : i32
    %4 = arith.addi %3, %arg1 : i32
    %c128_i32 = arith.constant 128 : i32
    %5 = arith.muli %4, %c128_i32 : i32
    %6 = tpu.assume_multiple %5, 128 : i32
    %7 = tpu.iota {dimensions = array<i32: 0>} : vector<128x1xi32>
    %8 = vector.broadcast %6 : i32 to vector<128x1xi32>
    %9 = arith.addi %7, %8 : vector<128x1xi32>
    %c16_i32 = arith.constant 16 : i32
    %10 = vector.broadcast %c16_i32 : i32 to vector<128x1xi32>
    %11 = arith.cmpi slt, %9, %10 : vector<128x1xi32>
    %12 = arith.extui %11 : vector<128x1xi1> to vector<128x1xi32>
    %13 = arith.sitofp %12 : vector<128x1xi32> to vector<128x1xf32>
    %14 = tpu.iota {dimensions = array<i32: 1>} : vector<1x128xi32>
    %c16_i32_1 = arith.constant 16 : i32
    %15 = vector.broadcast %c16_i32_1 : i32 to vector<1x128xi32>
    %16 = arith.cmpi slt, %14, %15 : vector<1x128xi32>
    %17 = arith.index_cast %6 : i32 to index
    %c0 = arith.constant 0 : index
    %18 = vector.load %arg2[%17, %c0] : memref<128x128xf32, #tpu.memory_space<vmem>>, vector<128x128xf32>
    %19 = arith.index_cast %6 : i32 to index
    %c0_2 = arith.constant 0 : index
    %20 = vector.load %arg3[%19, %c0_2] : memref<128x128xf32, #tpu.memory_space<vmem>>, vector<128x128xf32>
    %c0_3 = arith.constant 0 : index
    %c0_4 = arith.constant 0 : index
    %21 = vector.load %arg4[%c0_3, %c0_4] : memref<128x128xf32, #tpu.memory_space<vmem>>, vector<128x128xf32>
    %22 = arith.mulf %18, %20 : vector<128x128xf32>
    %cst = arith.constant dense<0.000000e+00> : vector<128xf32>
    %23 = vector.multi_reduction <add>, %22, %cst [1] : vector<128x128xf32> to vector<128xf32>
    %24 = vector.shape_cast %23 : vector<128xf32> to vector<128x1xf32>
    %25 = arith.mulf %18, %21 : vector<128x128xf32>
    %cst_5 = arith.constant dense<0.000000e+00> : vector<128xf32>
    %26 = vector.multi_reduction <add>, %25, %cst_5 [1] : vector<128x128xf32> to vector<128xf32>
    %27 = vector.shape_cast %26 : vector<128xf32> to vector<128x1xf32>
    %28 = arith.subf %27, %24 : vector<128x1xf32>
    %29 = math.absf %28 : vector<128x1xf32>
    %cst_6 = arith.constant 0.000000e+00 : f32
    %30 = vector.broadcast %cst_6 : f32 to vector<128x1xf32>
    %31 = arith.subf %30, %29 : vector<128x1xf32>
    %32 = math.exp %31 : vector<128x1xf32>
    %cst_7 = arith.constant 1.000000e+00 : f32
    %33 = vector.broadcast %cst_7 : f32 to vector<128x1xf32>
    %34 = arith.addf %33, %32 : vector<128x1xf32>
    %35 = math.log %34 : vector<128x1xf32>
    %cst_8 = arith.constant 0.000000e+00 : f32
    %36 = vector.broadcast %cst_8 : f32 to vector<128x1xf32>
    %37 = arith.maximumf %28, %36 : vector<128x1xf32>
    %38 = arith.addf %35, %37 : vector<128x1xf32>
    %39 = arith.mulf %38, %13 : vector<128x1xf32>
    %cst_9 = arith.constant dense<0.000000e+00> : vector<1xf32>
    %40 = vector.multi_reduction <add>, %39, %cst_9 [0] : vector<128x1xf32> to vector<1xf32>
    %41 = vector.shape_cast %40 : vector<1xf32> to vector<1x1xf32>
    %cst_10 = arith.constant 6.250000e-02 : f32
    %42 = vector.broadcast %cst_10 : f32 to vector<1x1xf32>
    %43 = arith.mulf %41, %42 : vector<1x1xf32>
    %c0_11 = arith.constant 0 : index
    %c0_12 = arith.constant 0 : index
    %44 = vector.load %arg5[%c0_11, %c0_12] : memref<128x128xf32, #tpu.memory_space<vmem>>, vector<128x128xf32>
    %c0_13 = arith.constant 0 : index
    %c0_14 = arith.constant 0 : index
    %45 = vector.load %arg6[%c0_13, %c0_14] : memref<128x128xf32, #tpu.memory_space<vmem>>, vector<128x128xf32>
    %46 = arith.mulf %44, %44 : vector<128x128xf32>
    %cst_15 = arith.constant dense<0.000000e+00> : vector<128xf32>
    %47 = vector.multi_reduction <add>, %46, %cst_15 [1] : vector<128x128xf32> to vector<128xf32>
    %48 = vector.shape_cast %47 : vector<128xf32> to vector<128x1xf32>
    %49 = arith.mulf %45, %45 : vector<128x128xf32>
    %cst_16 = arith.constant dense<0.000000e+00> : vector<128xf32>
    %50 = vector.multi_reduction <add>, %49, %cst_16 [1] : vector<128x128xf32> to vector<128xf32>
    %51 = vector.shape_cast %50 : vector<128xf32> to vector<128x1xf32>
    %52 = arith.addf %48, %51 : vector<128x1xf32>
    %cst_17 = arith.constant 5.000000e-01 : f32
    %53 = vector.broadcast %cst_17 : f32 to vector<128x1xf32>
    %54 = arith.mulf %53, %52 : vector<128x1xf32>
    %55 = arith.mulf %54, %13 : vector<128x1xf32>
    %cst_18 = arith.constant dense<0.000000e+00> : vector<1xf32>
    %56 = vector.multi_reduction <add>, %55, %cst_18 [0] : vector<128x1xf32> to vector<1xf32>
    %57 = vector.shape_cast %56 : vector<1xf32> to vector<1x1xf32>
    %cst_19 = arith.constant 9.99999974E-5 : f32
    %58 = vector.broadcast %cst_19 : f32 to vector<1x1xf32>
    %59 = arith.mulf %58, %57 : vector<1x1xf32>
    %cst_20 = arith.constant 6.250000e-02 : f32
    %60 = vector.broadcast %cst_20 : f32 to vector<1x1xf32>
    %61 = arith.mulf %59, %60 : vector<1x1xf32>
    %62 = arith.index_cast %6 : i32 to index
    %c0_21 = arith.constant 0 : index
    %63 = vector.load %arg8[%62, %c0_21] : memref<128x128xf32, #tpu.memory_space<vmem>>, vector<128x128xf32>
    %64 = arith.index_cast %6 : i32 to index
    %c0_22 = arith.constant 0 : index
    %65 = vector.load %arg9[%64, %c0_22] : memref<128x128xf32, #tpu.memory_space<vmem>>, vector<128x128xf32>
    %c0_23 = arith.constant 0 : index
    %c0_24 = arith.constant 0 : index
    %66 = vector.load %arg10[%c0_23, %c0_24] : memref<128x128xf32, #tpu.memory_space<vmem>>, vector<128x128xf32>
    %c0_25 = arith.constant 0 : index
    %c0_26 = arith.constant 0 : index
    %67 = vector.load %arg11[%c0_25, %c0_26] : memref<128x128xf32, #tpu.memory_space<vmem>>, vector<128x128xf32>
    %68 = arith.mulf %63, %63 : vector<128x128xf32>
    %cst_27 = arith.constant dense<0.000000e+00> : vector<128xf32>
    %69 = vector.multi_reduction <add>, %68, %cst_27 [1] : vector<128x128xf32> to vector<128xf32>
    %70 = vector.shape_cast %69 : vector<128xf32> to vector<128x1xf32>
    %cst_28 = arith.constant 5.000000e+00 : f32
    %71 = vector.broadcast %cst_28 : f32 to vector<128x1xf32>
    %72 = arith.mulf %70, %71 : vector<128x1xf32>
    %73 = arith.mulf %65, %65 : vector<128x128xf32>
    %cst_29 = arith.constant dense<0.000000e+00> : vector<128xf32>
    %74 = vector.multi_reduction <add>, %73, %cst_29 [1] : vector<128x128xf32> to vector<128xf32>
    %75 = vector.shape_cast %74 : vector<128xf32> to vector<128x1xf32>
    %cst_30 = arith.constant 5.000000e+00 : f32
    %76 = vector.broadcast %cst_30 : f32 to vector<128x1xf32>
    %77 = arith.mulf %75, %76 : vector<128x1xf32>
    %78 = arith.mulf %63, %65 : vector<128x128xf32>
    %cst_31 = arith.constant dense<0.000000e+00> : vector<128xf32>
    %79 = vector.multi_reduction <add>, %78, %cst_31 [1] : vector<128x128xf32> to vector<128xf32>
    %80 = vector.shape_cast %79 : vector<128xf32> to vector<128x1xf32>
    %cst_32 = arith.constant 5.000000e+00 : f32
    %81 = vector.broadcast %cst_32 : f32 to vector<128x1xf32>
    %82 = arith.mulf %80, %81 : vector<128x1xf32>
    %cst_33 = arith.constant dense<0.000000e+00> : vector<128x128xf32>
    %83 = tpu.matmul %63, %66, %cst_33 {dimension_numbers = #tpu.dot_dimension_numbers<[1], [0], [0], [1], [0, 0, 1, 1], [], []>} : vector<128x128xf32>, vector<128x128xf32>, vector<128x128xf32> -> vector<128x128xf32>
    %cst_34 = arith.constant 5.000000e+00 : f32
    %84 = vector.broadcast %cst_34 : f32 to vector<128x128xf32>
    %85 = arith.mulf %83, %84 : vector<128x128xf32>
    %cst_35 = arith.constant -1.000000e+30 : f32
    %86 = vector.shape_cast %16 : vector<1x128xi1> to vector<1x128xi1>
    %87 = vector.broadcast %86 : vector<1x128xi1> to vector<128x128xi1>
    %88 = vector.broadcast %cst_35 : f32 to vector<128x128xf32>
    %89 = arith.select %87, %85, %88 : vector<128x128xi1>, vector<128x128xf32>
    %cst_36 = arith.constant dense<0xFF800000> : vector<128xf32>
    %90 = vector.multi_reduction <maximumf>, %89, %cst_36 [1] : vector<128x128xf32> to vector<128xf32>
    %91 = vector.shape_cast %90 : vector<128xf32> to vector<128x1xf32>
    %92 = vector.broadcast %91 : vector<128x1xf32> to vector<128x128xf32>
    %93 = arith.subf %89, %92 : vector<128x128xf32>
    %94 = math.exp %93 : vector<128x128xf32>
    %cst_37 = arith.constant dense<0.000000e+00> : vector<128xf32>
    %95 = vector.multi_reduction <add>, %94, %cst_37 [1] : vector<128x128xf32> to vector<128xf32>
    %96 = vector.shape_cast %95 : vector<128xf32> to vector<128x1xf32>
    %97 = math.log %96 : vector<128x1xf32>
    %98 = arith.addf %97, %91 : vector<128x1xf32>
    %99 = arith.subf %98, %72 : vector<128x1xf32>
    %cst_38 = arith.constant dense<0.000000e+00> : vector<128x128xf32>
    %100 = tpu.matmul %65, %67, %cst_38 {dimension_numbers = #tpu.dot_dimension_numbers<[1], [0], [0], [1], [0, 0, 1, 1], [], []>} : vector<128x128xf32>, vector<128x128xf32>, vector<128x128xf32> -> vector<128x128xf32>
    %cst_39 = arith.constant 5.000000e+00 : f32
    %101 = vector.broadcast %cst_39 : f32 to vector<128x128xf32>
    %102 = arith.mulf %100, %101 : vector<128x128xf32>
    %cst_40 = arith.constant -1.000000e+30 : f32
    %103 = vector.shape_cast %16 : vector<1x128xi1> to vector<1x128xi1>
    %104 = vector.broadcast %103 : vector<1x128xi1> to vector<128x128xi1>
    %105 = vector.broadcast %cst_40 : f32 to vector<128x128xf32>
    %106 = arith.select %104, %102, %105 : vector<128x128xi1>, vector<128x128xf32>
    %cst_41 = arith.constant dense<0xFF800000> : vector<128xf32>
    %107 = vector.multi_reduction <maximumf>, %106, %cst_41 [1] : vector<128x128xf32> to vector<128xf32>
    %108 = vector.shape_cast %107 : vector<128xf32> to vector<128x1xf32>
    %109 = vector.broadcast %108 : vector<128x1xf32> to vector<128x128xf32>
    %110 = arith.subf %106, %109 : vector<128x128xf32>
    %111 = math.exp %110 : vector<128x128xf32>
    %cst_42 = arith.constant dense<0.000000e+00> : vector<128xf32>
    %112 = vector.multi_reduction <add>, %111, %cst_42 [1] : vector<128x128xf32> to vector<128xf32>
    %113 = vector.shape_cast %112 : vector<128xf32> to vector<128x1xf32>
    %114 = math.log %113 : vector<128x1xf32>
    %115 = arith.addf %114, %108 : vector<128x1xf32>
    %116 = arith.subf %115, %77 : vector<128x1xf32>
    %cst_43 = arith.constant dense<0.000000e+00> : vector<128x128xf32>
    %117 = tpu.matmul %63, %67, %cst_43 {dimension_numbers = #tpu.dot_dimension_numbers<[1], [0], [0], [1], [0, 0, 1, 1], [], []>} : vector<128x128xf32>, vector<128x128xf32>, vector<128x128xf32> -> vector<128x128xf32>
    %cst_44 = arith.constant 5.000000e+00 : f32
    %118 = vector.broadcast %cst_44 : f32 to vector<128x128xf32>
    %119 = arith.mulf %117, %118 : vector<128x128xf32>
    %cst_45 = arith.constant -1.000000e+30 : f32
    %120 = vector.shape_cast %16 : vector<1x128xi1> to vector<1x128xi1>
    %121 = vector.broadcast %120 : vector<1x128xi1> to vector<128x128xi1>
    %122 = vector.broadcast %cst_45 : f32 to vector<128x128xf32>
    %123 = arith.select %121, %119, %122 : vector<128x128xi1>, vector<128x128xf32>
    %cst_46 = arith.constant dense<0xFF800000> : vector<128xf32>
    %124 = vector.multi_reduction <maximumf>, %123, %cst_46 [1] : vector<128x128xf32> to vector<128xf32>
    %125 = vector.shape_cast %124 : vector<128xf32> to vector<128x1xf32>
    %126 = vector.broadcast %125 : vector<128x1xf32> to vector<128x128xf32>
    %127 = arith.subf %123, %126 : vector<128x128xf32>
    %128 = math.exp %127 : vector<128x128xf32>
    %cst_47 = arith.constant dense<0.000000e+00> : vector<128xf32>
    %129 = vector.multi_reduction <add>, %128, %cst_47 [1] : vector<128x128xf32> to vector<128xf32>
    %130 = vector.shape_cast %129 : vector<128xf32> to vector<128x1xf32>
    %131 = math.log %130 : vector<128x1xf32>
    %132 = arith.addf %131, %125 : vector<128x1xf32>
    %133 = arith.subf %132, %82 : vector<128x1xf32>
    %134 = arith.addf %99, %116 : vector<128x1xf32>
    %135 = arith.addf %134, %133 : vector<128x1xf32>
    %136 = arith.mulf %135, %13 : vector<128x1xf32>
    %cst_48 = arith.constant dense<0.000000e+00> : vector<1xf32>
    %137 = vector.multi_reduction <add>, %136, %cst_48 [0] : vector<128x1xf32> to vector<1xf32>
    %138 = vector.shape_cast %137 : vector<1xf32> to vector<1x1xf32>
    %cst_49 = arith.constant 1.000000e-01 : f32
    %139 = vector.broadcast %cst_49 : f32 to vector<1x1xf32>
    %140 = arith.mulf %139, %138 : vector<1x1xf32>
    %cst_50 = arith.constant 6.250000e-02 : f32
    %141 = vector.broadcast %cst_50 : f32 to vector<1x1xf32>
    %142 = arith.mulf %140, %141 : vector<1x1xf32>
    %143 = tpu.iota {dimensions = array<i32: 1>} : vector<1x128xi32>
    %c0_51 = arith.constant 0 : index
    %c0_52 = arith.constant 0 : index
    %144 = vector.load %arg7[%c0_51, %c0_52] : memref<1x128xf32, #tpu.memory_space<vmem>>, vector<1x128xf32>
    %c0_i32_53 = arith.constant 0 : i32
    %145 = vector.broadcast %c0_i32_53 : i32 to vector<1x128xi32>
    %146 = arith.cmpi eq, %143, %145 : vector<1x128xi32>
    %cst_54 = arith.constant 1.000000e+00 : f32
    %cst_55 = arith.constant 0.000000e+00 : f32
    %147 = vector.broadcast %cst_54 : f32 to vector<1x128xf32>
    %148 = vector.broadcast %cst_55 : f32 to vector<1x128xf32>
    %149 = arith.select %146, %147, %148 : vector<1x128xi1>, vector<1x128xf32>
    %150 = vector.broadcast %43 : vector<1x1xf32> to vector<1x128xf32>
    %151 = arith.mulf %149, %150 : vector<1x128xf32>
    %c1_i32_56 = arith.constant 1 : i32
    %152 = vector.broadcast %c1_i32_56 : i32 to vector<1x128xi32>
    %153 = arith.cmpi eq, %143, %152 : vector<1x128xi32>
    %cst_57 = arith.constant 1.000000e+00 : f32
    %cst_58 = arith.constant 0.000000e+00 : f32
    %154 = vector.broadcast %cst_57 : f32 to vector<1x128xf32>
    %155 = vector.broadcast %cst_58 : f32 to vector<1x128xf32>
    %156 = arith.select %153, %154, %155 : vector<1x128xi1>, vector<1x128xf32>
    %157 = vector.broadcast %61 : vector<1x1xf32> to vector<1x128xf32>
    %158 = arith.mulf %156, %157 : vector<1x128xf32>
    %159 = arith.addf %151, %158 : vector<1x128xf32>
    %c2_i32 = arith.constant 2 : i32
    %160 = vector.broadcast %c2_i32 : i32 to vector<1x128xi32>
    %161 = arith.cmpi eq, %143, %160 : vector<1x128xi32>
    %cst_59 = arith.constant 1.000000e+00 : f32
    %cst_60 = arith.constant 0.000000e+00 : f32
    %162 = vector.broadcast %cst_59 : f32 to vector<1x128xf32>
    %163 = vector.broadcast %cst_60 : f32 to vector<1x128xf32>
    %164 = arith.select %161, %162, %163 : vector<1x128xi1>, vector<1x128xf32>
    %165 = vector.broadcast %142 : vector<1x1xf32> to vector<1x128xf32>
    %166 = arith.mulf %164, %165 : vector<1x128xf32>
    %167 = arith.addf %159, %166 : vector<1x128xf32>
    %168 = arith.addf %144, %167 : vector<1x128xf32>
    %c0_61 = arith.constant 0 : index
    %c0_62 = arith.constant 0 : index
    %169 = vector.load %arg7[%c0_61, %c0_62] : memref<1x128xf32, #tpu.memory_space<vmem>>, vector<1x128xf32>
    tpu.vector_store %arg7[%c0_61, %c0_62], %168 {strides = array<i32>} : memref<1x128xf32, #tpu.memory_space<vmem>>, vector<1x128xf32>,
    return
  }
  func.func @transform_0(%arg0: i32, %arg1: i32) -> (i32, i32) {
    %c0_i32 = arith.constant 0 : i32
    %c0_i32_0 = arith.constant 0 : i32
    %c0_i32_1 = arith.constant 0 : i32
    return %c0_i32, %c0_i32_0 : i32, i32
  }
  func.func @transform_1(%arg0: i32, %arg1: i32) -> (i32, i32) {
    %c0_i32 = arith.constant 0 : i32
    %c0_i32_0 = arith.constant 0 : i32
    %c0_i32_1 = arith.constant 0 : i32
    return %c0_i32, %c0_i32_0 : i32, i32
  }
  func.func @transform_2(%arg0: i32, %arg1: i32) -> (i32, i32) {
    %c1_i32 = arith.constant 1 : i32
    %0 = arith.muli %arg0, %c1_i32 : i32
    %1 = arith.addi %0, %arg1 : i32
    %c0_i32 = arith.constant 0 : i32
    %c0_i32_0 = arith.constant 0 : i32
    return %1, %c0_i32 : i32, i32
  }
  func.func @transform_3(%arg0: i32, %arg1: i32) -> (i32, i32) {
    %c1_i32 = arith.constant 1 : i32
    %0 = arith.muli %arg0, %c1_i32 : i32
    %1 = arith.addi %0, %arg1 : i32
    %c0_i32 = arith.constant 0 : i32
    %c0_i32_0 = arith.constant 0 : i32
    return %1, %c0_i32 : i32, i32
  }
  func.func @transform_4(%arg0: i32, %arg1: i32) -> (i32, i32) {
    %c1_i32 = arith.constant 1 : i32
    %0 = arith.muli %arg0, %c1_i32 : i32
    %1 = arith.addi %0, %arg1 : i32
    %c0_i32 = arith.constant 0 : i32
    %c0_i32_0 = arith.constant 0 : i32
    return %1, %c0_i32 : i32, i32
  }
  func.func @transform_5(%arg0: i32, %arg1: i32) -> (i32, i32) {
    %c0_i32 = arith.constant 0 : i32
    %c0_i32_0 = arith.constant 0 : i32
    return %arg0, %c0_i32 : i32, i32
  }
}

</mosaic_0001>

<bundles_post_ra>
// kernel: egcf_forward.6
= control target key start
LH: loop header
LB: loop body
LE: loop exit
PB: predicated region body
PF: predicated region fallthrough
CT: control target
= control target key end

     0   :  { %s2232_s15 = smov 0   ;;  %s2234_s16 = smov 0   ;;  %s2631_s0 = inlined_call_operand.vmem [shape: bf16[256,512], index: 0, kind: input, shape index: {}]   ;;  %s2632_s1 = inlined_call_operand.vmem [shape: bf16[256,128], index: 1, kind: input, shape index: {}]   ;;  %s2633_s2 = inlined_call_operand.vmem [shape: f32[512,128], index: 2, kind: input, shape index: {}, may-alias: {2,4}]   ;;  %s2634_s3 = inlined_call_operand.vmem [shape: bf16[512,128], index: 3, kind: output, shape index: {0}]   ;;  %s2635_s4 = inlined_call_operand.vmem [shape: f32[512,128], index: 4, kind: output, shape index: {1}, may-alias: {2,4}]  }
   0x1   :  { %s2236_s17 = smov 0   ;;  %s2238_s18 = smov 0  }
   0x2   :  { %s2240_s19 = smov 0  }
   0x3 LB: > { %s34_s20 = sadd.s32 1, %s2201_s18  ;;  %p50_p1 = scmp.ne.s32.totalorder %s2193_s16, %s2189_s15  ;;  %s2205_s19 = sphi %s2240_s19, %s15_s19   ;;  %s2201_s18 = sphi %s2238_s18, %s2639_s18   ;;  %s2197_s17 = sphi %s2236_s17, %s2638_s17   ;;  %s2193_s16 = sphi %s2234_s16, %s2637_s16   ;;  %s2189_s15 = sphi %s2232_s15, %s2636_s15  }
   0x4   : > { %p36_p0 = scmp.ge.s32.totalorder %s34_s20, 2  ;;  %p51_p2 = scmp.eq.s32.totalorder %s2205_s19, 0 }
   0x5   : > { %s43_s22 = sadd.s32 1, %s2193_s16  ;;  %p1649_p5 = scmp.ge.s32.totalorder %s2205_s19, 2 }
   0x6   : > { %s2641_s20 = smov (%p36_p0, %s34_s20), 0  ;;  %p52_p3 = por %p51_p2, %p50_p1 }
   0x7   : > { %s39_s21 = ssub.s32 %s2201_s18, %s2641_s20  ;;  %200 = sbr.rel (%p1649_p5) target bundleno = 34 (0x22), region = 20 }
   0x8   : > { %p41_p4 = scmp.eq.s32.totalorder %s39_s21, 0 }
   0xa   : > { %s2267_s23 = scalar_select %p41_p4, %s2193_s16, %s43_s22  }
   0xe   : > { %203 = sbr.rel (!%p52_p3) target bundleno = 34 (0x22), region = 24  ;;  %s205_s24 = sand.u32 (%p52_p3), 1, %s2193_s16  }
   0xf   : > { %s1743_s25 = sshll.u32 (%p52_p3), %s2201_s18, 3  ;;  %s1650_s26 = sshll.u32 (%p52_p3), %s205_s24, 8 }
  0x10   : > { %s2275_s29 = scalar_lea.vmem (%p52_p3), %s2631_s0, %s1743_s25  ;;  %s2280_s30 = scalar_lea.vmem (%p52_p3), [#allocation3], %s1650_s26 }
  0x11   : > { %v303_v0 = vld [vmem:[%s2275_s29] sm:$0xff] (%p52_p3)  ;;  %v305_v1 = vld [vmem:[%s2275_s29 + $0x10] sm:$0xff] (%p52_p3) }
  0x12   : > { %v307_v2 = vld [vmem:[%s2275_s29 + $0x20] sm:$0xff] (%p52_p3)  ;;  %304 = vst [vmem:[%s2280_s30] sm:$0xff] (%p52_p3), %v303_v0  ;;  %306 = vst [vmem:[%s2280_s30 + $0x8] sm:$0xff] (%p52_p3), %v305_v1  ;;  %v309_v3 = vld [vmem:[%s2275_s29 + $0x30] sm:$0xff] (%p52_p3) }
  0x13   : > { %308 = vst [vmem:[%s2280_s30 + $0x10] sm:$0xff] (%p52_p3), %v307_v2  ;;  %v311_v4 = vld [vmem:[%s2275_s29 + $0x40] sm:$0xff] (%p52_p3)  ;;  %v313_v5 = vld [vmem:[%s2275_s29 + $0x50] sm:$0xff] (%p52_p3)  ;;  %310 = vst [vmem:[%s2280_s30 + $0x18] sm:$0xff] (%p52_p3), %v309_v3 }
  0x14   : > { %312 = vst [vmem:[%s2280_s30 + $0x20] sm:$0xff] (%p52_p3), %v311_v4  ;;  %314 = vst [vmem:[%s2280_s30 + $0x28] sm:$0xff] (%p52_p3), %v313_v5  ;;  %v315_v6 = vld [vmem:[%s2275_s29 + $0x60] sm:$0xff] (%p52_p3)  ;;  %v317_v7 = vld [vmem:[%s2275_s29 + $0x70] sm:$0xff] (%p52_p3) }
  0x15   : > { %v319_v8 = vld [vmem:[%s2275_s29 + $0x80] sm:$0xff]  ;;  %316 = vst [vmem:[%s2280_s30 + $0x30] sm:$0xff] %v315_v6  ;;  %318 = vst [vmem:[%s2280_s30 + $0x38] sm:$0xff] %v317_v7  ;;  %v321_v9 = vld [vmem:[%s2275_s29 + $0x90] sm:$0xff] }
  0x16   : > { %320 = vst [vmem:[%s2280_s30 + $0x40] sm:$0xff] %v319_v8  ;;  %v323_v10 = vld [vmem:[%s2275_s29 + $0xa0] sm:$0xff]  ;;  %v325_v11 = vld [vmem:[%s2275_s29 + $0xb0] sm:$0xff]  ;;  %322 = vst [vmem:[%s2280_s30 + $0x48] sm:$0xff] %v321_v9 }
  0x17   : > { %324 = vst [vmem:[%s2280_s30 + $0x50] sm:$0xff] %v323_v10  ;;  %326 = vst [vmem:[%s2280_s30 + $0x58] sm:$0xff] %v325_v11  ;;  %v327_v12 = vld [vmem:[%s2275_s29 + $0xc0] sm:$0xff]  ;;  %v329_v13 = vld [vmem:[%s2275_s29 + $0xd0] sm:$0xff] }
  0x18   : > { %v331_v14 = vld [vmem:[%s2275_s29 + $0xe0] sm:$0xff]  ;;  %328 = vst [vmem:[%s2280_s30 + $0x60] sm:$0xff] %v327_v12  ;;  %330 = vst [vmem:[%s2280_s30 + $0x68] sm:$0xff] %v329_v13  ;;  %v333_v15 = vld [vmem:[%s2275_s29 + $0xf0] sm:$0xff] }
  0x19   : > { %332 = vst [vmem:[%s2280_s30 + $0x70] sm:$0xff] %v331_v14  ;;  %v335_v16 = vld [vmem:[%s2275_s29 + $0x100] sm:$0xff]  ;;  %v337_v17 = vld [vmem:[%s2275_s29 + $0x110] sm:$0xff]  ;;  %334 = vst [vmem:[%s2280_s30 + $0x78] sm:$0xff] %v333_v15 }
  0x1a   : > { %336 = vst [vmem:[%s2280_s30 + $0x80] sm:$0xff] %v335_v16  ;;  %338 = vst [vmem:[%s2280_s30 + $0x88] sm:$0xff] %v337_v17  ;;  %v339_v18 = vld [vmem:[%s2275_s29 + $0x120] sm:$0xff]  ;;  %v341_v19 = vld [vmem:[%s2275_s29 + $0x130] sm:$0xff] }
  0x1b   : > { %v343_v20 = vld [vmem:[%s2275_s29 + $0x140] sm:$0xff]  ;;  %340 = vst [vmem:[%s2280_s30 + $0x90] sm:$0xff] %v339_v18  ;;  %342 = vst [vmem:[%s2280_s30 + $0x98] sm:$0xff] %v341_v19  ;;  %v345_v21 = vld [vmem:[%s2275_s29 + $0x150] sm:$0xff] }
  0x1c   : > { %344 = vst [vmem:[%s2280_s30 + $0xa0] sm:$0xff] %v343_v20  ;;  %v347_v22 = vld [vmem:[%s2275_s29 + $0x160] sm:$0xff]  ;;  %v349_v23 = vld [vmem:[%s2275_s29 + $0x170] sm:$0xff]  ;;  %346 = vst [vmem:[%s2280_s30 + $0xa8] sm:$0xff] %v345_v21 }
  0x1d   : > { %348 = vst [vmem:[%s2280_s30 + $0xb0] sm:$0xff] %v347_v22  ;;  %350 = vst [vmem:[%s2280_s30 + $0xb8] sm:$0xff] %v349_v23  ;;  %v351_v24 = vld [vmem:[%s2275_s29 + $0x180] sm:$0xff]  ;;  %v353_v25 = vld [vmem:[%s2275_s29 + $0x190] sm:$0xff] }
  0x1e   : > { %v355_v26 = vld [vmem:[%s2275_s29 + $0x1a0] sm:$0xff]  ;;  %352 = vst [vmem:[%s2280_s30 + $0xc0] sm:$0xff] %v351_v24  ;;  %354 = vst [vmem:[%s2280_s30 + $0xc8] sm:$0xff] %v353_v25  ;;  %v357_v27 = vld [vmem:[%s2275_s29 + $0x1b0] sm:$0xff] }
  0x1f   : > { %356 = vst [vmem:[%s2280_s30 + $0xd0] sm:$0xff] %v355_v26  ;;  %v359_v28 = vld [vmem:[%s2275_s29 + $0x1c0] sm:$0xff]  ;;  %v361_v29 = vld [vmem:[%s2275_s29 + $0x1d0] sm:$0xff]  ;;  %358 = vst [vmem:[%s2280_s30 + $0xd8] sm:$0xff] %v357_v27 }
  0x20   : > { %360 = vst [vmem:[%s2280_s30 + $0xe0] sm:$0xff] %v359_v28  ;;  %362 = vst [vmem:[%s2280_s30 + $0xe8] sm:$0xff] %v361_v29  ;;  %v363_v30 = vld [vmem:[%s2275_s29 + $0x1e0] sm:$0xff]  ;;  %v365_v31 = vld [vmem:[%s2275_s29 + $0x1f0] sm:$0xff] }
  0x21   : > { %364 = vst [vmem:[%s2280_s30 + $0xf0] sm:$0xff] %v363_v30  ;;  %366 = vst [vmem:[%s2280_s30 + $0xf8] sm:$0xff] %v365_v31 }
  0x22 PF: > { %p1653_p6 = scmp.ge.s32.totalorder %s2205_s19, 1  ;;  %p383_p7 = scmp.lt.s32.totalorder %s2205_s19, 3 }
  0x24   : > { %p384_p8 = pnand %p1653_p6, %p383_p7 }
  0x25   : > { %s390_s5 = sand.u32 (!%p384_p8), 1, %s2189_s15   ;;  %v2087_v32 = vld [vmem:[%s2632_s1 + $0x40] sm:$0xff] (!%p384_p8)   ;;  %v2089_v34 = vld [vmem:[%s2632_s1 + $0x48] sm:$0xff] (!%p384_p8)   ;;  %v2091_v50 = vld [vmem:[%s2632_s1 + $0x50] sm:$0xff] (!%p384_p8)  }
  0x26   : > { %387 = sbr.rel (%p384_p8) target bundleno = 465 (0x1d1), region = 66  ;;  %s1654_s8 = sshll.u32 (!%p384_p8), %s390_s5, 8  ;;  %v2088_v33 = vld [vmem:[%s2632_s1] sm:$0xff] (!%p384_p8)   ;;  %1871 = vmatprep.subr.bf16.mxu0 (!%p384_p8), %v2087_v32  ;;  %1983 = vmatprep.subr.bf16.mxu1 (!%p384_p8), %v2087_v32  ;;  %v2090_v49 = vld [vmem:[%s2632_s1 + $0x8] sm:$0xff] (!%p384_p8)   ;;  %v2092_v51 = vld [vmem:[%s2632_s1 + $0x10] sm:$0xff] (!%p384_p8)  }
  0x27   : > { %s2355_s13 = scalar_lea.vmem (!%p384_p8), [#allocation3], %s1654_s8  ;;  %1872 = vmatpush3.bf16.msra.mxu0 (!%p384_p8), %v2088_v33  ;;  %1991 = vmatpush3.bf16.msra.mxu1 (!%p384_p8), %v2088_v33  ;;  %v2093_v52 = vld [vmem:[%s2632_s1 + $0x58] sm:$0xff] (!%p384_p8)   ;;  %v2095_v56 = vld [vmem:[%s2632_s1 + $0x60] sm:$0xff] (!%p384_p8)   ;;  %v2097_v60 = vld [vmem:[%s2632_s1 + $0x68] sm:$0xff] (!%p384_p8)  }
  0x28   : > { %v2039_v35 = vld [vmem:[%s2355_s13 + $0x84] ss:$8 sps:$4 sm:$0xff] (!%p384_p8)   ;;  %v2041_v36 = vld [vmem:[%s2355_s13 + $0x80] ss:$8 sps:$4 sm:$0xff] (!%p384_p8)   ;;  %1873 = vmatprep.subr.bf16.mxu0 (!%p384_p8), %v2089_v34  ;;  %1984 = vmatprep.subr.bf16.mxu1 (!%p384_p8), %v2089_v34  ;;  %v2042_v37 = vld [vmem:[%s2355_s13 + $0x94] ss:$8 sps:$4 sm:$0xff] (!%p384_p8)  }
  0x29   : > { %821 = vxpose.xlu1.c.b16.start [1/8] (!%p384_p8), %v2039_v35, 128  ;;  %805 = vxpose.xlu0.c.b16.start [1/8] (!%p384_p8), %v2041_v36, 128  ;;  %v2044_v38 = vld [vmem:[%s2355_s13 + $0x90] ss:$8 sps:$4 sm:$0xff] (!%p384_p8)   ;;  %v2045_v39 = vld [vmem:[%s2355_s13 + $0xa4] ss:$8 sps:$4 sm:$0xff] (!%p384_p8)   ;;  %v2047_v40 = vld [vmem:[%s2355_s13 + $0xa0] ss:$8 sps:$4 sm:$0xff] (!%p384_p8)  }
  0x2a   : > { %v2048_v41 = vld [vmem:[%s2355_s13 + $0xb4] ss:$8 sps:$4 sm:$0xff] (!%p384_p8)   ;;  %v2050_v42 = vld [vmem:[%s2355_s13 + $0xb0] ss:$8 sps:$4 sm:$0xff] (!%p384_p8)   ;;  %v2051_v43 = vld [vmem:[%s2355_s13 + $0xc4] ss:$8 sps:$4 sm:$0xff] (!%p384_p8)  }
  0x2b   : > { %v2053_v44 = vld [vmem:[%s2355_s13 + $0xc0] ss:$8 sps:$4 sm:$0xff] (!%p384_p8)   ;;  %v2054_v45 = vld [vmem:[%s2355_s13 + $0xd4] ss:$8 sps:$4 sm:$0xff] (!%p384_p8)   ;;  %v2056_v46 = vld [vmem:[%s2355_s13 + $0xd0] ss:$8 sps:$4 sm:$0xff] (!%p384_p8)   ;;  %1874 = vmatpush3.bf16.msra.mxu0 (!%p384_p8), %v2090_v49  ;;  %1992 = vmatpush3.bf16.msra.mxu1 (!%p384_p8), %v2090_v49 }
  0x2c   : > { %v2057_v47 = vld [vmem:[%s2355_s13 + $0xe4] ss:$8 sps:$4 sm:$0xff] (!%p384_p8)   ;;  %v2059_v48 = vld [vmem:[%s2355_s13 + $0xe0] ss:$8 sps:$4 sm:$0xff] (!%p384_p8)   ;;  %1875 = vmatprep.subr.bf16.mxu0 (!%p384_p8), %v2091_v50  ;;  %1985 = vmatprep.subr.bf16.mxu1 (!%p384_p8), %v2091_v50  ;;  %v2060_v53 = vld [vmem:[%s2355_s13 + $0xf4] ss:$8 sps:$4 sm:$0xff] (!%p384_p8)  }
  0x2d   : > { %822 = vxpose.xlu1.c.b16.cont [2/8] %v2042_v37, 128  ;;  %806 = vxpose.xlu0.c.b16.cont [2/8] %v2044_v38, 128  ;;  %v2062_v54 = vld [vmem:[%s2355_s13 + $0xf0] ss:$8 sps:$4 sm:$0xff]   ;;  %v2063_v57 = vld [vmem:[%s2355_s13 + $0x4] ss:$8 sps:$4 sm:$0xff]   ;;  %v2065_v58 = vld [vmem:[%s2355_s13] ss:$8 sps:$4 sm:$0xff]  }
  0x2e   : > { %v2094_v55 = vld [vmem:[%s2632_s1 + $0x18] sm:$0xff]   ;;  %v2096_v59 = vld [vmem:[%s2632_s1 + $0x20] sm:$0xff]   ;;  %v2098_v63 = vld [vmem:[%s2632_s1 + $0x28] sm:$0xff]  }
  0x2f   : > { %1876 = vmatpush3.bf16.msra.mxu0 %v2092_v51  ;;  %1993 = vmatpush3.bf16.msra.mxu1 %v2092_v51  ;;  %v2066_v61 = vld [vmem:[%s2355_s13 + $0x14] ss:$8 sps:$4 sm:$0xff]   ;;  %v2068_v62 = vld [vmem:[%s2355_s13 + $0x10] ss:$8 sps:$4 sm:$0xff]   ;;  %v2069_v1 = vld [vmem:[%s2355_s13 + $0x24] ss:$8 sps:$4 sm:$0xff]  }
  0x30   : > { %1877 = vmatprep.subr.bf16.mxu0 %v2093_v52  ;;  %1986 = vmatprep.subr.bf16.mxu1 %v2093_v52  ;;  %v2099_v0 = vld [vmem:[%s2632_s1 + $0x70] sm:$0xff]   ;;  %v2071_v2 = vld [vmem:[%s2355_s13 + $0x20] ss:$8 sps:$4 sm:$0xff]   ;;  %v2101_v4 = vld [vmem:[%s2632_s1 + $0x78] sm:$0xff]  }
  0x31   : > { %823 = vxpose.xlu1.c.b16.cont [3/8] %v2045_v39, 128  ;;  %807 = vxpose.xlu0.c.b16.cont [3/8] %v2047_v40, 128  ;;  %v2100_v3 = vld [vmem:[%s2632_s1 + $0x30] sm:$0xff]   ;;  %v2102_v7 = vld [vmem:[%s2632_s1 + $0x38] sm:$0xff]   ;;  %v2075_v8 = vld [vmem:[%s2355_s13 + $0x44] ss:$8 sps:$4 sm:$0xff]  }
  0x32   : > { %v2072_v5 = vld [vmem:[%s2355_s13 + $0x34] ss:$8 sps:$4 sm:$0xff]   ;;  %v2074_v6 = vld [vmem:[%s2355_s13 + $0x30] ss:$8 sps:$4 sm:$0xff]   ;;  %v2077_v9 = vld [vmem:[%s2355_s13 + $0x40] ss:$8 sps:$4 sm:$0xff]  }
  0x33   : > { %1878 = vmatpush3.bf16.msra.mxu0 %v2094_v55  ;;  %1994 = vmatpush3.bf16.msra.mxu1 %v2094_v55  ;;  %v2078_v10 = vld [vmem:[%s2355_s13 + $0x54] ss:$8 sps:$4 sm:$0xff]   ;;  %v2080_v11 = vld [vmem:[%s2355_s13 + $0x50] ss:$8 sps:$4 sm:$0xff]   ;;  %v2081_v12 = vld [vmem:[%s2355_s13 + $0x64] ss:$8 sps:$4 sm:$0xff]  }
  0x34   : > { %1879 = vmatprep.subr.bf16.mxu0 %v2095_v56  ;;  %1987 = vmatprep.subr.bf16.mxu1 %v2095_v56  ;;  %v2083_v13 = vld [vmem:[%s2355_s13 + $0x60] ss:$8 sps:$4 sm:$0xff]   ;;  %v2084_v14 = vld [vmem:[%s2355_s13 + $0x74] ss:$8 sps:$4 sm:$0xff]   ;;  %v2086_v15 = vld [vmem:[%s2355_s13 + $0x70] ss:$8 sps:$4 sm:$0xff]  }
  0x35   : > { %824 = vxpose.xlu1.c.b16.cont [4/8] %v2048_v41, 128  ;;  %808 = vxpose.xlu0.c.b16.cont [4/8] %v2050_v42, 128  ;;  %s1655_s13 = sshll.u32 %s2197_s17, 5 }
  0x36   : > { %p454_p9 = scmp.lt.s32.totalorder %s1655_s13, 63 }
  0x37   : > { %1880 = vmatpush3.bf16.msra.mxu0 %v2096_v59  ;;  %1995 = vmatpush3.bf16.msra.mxu1 %v2096_v59 }
  0x38   : > { %1881 = vmatprep.subr.bf16.mxu0 %v2097_v60  ;;  %1988 = vmatprep.subr.bf16.mxu1 %v2097_v60  ;;  %s2643_s13 = smov (!%p454_p9, %s1655_s13), 63 }
  0x39   : > { %825 = vxpose.xlu1.c.b16.cont [5/8] %v2051_v43, 128  ;;  %809 = vxpose.xlu0.c.b16.cont [5/8] %v2053_v44, 128  ;;  %s1656_s27 = sshll.u32 %s2643_s13, 3  ;;  %s1658_s30 = sshll.u32 %s2643_s13, 2 }
  0x3a   : > { %s2437_s29 = scalar_lea.vmem %s2633_s2, %s1656_s27  ;;  %s2524_s7 = scalar_lea.vmem %s2635_s4, %s1656_s27 }
  0x3b   : > { %1882 = vmatpush3.bf16.msra.mxu0 %v2098_v63  ;;  %1996 = vmatpush3.bf16.msra.mxu1 %v2098_v63  ;;  %s2538_s10 = scalar_lea.vmem %s2634_s3, %s1658_s30 }
  0x3c   : > { %1883 = vmatprep.subr.bf16.mxu0 %v2099_v0  ;;  %1989 = vmatprep.subr.bf16.mxu1 %v2099_v0 }
  0x3d   : > { %826 = vxpose.xlu1.c.b16.cont [6/8] %v2054_v45, 128  ;;  %810 = vxpose.xlu0.c.b16.cont [6/8] %v2056_v46, 128 }
  0x3f   : > { %1884 = vmatpush3.bf16.msra.mxu0 %v2100_v3  ;;  %1997 = vmatpush3.bf16.msra.mxu1 %v2100_v3  ;;  %v1401_v3 = vld [vmem:[%s2437_s29 + $0x80] sm:$0xff] }
  0x40   : > { %1885 = vmatprep.subr.bf16.mxu0 %v2101_v4  ;;  %1990 = vmatprep.subr.bf16.mxu1 %v2101_v4 }
  0x41   : > { %827 = vxpose.xlu1.c.b16.cont [7/8] %v2057_v47, 128  ;;  %811 = vxpose.xlu0.c.b16.cont [7/8] %v2059_v48, 128 }
  0x43   : > { %1886 = vmatpush3.bf16.msra.mxu0 %v2102_v7  ;;  %1998 = vmatpush3.bf16.msra.mxu1 %v2102_v7  ;;  %v1386_v7 = vld [vmem:[%s2437_s29 + $0x8] sm:$0xff] }
  0x45   : > { %828 = vxpose.xlu1.c.b16.end [8/8] %v2060_v53, 128  ;;  %812 = vxpose.xlu0.c.b16.end [8/8] %v2062_v54, 128 }
  0x49   : > { %789 = vxpose.xlu1.c.b16.start [1/8] %v2063_v57, 128  ;;  %773 = vxpose.xlu0.c.b16.start [1/8] %v2065_v58, 128 }
  0x4d   : > { %790 = vxpose.xlu1.c.b16.cont [2/8] %v2066_v61, 128  ;;  %774 = vxpose.xlu0.c.b16.cont [2/8] %v2068_v62, 128 }
  0x51   : > { %791 = vxpose.xlu1.c.b16.cont [3/8] %v2069_v1, 128  ;;  %775 = vxpose.xlu0.c.b16.cont [3/8] %v2071_v2, 128  ;;  %v1385_v2 = vld [vmem:[%s2437_s29] sm:$0xff] }
  0x55   : > { %792 = vxpose.xlu1.c.b16.cont [4/8] %v2072_v5, 128  ;;  %776 = vxpose.xlu0.c.b16.cont [4/8] %v2074_v6, 128 }
  0x59   : > { %793 = vxpose.xlu1.c.b16.cont [5/8] %v2075_v8, 128  ;;  %777 = vxpose.xlu0.c.b16.cont [5/8] %v2077_v9, 128  ;;  %v1402_v8 = vld [vmem:[%s2437_s29 + $0x88] sm:$0xff]  ;;  %v2444_v9 = vld [vmem:[%s2437_s29 + $0x10] sm:$0xff] }
  0x5d   : > { %794 = vxpose.xlu1.c.b16.cont [6/8] %v2078_v10, 128  ;;  %778 = vxpose.xlu0.c.b16.cont [6/8] %v2080_v11, 128  ;;  %v2447_v10 = vld [vmem:[%s2437_s29 + $0x90] sm:$0xff] }
  0x61   : > { %795 = vxpose.xlu1.c.b16.cont [7/8] %v2081_v12, 128  ;;  %779 = vxpose.xlu0.c.b16.cont [7/8] %v2083_v13, 128  ;;  %v2450_v12 = vld [vmem:[%s2437_s29 + $0x18] sm:$0xff] }
  0x65   : > { %796 = vxpose.xlu1.c.b16.end [8/8] %v2084_v14, 128  ;;  %780 = vxpose.xlu0.c.b16.end [8/8] %v2086_v15, 128  ;;  %v2453_v14 = vld [vmem:[%s2437_s29 + $0x98] sm:$0xff]  ;;  %v2456_v15 = vld [vmem:[%s2437_s29 + $0x20] sm:$0xff] }
  0x8f   : > { %v829_v16 = vpop.trf.xlu1  ;;  %v813_v17 = vpop.trf.xlu0 }
  0x90   : > { %1029 = vmatprep.mubr.bf16.mxu1 %v829_v16  ;;  %965 = vmatprep.mubr.bf16.mxu0 %v813_v17  ;;  %v2459_v16 = vld [vmem:[%s2437_s29 + $0xa0] sm:$0xff]  ;;  %v2462_v17 = vld [vmem:[%s2437_s29 + $0x28] sm:$0xff] }
  0x93   : > { %v830_v18 = vpop.trf.xlu1  ;;  %v814_v19 = vpop.trf.xlu0 }
  0x97   : > { %v831_v20 = vpop.trf.xlu1  ;;  %v815_v21 = vpop.trf.xlu0 }
  0x9b   : > { %v832_v22 = vpop.trf.xlu1  ;;  %v816_v23 = vpop.trf.xlu0 }
  0x9f   : > { %v833_v24 = vpop.trf.xlu1  ;;  %v817_v25 = vpop.trf.xlu0 }
  0xa3   : > { %v834_v26 = vpop.trf.xlu1  ;;  %v818_v27 = vpop.trf.xlu0 }
  0xa7   : > { %v835_v28 = vpop.trf.xlu1  ;;  %v819_v29 = vpop.trf.xlu0 }
  0xab   : > { %v836_v30 = vpop.trf.xlu1  ;;  %v820_v31 = vpop.trf.xlu0 }
  0xaf   : > { %v797_v32 = vpop.trf.xlu1  ;;  %v781_v33 = vpop.trf.xlu0 }
  0xb0   : > { %1030 = vmatmul.mubr.bf16.vlgmr.msra.gmra.mrb[0].mxu1 %v797_v32  ;;  %966 = vmatmul.mubr.bf16.vlgmr.msra.gmra.mrb[0].mxu0 %v781_v33  ;;  %v2507_v32 = vld [vmem:[%s2437_s29 + $0xe0] sm:$0xff] }
  0xb1   : > { %1037 = vmatprep.mubr.bf16.mxu1 %v830_v18  ;;  %973 = vmatprep.mubr.bf16.mxu0 %v814_v19  ;;  %v2465_v18 = vld [vmem:[%s2437_s29 + $0xa8] sm:$0xff]  ;;  %v2468_v19 = vld [vmem:[%s2437_s29 + $0x30] sm:$0xff] }
  0xb3   : > { %v798_v34 = vpop.trf.xlu1  ;;  %v782_v35 = vpop.trf.xlu0 }
  0xb7   : > { %v799_v36 = vpop.trf.xlu1  ;;  %v783_v37 = vpop.trf.xlu0 }
  0xb8   : > { %1038 = vmatmul.mubr.bf16.gmra.mrb[4].mxu1 %v798_v34  ;;  %974 = vmatmul.mubr.bf16.gmra.mrb[4].mxu0 %v782_v35  ;;  %v2511_v34 = vld [vmem:[%s2437_s29 + $0x68] sm:$0xff] }
  0xb9   : > { %1045 = vmatprep.mubr.bf16.mxu1 %v831_v20  ;;  %981 = vmatprep.mubr.bf16.mxu0 %v815_v21  ;;  %v2471_v20 = vld [vmem:[%s2437_s29 + $0xb0] sm:$0xff]  ;;  %v2474_v21 = vld [vmem:[%s2437_s29 + $0x38] sm:$0xff]  ;;  %v2514_v35 = vld [vmem:[%s2437_s29 + $0xe8] sm:$0xff] }
  0xbb   : > { %v800_v38 = vpop.trf.xlu1  ;;  %v784_v39 = vpop.trf.xlu0 }
  0xbf   : > { %v801_v40 = vpop.trf.xlu1  ;;  %v785_v41 = vpop.trf.xlu0 }
  0xc0   : > { %1046 = vmatmul.mubr.bf16.gmra.mrb[8].mxu1 %v799_v36  ;;  %982 = vmatmul.mubr.bf16.gmra.mrb[8].mxu0 %v783_v37  ;;  %v2517_v36 = vld [vmem:[%s2437_s29 + $0x70] sm:$0xff] }
  0xc1   : > { %1053 = vmatprep.mubr.bf16.mxu1 %v832_v22  ;;  %989 = vmatprep.mubr.bf16.mxu0 %v816_v23  ;;  %v2477_v22 = vld [vmem:[%s2437_s29 + $0xb8] sm:$0xff]  ;;  %v2480_v23 = vld [vmem:[%s2437_s29 + $0x40] sm:$0xff] }
  0xc3   : > { %v802_v42 = vpop.trf.xlu1  ;;  %v786_v43 = vpop.trf.xlu0 }
  0xc7   : > { %v803_v44 = vpop.trf.xlu1  ;;  %v787_v45 = vpop.trf.xlu0 }
  0xc8   : > { %1054 = vmatmul.mubr.bf16.gmra.mrb[12].mxu1 %v800_v38  ;;  %990 = vmatmul.mubr.bf16.gmra.mrb[12].mxu0 %v784_v39  ;;  %v2527_v38 = vld [vmem:[%s2437_s29 + $0xf0] sm:$0xff]  ;;  %v2530_v39 = vld [vmem:[%s2437_s29 + $0x78] sm:$0xff] }
  0xc9   : > { %1061 = vmatprep.mubr.bf16.mxu1 %v833_v24  ;;  %997 = vmatprep.mubr.bf16.mxu0 %v817_v25  ;;  %v2483_v24 = vld [vmem:[%s2437_s29 + $0xc0] sm:$0xff]  ;;  %v2486_v25 = vld [vmem:[%s2437_s29 + $0x48] sm:$0xff] }
  0xcb   : > { %v804_v46 = vpop.trf.xlu1  ;;  %v788_v47 = vpop.trf.xlu0 }
  0xd0   : > { %1062 = vmatmul.mubr.bf16.gmra.mrb[16].mxu1 %v801_v40  ;;  %998 = vmatmul.mubr.bf16.gmra.mrb[16].mxu0 %v785_v41  ;;  %v2533_v40 = vld [vmem:[%s2437_s29 + $0xf8] sm:$0xff] }
  0xd1   : > { %1069 = vmatprep.mubr.bf16.mxu1 %v834_v26  ;;  %1005 = vmatprep.mubr.bf16.mxu0 %v818_v27  ;;  %v2489_v26 = vld [vmem:[%s2437_s29 + $0xc8] sm:$0xff]  ;;  %v2492_v27 = vld [vmem:[%s2437_s29 + $0x50] sm:$0xff] }
  0xd8   : > { %1070 = vmatmul.mubr.bf16.gmra.mrb[20].mxu1 %v802_v42  ;;  %1006 = vmatmul.mubr.bf16.gmra.mrb[20].mxu0 %v786_v43 }
  0xd9   : > { %1077 = vmatprep.mubr.bf16.mxu1 %v835_v28  ;;  %1013 = vmatprep.mubr.bf16.mxu0 %v819_v29  ;;  %v2495_v28 = vld [vmem:[%s2437_s29 + $0xd0] sm:$0xff]  ;;  %v2498_v29 = vld [vmem:[%s2437_s29 + $0x58] sm:$0xff] }
  0xe0   : > { %1078 = vmatmul.mubr.bf16.gmra.mrb[24].mxu1 %v803_v44  ;;  %1014 = vmatmul.mubr.bf16.gmra.mrb[24].mxu0 %v787_v45 }
  0xe1   : > { %1085 = vmatprep.mubr.bf16.mxu1 %v836_v30  ;;  %1021 = vmatprep.mubr.bf16.mxu0 %v820_v31  ;;  %v2501_v30 = vld [vmem:[%s2437_s29 + $0xd8] sm:$0xff]  ;;  %v2504_v31 = vld [vmem:[%s2437_s29 + $0x60] sm:$0xff] }
  0xe8   : > { %1086 = vmatmul.mubr.bf16.gmra.mrb[28].mxu1 %v804_v46  ;;  %1022 = vmatmul.mubr.bf16.gmra.mrb[28].mxu0 %v788_v47 }
 0x183   : > { %v1935_v48 = vpop.f32.mrb[0].mxu1  ;;  %v1887_v49 = vpop.f32.mrb[0].mxu0 }
 0x184   : > { %v1936_v50 = vpop.f32.mrb[1].mxu1  ;;  %v1888_v51 = vpop.f32.mrb[1].mxu0 }
 0x185   : > { %v1937_v52 = vadd.f32 %v1936_v50, %v1935_v48  ;;  %v1938_v53 = vpop.f32.mrb[2].mxu1  ;;  %v1889_v54 = vadd.f32 %v1888_v51, %v1887_v49  ;;  %v1890_v55 = vpop.f32.mrb[2].mxu0 }
 0x186   : > { %v1939_v56 = vpop.f32.mrb[3].mxu1  ;;  %v1891_v57 = vpop.f32.mrb[3].mxu0 }
 0x187   : > { %2103 = vtanh.f32 %v1937_v52  ;;  %v1940_v58 = vadd.f32 %v1939_v56, %v1938_v53  ;;  %v1892_v59 = vadd.f32 %v1891_v57, %v1890_v55 }
 0x188   : > { %2105 = vtanh.f32 %v1889_v54 }
 0x189   : > { %2107 = vtanh.f32 %v1940_v58 }
 0x18a   : > { %2109 = vtanh.f32 %v1892_v59 }
 0x18b   : > { %v1941_v60 = vpop.f32.mrb[4].mxu1  ;;  %v1893_v61 = vpop.f32.mrb[4].mxu0 }
 0x18c   : > { %v1942_v62 = vpop.f32.mrb[5].mxu1  ;;  %v1894_v63 = vpop.f32.mrb[5].mxu0 }
 0x18d   : > { %v1943_v0 = vadd.f32 %v1942_v62, %v1941_v60  ;;  %v1944_v1 = vpop.f32.mrb[6].mxu1  ;;  %v1895_v4 = vadd.f32 %v1894_v63, %v1893_v61  ;;  %v1896_v5 = vpop.f32.mrb[6].mxu0 }
 0x18e   : > { %v1945_v6 = vpop.f32.mrb[7].mxu1  ;;  %v1897_v11 = vpop.f32.mrb[7].mxu0 }
 0x18f   : > { %2111 = vtanh.f32 %v1943_v0  ;;  %v1946_v13 = vadd.f32 %v1945_v6, %v1944_v1  ;;  %v1898_v33 = vadd.f32 %v1897_v11, %v1896_v5 }
 0x190   : > { %2113 = vtanh.f32 %v1895_v4 }
 0x191   : > { %v2104_v37 = vpop.eup %2103  ;;  %2115 = vtanh.f32 %v1946_v13 }
 0x192   : > { %v2106_v41 = vpop.eup %2105  ;;  %v1433_v42 = vadd.f32 %v2104_v37, %v1401_v3  ;;  %2117 = vtanh.f32 %v1898_v33 }
 0x193   : > { %v2108_v43 = vpop.eup %2107  ;;  %v1417_v44 = vadd.f32 %v2106_v41, %v1385_v2  ;;  %v1947_v45 = vpop.f32.mrb[8].mxu1 }
 0x194   : > { %v2110_v46 = vpop.eup %2109  ;;  %v1819_v47 = vpack.c.bf16 %v2108_v43, %v2104_v37  ;;  %v1434_v48 = vadd.f32 %v2108_v43, %v1402_v8  ;;  %v1899_v49 = vpop.f32.mrb[8].mxu0  ;;  %1465 = vst [vmem:[%s2524_s7 + $0x80] sm:$0xff] %v1433_v42 }
 0x195   : > { %v1948_v50 = vpop.f32.mrb[9].mxu1  ;;  %v1779_v51 = vpack.c.bf16 %v2110_v46, %v2106_v41  ;;  %v1418_v52 = vadd.f32 %v2110_v46, %v1386_v7  ;;  %v1900_v53 = vpop.f32.mrb[9].mxu0  ;;  %1449 = vst [vmem:[%s2524_s7] sm:$0xff] %v1417_v44 }
 0x196   : > { %v1949_v54 = vadd.f32 %v1948_v50, %v1947_v45  ;;  %v1950_v55 = vpop.f32.mrb[10].mxu1  ;;  %1863 = vst [vmem:[%s2538_s10 + $0x40] sm:$0xff] %v1819_v47   ;;  %v1901_v56 = vadd.f32 %v1900_v53, %v1899_v49  ;;  %v1902_v57 = vpop.f32.mrb[10].mxu0  ;;  %1466 = vst [vmem:[%s2524_s7 + $0x88] sm:$0xff] %v1434_v48 }
 0x197   : > { %v1951_v58 = vpop.f32.mrb[11].mxu1  ;;  %1780 = vst [vmem:[%s2538_s10] sm:$0xff] %v1779_v51   ;;  %v1903_v59 = vpop.f32.mrb[11].mxu0  ;;  %1450 = vst [vmem:[%s2524_s7 + $0x8] sm:$0xff] %v1418_v52 }
 0x198   : > { %2119 = vtanh.f32 %v1949_v54  ;;  %v1952_v60 = vadd.f32 %v1951_v58, %v1950_v55  ;;  %v1904_v61 = vadd.f32 %v1903_v59, %v1902_v57 }
 0x199   : > { %2121 = vtanh.f32 %v1901_v56  ;;  %v2112_v62 = vpop.eup %2111 }
 0x19a   : > { %2123 = vtanh.f32 %v1952_v60  ;;  %v2114_v63 = vpop.eup %2113  ;;  %v1435_v0 = vadd.f32 %v2112_v62, %v2447_v10 }
 0x19b   : > { %2125 = vtanh.f32 %v1904_v61  ;;  %v2116_v1 = vpop.eup %2115  ;;  %v1419_v2 = vadd.f32 %v2114_v63, %v2444_v9  ;;  %v1953_v3 = vpop.f32.mrb[12].mxu1 }
 0x19c   : > { %v2118_v4 = vpop.eup %2117  ;;  %v1824_v5 = vpack.c.bf16 %v2116_v1, %v2112_v62  ;;  %v1436_v6 = vadd.f32 %v2116_v1, %v2453_v14  ;;  %v1905_v7 = vpop.f32.mrb[12].mxu0  ;;  %1467 = vst [vmem:[%s2524_s7 + $0x90] sm:$0xff] %v1435_v0 }
 0x19d   : > { %v1954_v8 = vpop.f32.mrb[13].mxu1  ;;  %v1784_v11 = vpack.c.bf16 %v2118_v4, %v2114_v63  ;;  %v1420_v10 = vadd.f32 %v2118_v4, %v2450_v12  ;;  %v1906_v13 = vpop.f32.mrb[13].mxu0  ;;  %1451 = vst [vmem:[%s2524_s7 + $0x10] sm:$0xff] %v1419_v2 }
 0x19e   : > { %v1955_v33 = vadd.f32 %v1954_v8, %v1953_v3  ;;  %v1956_v37 = vpop.f32.mrb[14].mxu1  ;;  %1864 = vst [vmem:[%s2538_s10 + $0x48] sm:$0xff] %v1824_v5   ;;  %v1907_v9 = vadd.f32 %v1906_v13, %v1905_v7  ;;  %v1908_v41 = vpop.f32.mrb[14].mxu0  ;;  %1468 = vst [vmem:[%s2524_s7 + $0x98] sm:$0xff] %v1436_v6 }
 0x19f   : > { %v1957_v42 = vpop.f32.mrb[15].mxu1  ;;  %1856 = vst [vmem:[%s2538_s10 + $0x8] sm:$0xff] %v1784_v11   ;;  %v1909_v43 = vpop.f32.mrb[15].mxu0  ;;  %1452 = vst [vmem:[%s2524_s7 + $0x18] sm:$0xff] %v1420_v10 }
 0x1a0   : > { %2127 = vtanh.f32 %v1955_v33  ;;  %v1958_v14 = vadd.f32 %v1957_v42, %v1956_v37  ;;  %v1910_v44 = vadd.f32 %v1909_v43, %v1908_v41 }
 0x1a1   : > { %2129 = vtanh.f32 %v1907_v9 }
 0x1a2   : > { %v2120_v45 = vpop.eup %2119  ;;  %2131 = vtanh.f32 %v1958_v14 }
 0x1a3   : > { %v2122_v12 = vpop.eup %2121  ;;  %v1437_v46 = vadd.f32 %v2120_v45, %v2459_v16  ;;  %2133 = vtanh.f32 %v1910_v44  ;;  %v1959_v49 = vpop.f32.mrb[16].mxu1 }
 0x1a4   : > { %v2124_v47 = vpop.eup %2123  ;;  %v1421_v48 = vadd.f32 %v2122_v12, %v2456_v15  ;;  %v1911_v53 = vpop.f32.mrb[16].mxu0 }
 0x1a5   : > { %v2126_v50 = vpop.eup %2125  ;;  %v1829_v51 = vpack.c.bf16 %v2124_v47, %v2120_v45  ;;  %v1438_v52 = vadd.f32 %v2124_v47, %v2465_v18  ;;  %v1960_v54 = vpop.f32.mrb[17].mxu1  ;;  %1469 = vst [vmem:[%s2524_s7 + $0xa0] sm:$0xff] %v1437_v46 }
 0x1a6   : > { %v1789_v55 = vpack.c.bf16 %v2126_v50, %v2122_v12  ;;  %v1422_v16 = vadd.f32 %v2126_v50, %v2462_v17  ;;  %v1912_v56 = vpop.f32.mrb[17].mxu0  ;;  %v1961_v57 = vadd.f32 %v1960_v54, %v1959_v49  ;;  %v1962_v58 = vpop.f32.mrb[18].mxu1  ;;  %1453 = vst [vmem:[%s2524_s7 + $0x20] sm:$0xff] %v1421_v48 }
 0x1a7   : > { %1865 = vst [vmem:[%s2538_s10 + $0x50] sm:$0xff] %v1829_v51   ;;  %v1913_v15 = vadd.f32 %v1912_v56, %v1911_v53  ;;  %v1914_v59 = vpop.f32.mrb[18].mxu0  ;;  %v1963_v60 = vpop.f32.mrb[19].mxu1  ;;  %1470 = vst [vmem:[%s2524_s7 + $0xa8] sm:$0xff] %v1438_v52 }
 0x1a8   : > { %1857 = vst [vmem:[%s2538_s10 + $0x10] sm:$0xff] %v1789_v55   ;;  %2135 = vtanh.f32 %v1961_v57  ;;  %v1915_v61 = vpop.f32.mrb[19].mxu0  ;;  %v1964_v18 = vadd.f32 %v1963_v60, %v1962_v58  ;;  %1454 = vst [vmem:[%s2524_s7 + $0x28] sm:$0xff] %v1422_v16 }
 0x1a9   : > { %2137 = vtanh.f32 %v1913_v15  ;;  %v1916_v62 = vadd.f32 %v1915_v61, %v1914_v59 }
 0x1aa   : > { %v2128_v63 = vpop.eup %2127  ;;  %2139 = vtanh.f32 %v1964_v18 }
 0x1ab   : > { %v2130_v17 = vpop.eup %2129  ;;  %v1439_v0 = vadd.f32 %v2128_v63, %v2471_v20  ;;  %2141 = vtanh.f32 %v1916_v62  ;;  %v1965_v3 = vpop.f32.mrb[20].mxu1 }
 0x1ac   : > { %v2132_v1 = vpop.eup %2131  ;;  %v1423_v2 = vadd.f32 %v2130_v17, %v2468_v19  ;;  %v1917_v7 = vpop.f32.mrb[20].mxu0 }
 0x1ad   : > { %v2134_v4 = vpop.eup %2133  ;;  %v1834_v5 = vpack.c.bf16 %v2132_v1, %v2128_v63  ;;  %v1440_v6 = vadd.f32 %v2132_v1, %v2477_v22  ;;  %v1966_v8 = vpop.f32.mrb[21].mxu1  ;;  %1471 = vst [vmem:[%s2524_s7 + $0xb0] sm:$0xff] %v1439_v0 }
 0x1ae   : > { %v1794_v11 = vpack.c.bf16 %v2134_v4, %v2130_v17  ;;  %v1424_v20 = vadd.f32 %v2134_v4, %v2474_v21  ;;  %v1918_v10 = vpop.f32.mrb[21].mxu0  ;;  %v1967_v13 = vadd.f32 %v1966_v8, %v1965_v3  ;;  %v1968_v33 = vpop.f32.mrb[22].mxu1  ;;  %1455 = vst [vmem:[%s2524_s7 + $0x30] sm:$0xff] %v1423_v2 }
 0x1af   : > { %1866 = vst [vmem:[%s2538_s10 + $0x58] sm:$0xff] %v1834_v5   ;;  %v1919_v19 = vadd.f32 %v1918_v10, %v1917_v7  ;;  %v1920_v37 = vpop.f32.mrb[22].mxu0  ;;  %v1969_v9 = vpop.f32.mrb[23].mxu1  ;;  %1472 = vst [vmem:[%s2524_s7 + $0xb8] sm:$0xff] %v1440_v6 }
 0x1b0   : > { %1858 = vst [vmem:[%s2538_s10 + $0x18] sm:$0xff] %v1794_v11   ;;  %2143 = vtanh.f32 %v1967_v13  ;;  %v1921_v41 = vpop.f32.mrb[23].mxu0  ;;  %v1970_v22 = vadd.f32 %v1969_v9, %v1968_v33  ;;  %1456 = vst [vmem:[%s2524_s7 + $0x38] sm:$0xff] %v1424_v20 }
 0x1b1   : > { %2145 = vtanh.f32 %v1919_v19  ;;  %v1922_v42 = vadd.f32 %v1921_v41, %v1920_v37 }
 0x1b2   : > { %v2136_v43 = vpop.eup %2135  ;;  %2147 = vtanh.f32 %v1970_v22 }
 0x1b3   : > { %v2138_v21 = vpop.eup %2137  ;;  %v1441_v14 = vadd.f32 %v2136_v43, %v2483_v24  ;;  %2149 = vtanh.f32 %v1922_v42  ;;  %v1971_v12 = vpop.f32.mrb[24].mxu1 }
 0x1b4   : > { %v2140_v44 = vpop.eup %2139  ;;  %v1425_v45 = vadd.f32 %v2138_v21, %v2480_v23  ;;  %v1923_v49 = vpop.f32.mrb[24].mxu0 }
 0x1b5   : > { %v2142_v46 = vpop.eup %2141  ;;  %v1839_v47 = vpack.c.bf16 %v2140_v44, %v2136_v43  ;;  %v1442_v48 = vadd.f32 %v2140_v44, %v2489_v26  ;;  %v1972_v50 = vpop.f32.mrb[25].mxu1  ;;  %1473 = vst [vmem:[%s2524_s7 + $0xc0] sm:$0xff] %v1441_v14 }
 0x1b6   : > { %v1799_v51 = vpack.c.bf16 %v2142_v46, %v2138_v21  ;;  %v1426_v24 = vadd.f32 %v2142_v46, %v2486_v25  ;;  %v1924_v52 = vpop.f32.mrb[25].mxu0  ;;  %v1973_v53 = vadd.f32 %v1972_v50, %v1971_v12  ;;  %v1974_v54 = vpop.f32.mrb[26].mxu1  ;;  %1457 = vst [vmem:[%s2524_s7 + $0x40] sm:$0xff] %v1425_v45 }
 0x1b7   : > { %1867 = vst [vmem:[%s2538_s10 + $0x60] sm:$0xff] %v1839_v47   ;;  %v1925_v23 = vadd.f32 %v1924_v52, %v1923_v49  ;;  %v1926_v55 = vpop.f32.mrb[26].mxu0  ;;  %v1975_v16 = vpop.f32.mrb[27].mxu1  ;;  %1474 = vst [vmem:[%s2524_s7 + $0xc8] sm:$0xff] %v1442_v48 }
 0x1b8   : > { %1859 = vst [vmem:[%s2538_s10 + $0x20] sm:$0xff] %v1799_v51   ;;  %2151 = vtanh.f32 %v1973_v53  ;;  %v1927_v56 = vpop.f32.mrb[27].mxu0  ;;  %v1976_v26 = vadd.f32 %v1975_v16, %v1974_v54  ;;  %1458 = vst [vmem:[%s2524_s7 + $0x48] sm:$0xff] %v1426_v24 }
 0x1b9   : > { %2153 = vtanh.f32 %v1925_v23  ;;  %v1928_v57 = vadd.f32 %v1927_v56, %v1926_v55 }
 0x1ba   : > { %v2144_v58 = vpop.eup %2143  ;;  %2155 = vtanh.f32 %v1976_v26 }
 0x1bb   : > { %v2146_v25 = vpop.eup %2145  ;;  %v1443_v15 = vadd.f32 %v2144_v58, %v2495_v28  ;;  %2157 = vtanh.f32 %v1928_v57  ;;  %v1977_v61 = vpop.f32.mrb[28].mxu1 }
 0x1bc   : > { %v2148_v59 = vpop.eup %2147  ;;  %v1427_v60 = vadd.f32 %v2146_v25, %v2492_v27  ;;  %v1929_v17 = vpop.f32.mrb[28].mxu0 }
 0x1bd   : > { %v2150_v18 = vpop.eup %2149  ;;  %v1844_v62 = vpack.c.bf16 %v2148_v59, %v2144_v58  ;;  %v1444_v63 = vadd.f32 %v2148_v59, %v2501_v30  ;;  %v1978_v0 = vpop.f32.mrb[29].mxu1  ;;  %1475 = vst [vmem:[%s2524_s7 + $0xd0] sm:$0xff] %v1443_v15 }
 0x1be   : > { %v1804_v1 = vpack.c.bf16 %v2150_v18, %v2146_v25  ;;  %v1428_v28 = vadd.f32 %v2150_v18, %v2498_v29  ;;  %v1930_v2 = vpop.f32.mrb[29].mxu0  ;;  %v1979_v3 = vadd.f32 %v1978_v0, %v1977_v61  ;;  %v1980_v4 = vpop.f32.mrb[30].mxu1  ;;  %1459 = vst [vmem:[%s2524_s7 + $0x50] sm:$0xff] %v1427_v60 }
 0x1bf   : > { %1868 = vst [vmem:[%s2538_s10 + $0x68] sm:$0xff] %v1844_v62   ;;  %v1931_v27 = vadd.f32 %v1930_v2, %v1929_v17  ;;  %v1932_v5 = vpop.f32.mrb[30].mxu0  ;;  %v1981_v6 = vpop.f32.mrb[31].mxu1  ;;  %1476 = vst [vmem:[%s2524_s7 + $0xd8] sm:$0xff] %v1444_v63 }
 0x1c0   : > { %1860 = vst [vmem:[%s2538_s10 + $0x28] sm:$0xff] %v1804_v1   ;;  %2159 = vtanh.f32 %v1979_v3  ;;  %v1933_v30 = vpop.f32.mrb[31].mxu0  ;;  %v1982_v7 = vadd.f32 %v1981_v6, %v1980_v4  ;;  %1460 = vst [vmem:[%s2524_s7 + $0x58] sm:$0xff] %v1428_v28 }
 0x1c1   : > { %2161 = vtanh.f32 %v1931_v27  ;;  %v1934_v8 = vadd.f32 %v1933_v30, %v1932_v5 }
 0x1c2   : > { %v2152_v29 = vpop.eup %2151  ;;  %2163 = vtanh.f32 %v1982_v7 }
 0x1c3   : > { %v2154_v11 = vpop.eup %2153  ;;  %v1445_v20 = vadd.f32 %v2152_v29, %v2507_v32  ;;  %2165 = vtanh.f32 %v1934_v8 }
 0x1c4   : > { %v2156_v10 = vpop.eup %2155  ;;  %v1429_v13 = vadd.f32 %v2154_v11, %v2504_v31 }
 0x1c5   : > { %v2158_v33 = vpop.eup %2157  ;;  %v1849_v19 = vpack.c.bf16 %v2156_v10, %v2152_v29  ;;  %v1446_v37 = vadd.f32 %v2156_v10, %v2514_v35  ;;  %1477 = vst [vmem:[%s2524_s7 + $0xe0] sm:$0xff] %v1445_v20 }
 0x1c6   : > { %v1809_v9 = vpack.c.bf16 %v2158_v33, %v2154_v11  ;;  %v1430_v41 = vadd.f32 %v2158_v33, %v2511_v34  ;;  %1461 = vst [vmem:[%s2524_s7 + $0x60] sm:$0xff] %v1429_v13 }
 0x1c7   : > { %1869 = vst [vmem:[%s2538_s10 + $0x70] sm:$0xff] %v1849_v19   ;;  %1478 = vst [vmem:[%s2524_s7 + $0xe8] sm:$0xff] %v1446_v37 }
 0x1c8   : > { %1861 = vst [vmem:[%s2538_s10 + $0x30] sm:$0xff] %v1809_v9   ;;  %1462 = vst [vmem:[%s2524_s7 + $0x68] sm:$0xff] %v1430_v41 }
 0x1ca   : > { %v2160_v31 = vpop.eup %2159 }
 0x1cb   : > { %v2162_v32 = vpop.eup %2161  ;;  %v1447_v22 = vadd.f32 %v2160_v31, %v2527_v38 }
 0x1cc   : > { %v2164_v35 = vpop.eup %2163  ;;  %v1431_v42 = vadd.f32 %v2162_v32, %v2517_v36 }
 0x1cd   : > { %v2166_v43 = vpop.eup %2165  ;;  %v1854_v21 = vpack.c.bf16 %v2164_v35, %v2160_v31  ;;  %v1448_v34 = vadd.f32 %v2164_v35, %v2533_v40  ;;  %1479 = vst [vmem:[%s2524_s7 + $0xf0] sm:$0xff] %v1447_v22 }
 0x1ce   : > { %v1814_v14 = vpack.c.bf16 %v2166_v43, %v2162_v32  ;;  %v1432_v44 = vadd.f32 %v2166_v43, %v2530_v39  ;;  %1463 = vst [vmem:[%s2524_s7 + $0x70] sm:$0xff] %v1431_v42 }
 0x1cf   : > { %1870 = vst [vmem:[%s2538_s10 + $0x78] sm:$0xff] %v1854_v21   ;;  %1480 = vst [vmem:[%s2524_s7 + $0xf8] sm:$0xff] %v1448_v34 }
 0x1d0   : > { %1862 = vst [vmem:[%s2538_s10 + $0x38] sm:$0xff] %v1814_v14   ;;  %1464 = vst [vmem:[%s2524_s7 + $0x78] sm:$0xff] %v1432_v44 }
 0x1d1 PF: > { %s15_s19 = sadd.s32 1, %s2205_s19   ;;  %s2636_s15 = smov %s2193_s16 }
 0x1d2   : > { %p12_p10 = scmp.ge.s32.totalorder %s15_s19, 4   ;;  %s2637_s16 = smov %s2267_s23 }
 0x1d3   : > { %s2638_s17 = smov %s2201_s18  ;;  %s2639_s18 = smov %s2641_s20 }
 0x1d4   :  { %14 = sbr.rel (!%p12_p10) target bundleno = 3 (0x3), region = 131 }

// kernel: egcf_forward.8
= control target key start
LH: loop header
LB: loop body
LE: loop exit
PB: predicated region body
PF: predicated region fallthrough
CT: control target
= control target key end

     0   :  { %10 = vsyncpa [#allocation5], 0  ;;  %s2760_s0 = inlined_call_operand.vmem [shape: bf16[256,512], index: 0, kind: input, shape index: {}]   ;;  %s2761_s1 = inlined_call_operand.vmem [shape: bf16[256,128], index: 1, kind: input, shape index: {}]   ;;  %s2762_s2 = inlined_call_operand.vmem [shape: f32[512,128], index: 2, kind: input, shape index: {}, may-alias: {2,4}]   ;;  %s2763_s3 = inlined_call_operand.hbm [shape: bf16[512,128], index: 3, kind: output, shape index: {0}]   ;;  %s2764_s4 = inlined_call_operand.vmem [shape: f32[512,128], index: 4, kind: output, shape index: {1}, may-alias: {2,4}]  }
   0x1   :  { %12 = vsyncpa [#allocation5 + $0x1], 0  ;;  %s2299_s15 = smov 0   ;;  %s2301_s16 = smov 0  }
   0x2   :  { %s2303_s17 = smov 0   ;;  %s2305_s18 = smov 0  }
   0x3   :  { %s2307_s19 = smov 0   ;;  %s2309_s20 = smov 0  }
   0x4 LB: > { %s1649_s21 = sadd.s32 4294967295, %s2269_s20   ;;  %s1650_s22 = sadd.s32 4294967294, %s2269_s20   ;;  %s2269_s20 = sphi %s2309_s20, %s18_s20   ;;  %s2265_s19 = sphi %s2307_s19, %s2771_s19   ;;  %s2261_s18 = sphi %s2305_s18, %s2770_s18   ;;  %s2257_s17 = sphi %s2303_s17, %s2769_s17   ;;  %s2253_s16 = sphi %s2301_s16, %s2768_s16   ;;  %s2249_s15 = sphi %s2299_s15, %s2767_s15  }
   0x5   : > { %s37_s23 = sadd.s32 1, %s2265_s19  ;;  %s46_s24 = sadd.s32 1, %s2257_s17 }
   0x6   : > { %p39_p0 = scmp.ge.s32.totalorder %s37_s23, 2  ;;  %p53_p1 = scmp.ne.s32.totalorder %s2257_s17, %s2253_s16 }
   0x7   : > { %p54_p2 = scmp.eq.s32.totalorder %s2269_s20, 0  ;;  %p141_p3 = scmp.eq.s32.totalorder %s1649_s21, 1 }
   0x8   : > { %s2773_s23 = smov (%p39_p0, %s37_s23), 0  ;;  %p146_p6 = scmp.ne.s32.totalorder %s2253_s16, %s2249_s15 }
   0x9   : > { %p55_p4 = por %p54_p2, %p53_p1  ;;  %p2338_p5 = por %p141_p3, %p53_p1 }
   0xa   : > { %s42_s26 = ssub.s32 %s2265_s19, %s2773_s23  ;;  %p147_p8 = scmp.eq.s32.totalorder %s1650_s22, 1 }
   0xb   : > { %p44_p7 = scmp.eq.s32.totalorder %s42_s26, 0  ;;  %p1653_p10 = scmp.ge.s32.totalorder %s2269_s20, 2 }
   0xc   : > { %p2349_p9 = por %p147_p8, %p146_p6 }
   0xd   : > { %s2347_s27 = scalar_select %p44_p7, %s2257_s17, %s46_s24  }
   0xe   : > { %203 = sbr.rel (%p1653_p10) target bundleno = 41 (0x29), region = 20 }
  0x15   : > { %206 = sbr.rel (!%p55_p4) target bundleno = 41 (0x29), region = 24  ;;  %s208_s29 = sand.u32 (%p55_p4), 1, %s2257_s17  }
  0x16   : > { %s1749_s30 = sshll.u32 (%p55_p4), %s2265_s19, 3  ;;  %s1654_s5 = sshll.u32 (%p55_p4), %s208_s29, 8 }
  0x17   : > { %s2361_s8 = scalar_lea.vmem (%p55_p4), %s2760_s0, %s1749_s30  ;;  %s2366_s9 = scalar_lea.vmem (%p55_p4), [#allocation3], %s1654_s5 }
  0x18   : > { %v306_v0 = vld [vmem:[%s2361_s8] sm:$0xff] (%p55_p4)  ;;  %v308_v1 = vld [vmem:[%s2361_s8 + $0x10] sm:$0xff] (%p55_p4) }
  0x19   : > { %v310_v2 = vld [vmem:[%s2361_s8 + $0x20] sm:$0xff] (%p55_p4)  ;;  %307 = vst [vmem:[%s2366_s9] sm:$0xff] (%p55_p4), %v306_v0  ;;  %309 = vst [vmem:[%s2366_s9 + $0x8] sm:$0xff] (%p55_p4), %v308_v1  ;;  %v312_v3 = vld [vmem:[%s2361_s8 + $0x30] sm:$0xff] (%p55_p4) }
  0x1a   : > { %311 = vst [vmem:[%s2366_s9 + $0x10] sm:$0xff] (%p55_p4), %v310_v2  ;;  %v314_v4 = vld [vmem:[%s2361_s8 + $0x40] sm:$0xff] (%p55_p4)  ;;  %v316_v5 = vld [vmem:[%s2361_s8 + $0x50] sm:$0xff] (%p55_p4)  ;;  %313 = vst [vmem:[%s2366_s9 + $0x18] sm:$0xff] (%p55_p4), %v312_v3 }
  0x1b   : > { %315 = vst [vmem:[%s2366_s9 + $0x20] sm:$0xff] (%p55_p4), %v314_v4  ;;  %317 = vst [vmem:[%s2366_s9 + $0x28] sm:$0xff] (%p55_p4), %v316_v5  ;;  %v318_v6 = vld [vmem:[%s2361_s8 + $0x60] sm:$0xff] (%p55_p4)  ;;  %v320_v7 = vld [vmem:[%s2361_s8 + $0x70] sm:$0xff] (%p55_p4) }
  0x1c   : > { %v322_v8 = vld [vmem:[%s2361_s8 + $0x80] sm:$0xff]  ;;  %319 = vst [vmem:[%s2366_s9 + $0x30] sm:$0xff] %v318_v6  ;;  %321 = vst [vmem:[%s2366_s9 + $0x38] sm:$0xff] %v320_v7  ;;  %v324_v9 = vld [vmem:[%s2361_s8 + $0x90] sm:$0xff] }
  0x1d   : > { %323 = vst [vmem:[%s2366_s9 + $0x40] sm:$0xff] %v322_v8  ;;  %v326_v10 = vld [vmem:[%s2361_s8 + $0xa0] sm:$0xff]  ;;  %v328_v11 = vld [vmem:[%s2361_s8 + $0xb0] sm:$0xff]  ;;  %325 = vst [vmem:[%s2366_s9 + $0x48] sm:$0xff] %v324_v9 }
  0x1e   : > { %327 = vst [vmem:[%s2366_s9 + $0x50] sm:$0xff] %v326_v10  ;;  %329 = vst [vmem:[%s2366_s9 + $0x58] sm:$0xff] %v328_v11  ;;  %v330_v12 = vld [vmem:[%s2361_s8 + $0xc0] sm:$0xff]  ;;  %v332_v13 = vld [vmem:[%s2361_s8 + $0xd0] sm:$0xff] }
  0x1f   : > { %v334_v14 = vld [vmem:[%s2361_s8 + $0xe0] sm:$0xff]  ;;  %331 = vst [vmem:[%s2366_s9 + $0x60] sm:$0xff] %v330_v12  ;;  %333 = vst [vmem:[%s2366_s9 + $0x68] sm:$0xff] %v332_v13  ;;  %v336_v15 = vld [vmem:[%s2361_s8 + $0xf0] sm:$0xff] }
  0x20   : > { %335 = vst [vmem:[%s2366_s9 + $0x70] sm:$0xff] %v334_v14  ;;  %v338_v16 = vld [vmem:[%s2361_s8 + $0x100] sm:$0xff]  ;;  %v340_v17 = vld [vmem:[%s2361_s8 + $0x110] sm:$0xff]  ;;  %337 = vst [vmem:[%s2366_s9 + $0x78] sm:$0xff] %v336_v15 }
  0x21   : > { %339 = vst [vmem:[%s2366_s9 + $0x80] sm:$0xff] %v338_v16  ;;  %341 = vst [vmem:[%s2366_s9 + $0x88] sm:$0xff] %v340_v17  ;;  %v342_v18 = vld [vmem:[%s2361_s8 + $0x120] sm:$0xff]  ;;  %v344_v19 = vld [vmem:[%s2361_s8 + $0x130] sm:$0xff] }
  0x22   : > { %v346_v20 = vld [vmem:[%s2361_s8 + $0x140] sm:$0xff]  ;;  %343 = vst [vmem:[%s2366_s9 + $0x90] sm:$0xff] %v342_v18  ;;  %345 = vst [vmem:[%s2366_s9 + $0x98] sm:$0xff] %v344_v19  ;;  %v348_v21 = vld [vmem:[%s2361_s8 + $0x150] sm:$0xff] }
  0x23   : > { %347 = vst [vmem:[%s2366_s9 + $0xa0] sm:$0xff] %v346_v20  ;;  %v350_v22 = vld [vmem:[%s2361_s8 + $0x160] sm:$0xff]  ;;  %v352_v23 = vld [vmem:[%s2361_s8 + $0x170] sm:$0xff]  ;;  %349 = vst [vmem:[%s2366_s9 + $0xa8] sm:$0xff] %v348_v21 }
  0x24   : > { %351 = vst [vmem:[%s2366_s9 + $0xb0] sm:$0xff] %v350_v22  ;;  %353 = vst [vmem:[%s2366_s9 + $0xb8] sm:$0xff] %v352_v23  ;;  %v354_v24 = vld [vmem:[%s2361_s8 + $0x180] sm:$0xff]  ;;  %v356_v25 = vld [vmem:[%s2361_s8 + $0x190] sm:$0xff] }
  0x25   : > { %v358_v26 = vld [vmem:[%s2361_s8 + $0x1a0] sm:$0xff]  ;;  %355 = vst [vmem:[%s2366_s9 + $0xc0] sm:$0xff] %v354_v24  ;;  %357 = vst [vmem:[%s2366_s9 + $0xc8] sm:$0xff] %v356_v25  ;;  %v360_v27 = vld [vmem:[%s2361_s8 + $0x1b0] sm:$0xff] }
  0x26   : > { %359 = vst [vmem:[%s2366_s9 + $0xd0] sm:$0xff] %v358_v26  ;;  %v362_v28 = vld [vmem:[%s2361_s8 + $0x1c0] sm:$0xff]  ;;  %v364_v29 = vld [vmem:[%s2361_s8 + $0x1d0] sm:$0xff]  ;;  %361 = vst [vmem:[%s2366_s9 + $0xd8] sm:$0xff] %v360_v27 }
  0x27   : > { %363 = vst [vmem:[%s2366_s9 + $0xe0] sm:$0xff] %v362_v28  ;;  %365 = vst [vmem:[%s2366_s9 + $0xe8] sm:$0xff] %v364_v29  ;;  %v366_v30 = vld [vmem:[%s2361_s8 + $0x1e0] sm:$0xff]  ;;  %v368_v31 = vld [vmem:[%s2361_s8 + $0x1f0] sm:$0xff] }
  0x28   : > { %367 = vst [vmem:[%s2366_s9 + $0xf0] sm:$0xff] %v366_v30  ;;  %369 = vst [vmem:[%s2366_s9 + $0xf8] sm:$0xff] %v368_v31 }
  0x29 PF: > { %p1657_p11 = scmp.ge.s32.totalorder %s2269_s20, 1  ;;  %p386_p12 = scmp.lt.s32.totalorder %s2269_s20, 3 }
  0x2b   : > { %p387_p13 = pnand %p1657_p11, %p386_p12 }
  0x2c   : > { %s2432_s10 = sand.u32 (!%p387_p13), 1, %s2253_s16   ;;  %v2111_v32 = vld [vmem:[%s2761_s1 + $0x40] sm:$0xff] (!%p387_p13)   ;;  %v2113_v34 = vld [vmem:[%s2761_s1 + $0x48] sm:$0xff] (!%p387_p13)   ;;  %v2115_v50 = vld [vmem:[%s2761_s1 + $0x50] sm:$0xff] (!%p387_p13)   ;;  %s1782_s11 = sshll.u32 (!%p387_p13), %s2261_s18, 11 }
  0x2d   : > { %390 = sbr.rel (%p387_p13) target bundleno = 486 (0x1e6), region = 66  ;;  %s1658_s13 = sshll.u32 (!%p387_p13), %s2432_s10, 8  ;;  %v2112_v33 = vld [vmem:[%s2761_s1] sm:$0xff] (!%p387_p13)   ;;  %1878 = vmatprep.subr.bf16.mxu0 (!%p387_p13), %v2111_v32  ;;  %1990 = vmatprep.subr.bf16.mxu1 (!%p387_p13), %v2111_v32  ;;  %v2114_v49 = vld [vmem:[%s2761_s1 + $0x8] sm:$0xff] (!%p387_p13)   ;;  %v2116_v51 = vld [vmem:[%s2761_s1 + $0x10] sm:$0xff] (!%p387_p13)  }
  0x2e   : > { %s2444_s26 = scalar_lea.vmem (!%p387_p13), [#allocation3], %s1658_s13  ;;  %1879 = vmatpush3.bf16.msra.mxu0 (!%p387_p13), %v2112_v33  ;;  %1998 = vmatpush3.bf16.msra.mxu1 (!%p387_p13), %v2112_v33  ;;  %v2117_v52 = vld [vmem:[%s2761_s1 + $0x58] sm:$0xff] (!%p387_p13)   ;;  %v2119_v56 = vld [vmem:[%s2761_s1 + $0x60] sm:$0xff] (!%p387_p13)   ;;  %v2121_v60 = vld [vmem:[%s2761_s1 + $0x68] sm:$0xff] (!%p387_p13)   ;;  %s1659_s5 = sshll.u32 (!%p387_p13), %s2432_s10, 7 }
  0x2f   : > { %v2063_v35 = vld [vmem:[%s2444_s26 + $0x84] ss:$8 sps:$4 sm:$0xff] (!%p387_p13)   ;;  %v2065_v36 = vld [vmem:[%s2444_s26 + $0x80] ss:$8 sps:$4 sm:$0xff] (!%p387_p13)   ;;  %1880 = vmatprep.subr.bf16.mxu0 (!%p387_p13), %v2113_v34  ;;  %1991 = vmatprep.subr.bf16.mxu1 (!%p387_p13), %v2113_v34  ;;  %v2066_v37 = vld [vmem:[%s2444_s26 + $0x94] ss:$8 sps:$4 sm:$0xff] (!%p387_p13)  }
  0x30   : > { %813 = vxpose.xlu1.c.b16.start [1/8] (!%p387_p13), %v2063_v35, 128  ;;  %797 = vxpose.xlu0.c.b16.start [1/8] (!%p387_p13), %v2065_v36, 128  ;;  %v2068_v38 = vld [vmem:[%s2444_s26 + $0x90] ss:$8 sps:$4 sm:$0xff] (!%p387_p13)   ;;  %v2069_v39 = vld [vmem:[%s2444_s26 + $0xa4] ss:$8 sps:$4 sm:$0xff] (!%p387_p13)   ;;  %v2071_v40 = vld [vmem:[%s2444_s26 + $0xa0] ss:$8 sps:$4 sm:$0xff] (!%p387_p13)  }
  0x31   : > { %v2072_v41 = vld [vmem:[%s2444_s26 + $0xb4] ss:$8 sps:$4 sm:$0xff] (!%p387_p13)   ;;  %v2074_v42 = vld [vmem:[%s2444_s26 + $0xb0] ss:$8 sps:$4 sm:$0xff] (!%p387_p13)   ;;  %v2075_v43 = vld [vmem:[%s2444_s26 + $0xc4] ss:$8 sps:$4 sm:$0xff] (!%p387_p13)  }
  0x32   : > { %v2077_v44 = vld [vmem:[%s2444_s26 + $0xc0] ss:$8 sps:$4 sm:$0xff] (!%p387_p13)   ;;  %v2078_v45 = vld [vmem:[%s2444_s26 + $0xd4] ss:$8 sps:$4 sm:$0xff] (!%p387_p13)   ;;  %v2080_v46 = vld [vmem:[%s2444_s26 + $0xd0] ss:$8 sps:$4 sm:$0xff] (!%p387_p13)   ;;  %1881 = vmatpush3.bf16.msra.mxu0 (!%p387_p13), %v2114_v49  ;;  %1999 = vmatpush3.bf16.msra.mxu1 (!%p387_p13), %v2114_v49 }
  0x33   : > { %v2081_v47 = vld [vmem:[%s2444_s26 + $0xe4] ss:$8 sps:$4 sm:$0xff] (!%p387_p13)   ;;  %v2083_v48 = vld [vmem:[%s2444_s26 + $0xe0] ss:$8 sps:$4 sm:$0xff] (!%p387_p13)   ;;  %1882 = vmatprep.subr.bf16.mxu0 (!%p387_p13), %v2115_v50  ;;  %1992 = vmatprep.subr.bf16.mxu1 (!%p387_p13), %v2115_v50  ;;  %v2084_v53 = vld [vmem:[%s2444_s26 + $0xf4] ss:$8 sps:$4 sm:$0xff] (!%p387_p13)  }
  0x34   : > { %814 = vxpose.xlu1.c.b16.cont [2/8] %v2066_v37, 128  ;;  %798 = vxpose.xlu0.c.b16.cont [2/8] %v2068_v38, 128  ;;  %v2086_v54 = vld [vmem:[%s2444_s26 + $0xf0] ss:$8 sps:$4 sm:$0xff]   ;;  %v2087_v57 = vld [vmem:[%s2444_s26 + $0x4] ss:$8 sps:$4 sm:$0xff]   ;;  %v2089_v58 = vld [vmem:[%s2444_s26] ss:$8 sps:$4 sm:$0xff]  }
  0x35   : > { %v2118_v55 = vld [vmem:[%s2761_s1 + $0x18] sm:$0xff]   ;;  %v2120_v59 = vld [vmem:[%s2761_s1 + $0x20] sm:$0xff]   ;;  %v2122_v63 = vld [vmem:[%s2761_s1 + $0x28] sm:$0xff]   ;;  %s2628_s9 = scalar_lea.vmem [#allocation4], %s1659_s5  ;;  %s1474_s21 = scalar_lea.sflag [#allocation5], %s2432_s10 }
  0x36   : > { %1883 = vmatpush3.bf16.msra.mxu0 %v2116_v51  ;;  %2000 = vmatpush3.bf16.msra.mxu1 %v2116_v51  ;;  %v2090_v61 = vld [vmem:[%s2444_s26 + $0x14] ss:$8 sps:$4 sm:$0xff]   ;;  %v2092_v62 = vld [vmem:[%s2444_s26 + $0x10] ss:$8 sps:$4 sm:$0xff]   ;;  %v2093_v1 = vld [vmem:[%s2444_s26 + $0x24] ss:$8 sps:$4 sm:$0xff]  }
  0x37   : > { %1884 = vmatprep.subr.bf16.mxu0 %v2117_v52  ;;  %1993 = vmatprep.subr.bf16.mxu1 %v2117_v52  ;;  %v2123_v0 = vld [vmem:[%s2761_s1 + $0x70] sm:$0xff]   ;;  %v2095_v2 = vld [vmem:[%s2444_s26 + $0x20] ss:$8 sps:$4 sm:$0xff]   ;;  %v2125_v4 = vld [vmem:[%s2761_s1 + $0x78] sm:$0xff]   ;;  %s1496_s12 = sshll.u32 %s2628_s9, 4  ;;  %s2705_s12 = int_to_ptr.vmem [resolvable:$true] %s1496_s12 }
  0x38   : > { %815 = vxpose.xlu1.c.b16.cont [3/8] %v2069_v39, 128  ;;  %799 = vxpose.xlu0.c.b16.cont [3/8] %v2071_v40, 128  ;;  %v2124_v3 = vld [vmem:[%s2761_s1 + $0x30] sm:$0xff]   ;;  %v2126_v7 = vld [vmem:[%s2761_s1 + $0x38] sm:$0xff]   ;;  %v2099_v8 = vld [vmem:[%s2444_s26 + $0x44] ss:$8 sps:$4 sm:$0xff]  }
  0x39   : > { %v2096_v5 = vld [vmem:[%s2444_s26 + $0x34] ss:$8 sps:$4 sm:$0xff]   ;;  %v2098_v6 = vld [vmem:[%s2444_s26 + $0x30] ss:$8 sps:$4 sm:$0xff]   ;;  %v2101_v9 = vld [vmem:[%s2444_s26 + $0x40] ss:$8 sps:$4 sm:$0xff]  }
  0x3a   : > { %1885 = vmatpush3.bf16.msra.mxu0 %v2118_v55  ;;  %2001 = vmatpush3.bf16.msra.mxu1 %v2118_v55  ;;  %v2102_v10 = vld [vmem:[%s2444_s26 + $0x54] ss:$8 sps:$4 sm:$0xff]   ;;  %v2104_v11 = vld [vmem:[%s2444_s26 + $0x50] ss:$8 sps:$4 sm:$0xff]   ;;  %v2105_v12 = vld [vmem:[%s2444_s26 + $0x64] ss:$8 sps:$4 sm:$0xff]  }
  0x3b   : > { %1886 = vmatprep.subr.bf16.mxu0 %v2119_v56  ;;  %1994 = vmatprep.subr.bf16.mxu1 %v2119_v56  ;;  %v2107_v13 = vld [vmem:[%s2444_s26 + $0x60] ss:$8 sps:$4 sm:$0xff]   ;;  %v2108_v14 = vld [vmem:[%s2444_s26 + $0x74] ss:$8 sps:$4 sm:$0xff]   ;;  %v2110_v15 = vld [vmem:[%s2444_s26 + $0x70] ss:$8 sps:$4 sm:$0xff]  }
  0x3c   : > { %816 = vxpose.xlu1.c.b16.cont [4/8] %v2072_v41, 128  ;;  %800 = vxpose.xlu0.c.b16.cont [4/8] %v2074_v42, 128  ;;  %s1660_s26 = sshll.u32 %s2261_s18, 5  ;;  %s2703_s18 = scalar_lea.hbm %s2763_s3, %s1782_s11 }
  0x3d   : > { %p454_p0 = scmp.lt.s32.totalorder %s1660_s26, 63 }
  0x3e   : > { %1887 = vmatpush3.bf16.msra.mxu0 %v2120_v59  ;;  %2002 = vmatpush3.bf16.msra.mxu1 %v2120_v59 }
  0x3f   : > { %1888 = vmatprep.subr.bf16.mxu0 %v2121_v60  ;;  %1995 = vmatprep.subr.bf16.mxu1 %v2121_v60  ;;  %s2775_s26 = smov (!%p454_p0, %s1660_s26), 63 }
  0x40   : > { %817 = vxpose.xlu1.c.b16.cont [5/8] %v2075_v43, 128  ;;  %801 = vxpose.xlu0.c.b16.cont [5/8] %v2077_v44, 128  ;;  %s1661_s22 = sshll.u32 %s2775_s26, 3  ;;  %s2191_s26 = scalar_lea.vmem %s2705_s12, 2048 }
  0x41   : > { %s2526_s30 = scalar_lea.vmem %s2762_s2, %s1661_s22  ;;  %s2613_s8 = scalar_lea.vmem %s2764_s4, %s1661_s22 }
  0x42   : > { %1889 = vmatpush3.bf16.msra.mxu0 %v2122_v63  ;;  %2003 = vmatpush3.bf16.msra.mxu1 %v2122_v63  ;;  %p2192_p1 = scmp.ne.s32.totalorder %s2705_s12, %s2191_s26  ;;  %s2271_s22 = smov [#allocation4]  }
  0x43   : > { %1890 = vmatprep.subr.bf16.mxu0 %v2123_v0  ;;  %1996 = vmatprep.subr.bf16.mxu1 %v2123_v0  ;;  %s2195_s24 = sshll.u32 %s2271_s22, 4  ;;  %s2196_s24 = int_to_ptr.vmem [resolvable:$false] %s2195_s24 }
  0x44   : > { %818 = vxpose.xlu1.c.b16.cont [6/8] %v2078_v45, 128  ;;  %802 = vxpose.xlu0.c.b16.cont [6/8] %v2080_v46, 128  ;;  %p2193_p2 = pnand %p2192_p1, %p2338_p5  ;;  %s2197_s29 = scalar_lea.vmem %s2196_s24, 4096 }
  0x45   : > { %p2198_p4 = scmp.lt.s32.totalorder %s2705_s12, %s2196_s24  ;;  %p2199_p6 = scmp.lt.s32.totalorder %s2197_s29, %s2191_s26 }
  0x46   : > { %1891 = vmatpush3.bf16.msra.mxu0 %v2124_v3  ;;  %2004 = vmatpush3.bf16.msra.mxu1 %v2124_v3  ;;  %v1393_v3 = vld [vmem:[%s2526_s30 + $0x80] sm:$0xff]  ;;  %p2194_p3 = pneg %p2193_p2 }
  0x47   : > { %1892 = vmatprep.subr.bf16.mxu0 %v2125_v4  ;;  %1997 = vmatprep.subr.bf16.mxu1 %v2125_v4  ;;  %p2200_p7 = por %p2199_p6, %p2198_p4 }
  0x48   : > { %819 = vxpose.xlu1.c.b16.cont [7/8] %v2081_v47, 128  ;;  %803 = vxpose.xlu0.c.b16.cont [7/8] %v2083_v48, 128 }
  0x49   : > { %p2201_p8 = pnand %p2200_p7, %p2194_p3 }
  0x4a   : > { %1893 = vmatpush3.bf16.msra.mxu0 %v2126_v7  ;;  %2005 = vmatpush3.bf16.msra.mxu1 %v2126_v7  ;;  %v1378_v7 = vld [vmem:[%s2526_s30 + $0x8] sm:$0xff] }
  0x4c   : > { %820 = vxpose.xlu1.c.b16.end [8/8] %v2084_v53, 128  ;;  %804 = vxpose.xlu0.c.b16.end [8/8] %v2086_v54, 128 }
  0x50   : > { %781 = vxpose.xlu1.c.b16.start [1/8] %v2087_v57, 128  ;;  %765 = vxpose.xlu0.c.b16.start [1/8] %v2089_v58, 128 }
  0x54   : > { %782 = vxpose.xlu1.c.b16.cont [2/8] %v2090_v61, 128  ;;  %766 = vxpose.xlu0.c.b16.cont [2/8] %v2092_v62, 128 }
  0x58   : > { %783 = vxpose.xlu1.c.b16.cont [3/8] %v2093_v1, 128  ;;  %767 = vxpose.xlu0.c.b16.cont [3/8] %v2095_v2, 128  ;;  %v1377_v2 = vld [vmem:[%s2526_s30] sm:$0xff] }
  0x5c   : > { %784 = vxpose.xlu1.c.b16.cont [4/8] %v2096_v5, 128  ;;  %768 = vxpose.xlu0.c.b16.cont [4/8] %v2098_v6, 128 }
  0x60   : > { %785 = vxpose.xlu1.c.b16.cont [5/8] %v2099_v8, 128  ;;  %769 = vxpose.xlu0.c.b16.cont [5/8] %v2101_v9, 128  ;;  %v1394_v8 = vld [vmem:[%s2526_s30 + $0x88] sm:$0xff]  ;;  %v2533_v9 = vld [vmem:[%s2526_s30 + $0x10] sm:$0xff] }
  0x64   : > { %786 = vxpose.xlu1.c.b16.cont [6/8] %v2102_v10, 128  ;;  %770 = vxpose.xlu0.c.b16.cont [6/8] %v2104_v11, 128  ;;  %v2536_v10 = vld [vmem:[%s2526_s30 + $0x90] sm:$0xff] }
  0x68   : > { %787 = vxpose.xlu1.c.b16.cont [7/8] %v2105_v12, 128  ;;  %771 = vxpose.xlu0.c.b16.cont [7/8] %v2107_v13, 128  ;;  %v2539_v12 = vld [vmem:[%s2526_s30 + $0x18] sm:$0xff] }
  0x6c   : > { %788 = vxpose.xlu1.c.b16.end [8/8] %v2108_v14, 128  ;;  %772 = vxpose.xlu0.c.b16.end [8/8] %v2110_v15, 128  ;;  %v2542_v14 = vld [vmem:[%s2526_s30 + $0x98] sm:$0xff]  ;;  %v2545_v15 = vld [vmem:[%s2526_s30 + $0x20] sm:$0xff] }
  0x96   : > { %v821_v16 = vpop.trf.xlu1  ;;  %v805_v17 = vpop.trf.xlu0 }
  0x97   : > { %1021 = vmatprep.mubr.bf16.mxu1 %v821_v16  ;;  %957 = vmatprep.mubr.bf16.mxu0 %v805_v17  ;;  %v2548_v16 = vld [vmem:[%s2526_s30 + $0xa0] sm:$0xff]  ;;  %v2551_v17 = vld [vmem:[%s2526_s30 + $0x28] sm:$0xff] }
  0x9a   : > { %v822_v18 = vpop.trf.xlu1  ;;  %v806_v19 = vpop.trf.xlu0 }
  0x9e   : > { %v823_v20 = vpop.trf.xlu1  ;;  %v807_v21 = vpop.trf.xlu0 }
  0xa2   : > { %v824_v22 = vpop.trf.xlu1  ;;  %v808_v23 = vpop.trf.xlu0 }
  0xa6   : > { %v825_v24 = vpop.trf.xlu1  ;;  %v809_v25 = vpop.trf.xlu0 }
  0xaa   : > { %v826_v26 = vpop.trf.xlu1  ;;  %v810_v27 = vpop.trf.xlu0 }
  0xae   : > { %v827_v28 = vpop.trf.xlu1  ;;  %v811_v29 = vpop.trf.xlu0 }
  0xb2   : > { %v828_v30 = vpop.trf.xlu1  ;;  %v812_v31 = vpop.trf.xlu0 }
  0xb6   : > { %v789_v32 = vpop.trf.xlu1  ;;  %v773_v33 = vpop.trf.xlu0 }
  0xb7   : > { %1022 = vmatmul.mubr.bf16.vlgmr.msra.gmra.mrb[0].mxu1 %v789_v32  ;;  %958 = vmatmul.mubr.bf16.vlgmr.msra.gmra.mrb[0].mxu0 %v773_v33  ;;  %v2596_v32 = vld [vmem:[%s2526_s30 + $0xe0] sm:$0xff] }
  0xb8   : > { %1029 = vmatprep.mubr.bf16.mxu1 %v822_v18  ;;  %965 = vmatprep.mubr.bf16.mxu0 %v806_v19  ;;  %v2554_v18 = vld [vmem:[%s2526_s30 + $0xa8] sm:$0xff]  ;;  %v2557_v19 = vld [vmem:[%s2526_s30 + $0x30] sm:$0xff] }
  0xba   : > { %v790_v34 = vpop.trf.xlu1  ;;  %v774_v35 = vpop.trf.xlu0 }
  0xbe   : > { %v791_v36 = vpop.trf.xlu1  ;;  %v775_v37 = vpop.trf.xlu0 }
  0xbf   : > { %1030 = vmatmul.mubr.bf16.gmra.mrb[4].mxu1 %v790_v34  ;;  %966 = vmatmul.mubr.bf16.gmra.mrb[4].mxu0 %v774_v35  ;;  %v2600_v34 = vld [vmem:[%s2526_s30 + $0x68] sm:$0xff] }
  0xc0   : > { %1037 = vmatprep.mubr.bf16.mxu1 %v823_v20  ;;  %973 = vmatprep.mubr.bf16.mxu0 %v807_v21  ;;  %v2560_v20 = vld [vmem:[%s2526_s30 + $0xb0] sm:$0xff]  ;;  %v2563_v21 = vld [vmem:[%s2526_s30 + $0x38] sm:$0xff]  ;;  %v2603_v35 = vld [vmem:[%s2526_s30 + $0xe8] sm:$0xff] }
  0xc2   : > { %v792_v38 = vpop.trf.xlu1  ;;  %v776_v39 = vpop.trf.xlu0 }
  0xc6   : > { %v793_v40 = vpop.trf.xlu1  ;;  %v777_v41 = vpop.trf.xlu0 }
  0xc7   : > { %1038 = vmatmul.mubr.bf16.gmra.mrb[8].mxu1 %v791_v36  ;;  %974 = vmatmul.mubr.bf16.gmra.mrb[8].mxu0 %v775_v37  ;;  %v2606_v36 = vld [vmem:[%s2526_s30 + $0x70] sm:$0xff] }
  0xc8   : > { %1045 = vmatprep.mubr.bf16.mxu1 %v824_v22  ;;  %981 = vmatprep.mubr.bf16.mxu0 %v808_v23  ;;  %v2566_v22 = vld [vmem:[%s2526_s30 + $0xb8] sm:$0xff]  ;;  %v2569_v23 = vld [vmem:[%s2526_s30 + $0x40] sm:$0xff] }
  0xca   : > { %v794_v42 = vpop.trf.xlu1  ;;  %v778_v43 = vpop.trf.xlu0 }
  0xce   : > { %v795_v44 = vpop.trf.xlu1  ;;  %v779_v45 = vpop.trf.xlu0 }
  0xcf   : > { %1046 = vmatmul.mubr.bf16.gmra.mrb[12].mxu1 %v792_v38  ;;  %982 = vmatmul.mubr.bf16.gmra.mrb[12].mxu0 %v776_v39  ;;  %v2616_v38 = vld [vmem:[%s2526_s30 + $0xf0] sm:$0xff]  ;;  %v2619_v39 = vld [vmem:[%s2526_s30 + $0x78] sm:$0xff] }
  0xd0   : > { %1053 = vmatprep.mubr.bf16.mxu1 %v825_v24  ;;  %989 = vmatprep.mubr.bf16.mxu0 %v809_v25  ;;  %v2572_v24 = vld [vmem:[%s2526_s30 + $0xc0] sm:$0xff]  ;;  %v2575_v25 = vld [vmem:[%s2526_s30 + $0x48] sm:$0xff] }
  0xd2   : > { %v796_v46 = vpop.trf.xlu1  ;;  %v780_v47 = vpop.trf.xlu0 }
  0xd7   : > { %1054 = vmatmul.mubr.bf16.gmra.mrb[16].mxu1 %v793_v40  ;;  %990 = vmatmul.mubr.bf16.gmra.mrb[16].mxu0 %v777_v41  ;;  %v2622_v40 = vld [vmem:[%s2526_s30 + $0xf8] sm:$0xff] }
  0xd8   : > { %1061 = vmatprep.mubr.bf16.mxu1 %v826_v26  ;;  %997 = vmatprep.mubr.bf16.mxu0 %v810_v27  ;;  %v2578_v26 = vld [vmem:[%s2526_s30 + $0xc8] sm:$0xff]  ;;  %v2581_v27 = vld [vmem:[%s2526_s30 + $0x50] sm:$0xff] }
  0xdf   : > { %1062 = vmatmul.mubr.bf16.gmra.mrb[20].mxu1 %v794_v42  ;;  %998 = vmatmul.mubr.bf16.gmra.mrb[20].mxu0 %v778_v43 }
  0xe0   : > { %1069 = vmatprep.mubr.bf16.mxu1 %v827_v28  ;;  %1005 = vmatprep.mubr.bf16.mxu0 %v811_v29  ;;  %v2584_v28 = vld [vmem:[%s2526_s30 + $0xd0] sm:$0xff]  ;;  %v2587_v29 = vld [vmem:[%s2526_s30 + $0x58] sm:$0xff] }
  0xe7   : > { %1070 = vmatmul.mubr.bf16.gmra.mrb[24].mxu1 %v795_v44  ;;  %1006 = vmatmul.mubr.bf16.gmra.mrb[24].mxu0 %v779_v45 }
  0xe8   : > { %1077 = vmatprep.mubr.bf16.mxu1 %v828_v30  ;;  %1013 = vmatprep.mubr.bf16.mxu0 %v812_v31  ;;  %v2590_v30 = vld [vmem:[%s2526_s30 + $0xd8] sm:$0xff]  ;;  %v2593_v31 = vld [vmem:[%s2526_s30 + $0x60] sm:$0xff] }
  0xef   : > { %1078 = vmatmul.mubr.bf16.gmra.mrb[28].mxu1 %v796_v46  ;;  %1014 = vmatmul.mubr.bf16.gmra.mrb[28].mxu0 %v780_v47 }
 0x18a   : > { %v1942_v48 = vpop.f32.mrb[0].mxu1  ;;  %v1894_v49 = vpop.f32.mrb[0].mxu0 }
 0x18b   : > { %v1943_v50 = vpop.f32.mrb[1].mxu1  ;;  %v1895_v51 = vpop.f32.mrb[1].mxu0 }
 0x18c   : > { %v1944_v52 = vadd.f32 %v1943_v50, %v1942_v48  ;;  %v1945_v53 = vpop.f32.mrb[2].mxu1  ;;  %v1896_v54 = vadd.f32 %v1895_v51, %v1894_v49  ;;  %v1897_v55 = vpop.f32.mrb[2].mxu0 }
 0x18d   : > { %v1946_v56 = vpop.f32.mrb[3].mxu1  ;;  %v1898_v57 = vpop.f32.mrb[3].mxu0 }
 0x18e   : > { %2127 = vtanh.f32 %v1944_v52  ;;  %v1947_v58 = vadd.f32 %v1946_v56, %v1945_v53  ;;  %v1899_v59 = vadd.f32 %v1898_v57, %v1897_v55 }
 0x18f   : > { %2129 = vtanh.f32 %v1896_v54 }
 0x190   : > { %2131 = vtanh.f32 %v1947_v58 }
 0x191   : > { %2133 = vtanh.f32 %v1899_v59 }
 0x192   : > { %v1948_v60 = vpop.f32.mrb[4].mxu1  ;;  %v1900_v61 = vpop.f32.mrb[4].mxu0 }
 0x193   : > { %v1949_v62 = vpop.f32.mrb[5].mxu1  ;;  %v1901_v63 = vpop.f32.mrb[5].mxu0 }
 0x194   : > { %v1950_v0 = vadd.f32 %v1949_v62, %v1948_v60  ;;  %v1951_v1 = vpop.f32.mrb[6].mxu1  ;;  %v1902_v4 = vadd.f32 %v1901_v63, %v1900_v61  ;;  %v1903_v5 = vpop.f32.mrb[6].mxu0 }
 0x195   : > { %v1952_v6 = vpop.f32.mrb[7].mxu1  ;;  %v1904_v11 = vpop.f32.mrb[7].mxu0 }
 0x196   : > { %2135 = vtanh.f32 %v1950_v0  ;;  %v1953_v13 = vadd.f32 %v1952_v6, %v1951_v1  ;;  %v1905_v33 = vadd.f32 %v1904_v11, %v1903_v5 }
 0x197   : > { %2137 = vtanh.f32 %v1902_v4 }
 0x198   : > { %v2128_v37 = vpop.eup %2127  ;;  %2139 = vtanh.f32 %v1953_v13 }
 0x199   : > { %v2130_v41 = vpop.eup %2129  ;;  %v1425_v42 = vadd.f32 %v2128_v37, %v1393_v3  ;;  %2141 = vtanh.f32 %v1905_v33 }
 0x19a   : > { %v2132_v43 = vpop.eup %2131  ;;  %v1409_v44 = vadd.f32 %v2130_v41, %v1377_v2  ;;  %v1954_v45 = vpop.f32.mrb[8].mxu1 }
 0x19b   : > { %v2134_v46 = vpop.eup %2133  ;;  %v1826_v47 = vpack.c.bf16 %v2132_v43, %v2128_v37  ;;  %v1426_v48 = vadd.f32 %v2132_v43, %v1394_v8  ;;  %v1906_v49 = vpop.f32.mrb[8].mxu0  ;;  %1457 = vst [vmem:[%s2613_s8 + $0x80] sm:$0xff] %v1425_v42 }
 0x19c   : > { %v1955_v50 = vpop.f32.mrb[9].mxu1  ;;  %v1786_v51 = vpack.c.bf16 %v2134_v46, %v2130_v41  ;;  %v1410_v52 = vadd.f32 %v2134_v46, %v1378_v7  ;;  %v1907_v53 = vpop.f32.mrb[9].mxu0  ;;  %1441 = vst [vmem:[%s2613_s8] sm:$0xff] %v1409_v44 }
 0x19d   : > { %v1956_v54 = vadd.f32 %v1955_v50, %v1954_v45  ;;  %v1957_v55 = vpop.f32.mrb[10].mxu1  ;;  %1870 = vst [vmem:[%s2628_s9 + $0x40] sm:$0xff] %v1826_v47   ;;  %v1908_v56 = vadd.f32 %v1907_v53, %v1906_v49  ;;  %v1909_v57 = vpop.f32.mrb[10].mxu0  ;;  %1458 = vst [vmem:[%s2613_s8 + $0x88] sm:$0xff] %v1426_v48 }
 0x19e   : > { %v1958_v58 = vpop.f32.mrb[11].mxu1  ;;  %1787 = vst [vmem:[%s2628_s9] sm:$0xff] %v1786_v51   ;;  %v1910_v59 = vpop.f32.mrb[11].mxu0  ;;  %1442 = vst [vmem:[%s2613_s8 + $0x8] sm:$0xff] %v1410_v52 }
 0x19f   : > { %2143 = vtanh.f32 %v1956_v54  ;;  %v1959_v60 = vadd.f32 %v1958_v58, %v1957_v55  ;;  %v1911_v61 = vadd.f32 %v1910_v59, %v1909_v57 }
 0x1a0   : > { %2145 = vtanh.f32 %v1908_v56  ;;  %v2136_v62 = vpop.eup %2135 }
 0x1a1   : > { %2147 = vtanh.f32 %v1959_v60  ;;  %v2138_v63 = vpop.eup %2137  ;;  %v1427_v0 = vadd.f32 %v2136_v62, %v2536_v10 }
 0x1a2   : > { %2149 = vtanh.f32 %v1911_v61  ;;  %v2140_v1 = vpop.eup %2139  ;;  %v1411_v2 = vadd.f32 %v2138_v63, %v2533_v9  ;;  %v1960_v3 = vpop.f32.mrb[12].mxu1 }
 0x1a3   : > { %v2142_v4 = vpop.eup %2141  ;;  %v1831_v5 = vpack.c.bf16 %v2140_v1, %v2136_v62  ;;  %v1428_v6 = vadd.f32 %v2140_v1, %v2542_v14  ;;  %v1912_v7 = vpop.f32.mrb[12].mxu0  ;;  %1459 = vst [vmem:[%s2613_s8 + $0x90] sm:$0xff] %v1427_v0 }
 0x1a4   : > { %v1961_v8 = vpop.f32.mrb[13].mxu1  ;;  %v1791_v11 = vpack.c.bf16 %v2142_v4, %v2138_v63  ;;  %v1412_v10 = vadd.f32 %v2142_v4, %v2539_v12  ;;  %v1913_v13 = vpop.f32.mrb[13].mxu0  ;;  %1443 = vst [vmem:[%s2613_s8 + $0x10] sm:$0xff] %v1411_v2 }
 0x1a5   : > { %v1962_v33 = vadd.f32 %v1961_v8, %v1960_v3  ;;  %v1963_v37 = vpop.f32.mrb[14].mxu1  ;;  %1871 = vst [vmem:[%s2628_s9 + $0x48] sm:$0xff] %v1831_v5   ;;  %v1914_v9 = vadd.f32 %v1913_v13, %v1912_v7  ;;  %v1915_v41 = vpop.f32.mrb[14].mxu0  ;;  %1460 = vst [vmem:[%s2613_s8 + $0x98] sm:$0xff] %v1428_v6 }
 0x1a6   : > { %v1964_v42 = vpop.f32.mrb[15].mxu1  ;;  %1863 = vst [vmem:[%s2628_s9 + $0x8] sm:$0xff] %v1791_v11   ;;  %v1916_v43 = vpop.f32.mrb[15].mxu0  ;;  %1444 = vst [vmem:[%s2613_s8 + $0x18] sm:$0xff] %v1412_v10 }
 0x1a7   : > { %2151 = vtanh.f32 %v1962_v33  ;;  %v1965_v14 = vadd.f32 %v1964_v42, %v1963_v37  ;;  %v1917_v44 = vadd.f32 %v1916_v43, %v1915_v41 }
 0x1a8   : > { %2153 = vtanh.f32 %v1914_v9 }
 0x1a9   : > { %v2144_v45 = vpop.eup %2143  ;;  %2155 = vtanh.f32 %v1965_v14 }
 0x1aa   : > { %v2146_v12 = vpop.eup %2145  ;;  %v1429_v46 = vadd.f32 %v2144_v45, %v2548_v16  ;;  %2157 = vtanh.f32 %v1917_v44  ;;  %v1966_v49 = vpop.f32.mrb[16].mxu1 }
 0x1ab   : > { %v2148_v47 = vpop.eup %2147  ;;  %v1413_v48 = vadd.f32 %v2146_v12, %v2545_v15  ;;  %v1918_v53 = vpop.f32.mrb[16].mxu0 }
 0x1ac   : > { %v2150_v50 = vpop.eup %2149  ;;  %v1836_v51 = vpack.c.bf16 %v2148_v47, %v2144_v45  ;;  %v1430_v52 = vadd.f32 %v2148_v47, %v2554_v18  ;;  %v1967_v54 = vpop.f32.mrb[17].mxu1  ;;  %1461 = vst [vmem:[%s2613_s8 + $0xa0] sm:$0xff] %v1429_v46 }
 0x1ad   : > { %v1796_v55 = vpack.c.bf16 %v2150_v50, %v2146_v12  ;;  %v1414_v16 = vadd.f32 %v2150_v50, %v2551_v17  ;;  %v1919_v56 = vpop.f32.mrb[17].mxu0  ;;  %v1968_v57 = vadd.f32 %v1967_v54, %v1966_v49  ;;  %v1969_v58 = vpop.f32.mrb[18].mxu1  ;;  %1445 = vst [vmem:[%s2613_s8 + $0x20] sm:$0xff] %v1413_v48 }
 0x1ae   : > { %1872 = vst [vmem:[%s2628_s9 + $0x50] sm:$0xff] %v1836_v51   ;;  %v1920_v15 = vadd.f32 %v1919_v56, %v1918_v53  ;;  %v1921_v59 = vpop.f32.mrb[18].mxu0  ;;  %v1970_v60 = vpop.f32.mrb[19].mxu1  ;;  %1462 = vst [vmem:[%s2613_s8 + $0xa8] sm:$0xff] %v1430_v52 }
 0x1af   : > { %1864 = vst [vmem:[%s2628_s9 + $0x10] sm:$0xff] %v1796_v55   ;;  %2159 = vtanh.f32 %v1968_v57  ;;  %v1922_v61 = vpop.f32.mrb[19].mxu0  ;;  %v1971_v18 = vadd.f32 %v1970_v60, %v1969_v58  ;;  %1446 = vst [vmem:[%s2613_s8 + $0x28] sm:$0xff] %v1414_v16 }
 0x1b0   : > { %2161 = vtanh.f32 %v1920_v15  ;;  %v1923_v62 = vadd.f32 %v1922_v61, %v1921_v59 }
 0x1b1   : > { %v2152_v63 = vpop.eup %2151  ;;  %2163 = vtanh.f32 %v1971_v18 }
 0x1b2   : > { %v2154_v17 = vpop.eup %2153  ;;  %v1431_v0 = vadd.f32 %v2152_v63, %v2560_v20  ;;  %2165 = vtanh.f32 %v1923_v62  ;;  %v1972_v3 = vpop.f32.mrb[20].mxu1 }
 0x1b3   : > { %v2156_v1 = vpop.eup %2155  ;;  %v1415_v2 = vadd.f32 %v2154_v17, %v2557_v19  ;;  %v1924_v7 = vpop.f32.mrb[20].mxu0 }
 0x1b4   : > { %v2158_v4 = vpop.eup %2157  ;;  %v1841_v5 = vpack.c.bf16 %v2156_v1, %v2152_v63  ;;  %v1432_v6 = vadd.f32 %v2156_v1, %v2566_v22  ;;  %v1973_v8 = vpop.f32.mrb[21].mxu1  ;;  %1463 = vst [vmem:[%s2613_s8 + $0xb0] sm:$0xff] %v1431_v0 }
 0x1b5   : > { %v1801_v11 = vpack.c.bf16 %v2158_v4, %v2154_v17  ;;  %v1416_v20 = vadd.f32 %v2158_v4, %v2563_v21  ;;  %v1925_v10 = vpop.f32.mrb[21].mxu0  ;;  %v1974_v13 = vadd.f32 %v1973_v8, %v1972_v3  ;;  %v1975_v33 = vpop.f32.mrb[22].mxu1  ;;  %1447 = vst [vmem:[%s2613_s8 + $0x30] sm:$0xff] %v1415_v2 }
 0x1b6   : > { %1873 = vst [vmem:[%s2628_s9 + $0x58] sm:$0xff] %v1841_v5   ;;  %v1926_v19 = vadd.f32 %v1925_v10, %v1924_v7  ;;  %v1927_v37 = vpop.f32.mrb[22].mxu0  ;;  %v1976_v9 = vpop.f32.mrb[23].mxu1  ;;  %1464 = vst [vmem:[%s2613_s8 + $0xb8] sm:$0xff] %v1432_v6 }
 0x1b7   : > { %1865 = vst [vmem:[%s2628_s9 + $0x18] sm:$0xff] %v1801_v11   ;;  %2167 = vtanh.f32 %v1974_v13  ;;  %v1928_v41 = vpop.f32.mrb[23].mxu0  ;;  %v1977_v22 = vadd.f32 %v1976_v9, %v1975_v33  ;;  %1448 = vst [vmem:[%s2613_s8 + $0x38] sm:$0xff] %v1416_v20 }
 0x1b8   : > { %2169 = vtanh.f32 %v1926_v19  ;;  %v1929_v42 = vadd.f32 %v1928_v41, %v1927_v37 }
 0x1b9   : > { %v2160_v43 = vpop.eup %2159  ;;  %2171 = vtanh.f32 %v1977_v22 }
 0x1ba   : > { %v2162_v21 = vpop.eup %2161  ;;  %v1433_v14 = vadd.f32 %v2160_v43, %v2572_v24  ;;  %2173 = vtanh.f32 %v1929_v42  ;;  %v1978_v12 = vpop.f32.mrb[24].mxu1 }
 0x1bb   : > { %v2164_v44 = vpop.eup %2163  ;;  %v1417_v45 = vadd.f32 %v2162_v21, %v2569_v23  ;;  %v1930_v49 = vpop.f32.mrb[24].mxu0 }
 0x1bc   : > { %v2166_v46 = vpop.eup %2165  ;;  %v1846_v47 = vpack.c.bf16 %v2164_v44, %v2160_v43  ;;  %v1434_v48 = vadd.f32 %v2164_v44, %v2578_v26  ;;  %v1979_v50 = vpop.f32.mrb[25].mxu1  ;;  %1465 = vst [vmem:[%s2613_s8 + $0xc0] sm:$0xff] %v1433_v14 }
 0x1bd   : > { %v1806_v51 = vpack.c.bf16 %v2166_v46, %v2162_v21  ;;  %v1418_v24 = vadd.f32 %v2166_v46, %v2575_v25  ;;  %v1931_v52 = vpop.f32.mrb[25].mxu0  ;;  %v1980_v53 = vadd.f32 %v1979_v50, %v1978_v12  ;;  %v1981_v54 = vpop.f32.mrb[26].mxu1  ;;  %1449 = vst [vmem:[%s2613_s8 + $0x40] sm:$0xff] %v1417_v45 }
 0x1be   : > { %1874 = vst [vmem:[%s2628_s9 + $0x60] sm:$0xff] %v1846_v47   ;;  %v1932_v23 = vadd.f32 %v1931_v52, %v1930_v49  ;;  %v1933_v55 = vpop.f32.mrb[26].mxu0  ;;  %v1982_v16 = vpop.f32.mrb[27].mxu1  ;;  %1466 = vst [vmem:[%s2613_s8 + $0xc8] sm:$0xff] %v1434_v48 }
 0x1bf   : > { %1866 = vst [vmem:[%s2628_s9 + $0x20] sm:$0xff] %v1806_v51   ;;  %2175 = vtanh.f32 %v1980_v53  ;;  %v1934_v56 = vpop.f32.mrb[27].mxu0  ;;  %v1983_v26 = vadd.f32 %v1982_v16, %v1981_v54  ;;  %1450 = vst [vmem:[%s2613_s8 + $0x48] sm:$0xff] %v1418_v24 }
 0x1c0   : > { %2177 = vtanh.f32 %v1932_v23  ;;  %v1935_v57 = vadd.f32 %v1934_v56, %v1933_v55 }
 0x1c1   : > { %v2168_v58 = vpop.eup %2167  ;;  %2179 = vtanh.f32 %v1983_v26 }
 0x1c2   : > { %v2170_v25 = vpop.eup %2169  ;;  %v1435_v15 = vadd.f32 %v2168_v58, %v2584_v28  ;;  %2181 = vtanh.f32 %v1935_v57  ;;  %v1984_v61 = vpop.f32.mrb[28].mxu1 }
 0x1c3   : > { %v2172_v59 = vpop.eup %2171  ;;  %v1419_v60 = vadd.f32 %v2170_v25, %v2581_v27  ;;  %v1936_v17 = vpop.f32.mrb[28].mxu0 }
 0x1c4   : > { %v2174_v18 = vpop.eup %2173  ;;  %v1851_v62 = vpack.c.bf16 %v2172_v59, %v2168_v58  ;;  %v1436_v63 = vadd.f32 %v2172_v59, %v2590_v30  ;;  %v1985_v0 = vpop.f32.mrb[29].mxu1  ;;  %1467 = vst [vmem:[%s2613_s8 + $0xd0] sm:$0xff] %v1435_v15 }
 0x1c5   : > { %v1811_v1 = vpack.c.bf16 %v2174_v18, %v2170_v25  ;;  %v1420_v28 = vadd.f32 %v2174_v18, %v2587_v29  ;;  %v1937_v2 = vpop.f32.mrb[29].mxu0  ;;  %v1986_v3 = vadd.f32 %v1985_v0, %v1984_v61  ;;  %v1987_v4 = vpop.f32.mrb[30].mxu1  ;;  %1451 = vst [vmem:[%s2613_s8 + $0x50] sm:$0xff] %v1419_v60 }
 0x1c6   : > { %1875 = vst [vmem:[%s2628_s9 + $0x68] sm:$0xff] %v1851_v62   ;;  %v1938_v27 = vadd.f32 %v1937_v2, %v1936_v17  ;;  %v1939_v5 = vpop.f32.mrb[30].mxu0  ;;  %v1988_v6 = vpop.f32.mrb[31].mxu1  ;;  %1468 = vst [vmem:[%s2613_s8 + $0xd8] sm:$0xff] %v1436_v63 }
 0x1c7   : > { %1867 = vst [vmem:[%s2628_s9 + $0x28] sm:$0xff] %v1811_v1   ;;  %2183 = vtanh.f32 %v1986_v3  ;;  %v1940_v30 = vpop.f32.mrb[31].mxu0  ;;  %v1989_v7 = vadd.f32 %v1988_v6, %v1987_v4  ;;  %1452 = vst [vmem:[%s2613_s8 + $0x58] sm:$0xff] %v1420_v28 }
 0x1c8   : > { %2185 = vtanh.f32 %v1938_v27  ;;  %v1941_v8 = vadd.f32 %v1940_v30, %v1939_v5 }
 0x1c9   : > { %v2176_v29 = vpop.eup %2175  ;;  %2187 = vtanh.f32 %v1989_v7 }
 0x1ca   : > { %v2178_v11 = vpop.eup %2177  ;;  %v1437_v20 = vadd.f32 %v2176_v29, %v2596_v32  ;;  %2189 = vtanh.f32 %v1941_v8 }
 0x1cb   : > { %v2180_v10 = vpop.eup %2179  ;;  %v1421_v13 = vadd.f32 %v2178_v11, %v2593_v31 }
 0x1cc   : > { %v2182_v33 = vpop.eup %2181  ;;  %v1856_v19 = vpack.c.bf16 %v2180_v10, %v2176_v29  ;;  %v1438_v37 = vadd.f32 %v2180_v10, %v2603_v35  ;;  %1469 = vst [vmem:[%s2613_s8 + $0xe0] sm:$0xff] %v1437_v20 }
 0x1cd   : > { %v1816_v9 = vpack.c.bf16 %v2182_v33, %v2178_v11  ;;  %v1422_v41 = vadd.f32 %v2182_v33, %v2600_v34  ;;  %1453 = vst [vmem:[%s2613_s8 + $0x60] sm:$0xff] %v1421_v13 }
 0x1ce   : > { %1876 = vst [vmem:[%s2628_s9 + $0x70] sm:$0xff] %v1856_v19   ;;  %1470 = vst [vmem:[%s2613_s8 + $0xe8] sm:$0xff] %v1438_v37 }
 0x1cf   : > { %1868 = vst [vmem:[%s2628_s9 + $0x30] sm:$0xff] %v1816_v9   ;;  %1454 = vst [vmem:[%s2613_s8 + $0x68] sm:$0xff] %v1422_v41 }
 0x1d1   : > { %v2184_v32 = vpop.eup %2183 }
 0x1d2   : > { %v2186_v31 = vpop.eup %2185  ;;  %v1439_v35 = vadd.f32 %v2184_v32, %v2616_v38 }
 0x1d3   : > { %v2188_v22 = vpop.eup %2187  ;;  %v1423_v34 = vadd.f32 %v2186_v31, %v2606_v36 }
 0x1d4   : > { %v2190_v42 = vpop.eup %2189  ;;  %v1861_v43 = vpack.c.bf16 %v2188_v22, %v2184_v32  ;;  %v1440_v21 = vadd.f32 %v2188_v22, %v2622_v40  ;;  %1471 = vst [vmem:[%s2613_s8 + $0xf0] sm:$0xff] %v1439_v35 }
 0x1d5   : > { %v1821_v38 = vpack.c.bf16 %v2190_v42, %v2186_v31  ;;  %v1424_v14 = vadd.f32 %v2190_v42, %v2619_v39  ;;  %1455 = vst [vmem:[%s2613_s8 + $0x70] sm:$0xff] %v1423_v34 }
 0x1d6   : > { %1877 = vst [vmem:[%s2628_s9 + $0x78] sm:$0xff] %v1861_v43   ;;  %1472 = vst [vmem:[%s2613_s8 + $0xf8] sm:$0xff] %v1440_v21 }
 0x1d7   : > { %1869 = vst [vmem:[%s2628_s9 + $0x38] sm:$0xff] %v1821_v38   ;;  %1456 = vst [vmem:[%s2613_s8 + $0x78] sm:$0xff] %v1424_v14 }
 0x1d8   : > { %2204 = shalt.err (!%p2201_p8)
}
 0x1d9   : > { %s2205_s30 = scalar_lea.hbm %s2703_s18, 2048  ;;  %s2209_s7 = scalar_lea.hbm %s2763_s3, 4096 }
 0x1da   : > { %p2206_p11 = scmp.ne.s32.totalorder %s2703_s18, %s2205_s30  ;;  %p2210_p0 = scmp.lt.u32.totalorder %s2703_s18, %s2763_s3 }
 0x1db   : > { %p2211_p1 = scmp.lt.u32.totalorder %s2209_s7, %s2205_s30  ;;  %p2213_p3 = scmp.lt.u32.totalorder %s2205_s30, %s2703_s18 }
 0x1dc   : > { %p2207_p12 = pnand %p2206_p11, %p2338_p5 }
 0x1dd   : > { %p2212_p2 = por %p2211_p1, %p2210_p0 }
 0x1de   : > { %p2208_p13 = pneg %p2207_p12 }
 0x1df   : > { %p2214_p4 = por %p2213_p3, %p2212_p2 }
 0x1e1   : > { %p2215_p6 = pnand %p2214_p4, %p2208_p13 }
 0x1e3   : > { %2218 = shalt.err (!%p2215_p6)
}
 0x1e4   : > { %s2272_s11 = smov 64   ;;  %s2273_s13 = smov 4  }
 0x1e5   : > { %2006 = dma.vmem_to_hbm [thread:$0]  (%p2338_p5), %s2705_s12, 2048, %s2703_s18, %s1474_s21, %s2272_s11, %s2272_s11, %s2273_s13  }
 0x1e6 PF: > { %s1515_s14 = sand.u32 1, %s2249_s15   ;;  %p2009_p7 = pnand %p1653_p10, %p2349_p9 }
 0x1e7   : > { %s1516_s26 = scalar_lea.sflag [#allocation5], %s1515_s14 }
 0x1e8   : > { %2244 = dma.done.wait (!%p2009_p7), %s1516_s26, 2048  }
 0x1e9   : > { %2246 = vsyncadd (!%p2009_p7), %s1516_s26, 4294965248  ;;  %s18_s20 = sadd.s32 1, %s2269_s20   ;;  %s2767_s15 = smov %s2253_s16 }
 0x1ea   : > { %p15_p8 = scmp.ge.s32.totalorder %s18_s20, 4   ;;  %s2768_s16 = smov %s2257_s17 }
 0x1eb   : > { %s2769_s17 = smov %s2347_s27  ;;  %s2770_s18 = smov %s2265_s19 }
 0x1ec   : > { %s2771_s19 = smov %s2773_s23  ;;  %17 = sbr.rel (!%p15_p8) target bundleno = 4 (0x4), region = 136 }
 0x1f3   :  { %1532 = vsyncpa [#allocation5], 1 }
 0x1f4   :  { %1534 = vsyncpa [#allocation5 + $0x1], 1 }

// kernel: egcf_forward.5
= control target key start
LH: loop header
LB: loop body
LE: loop exit
PB: predicated region body
PF: predicated region fallthrough
CT: control target
= control target key end

     0   :  { %s2666_s1 = inlined_call_operand.vmem [shape: bf16[512,128], index: 1, kind: input, shape index: {}]   ;;  %s2667_s0 = inlined_call_operand.vmem [shape: bf16[256,512], index: 0, kind: input, shape index: {}]   ;;  %s2668_s2 = inlined_call_operand.vmem [shape: f32[256,128], index: 2, kind: input, shape index: {}, may-alias: {2,4}]   ;;  %s2669_s4 = inlined_call_operand.vmem [shape: f32[256,128], index: 4, kind: output, shape index: {1}, may-alias: {2,4}]   ;;  %s2670_s3 = inlined_call_operand.vmem [shape: bf16[256,128], index: 3, kind: output, shape index: {0}]  }
   0x1   :  { %v1921_v0 = vld [vmem:[%s2666_s1 + $0x40] sm:$0xff]   ;;  %v1925_v4 = vld [vmem:[%s2666_s1 + $0x48] sm:$0xff]   ;;  %v1929_v8 = vld [vmem:[%s2666_s1 + $0x50] sm:$0xff]  }
   0x2   :  { %v1922_v1 = vld [vmem:[%s2666_s1 + $0xc0] sm:$0xff]   ;;  %1697 = vmatprep.subr.bf16.mxu0 %v1921_v0  ;;  %v1926_v5 = vld [vmem:[%s2666_s1 + $0xc8] sm:$0xff]   ;;  %v1930_v9 = vld [vmem:[%s2666_s1 + $0xd0] sm:$0xff]  }
   0x3   :  { %v1923_v2 = vld [vmem:[%s2666_s1] sm:$0xff]   ;;  %1809 = vmatprep.subr.bf16.mxu1 %v1922_v1  ;;  %v1927_v6 = vld [vmem:[%s2666_s1 + $0x8] sm:$0xff]   ;;  %v1931_v10 = vld [vmem:[%s2666_s1 + $0x10] sm:$0xff]  }
   0x4   :  { %v1924_v3 = vld [vmem:[%s2666_s1 + $0x80] sm:$0xff]   ;;  %1698 = vmatpush3.bf16.msra.mxu0 %v1923_v2  ;;  %v1928_v7 = vld [vmem:[%s2666_s1 + $0x88] sm:$0xff]   ;;  %v1932_v11 = vld [vmem:[%s2666_s1 + $0x90] sm:$0xff]  }
   0x5   :  { %1810 = vmatpush3.bf16.msra.mxu1 %v1924_v3  ;;  %1699 = vmatprep.subr.bf16.mxu0 %v1925_v4  ;;  %v1933_v12 = vld [vmem:[%s2666_s1 + $0x58] sm:$0xff]   ;;  %v1937_v16 = vld [vmem:[%s2666_s1 + $0x60] sm:$0xff]   ;;  %v1941_v20 = vld [vmem:[%s2666_s1 + $0x68] sm:$0xff]  }
   0x6   :  { %1811 = vmatprep.subr.bf16.mxu1 %v1926_v5  ;;  %v1934_v13 = vld [vmem:[%s2666_s1 + $0xd8] sm:$0xff]   ;;  %v1938_v17 = vld [vmem:[%s2666_s1 + $0xe0] sm:$0xff]   ;;  %v1942_v21 = vld [vmem:[%s2666_s1 + $0xe8] sm:$0xff]  }
   0x7   :  { %v1935_v14 = vld [vmem:[%s2666_s1 + $0x18] sm:$0xff]   ;;  %v1939_v18 = vld [vmem:[%s2666_s1 + $0x20] sm:$0xff]   ;;  %v1943_v22 = vld [vmem:[%s2666_s1 + $0x28] sm:$0xff]  }
   0x8   :  { %1700 = vmatpush3.bf16.msra.mxu0 %v1927_v6  ;;  %v1936_v15 = vld [vmem:[%s2666_s1 + $0x98] sm:$0xff]   ;;  %v1940_v19 = vld [vmem:[%s2666_s1 + $0xa0] sm:$0xff]   ;;  %v1944_v23 = vld [vmem:[%s2666_s1 + $0xa8] sm:$0xff]  }
   0x9   :  { %1812 = vmatpush3.bf16.msra.mxu1 %v1928_v7  ;;  %1701 = vmatprep.subr.bf16.mxu0 %v1929_v8  ;;  %v1945_v24 = vld [vmem:[%s2666_s1 + $0x70] sm:$0xff]   ;;  %v1949_v28 = vld [vmem:[%s2666_s1 + $0x78] sm:$0xff]  }
   0xa   :  { %1813 = vmatprep.subr.bf16.mxu1 %v1930_v9  ;;  %v1946_v25 = vld [vmem:[%s2666_s1 + $0xf0] sm:$0xff]   ;;  %v1950_v29 = vld [vmem:[%s2666_s1 + $0xf8] sm:$0xff]  }
   0xb   :  { %v1947_v26 = vld [vmem:[%s2666_s1 + $0x30] sm:$0xff]   ;;  %v1951_v30 = vld [vmem:[%s2666_s1 + $0x38] sm:$0xff]  }
   0xc   :  { %1702 = vmatpush3.bf16.msra.mxu0 %v1931_v10  ;;  %v1948_v27 = vld [vmem:[%s2666_s1 + $0xb0] sm:$0xff]   ;;  %v1952_v31 = vld [vmem:[%s2666_s1 + $0xb8] sm:$0xff]  }
   0xd   :  { %1814 = vmatpush3.bf16.msra.mxu1 %v1932_v11  ;;  %1703 = vmatprep.subr.bf16.mxu0 %v1933_v12  ;;  %v1953_v32 = vld [vmem:[%s2667_s0] ss:$16 sps:$4 sm:$0xff]   ;;  %v1955_v33 = vld [vmem:[%s2667_s0 + $0x4] ss:$16 sps:$4 sm:$0xff]   ;;  %v1956_v34 = vld [vmem:[%s2667_s0 + $0x8] ss:$16 sps:$4 sm:$0xff]  }
   0xe   :  { %1815 = vmatprep.subr.bf16.mxu1 %v1934_v13  ;;  %v1958_v35 = vld [vmem:[%s2667_s0 + $0xc] ss:$16 sps:$4 sm:$0xff]   ;;  %757 = vmatprep.mubr.bf16.mxu0 %v1955_v33  ;;  %v1959_v36 = vld [vmem:[%s2667_s0 + $0x24] ss:$16 sps:$4 sm:$0xff]   ;;  %v1963_v38 = vld [vmem:[%s2667_s0 + $0x20] ss:$16 sps:$4 sm:$0xff]  }
   0xf   :  { %918 = vmatprep.mubr.bf16.mxu1 %v1958_v35  ;;  %v1961_v37 = vld [vmem:[%s2667_s0 + $0x2c] ss:$16 sps:$4 sm:$0xff]   ;;  %v1964_v39 = vld [vmem:[%s2667_s0 + $0x28] ss:$16 sps:$4 sm:$0xff]   ;;  %v1965_v40 = vld [vmem:[%s2667_s0 + $0x44] ss:$16 sps:$4 sm:$0xff]  }
  0x10   :  { %1704 = vmatpush3.bf16.msra.mxu0 %v1935_v14  ;;  %v1967_v41 = vld [vmem:[%s2667_s0 + $0x4c] ss:$16 sps:$4 sm:$0xff]   ;;  %v1969_v42 = vld [vmem:[%s2667_s0 + $0x40] ss:$16 sps:$4 sm:$0xff]   ;;  %v1970_v43 = vld [vmem:[%s2667_s0 + $0x48] ss:$16 sps:$4 sm:$0xff]  }
  0x11   :  { %1816 = vmatpush3.bf16.msra.mxu1 %v1936_v15  ;;  %1705 = vmatprep.subr.bf16.mxu0 %v1937_v16  ;;  %v1971_v44 = vld [vmem:[%s2667_s0 + $0x64] ss:$16 sps:$4 sm:$0xff]   ;;  %v1973_v45 = vld [vmem:[%s2667_s0 + $0x6c] ss:$16 sps:$4 sm:$0xff]   ;;  %v1975_v46 = vld [vmem:[%s2667_s0 + $0x60] ss:$16 sps:$4 sm:$0xff]  }
  0x12   :  { %1817 = vmatprep.subr.bf16.mxu1 %v1938_v17  ;;  %v1976_v47 = vld [vmem:[%s2667_s0 + $0x68] ss:$16 sps:$4 sm:$0xff]   ;;  %v1977_v48 = vld [vmem:[%s2667_s0 + $0x84] ss:$16 sps:$4 sm:$0xff]   ;;  %v1979_v49 = vld [vmem:[%s2667_s0 + $0x8c] ss:$16 sps:$4 sm:$0xff]  }
  0x13   :  { %v1981_v50 = vld [vmem:[%s2667_s0 + $0x80] ss:$16 sps:$4 sm:$0xff]   ;;  %v1982_v51 = vld [vmem:[%s2667_s0 + $0x88] ss:$16 sps:$4 sm:$0xff]   ;;  %v1983_v52 = vld [vmem:[%s2667_s0 + $0xa4] ss:$16 sps:$4 sm:$0xff]  }
  0x14   :  { %1706 = vmatpush3.bf16.msra.mxu0 %v1939_v18  ;;  %v1985_v53 = vld [vmem:[%s2667_s0 + $0xac] ss:$16 sps:$4 sm:$0xff]   ;;  %v1987_v54 = vld [vmem:[%s2667_s0 + $0xa0] ss:$16 sps:$4 sm:$0xff]   ;;  %v1988_v55 = vld [vmem:[%s2667_s0 + $0xa8] ss:$16 sps:$4 sm:$0xff]  }
  0x15   :  { %1818 = vmatpush3.bf16.msra.mxu1 %v1940_v19  ;;  %1707 = vmatprep.subr.bf16.mxu0 %v1941_v20  ;;  %v1989_v56 = vld [vmem:[%s2667_s0 + $0xc4] ss:$16 sps:$4 sm:$0xff]   ;;  %v1991_v57 = vld [vmem:[%s2667_s0 + $0xcc] ss:$16 sps:$4 sm:$0xff]   ;;  %v1993_v58 = vld [vmem:[%s2667_s0 + $0xc0] ss:$16 sps:$4 sm:$0xff]  }
  0x16   :  { %1819 = vmatprep.subr.bf16.mxu1 %v1942_v21  ;;  %v1994_v59 = vld [vmem:[%s2667_s0 + $0xc8] ss:$16 sps:$4 sm:$0xff]   ;;  %v1995_v60 = vld [vmem:[%s2667_s0 + $0xe4] ss:$16 sps:$4 sm:$0xff]   ;;  %v1997_v61 = vld [vmem:[%s2667_s0 + $0xec] ss:$16 sps:$4 sm:$0xff]  }
  0x17   :  { %v1999_v62 = vld [vmem:[%s2667_s0 + $0xe0] ss:$16 sps:$4 sm:$0xff]   ;;  %v2000_v63 = vld [vmem:[%s2667_s0 + $0xe8] ss:$16 sps:$4 sm:$0xff]   ;;  %v2001_v0 = vld [vmem:[%s2667_s0 + $0x104] ss:$16 sps:$4 sm:$0xff]  }
  0x18   :  { %1708 = vmatpush3.bf16.msra.mxu0 %v1943_v22  ;;  %v2003_v1 = vld [vmem:[%s2667_s0 + $0x10c] ss:$16 sps:$4 sm:$0xff]   ;;  %v2005_v2 = vld [vmem:[%s2667_s0 + $0x100] ss:$16 sps:$4 sm:$0xff]   ;;  %v2006_v3 = vld [vmem:[%s2667_s0 + $0x108] ss:$16 sps:$4 sm:$0xff]  }
  0x19   :  { %1820 = vmatpush3.bf16.msra.mxu1 %v1944_v23  ;;  %1709 = vmatprep.subr.bf16.mxu0 %v1945_v24  ;;  %v2007_v4 = vld [vmem:[%s2667_s0 + $0x124] ss:$16 sps:$4 sm:$0xff]   ;;  %v2009_v5 = vld [vmem:[%s2667_s0 + $0x12c] ss:$16 sps:$4 sm:$0xff]   ;;  %v2011_v6 = vld [vmem:[%s2667_s0 + $0x120] ss:$16 sps:$4 sm:$0xff]  }
  0x1a   :  { %1821 = vmatprep.subr.bf16.mxu1 %v1946_v25  ;;  %v2012_v7 = vld [vmem:[%s2667_s0 + $0x128] ss:$16 sps:$4 sm:$0xff]   ;;  %v2013_v8 = vld [vmem:[%s2667_s0 + $0x144] ss:$16 sps:$4 sm:$0xff]   ;;  %v2015_v9 = vld [vmem:[%s2667_s0 + $0x14c] ss:$16 sps:$4 sm:$0xff]  }
  0x1b   :  { %v2017_v10 = vld [vmem:[%s2667_s0 + $0x140] ss:$16 sps:$4 sm:$0xff]   ;;  %v2018_v11 = vld [vmem:[%s2667_s0 + $0x148] ss:$16 sps:$4 sm:$0xff]   ;;  %v2019_v12 = vld [vmem:[%s2667_s0 + $0x164] ss:$16 sps:$4 sm:$0xff]  }
  0x1c   :  { %1710 = vmatpush3.bf16.msra.mxu0 %v1947_v26  ;;  %v2021_v13 = vld [vmem:[%s2667_s0 + $0x16c] ss:$16 sps:$4 sm:$0xff]   ;;  %v2023_v14 = vld [vmem:[%s2667_s0 + $0x160] ss:$16 sps:$4 sm:$0xff]   ;;  %v2024_v15 = vld [vmem:[%s2667_s0 + $0x168] ss:$16 sps:$4 sm:$0xff]  }
  0x1d   :  { %1822 = vmatpush3.bf16.msra.mxu1 %v1948_v27  ;;  %1711 = vmatprep.subr.bf16.mxu0 %v1949_v28  ;;  %v2025_v16 = vld [vmem:[%s2667_s0 + $0x184] ss:$16 sps:$4 sm:$0xff]   ;;  %v2027_v17 = vld [vmem:[%s2667_s0 + $0x18c] ss:$16 sps:$4 sm:$0xff]   ;;  %v2029_v18 = vld [vmem:[%s2667_s0 + $0x180] ss:$16 sps:$4 sm:$0xff]  }
  0x1e   :  { %1823 = vmatprep.subr.bf16.mxu1 %v1950_v29  ;;  %v2030_v19 = vld [vmem:[%s2667_s0 + $0x188] ss:$16 sps:$4 sm:$0xff]   ;;  %v2031_v20 = vld [vmem:[%s2667_s0 + $0x1a4] ss:$16 sps:$4 sm:$0xff]   ;;  %v2033_v21 = vld [vmem:[%s2667_s0 + $0x1ac] ss:$16 sps:$4 sm:$0xff]  }
  0x1f   :  { %v2035_v22 = vld [vmem:[%s2667_s0 + $0x1a0] ss:$16 sps:$4 sm:$0xff]   ;;  %v2036_v23 = vld [vmem:[%s2667_s0 + $0x1a8] ss:$16 sps:$4 sm:$0xff]   ;;  %v2037_v24 = vld [vmem:[%s2667_s0 + $0x1c4] ss:$16 sps:$4 sm:$0xff]  }
  0x20   :  { %1712 = vmatpush3.bf16.msra.mxu0 %v1951_v30  ;;  %v2039_v25 = vld [vmem:[%s2667_s0 + $0x1cc] ss:$16 sps:$4 sm:$0xff]   ;;  %v2041_v26 = vld [vmem:[%s2667_s0 + $0x1c0] ss:$16 sps:$4 sm:$0xff]   ;;  %v2042_v27 = vld [vmem:[%s2667_s0 + $0x1c8] ss:$16 sps:$4 sm:$0xff]  }
  0x21   :  { %1824 = vmatpush3.bf16.msra.mxu1 %v1952_v31  ;;  %v2043_v28 = vld [vmem:[%s2667_s0 + $0x1e4] ss:$16 sps:$4 sm:$0xff]   ;;  %v2045_v29 = vld [vmem:[%s2667_s0 + $0x1ec] ss:$16 sps:$4 sm:$0xff]   ;;  %v2047_v30 = vld [vmem:[%s2667_s0 + $0x1e0] ss:$16 sps:$4 sm:$0xff]  }
  0x22   :  { %v2048_v31 = vld [vmem:[%s2667_s0 + $0x1e8] ss:$16 sps:$4 sm:$0xff]  }
  0x23   :  { %758 = vmatmul.mubr.bf16.vlgmr.msra.gmra.mrb[0].mxu0 %v1953_v32 }
  0x24   :  { %919 = vmatmul.mubr.bf16.vlgmr.msra.gmra.mrb[0].mxu1 %v1956_v34  ;;  %765 = vmatprep.mubr.bf16.mxu0 %v1959_v36 }
  0x25   :  { %926 = vmatprep.mubr.bf16.mxu1 %v1961_v37 }
  0x2b   :  { %766 = vmatmul.mubr.bf16.gmra.mrb[4].mxu0 %v1963_v38 }
  0x2c   :  { %927 = vmatmul.mubr.bf16.gmra.mrb[4].mxu1 %v1964_v39  ;;  %773 = vmatprep.mubr.bf16.mxu0 %v1965_v40 }
  0x2d   :  { %934 = vmatprep.mubr.bf16.mxu1 %v1967_v41 }
  0x33   :  { %774 = vmatmul.mubr.bf16.gmra.mrb[8].mxu0 %v1969_v42 }
  0x34   :  { %935 = vmatmul.mubr.bf16.gmra.mrb[8].mxu1 %v1970_v43  ;;  %781 = vmatprep.mubr.bf16.mxu0 %v1971_v44 }
  0x35   :  { %942 = vmatprep.mubr.bf16.mxu1 %v1973_v45 }
  0x3b   :  { %782 = vmatmul.mubr.bf16.gmra.mrb[12].mxu0 %v1975_v46 }
  0x3c   :  { %943 = vmatmul.mubr.bf16.gmra.mrb[12].mxu1 %v1976_v47  ;;  %789 = vmatprep.mubr.bf16.mxu0 %v1977_v48 }
  0x3d   :  { %950 = vmatprep.mubr.bf16.mxu1 %v1979_v49 }
  0x43   :  { %790 = vmatmul.mubr.bf16.gmra.mrb[16].mxu0 %v1981_v50 }
  0x44   :  { %951 = vmatmul.mubr.bf16.gmra.mrb[16].mxu1 %v1982_v51  ;;  %797 = vmatprep.mubr.bf16.mxu0 %v1983_v52 }
  0x45   :  { %958 = vmatprep.mubr.bf16.mxu1 %v1985_v53 }
  0x4b   :  { %798 = vmatmul.mubr.bf16.gmra.mrb[20].mxu0 %v1987_v54 }
  0x4c   :  { %959 = vmatmul.mubr.bf16.gmra.mrb[20].mxu1 %v1988_v55  ;;  %805 = vmatprep.mubr.bf16.mxu0 %v1989_v56 }
  0x4d   :  { %966 = vmatprep.mubr.bf16.mxu1 %v1991_v57 }
  0x53   :  { %806 = vmatmul.mubr.bf16.gmra.mrb[24].mxu0 %v1993_v58 }
  0x54   :  { %967 = vmatmul.mubr.bf16.gmra.mrb[24].mxu1 %v1994_v59  ;;  %813 = vmatprep.mubr.bf16.mxu0 %v1995_v60  ;;  %v1338_v59 = vld [vmem:[%s2668_s2] sm:$0xff] }
  0x55   :  { %974 = vmatprep.mubr.bf16.mxu1 %v1997_v61 }
  0x5b   :  { %814 = vmatmul.mubr.bf16.gmra.mrb[28].mxu0 %v1999_v62 }
  0x5c   :  { %975 = vmatmul.mubr.bf16.gmra.mrb[28].mxu1 %v2000_v63  ;;  %821 = vmatprep.mubr.bf16.mxu0 %v2001_v0  ;;  %v1339_v63 = vld [vmem:[%s2668_s2 + $0x8] sm:$0xff] }
  0x5d   :  { %982 = vmatprep.mubr.bf16.mxu1 %v2003_v1 }
  0x63   :  { %822 = vmatmul.mubr.bf16.gmra.mrb[32].mxu0 %v2005_v2 }
  0x64   :  { %983 = vmatmul.mubr.bf16.gmra.mrb[32].mxu1 %v2006_v3  ;;  %829 = vmatprep.mubr.bf16.mxu0 %v2007_v4 }
  0x65   :  { %990 = vmatprep.mubr.bf16.mxu1 %v2009_v5 }
  0x6b   :  { %830 = vmatmul.mubr.bf16.gmra.mrb[36].mxu0 %v2011_v6 }
  0x6c   :  { %991 = vmatmul.mubr.bf16.gmra.mrb[36].mxu1 %v2012_v7  ;;  %837 = vmatprep.mubr.bf16.mxu0 %v2013_v8 }
  0x6d   :  { %998 = vmatprep.mubr.bf16.mxu1 %v2015_v9 }
  0x73   :  { %838 = vmatmul.mubr.bf16.gmra.mrb[40].mxu0 %v2017_v10 }
  0x74   :  { %999 = vmatmul.mubr.bf16.gmra.mrb[40].mxu1 %v2018_v11  ;;  %845 = vmatprep.mubr.bf16.mxu0 %v2019_v12 }
  0x75   :  { %1006 = vmatprep.mubr.bf16.mxu1 %v2021_v13 }
  0x7b   :  { %846 = vmatmul.mubr.bf16.gmra.mrb[44].mxu0 %v2023_v14 }
  0x7c   :  { %1007 = vmatmul.mubr.bf16.gmra.mrb[44].mxu1 %v2024_v15  ;;  %853 = vmatprep.mubr.bf16.mxu0 %v2025_v16 }
  0x7d   :  { %1014 = vmatprep.mubr.bf16.mxu1 %v2027_v17 }
  0x83   :  { %854 = vmatmul.mubr.bf16.gmra.mrb[48].mxu0 %v2029_v18 }
  0x84   :  { %1015 = vmatmul.mubr.bf16.gmra.mrb[48].mxu1 %v2030_v19  ;;  %861 = vmatprep.mubr.bf16.mxu0 %v2031_v20 }
  0x85   :  { %1022 = vmatprep.mubr.bf16.mxu1 %v2033_v21 }
  0x8b   :  { %862 = vmatmul.mubr.bf16.gmra.mrb[52].mxu0 %v2035_v22 }
  0x8c   :  { %1023 = vmatmul.mubr.bf16.gmra.mrb[52].mxu1 %v2036_v23  ;;  %869 = vmatprep.mubr.bf16.mxu0 %v2037_v24 }
  0x8d   :  { %1030 = vmatprep.mubr.bf16.mxu1 %v2039_v25 }
  0x93   :  { %870 = vmatmul.mubr.bf16.gmra.mrb[56].mxu0 %v2041_v26 }
  0x94   :  { %1031 = vmatmul.mubr.bf16.gmra.mrb[56].mxu1 %v2042_v27  ;;  %877 = vmatprep.mubr.bf16.mxu0 %v2043_v28 }
  0x95   :  { %1038 = vmatprep.mubr.bf16.mxu1 %v2045_v29 }
  0x9b   :  { %878 = vmatmul.mubr.bf16.gmra.mrb[60].mxu0 %v2047_v30 }
  0x9c   :  { %1039 = vmatmul.mubr.bf16.gmra.mrb[60].mxu1 %v2048_v31 }
  0xf6   :  { %v1713_v32 = vpop.f32.mrb[0].mxu0 }
  0xf7   :  { %v1825_v33 = vpop.f32.mrb[0].mxu1  ;;  %v1714_v34 = vpop.f32.mrb[1].mxu0 }
  0xf8   :  { %v1715_v35 = vadd.f32 %v1714_v34, %v1713_v32  ;;  %v1826_v36 = vpop.f32.mrb[1].mxu1  ;;  %v1716_v37 = vpop.f32.mrb[2].mxu0 }
  0xf9   :  { %v1827_v38 = vadd.f32 %v1826_v36, %v1825_v33  ;;  %v1828_v39 = vpop.f32.mrb[2].mxu1  ;;  %v1717_v40 = vpop.f32.mrb[3].mxu0 }
  0xfa   :  { %v1718_v41 = vadd.f32 %v1717_v40, %v1716_v37  ;;  %v1829_v42 = vpop.f32.mrb[3].mxu1 }
  0xfb   :  { %v921_v43 = vadd.f32 %v1827_v38, %v1715_v35  ;;  %v1830_v44 = vadd.f32 %v1829_v42, %v1828_v39 }
  0xfd   :  { %2049 = vtanh.f32 %v921_v43  ;;  %v924_v45 = vadd.f32 %v1830_v44, %v1718_v41 }
  0xfe   :  { %v1719_v46 = vpop.f32.mrb[4].mxu0 }
  0xff   :  { %2051 = vtanh.f32 %v924_v45  ;;  %v1831_v47 = vpop.f32.mrb[4].mxu1  ;;  %v1720_v48 = vpop.f32.mrb[5].mxu0 }
 0x100   :  { %v1721_v49 = vadd.f32 %v1720_v48, %v1719_v46  ;;  %v1832_v50 = vpop.f32.mrb[5].mxu1  ;;  %v1722_v51 = vpop.f32.mrb[6].mxu0 }
 0x101   :  { %v1833_v52 = vadd.f32 %v1832_v50, %v1831_v47  ;;  %v1834_v53 = vpop.f32.mrb[6].mxu1  ;;  %v1723_v54 = vpop.f32.mrb[7].mxu0 }
 0x102   :  { %v1724_v55 = vadd.f32 %v1723_v54, %v1722_v51  ;;  %v1835_v56 = vpop.f32.mrb[7].mxu1 }
 0x103   :  { %v929_v57 = vadd.f32 %v1833_v52, %v1721_v49  ;;  %v1836_v58 = vadd.f32 %v1835_v56, %v1834_v53 }
 0x105   :  { %2053 = vtanh.f32 %v929_v57  ;;  %v932_v60 = vadd.f32 %v1836_v58, %v1724_v55 }
 0x106   :  { %v1725_v61 = vpop.f32.mrb[8].mxu0 }
 0x107   :  { %v2050_v62 = vpop.eup %2049  ;;  %2055 = vtanh.f32 %v932_v60  ;;  %v1837_v0 = vpop.f32.mrb[8].mxu1 }
 0x108   :  { %v1726_v1 = vpop.f32.mrb[9].mxu0  ;;  %v1370_v2 = vadd.f32 %v2050_v62, %v1338_v59  ;;  %v1838_v4 = vpop.f32.mrb[9].mxu1 }
 0x109   :  { %v1727_v3 = vadd.f32 %v1726_v1, %v1725_v61  ;;  %v1728_v5 = vpop.f32.mrb[10].mxu0  ;;  %v2052_v6 = vpop.eup %2051  ;;  %v1839_v7 = vadd.f32 %v1838_v4, %v1837_v0 }
 0x10a   :  { %v1840_v8 = vpop.f32.mrb[10].mxu1  ;;  %v1729_v9 = vpop.f32.mrb[11].mxu0  ;;  %1402 = vst [vmem:[%s2669_s4] sm:$0xff] %v1370_v2  ;;  %v1605_v10 = vpack.c.bf16 %v2052_v6, %v2050_v62  ;;  %v1371_v11 = vadd.f32 %v2052_v6, %v1339_v63 }
 0x10b   :  { %v1730_v12 = vadd.f32 %v1729_v9, %v1728_v5  ;;  %v1841_v13 = vpop.f32.mrb[11].mxu1  ;;  %v937_v14 = vadd.f32 %v1839_v7, %v1727_v3 }
 0x10c   :  { %v1842_v15 = vadd.f32 %v1841_v13, %v1840_v8  ;;  %1606 = vst [vmem:[%s2670_s3] sm:$0xff] %v1605_v10   ;;  %1403 = vst [vmem:[%s2669_s4 + $0x8] sm:$0xff] %v1371_v11 }
 0x10d   :  { %2057 = vtanh.f32 %v937_v14 }
 0x10e   :  { %v940_v17 = vadd.f32 %v1842_v15, %v1730_v12  ;;  %v1731_v18 = vpop.f32.mrb[12].mxu0 }
 0x10f   :  { %v2054_v19 = vpop.eup %2053  ;;  %v1843_v21 = vpop.f32.mrb[12].mxu1 }
 0x110   :  { %2059 = vtanh.f32 %v940_v17  ;;  %v1732_v22 = vpop.f32.mrb[13].mxu0  ;;  %v1844_v25 = vpop.f32.mrb[13].mxu1 }
 0x111   :  { %v1733_v24 = vadd.f32 %v1732_v22, %v1731_v18  ;;  %v1734_v26 = vpop.f32.mrb[14].mxu0  ;;  %v2056_v27 = vpop.eup %2055  ;;  %v1845_v28 = vadd.f32 %v1844_v25, %v1843_v21 }
 0x112   :  { %v1846_v29 = vpop.f32.mrb[14].mxu1  ;;  %v1735_v30 = vpop.f32.mrb[15].mxu0  ;;  %v1610_v31 = vpack.c.bf16 %v2056_v27, %v2054_v19 }
 0x113   :  { %v1340_v16 = vld [vmem:[%s2668_s2 + $0x10] sm:$0xff]  ;;  %v1341_v20 = vld [vmem:[%s2668_s2 + $0x18] sm:$0xff]  ;;  %v1736_v33 = vadd.f32 %v1735_v30, %v1734_v26  ;;  %v1847_v34 = vpop.f32.mrb[15].mxu1  ;;  %v945_v35 = vadd.f32 %v1845_v28, %v1733_v24 }
 0x114   :  { %v1372_v23 = vadd.f32 %v2054_v19, %v1340_v16  ;;  %v1373_v32 = vadd.f32 %v2056_v27, %v1341_v20  ;;  %v1848_v36 = vadd.f32 %v1847_v34, %v1846_v29  ;;  %1682 = vst [vmem:[%s2670_s3 + $0x8] sm:$0xff] %v1610_v31  }
 0x115   :  { %2061 = vtanh.f32 %v945_v35 }
 0x116   :  { %1404 = vst [vmem:[%s2669_s4 + $0x10] sm:$0xff] %v1372_v23  ;;  %1405 = vst [vmem:[%s2669_s4 + $0x18] sm:$0xff] %v1373_v32  ;;  %v948_v38 = vadd.f32 %v1848_v36, %v1736_v33  ;;  %v1737_v39 = vpop.f32.mrb[16].mxu0 }
 0x117   :  { %v2058_v40 = vpop.eup %2057  ;;  %v1849_v42 = vpop.f32.mrb[16].mxu1 }
 0x118   :  { %2063 = vtanh.f32 %v948_v38  ;;  %v1738_v43 = vpop.f32.mrb[17].mxu0  ;;  %v1850_v46 = vpop.f32.mrb[17].mxu1 }
 0x119   :  { %v1739_v45 = vadd.f32 %v1738_v43, %v1737_v39  ;;  %v1740_v47 = vpop.f32.mrb[18].mxu0  ;;  %v1851_v49 = vadd.f32 %v1850_v46, %v1849_v42  ;;  %v1852_v50 = vpop.f32.mrb[18].mxu1 }
 0x11a   :  { %v2060_v48 = vpop.eup %2059  ;;  %v1741_v51 = vpop.f32.mrb[19].mxu0 }
 0x11b   :  { %v1615_v52 = vpack.c.bf16 %v2060_v48, %v2058_v40  ;;  %v1742_v54 = vadd.f32 %v1741_v51, %v1740_v47  ;;  %v1853_v55 = vpop.f32.mrb[19].mxu1  ;;  %v953_v56 = vadd.f32 %v1851_v49, %v1739_v45 }
 0x11c   :  { %v1854_v57 = vadd.f32 %v1853_v55, %v1852_v50 }
 0x11d   :  { %v1342_v37 = vld [vmem:[%s2668_s2 + $0x20] sm:$0xff]  ;;  %v1343_v41 = vld [vmem:[%s2668_s2 + $0x28] sm:$0xff]  ;;  %1683 = vst [vmem:[%s2670_s3 + $0x10] sm:$0xff] %v1615_v52   ;;  %2065 = vtanh.f32 %v953_v56 }
 0x11e   :  { %v1374_v44 = vadd.f32 %v2058_v40, %v1342_v37  ;;  %v1375_v53 = vadd.f32 %v2060_v48, %v1343_v41  ;;  %v956_v59 = vadd.f32 %v1854_v57, %v1742_v54  ;;  %v1743_v60 = vpop.f32.mrb[20].mxu0 }
 0x11f   :  { %v2062_v61 = vpop.eup %2061  ;;  %v1855_v63 = vpop.f32.mrb[20].mxu1 }
 0x120   :  { %1406 = vst [vmem:[%s2669_s4 + $0x20] sm:$0xff] %v1374_v44  ;;  %1407 = vst [vmem:[%s2669_s4 + $0x28] sm:$0xff] %v1375_v53  ;;  %2067 = vtanh.f32 %v956_v59  ;;  %v1744_v0 = vpop.f32.mrb[21].mxu0  ;;  %v1856_v3 = vpop.f32.mrb[21].mxu1 }
 0x121   :  { %v1745_v2 = vadd.f32 %v1744_v0, %v1743_v60  ;;  %v1746_v4 = vpop.f32.mrb[22].mxu0  ;;  %v1857_v6 = vadd.f32 %v1856_v3, %v1855_v63  ;;  %v1858_v7 = vpop.f32.mrb[22].mxu1 }
 0x122   :  { %v2064_v5 = vpop.eup %2063  ;;  %v1747_v8 = vpop.f32.mrb[23].mxu0 }
 0x123   :  { %v1620_v9 = vpack.c.bf16 %v2064_v5, %v2062_v61  ;;  %v1748_v11 = vadd.f32 %v1747_v8, %v1746_v4  ;;  %v1859_v12 = vpop.f32.mrb[23].mxu1  ;;  %v961_v13 = vadd.f32 %v1857_v6, %v1745_v2 }
 0x124   :  { %v1860_v14 = vadd.f32 %v1859_v12, %v1858_v7 }
 0x125   :  { %1684 = vst [vmem:[%s2670_s3 + $0x18] sm:$0xff] %v1620_v9   ;;  %2069 = vtanh.f32 %v961_v13 }
 0x126   :  { %v964_v16 = vadd.f32 %v1860_v14, %v1748_v11  ;;  %v1749_v17 = vpop.f32.mrb[24].mxu0 }
 0x127   :  { %v1344_v58 = vld [vmem:[%s2668_s2 + $0x30] sm:$0xff]  ;;  %v1345_v62 = vld [vmem:[%s2668_s2 + $0x38] sm:$0xff]  ;;  %v2066_v18 = vpop.eup %2065  ;;  %v1861_v20 = vpop.f32.mrb[24].mxu1 }
 0x128   :  { %v1376_v1 = vadd.f32 %v2062_v61, %v1344_v58  ;;  %v1377_v10 = vadd.f32 %v2064_v5, %v1345_v62  ;;  %2071 = vtanh.f32 %v964_v16  ;;  %v1750_v21 = vpop.f32.mrb[25].mxu0  ;;  %v1862_v24 = vpop.f32.mrb[25].mxu1 }
 0x129   :  { %v1751_v23 = vadd.f32 %v1750_v21, %v1749_v17  ;;  %v1752_v25 = vpop.f32.mrb[26].mxu0  ;;  %v1863_v27 = vadd.f32 %v1862_v24, %v1861_v20  ;;  %v1864_v28 = vpop.f32.mrb[26].mxu1 }
 0x12a   :  { %1408 = vst [vmem:[%s2669_s4 + $0x30] sm:$0xff] %v1376_v1  ;;  %1409 = vst [vmem:[%s2669_s4 + $0x38] sm:$0xff] %v1377_v10  ;;  %v2068_v26 = vpop.eup %2067  ;;  %v1753_v29 = vpop.f32.mrb[27].mxu0 }
 0x12b   :  { %v1625_v30 = vpack.c.bf16 %v2068_v26, %v2066_v18  ;;  %v1754_v32 = vadd.f32 %v1753_v29, %v1752_v25  ;;  %v1865_v33 = vpop.f32.mrb[27].mxu1  ;;  %v969_v34 = vadd.f32 %v1863_v27, %v1751_v23 }
 0x12c   :  { %v1866_v35 = vadd.f32 %v1865_v33, %v1864_v28 }
 0x12d   :  { %1685 = vst [vmem:[%s2670_s3 + $0x20] sm:$0xff] %v1625_v30   ;;  %2073 = vtanh.f32 %v969_v34 }
 0x12e   :  { %v972_v37 = vadd.f32 %v1866_v35, %v1754_v32  ;;  %v1755_v38 = vpop.f32.mrb[28].mxu0 }
 0x12f   :  { %v2070_v39 = vpop.eup %2069  ;;  %v1867_v41 = vpop.f32.mrb[28].mxu1 }
 0x130   :  { %2075 = vtanh.f32 %v972_v37  ;;  %v1756_v42 = vpop.f32.mrb[29].mxu0  ;;  %v1868_v45 = vpop.f32.mrb[29].mxu1 }
 0x131   :  { %v1346_v15 = vld [vmem:[%s2668_s2 + $0x40] sm:$0xff]  ;;  %v1347_v19 = vld [vmem:[%s2668_s2 + $0x48] sm:$0xff]  ;;  %v1757_v44 = vadd.f32 %v1756_v42, %v1755_v38  ;;  %v1758_v46 = vpop.f32.mrb[30].mxu0  ;;  %v1869_v48 = vadd.f32 %v1868_v45, %v1867_v41  ;;  %v1870_v49 = vpop.f32.mrb[30].mxu1 }
 0x132   :  { %v1378_v22 = vadd.f32 %v2066_v18, %v1346_v15  ;;  %v1379_v31 = vadd.f32 %v2068_v26, %v1347_v19  ;;  %v2072_v47 = vpop.eup %2071  ;;  %v1759_v50 = vpop.f32.mrb[31].mxu0 }
 0x133   :  { %v1630_v51 = vpack.c.bf16 %v2072_v47, %v2070_v39  ;;  %v1760_v53 = vadd.f32 %v1759_v50, %v1758_v46  ;;  %v1871_v54 = vpop.f32.mrb[31].mxu1  ;;  %v977_v55 = vadd.f32 %v1869_v48, %v1757_v44 }
 0x134   :  { %1410 = vst [vmem:[%s2669_s4 + $0x40] sm:$0xff] %v1378_v22  ;;  %1411 = vst [vmem:[%s2669_s4 + $0x48] sm:$0xff] %v1379_v31  ;;  %v1872_v56 = vadd.f32 %v1871_v54, %v1870_v49 }
 0x135   :  { %1686 = vst [vmem:[%s2670_s3 + $0x28] sm:$0xff] %v1630_v51   ;;  %2077 = vtanh.f32 %v977_v55 }
 0x136   :  { %v980_v58 = vadd.f32 %v1872_v56, %v1760_v53  ;;  %v1761_v59 = vpop.f32.mrb[32].mxu0 }
 0x137   :  { %v2074_v60 = vpop.eup %2073  ;;  %v1873_v62 = vpop.f32.mrb[32].mxu1 }
 0x138   :  { %2079 = vtanh.f32 %v980_v58  ;;  %v1762_v63 = vpop.f32.mrb[33].mxu0  ;;  %v1874_v2 = vpop.f32.mrb[33].mxu1 }
 0x139   :  { %v1763_v1 = vadd.f32 %v1762_v63, %v1761_v59  ;;  %v1764_v3 = vpop.f32.mrb[34].mxu0  ;;  %v1875_v5 = vadd.f32 %v1874_v2, %v1873_v62  ;;  %v1876_v6 = vpop.f32.mrb[34].mxu1 }
 0x13a   :  { %v2076_v4 = vpop.eup %2075  ;;  %v1765_v7 = vpop.f32.mrb[35].mxu0 }
 0x13b   :  { %v1348_v36 = vld [vmem:[%s2668_s2 + $0x50] sm:$0xff]  ;;  %v1349_v40 = vld [vmem:[%s2668_s2 + $0x58] sm:$0xff]  ;;  %v1635_v8 = vpack.c.bf16 %v2076_v4, %v2074_v60  ;;  %v1766_v10 = vadd.f32 %v1765_v7, %v1764_v3  ;;  %v1877_v11 = vpop.f32.mrb[35].mxu1  ;;  %v985_v12 = vadd.f32 %v1875_v5, %v1763_v1 }
 0x13c   :  { %v1380_v43 = vadd.f32 %v2070_v39, %v1348_v36  ;;  %v1381_v52 = vadd.f32 %v2072_v47, %v1349_v40  ;;  %v1878_v13 = vadd.f32 %v1877_v11, %v1876_v6 }
 0x13d   :  { %1687 = vst [vmem:[%s2670_s3 + $0x30] sm:$0xff] %v1635_v8   ;;  %2081 = vtanh.f32 %v985_v12 }
 0x13e   :  { %1412 = vst [vmem:[%s2669_s4 + $0x50] sm:$0xff] %v1380_v43  ;;  %1413 = vst [vmem:[%s2669_s4 + $0x58] sm:$0xff] %v1381_v52  ;;  %v988_v15 = vadd.f32 %v1878_v13, %v1766_v10  ;;  %v1767_v16 = vpop.f32.mrb[36].mxu0 }
 0x13f   :  { %v2078_v17 = vpop.eup %2077  ;;  %v1879_v19 = vpop.f32.mrb[36].mxu1 }
 0x140   :  { %2083 = vtanh.f32 %v988_v15  ;;  %v1768_v20 = vpop.f32.mrb[37].mxu0  ;;  %v1880_v23 = vpop.f32.mrb[37].mxu1 }
 0x141   :  { %v1769_v22 = vadd.f32 %v1768_v20, %v1767_v16  ;;  %v1770_v24 = vpop.f32.mrb[38].mxu0  ;;  %v1881_v26 = vadd.f32 %v1880_v23, %v1879_v19  ;;  %v1882_v27 = vpop.f32.mrb[38].mxu1 }
 0x142   :  { %v2080_v25 = vpop.eup %2079  ;;  %v1771_v28 = vpop.f32.mrb[39].mxu0 }
 0x143   :  { %v1640_v29 = vpack.c.bf16 %v2080_v25, %v2078_v17  ;;  %v1772_v31 = vadd.f32 %v1771_v28, %v1770_v24  ;;  %v1883_v32 = vpop.f32.mrb[39].mxu1  ;;  %v993_v33 = vadd.f32 %v1881_v26, %v1769_v22 }
 0x144   :  { %v1884_v34 = vadd.f32 %v1883_v32, %v1882_v27 }
 0x145   :  { %v1350_v57 = vld [vmem:[%s2668_s2 + $0x60] sm:$0xff]  ;;  %v1351_v61 = vld [vmem:[%s2668_s2 + $0x68] sm:$0xff]  ;;  %1688 = vst [vmem:[%s2670_s3 + $0x38] sm:$0xff] %v1640_v29   ;;  %2085 = vtanh.f32 %v993_v33 }
 0x146   :  { %v1382_v0 = vadd.f32 %v2074_v60, %v1350_v57  ;;  %v1383_v9 = vadd.f32 %v2076_v4, %v1351_v61  ;;  %v996_v36 = vadd.f32 %v1884_v34, %v1772_v31  ;;  %v1773_v37 = vpop.f32.mrb[40].mxu0 }
 0x147   :  { %v2082_v38 = vpop.eup %2081  ;;  %v1885_v40 = vpop.f32.mrb[40].mxu1 }
 0x148   :  { %1414 = vst [vmem:[%s2669_s4 + $0x60] sm:$0xff] %v1382_v0  ;;  %1415 = vst [vmem:[%s2669_s4 + $0x68] sm:$0xff] %v1383_v9  ;;  %2087 = vtanh.f32 %v996_v36  ;;  %v1774_v41 = vpop.f32.mrb[41].mxu0  ;;  %v1886_v44 = vpop.f32.mrb[41].mxu1 }
 0x149   :  { %v1775_v43 = vadd.f32 %v1774_v41, %v1773_v37  ;;  %v1776_v45 = vpop.f32.mrb[42].mxu0  ;;  %v1887_v47 = vadd.f32 %v1886_v44, %v1885_v40  ;;  %v1888_v48 = vpop.f32.mrb[42].mxu1 }
 0x14a   :  { %v2084_v46 = vpop.eup %2083  ;;  %v1777_v49 = vpop.f32.mrb[43].mxu0 }
 0x14b   :  { %v1645_v50 = vpack.c.bf16 %v2084_v46, %v2082_v38  ;;  %v1778_v52 = vadd.f32 %v1777_v49, %v1776_v45  ;;  %v1889_v53 = vpop.f32.mrb[43].mxu1  ;;  %v1001_v54 = vadd.f32 %v1887_v47, %v1775_v43 }
 0x14c   :  { %v1890_v55 = vadd.f32 %v1889_v53, %v1888_v48 }
 0x14d   :  { %1689 = vst [vmem:[%s2670_s3 + $0x40] sm:$0xff] %v1645_v50   ;;  %2089 = vtanh.f32 %v1001_v54 }
 0x14e   :  { %v1004_v57 = vadd.f32 %v1890_v55, %v1778_v52  ;;  %v1779_v58 = vpop.f32.mrb[44].mxu0 }
 0x14f   :  { %v1352_v14 = vld [vmem:[%s2668_s2 + $0x70] sm:$0xff]  ;;  %v1353_v18 = vld [vmem:[%s2668_s2 + $0x78] sm:$0xff]  ;;  %v2086_v59 = vpop.eup %2085  ;;  %v1891_v61 = vpop.f32.mrb[44].mxu1 }
 0x150   :  { %v1384_v21 = vadd.f32 %v2078_v17, %v1352_v14  ;;  %v1385_v30 = vadd.f32 %v2080_v25, %v1353_v18  ;;  %2091 = vtanh.f32 %v1004_v57  ;;  %v1780_v62 = vpop.f32.mrb[45].mxu0  ;;  %v1892_v1 = vpop.f32.mrb[45].mxu1 }
 0x151   :  { %v1781_v0 = vadd.f32 %v1780_v62, %v1779_v58  ;;  %v1782_v2 = vpop.f32.mrb[46].mxu0  ;;  %v1893_v4 = vadd.f32 %v1892_v1, %v1891_v61  ;;  %v1894_v5 = vpop.f32.mrb[46].mxu1 }
 0x152   :  { %1416 = vst [vmem:[%s2669_s4 + $0x70] sm:$0xff] %v1384_v21  ;;  %1417 = vst [vmem:[%s2669_s4 + $0x78] sm:$0xff] %v1385_v30  ;;  %v2088_v3 = vpop.eup %2087  ;;  %v1783_v6 = vpop.f32.mrb[47].mxu0 }
 0x153   :  { %v1650_v7 = vpack.c.bf16 %v2088_v3, %v2086_v59  ;;  %v1784_v9 = vadd.f32 %v1783_v6, %v1782_v2  ;;  %v1895_v10 = vpop.f32.mrb[47].mxu1  ;;  %v1009_v11 = vadd.f32 %v1893_v4, %v1781_v0 }
 0x154   :  { %v1896_v12 = vadd.f32 %v1895_v10, %v1894_v5 }
 0x155   :  { %1690 = vst [vmem:[%s2670_s3 + $0x48] sm:$0xff] %v1650_v7   ;;  %2093 = vtanh.f32 %v1009_v11 }
 0x156   :  { %v1012_v14 = vadd.f32 %v1896_v12, %v1784_v9  ;;  %v1785_v15 = vpop.f32.mrb[48].mxu0 }
 0x157   :  { %v2090_v16 = vpop.eup %2089  ;;  %v1897_v18 = vpop.f32.mrb[48].mxu1 }
 0x158   :  { %2095 = vtanh.f32 %v1012_v14  ;;  %v1786_v19 = vpop.f32.mrb[49].mxu0  ;;  %v1898_v22 = vpop.f32.mrb[49].mxu1 }
 0x159   :  { %v1354_v35 = vld [vmem:[%s2668_s2 + $0x80] sm:$0xff]  ;;  %v1355_v39 = vld [vmem:[%s2668_s2 + $0x88] sm:$0xff]  ;;  %v1787_v21 = vadd.f32 %v1786_v19, %v1785_v15  ;;  %v1788_v23 = vpop.f32.mrb[50].mxu0  ;;  %v1899_v25 = vadd.f32 %v1898_v22, %v1897_v18  ;;  %v1900_v26 = vpop.f32.mrb[50].mxu1 }
 0x15a   :  { %v1386_v42 = vadd.f32 %v2082_v38, %v1354_v35  ;;  %v1387_v51 = vadd.f32 %v2084_v46, %v1355_v39  ;;  %v2092_v24 = vpop.eup %2091  ;;  %v1789_v27 = vpop.f32.mrb[51].mxu0 }
 0x15b   :  { %v1655_v28 = vpack.c.bf16 %v2092_v24, %v2090_v16  ;;  %v1790_v30 = vadd.f32 %v1789_v27, %v1788_v23  ;;  %v1901_v31 = vpop.f32.mrb[51].mxu1  ;;  %v1017_v32 = vadd.f32 %v1899_v25, %v1787_v21 }
 0x15c   :  { %1418 = vst [vmem:[%s2669_s4 + $0x80] sm:$0xff] %v1386_v42  ;;  %1419 = vst [vmem:[%s2669_s4 + $0x88] sm:$0xff] %v1387_v51  ;;  %v1902_v33 = vadd.f32 %v1901_v31, %v1900_v26 }
 0x15d   :  { %1691 = vst [vmem:[%s2670_s3 + $0x50] sm:$0xff] %v1655_v28   ;;  %2097 = vtanh.f32 %v1017_v32 }
 0x15e   :  { %v1020_v35 = vadd.f32 %v1902_v33, %v1790_v30  ;;  %v1791_v36 = vpop.f32.mrb[52].mxu0 }
 0x15f   :  { %v2094_v37 = vpop.eup %2093  ;;  %v1903_v39 = vpop.f32.mrb[52].mxu1 }
 0x160   :  { %2099 = vtanh.f32 %v1020_v35  ;;  %v1792_v40 = vpop.f32.mrb[53].mxu0  ;;  %v1904_v43 = vpop.f32.mrb[53].mxu1 }
 0x161   :  { %v1793_v42 = vadd.f32 %v1792_v40, %v1791_v36  ;;  %v1794_v44 = vpop.f32.mrb[54].mxu0  ;;  %v1905_v46 = vadd.f32 %v1904_v43, %v1903_v39  ;;  %v1906_v47 = vpop.f32.mrb[54].mxu1 }
 0x162   :  { %v2096_v45 = vpop.eup %2095  ;;  %v1795_v48 = vpop.f32.mrb[55].mxu0 }
 0x163   :  { %v1356_v56 = vld [vmem:[%s2668_s2 + $0x90] sm:$0xff]  ;;  %v1357_v60 = vld [vmem:[%s2668_s2 + $0x98] sm:$0xff]  ;;  %v1660_v49 = vpack.c.bf16 %v2096_v45, %v2094_v37  ;;  %v1796_v51 = vadd.f32 %v1795_v48, %v1794_v44  ;;  %v1907_v52 = vpop.f32.mrb[55].mxu1  ;;  %v1025_v53 = vadd.f32 %v1905_v46, %v1793_v42 }
 0x164   :  { %v1388_v63 = vadd.f32 %v2086_v59, %v1356_v56  ;;  %v1389_v8 = vadd.f32 %v2088_v3, %v1357_v60  ;;  %v1908_v54 = vadd.f32 %v1907_v52, %v1906_v47 }
 0x165   :  { %1692 = vst [vmem:[%s2670_s3 + $0x58] sm:$0xff] %v1660_v49   ;;  %2101 = vtanh.f32 %v1025_v53 }
 0x166   :  { %1420 = vst [vmem:[%s2669_s4 + $0x90] sm:$0xff] %v1388_v63  ;;  %1421 = vst [vmem:[%s2669_s4 + $0x98] sm:$0xff] %v1389_v8  ;;  %v1028_v56 = vadd.f32 %v1908_v54, %v1796_v51  ;;  %v1797_v57 = vpop.f32.mrb[56].mxu0 }
 0x167   :  { %v2098_v58 = vpop.eup %2097  ;;  %v1909_v60 = vpop.f32.mrb[56].mxu1 }
 0x168   :  { %2103 = vtanh.f32 %v1028_v56  ;;  %v1798_v61 = vpop.f32.mrb[57].mxu0  ;;  %v1910_v0 = vpop.f32.mrb[57].mxu1 }
 0x169   :  { %v1799_v63 = vadd.f32 %v1798_v61, %v1797_v57  ;;  %v1800_v1 = vpop.f32.mrb[58].mxu0  ;;  %v1911_v3 = vadd.f32 %v1910_v0, %v1909_v60  ;;  %v1912_v4 = vpop.f32.mrb[58].mxu1 }
 0x16a   :  { %v2100_v2 = vpop.eup %2099  ;;  %v1801_v5 = vpop.f32.mrb[59].mxu0 }
 0x16b   :  { %v1665_v6 = vpack.c.bf16 %v2100_v2, %v2098_v58  ;;  %v1802_v8 = vadd.f32 %v1801_v5, %v1800_v1  ;;  %v1913_v9 = vpop.f32.mrb[59].mxu1  ;;  %v1033_v10 = vadd.f32 %v1911_v3, %v1799_v63 }
 0x16c   :  { %v1914_v11 = vadd.f32 %v1913_v9, %v1912_v4 }
 0x16d   :  { %v1358_v13 = vld [vmem:[%s2668_s2 + $0xa0] sm:$0xff]  ;;  %v1359_v17 = vld [vmem:[%s2668_s2 + $0xa8] sm:$0xff]  ;;  %1693 = vst [vmem:[%s2670_s3 + $0x60] sm:$0xff] %v1665_v6   ;;  %2105 = vtanh.f32 %v1033_v10 }
 0x16e   :  { %v1390_v20 = vadd.f32 %v2090_v16, %v1358_v13  ;;  %v1391_v29 = vadd.f32 %v2092_v24, %v1359_v17  ;;  %v1036_v13 = vadd.f32 %v1914_v11, %v1802_v8  ;;  %v1803_v14 = vpop.f32.mrb[60].mxu0 }
 0x16f   :  { %v2102_v15 = vpop.eup %2101  ;;  %v1915_v17 = vpop.f32.mrb[60].mxu1 }
 0x170   :  { %1422 = vst [vmem:[%s2669_s4 + $0xa0] sm:$0xff] %v1390_v20  ;;  %1423 = vst [vmem:[%s2669_s4 + $0xa8] sm:$0xff] %v1391_v29  ;;  %2107 = vtanh.f32 %v1036_v13  ;;  %v1804_v18 = vpop.f32.mrb[61].mxu0  ;;  %v1916_v21 = vpop.f32.mrb[61].mxu1 }
 0x171   :  { %v1805_v20 = vadd.f32 %v1804_v18, %v1803_v14  ;;  %v1806_v22 = vpop.f32.mrb[62].mxu0  ;;  %v1917_v24 = vadd.f32 %v1916_v21, %v1915_v17  ;;  %v1918_v25 = vpop.f32.mrb[62].mxu1 }
 0x172   :  { %v2104_v23 = vpop.eup %2103  ;;  %v1807_v26 = vpop.f32.mrb[63].mxu0 }
 0x173   :  { %v1670_v27 = vpack.c.bf16 %v2104_v23, %v2102_v15  ;;  %v1808_v29 = vadd.f32 %v1807_v26, %v1806_v22  ;;  %v1919_v30 = vpop.f32.mrb[63].mxu1  ;;  %v1041_v31 = vadd.f32 %v1917_v24, %v1805_v20 }
 0x174   :  { %v1920_v32 = vadd.f32 %v1919_v30, %v1918_v25 }
 0x175   :  { %1694 = vst [vmem:[%s2670_s3 + $0x68] sm:$0xff] %v1670_v27   ;;  %2109 = vtanh.f32 %v1041_v31 }
 0x177   :  { %v1360_v34 = vld [vmem:[%s2668_s2 + $0xb0] sm:$0xff]  ;;  %v1361_v38 = vld [vmem:[%s2668_s2 + $0xb8] sm:$0xff]  ;;  %v2106_v35 = vpop.eup %2105 }
 0x178   :  { %v1392_v41 = vadd.f32 %v2094_v37, %v1360_v34  ;;  %v1393_v50 = vadd.f32 %v2096_v45, %v1361_v38  ;;  %v1044_v34 = vadd.f32 %v1920_v32, %v1808_v29 }
 0x17a   :  { %1424 = vst [vmem:[%s2669_s4 + $0xb0] sm:$0xff] %v1392_v41  ;;  %1425 = vst [vmem:[%s2669_s4 + $0xb8] sm:$0xff] %v1393_v50  ;;  %2111 = vtanh.f32 %v1044_v34  ;;  %v2108_v38 = vpop.eup %2107 }
 0x17b   :  { %v1675_v39 = vpack.c.bf16 %v2108_v38, %v2106_v35 }
 0x17d   :  { %1695 = vst [vmem:[%s2670_s3 + $0x70] sm:$0xff] %v1675_v39  }
 0x17f   :  { %v2110_v42 = vpop.eup %2109 }
 0x181   :  { %v1362_v55 = vld [vmem:[%s2668_s2 + $0xc0] sm:$0xff]  ;;  %v1363_v59 = vld [vmem:[%s2668_s2 + $0xc8] sm:$0xff] }
 0x182   :  { %v1394_v62 = vadd.f32 %v2098_v58, %v1362_v55  ;;  %v1395_v7 = vadd.f32 %v2100_v2, %v1363_v59 }
 0x184   :  { %1426 = vst [vmem:[%s2669_s4 + $0xc0] sm:$0xff] %v1394_v62  ;;  %1427 = vst [vmem:[%s2669_s4 + $0xc8] sm:$0xff] %v1395_v7  ;;  %v2112_v45 = vpop.eup %2111 }
 0x185   :  { %v1680_v46 = vpack.c.bf16 %v2112_v45, %v2110_v42 }
 0x187   :  { %1696 = vst [vmem:[%s2670_s3 + $0x78] sm:$0xff] %v1680_v46  }
 0x18b   :  { %v1364_v12 = vld [vmem:[%s2668_s2 + $0xd0] sm:$0xff]  ;;  %v1365_v16 = vld [vmem:[%s2668_s2 + $0xd8] sm:$0xff] }
 0x18c   :  { %v1396_v19 = vadd.f32 %v2102_v15, %v1364_v12  ;;  %v1397_v28 = vadd.f32 %v2104_v23, %v1365_v16 }
 0x18e   :  { %1428 = vst [vmem:[%s2669_s4 + $0xd0] sm:$0xff] %v1396_v19  ;;  %1429 = vst [vmem:[%s2669_s4 + $0xd8] sm:$0xff] %v1397_v28 }
 0x195   :  { %v1366_v33 = vld [vmem:[%s2668_s2 + $0xe0] sm:$0xff]  ;;  %v1367_v36 = vld [vmem:[%s2668_s2 + $0xe8] sm:$0xff] }
 0x196   :  { %v1398_v37 = vadd.f32 %v2106_v35, %v1366_v33  ;;  %v1399_v40 = vadd.f32 %v2108_v38, %v1367_v36 }
 0x198   :  { %1430 = vst [vmem:[%s2669_s4 + $0xe0] sm:$0xff] %v1398_v37  ;;  %1431 = vst [vmem:[%s2669_s4 + $0xe8] sm:$0xff] %v1399_v40 }
 0x19f   :  { %v1368_v41 = vld [vmem:[%s2668_s2 + $0xf0] sm:$0xff]  ;;  %v1369_v43 = vld [vmem:[%s2668_s2 + $0xf8] sm:$0xff] }
 0x1a0   :  { %v1400_v44 = vadd.f32 %v2110_v42, %v1368_v41  ;;  %v1401_v47 = vadd.f32 %v2112_v45, %v1369_v43 }
 0x1a2   :  { %1432 = vst [vmem:[%s2669_s4 + $0xf0] sm:$0xff] %v1400_v44  ;;  %1433 = vst [vmem:[%s2669_s4 + $0xf8] sm:$0xff] %v1401_v47 }

// kernel: egcf_forward.9
= control target key start
LH: loop header
LB: loop body
LE: loop exit
PB: predicated region body
PF: predicated region fallthrough
CT: control target
= control target key end

     0   :  { %s5257_s0 = inlined_call_operand.vmem [shape: f32[128,128], index: 0, kind: input, shape index: {}]   ;;  %s5258_s1 = inlined_call_operand.vmem [shape: f32[128,128], index: 1, kind: input, shape index: {}]   ;;  %s5259_s2 = inlined_call_operand.vmem [shape: f32[128,128], index: 2, kind: input, shape index: {}]   ;;  %s5260_s3 = inlined_call_operand.vmem [shape: f32[128,128], index: 3, kind: input, shape index: {}]   ;;  %s5261_s4 = inlined_call_operand.vmem [shape: f32[128,128], index: 4, kind: input, shape index: {}]   ;;  %s5262_s5 = inlined_call_operand.vmem [shape: f32[1,128], index: 5, kind: output, shape index: {}]  }
   0x1   :  { %v3342_v0 = vld [vmem:[%s5257_s0 + $0x10] sm:$0xff]  ;;  %v3347_v1 = vld [vmem:[%s5257_s0] sm:$0xff]  ;;  %v3352_v2 = vld [vmem:[%s5257_s0 + $0x18] sm:$0xff] }
   0x2   :  { %v124_v3 = vmul.f32 %v3342_v0, %v3342_v0  ;;  %v122_v4 = vmul.f32 %v3347_v1, %v3347_v1  ;;  %v3361_v5 = vld [vmem:[%s5257_s0 + $0x8] sm:$0xff]  ;;  %v125_v6 = vmul.f32 %v3352_v2, %v3352_v2  ;;  %v3375_v9 = vld [vmem:[%s5257_s0 + $0x20] sm:$0xff]  ;;  %v3384_v12 = vld [vmem:[%s5257_s0 + $0x38] sm:$0xff] }
   0x3   :  { %v123_v7 = vmul.f32 %v3361_v5, %v3361_v5  ;;  %v3370_v8 = vld [vmem:[%s5257_s0 + $0x28] sm:$0xff]  ;;  %v126_v11 = vmul.f32 %v3375_v9, %v3375_v9  ;;  %v3389_v13 = vld [vmem:[%s5257_s0 + $0x30] sm:$0xff]  ;;  %v129_v14 = vmul.f32 %v3384_v12, %v3384_v12  ;;  %v3398_v16 = vld [vmem:[%s5258_s1] sm:$0xff] }
   0x4   :  { %142 = vadd.xlane.f32.xlu1 %v124_v3  ;;  %138 = vadd.xlane.f32.xlu0 %v122_v4  ;;  %v127_v10 = vmul.f32 %v3370_v8, %v3370_v8  ;;  %v128_v15 = vmul.f32 %v3389_v13, %v3389_v13  ;;  %v3403_v17 = vld [vmem:[%s5257_s0 + $0x40] sm:$0xff]  ;;  %v218_v18 = vmul.f32 %v3398_v16, %v3398_v16  ;;  %v3412_v20 = vld [vmem:[%s5258_s1 + $0x8] sm:$0xff]  ;;  %v3426_v24 = vld [vmem:[%s5258_s1 + $0x10] sm:$0xff] }
   0x5   :  { %v130_v19 = vmul.f32 %v3403_v17, %v3403_v17  ;;  %v3417_v21 = vld [vmem:[%s5257_s0 + $0x48] sm:$0xff]  ;;  %v219_v22 = vmul.f32 %v3412_v20, %v3412_v20  ;;  %v3431_v25 = vld [vmem:[%s5257_s0 + $0x50] sm:$0xff]  ;;  %v220_v26 = vmul.f32 %v3426_v24, %v3426_v24  ;;  %v3440_v28 = vld [vmem:[%s5258_s1 + $0x18] sm:$0xff]  ;;  %v580_v3 = vmul.f32 %v3398_v16, %v3347_v1 }
   0x6   :  { %v131_v23 = vmul.f32 %v3417_v21, %v3417_v21  ;;  %v132_v27 = vmul.f32 %v3431_v25, %v3431_v25  ;;  %v3445_v29 = vld [vmem:[%s5257_s0 + $0x58] sm:$0xff]  ;;  %v221_v30 = vmul.f32 %v3440_v28, %v3440_v28  ;;  %v3454_v32 = vld [vmem:[%s5258_s1 + $0x20] sm:$0xff]  ;;  %v3468_v36 = vld [vmem:[%s5258_s1 + $0x28] sm:$0xff]  ;;  %v581_v4 = vmul.f32 %v3412_v20, %v3361_v5 }
   0x7   :  { %v133_v31 = vmul.f32 %v3445_v29, %v3445_v29  ;;  %v3459_v33 = vld [vmem:[%s5257_s0 + $0x60] sm:$0xff]  ;;  %v222_v34 = vmul.f32 %v3454_v32, %v3454_v32  ;;  %v3473_v37 = vld [vmem:[%s5257_s0 + $0x68] sm:$0xff]  ;;  %v223_v38 = vmul.f32 %v3468_v36, %v3468_v36  ;;  %v3482_v40 = vld [vmem:[%s5258_s1 + $0x30] sm:$0xff] }
   0x8   :  { %144 = vadd.xlane.f32.xlu1 %v125_v6  ;;  %140 = vadd.xlane.f32.xlu0 %v123_v7  ;;  %v134_v35 = vmul.f32 %v3459_v33, %v3459_v33  ;;  %v135_v39 = vmul.f32 %v3473_v37, %v3473_v37  ;;  %v3487_v41 = vld [vmem:[%s5257_s0 + $0x70] sm:$0xff]  ;;  %v224_v42 = vmul.f32 %v3482_v40, %v3482_v40  ;;  %v3496_v44 = vld [vmem:[%s5258_s1 + $0x38] sm:$0xff]  ;;  %v3510_v48 = vld [vmem:[%s5258_s1 + $0x48] sm:$0xff] }
   0x9   :  { %v136_v43 = vmul.f32 %v3487_v41, %v3487_v41  ;;  %v3501_v45 = vld [vmem:[%s5257_s0 + $0x78] sm:$0xff]  ;;  %v225_v46 = vmul.f32 %v3496_v44, %v3496_v44  ;;  %v3515_v49 = vld [vmem:[%s5258_s1 + $0x40] sm:$0xff]  ;;  %v227_v50 = vmul.f32 %v3510_v48, %v3510_v48  ;;  %v3529_v53 = vld [vmem:[%s5258_s1 + $0x50] sm:$0xff]  ;;  %v582_v6 = vmul.f32 %v3426_v24, %v3342_v0 }
   0xa   :  { %v137_v47 = vmul.f32 %v3501_v45, %v3501_v45  ;;  %v226_v51 = vmul.f32 %v3515_v49, %v3515_v49  ;;  %v3524_v52 = vld [vmem:[%s5258_s1 + $0x58] sm:$0xff]  ;;  %v228_v55 = vmul.f32 %v3529_v53, %v3529_v53  ;;  %v3538_v56 = vld [vmem:[%s5258_s1 + $0x68] sm:$0xff]  ;;  %v3543_v57 = vld [vmem:[%s5258_s1 + $0x60] sm:$0xff]  ;;  %v583_v7 = vmul.f32 %v3440_v28, %v3352_v2 }
   0xb   :  { %v229_v54 = vmul.f32 %v3524_v52, %v3524_v52  ;;  %v231_v58 = vmul.f32 %v3538_v56, %v3538_v56  ;;  %v230_v59 = vmul.f32 %v3543_v57, %v3543_v57  ;;  %v3552_v60 = vld [vmem:[%s5258_s1 + $0x78] sm:$0xff]  ;;  %v3557_v61 = vld [vmem:[%s5258_s1 + $0x70] sm:$0xff] }
   0xc   :  { %148 = vadd.xlane.f32.xlu1 %v127_v10  ;;  %146 = vadd.xlane.f32.xlu0 %v126_v11  ;;  %v233_v62 = vmul.f32 %v3552_v60, %v3552_v60  ;;  %v232_v63 = vmul.f32 %v3557_v61, %v3557_v61  ;;  %v584_v10 = vmul.f32 %v3454_v32, %v3375_v9 }
   0xd   :  { %v585_v11 = vmul.f32 %v3468_v36, %v3370_v8 }
  0x10   :  { %152 = vadd.xlane.f32.xlu1 %v129_v14  ;;  %150 = vadd.xlane.f32.xlu0 %v128_v15  ;;  %v586_v14 = vmul.f32 %v3482_v40, %v3389_v13  ;;  %v587_v15 = vmul.f32 %v3496_v44, %v3384_v12 }
  0x14   :  { %234 = vadd.xlane.f32.xlu1 %v218_v18  ;;  %154 = vadd.xlane.f32.xlu0 %v130_v19  ;;  %v588_v18 = vmul.f32 %v3515_v49, %v3403_v17  ;;  %v589_v19 = vmul.f32 %v3510_v48, %v3417_v21 }
  0x18   :  { %236 = vadd.xlane.f32.xlu1 %v219_v22  ;;  %156 = vadd.xlane.f32.xlu0 %v131_v23  ;;  %v590_v22 = vmul.f32 %v3529_v53, %v3431_v25  ;;  %v591_v23 = vmul.f32 %v3524_v52, %v3445_v29 }
  0x1c   :  { %238 = vadd.xlane.f32.xlu1 %v220_v26  ;;  %158 = vadd.xlane.f32.xlu0 %v132_v27  ;;  %v592_v26 = vmul.f32 %v3543_v57, %v3459_v33  ;;  %v593_v27 = vmul.f32 %v3538_v56, %v3473_v37 }
  0x20   :  { %240 = vadd.xlane.f32.xlu1 %v221_v30  ;;  %160 = vadd.xlane.f32.xlu0 %v133_v31  ;;  %v594_v30 = vmul.f32 %v3557_v61, %v3487_v41  ;;  %v595_v31 = vmul.f32 %v3552_v60, %v3501_v45 }
  0x24   :  { %242 = vadd.xlane.f32.xlu1 %v222_v34  ;;  %162 = vadd.xlane.f32.xlu0 %v134_v35  ;;  %v564_v34 = vld [vmem:[%s5259_s2] sm:$0xff] }
  0x25   :  { %v628_v35 = vmul.f32 %v564_v34, %v3347_v1 }
  0x28   :  { %244 = vadd.xlane.f32.xlu1 %v223_v38  ;;  %164 = vadd.xlane.f32.xlu0 %v135_v39  ;;  %v565_v38 = vld [vmem:[%s5259_s2 + $0x8] sm:$0xff] }
  0x29   :  { %v629_v39 = vmul.f32 %v565_v38, %v3361_v5 }
  0x2c   :  { %246 = vadd.xlane.f32.xlu1 %v224_v42  ;;  %166 = vadd.xlane.f32.xlu0 %v136_v43  ;;  %v566_v42 = vld [vmem:[%s5259_s2 + $0x10] sm:$0xff] }
  0x2d   :  { %v630_v43 = vmul.f32 %v566_v42, %v3342_v0  ;;  %v574_v42 = vld [vmem:[%s5259_s2 + $0x50] sm:$0xff] }
  0x30   :  { %248 = vadd.xlane.f32.xlu1 %v225_v46  ;;  %168 = vadd.xlane.f32.xlu0 %v137_v47  ;;  %v567_v46 = vld [vmem:[%s5259_s2 + $0x18] sm:$0xff] }
  0x31   :  { %v631_v47 = vmul.f32 %v567_v46, %v3352_v2 }
  0x34   :  { %252 = vadd.xlane.f32.xlu1 %v227_v50  ;;  %250 = vadd.xlane.f32.xlu0 %v226_v51  ;;  %v568_v50 = vld [vmem:[%s5259_s2 + $0x20] sm:$0xff] }
  0x35   :  { %v632_v51 = vmul.f32 %v568_v50, %v3375_v9 }
  0x38   :  { %256 = vadd.xlane.f32.xlu1 %v229_v54  ;;  %254 = vadd.xlane.f32.xlu0 %v228_v55 }
  0x3c   :  { %260 = vadd.xlane.f32.xlu1 %v231_v58  ;;  %258 = vadd.xlane.f32.xlu0 %v230_v59  ;;  %v569_v58 = vld [vmem:[%s5259_s2 + $0x28] sm:$0xff] }
  0x40   :  { %264 = vadd.xlane.f32.xlu1 %v233_v62  ;;  %262 = vadd.xlane.f32.xlu0 %v232_v63  ;;  %v633_v62 = vmul.f32 %v569_v58, %v3370_v8 }
  0x44   :  { %596 = vadd.xlane.f32.xlu1 %v580_v3 }
  0x48   :  { %598 = vadd.xlane.f32.xlu1 %v581_v4  ;;  %v570_v4 = vld [vmem:[%s5259_s2 + $0x30] sm:$0xff] }
  0x4c   :  { %600 = vadd.xlane.f32.xlu1 %v582_v6  ;;  %v634_v6 = vmul.f32 %v570_v4, %v3389_v13  ;;  %v577_v4 = vld [vmem:[%s5259_s2 + $0x68] sm:$0xff] }
  0x50   :  { %602 = vadd.xlane.f32.xlu1 %v583_v7 }
  0x54   :  { %604 = vadd.xlane.f32.xlu1 %v584_v10 }
  0x58   :  { %606 = vadd.xlane.f32.xlu1 %v585_v11  ;;  %v571_v11 = vld [vmem:[%s5259_s2 + $0x38] sm:$0xff] }
  0x5c   :  { %608 = vadd.xlane.f32.xlu1 %v586_v14  ;;  %v635_v14 = vmul.f32 %v571_v11, %v3384_v12 }
  0x60   :  { %610 = vadd.xlane.f32.xlu1 %v587_v15 }
  0x64   :  { %612 = vadd.xlane.f32.xlu1 %v588_v18 }
  0x68   :  { %614 = vadd.xlane.f32.xlu1 %v589_v19  ;;  %v572_v19 = vld [vmem:[%s5259_s2 + $0x40] sm:$0xff] }
  0x6c   :  { %616 = vadd.xlane.f32.xlu1 %v590_v22 }
  0x70   :  { %618 = vadd.xlane.f32.xlu1 %v591_v23 }
  0x74   :  { %620 = vadd.xlane.f32.xlu1 %v592_v26  ;;  %v636_v26 = vmul.f32 %v572_v19, %v3403_v17 }
  0x78   :  { %622 = vadd.xlane.f32.xlu1 %v593_v27 }
  0x7c   :  { %624 = vadd.xlane.f32.xlu1 %v594_v30 }
  0x80   :  { %626 = vadd.xlane.f32.xlu1 %v595_v31  ;;  %v573_v31 = vld [vmem:[%s5259_s2 + $0x48] sm:$0xff] }
  0x81   :  { %v637_v38 = vmul.f32 %v573_v31, %v3417_v21 }
  0x84   :  { %644 = vadd.xlane.f32.xlu1 %v628_v35 }
  0x88   :  { %646 = vadd.xlane.f32.xlu1 %v629_v39 }
  0x8c   :  { %648 = vadd.xlane.f32.xlu1 %v630_v43 }
  0x90   :  { %650 = vadd.xlane.f32.xlu1 %v631_v47  ;;  %v638_v47 = vmul.f32 %v574_v42, %v3431_v25 }
  0x91   :  { %v143_v54 = vpop.xlane.xlu1 %142  ;;  %v139_v55 = vpop.xlane.xlu0 %138 }
  0x92   :  { %v170_v59 = vadd.f32 1e-12, %v139_v55  ;;  %v172_v43 = vadd.f32 1e-12, %v143_v54  ;;  %v576_v55 = vld [vmem:[%s5259_s2 + $0x60] sm:$0xff] }
  0x93   :  { %v640_v54 = vmul.f32 %v576_v55, %v3459_v33 }
  0x94   :  { %652 = vadd.xlane.f32.xlu1 %v632_v51  ;;  %2988 = vrsqrt.f32 %v170_v59 }
  0x95   :  { %v145_v63 = vpop.xlane.xlu1 %144  ;;  %v141_v3 = vpop.xlane.xlu0 %140 }
  0x96   :  { %v171_v34 = vadd.f32 1e-12, %v141_v3  ;;  %v173_v58 = vadd.f32 1e-12, %v145_v63 }
  0x98   :  { %654 = vadd.xlane.f32.xlu1 %v633_v62 }
  0x99   :  { %v149_v7 = vpop.xlane.xlu1 %148  ;;  %v147_v10 = vpop.xlane.xlu0 %146 }
  0x9a   :  { %v174_v11 = vadd.f32 1e-12, %v147_v10  ;;  %v578_v10 = vld [vmem:[%s5259_s2 + $0x70] sm:$0xff] }
  0x9c   :  { %656 = vadd.xlane.f32.xlu1 %v634_v6 }
  0x9d   :  { %v3627_v15 = vpop.xlane.xlu1 %152  ;;  %v3629_v18 = vpop.xlane.xlu0 %150 }
  0x9e   :  { %v2989_v22 = vpop.eup %2988 }
  0x9f   :  { %v3635_v23 = vmul.f32 %v2989_v22, %v3347_v1  ;;  %v641_v22 = vmul.f32 %v577_v4, %v3473_v37 }
  0xa0   :  { %658 = vadd.xlane.f32.xlu1 %v635_v14 }
  0xa1   :  { %v235_v27 = vpop.xlane.xlu1 %234  ;;  %v3638_v30 = vpop.xlane.xlu0 %154  ;;  %2627 = vmatprep.mubr.f32.mxu0 %v3635_v23 }
  0xa2   :  { %v266_v35 = vadd.f32 1e-12, %v235_v27 }
  0xa4   :  { %2990 = vrsqrt.f32 %v266_v35  ;;  %660 = vadd.xlane.f32.xlu1 %v636_v26 }
  0xa5   :  { %v237_v39 = vpop.xlane.xlu1 %236  ;;  %v3645_v1 = vpop.xlane.xlu0 %156  ;;  %2992 = vrsqrt.f32 %v171_v34 }
  0xa6   :  { %v267_v46 = vadd.f32 1e-12, %v237_v39 }
  0xa8   :  { %2994 = vrsqrt.f32 %v267_v46  ;;  %662 = vadd.xlane.f32.xlu1 %v637_v38 }
  0xa9   :  { %v239_v50 = vpop.xlane.xlu1 %238  ;;  %v3651_v51 = vpop.xlane.xlu0 %158  ;;  %2996 = vrsqrt.f32 %v172_v43  ;;  %v642_v43 = vmul.f32 %v578_v10, %v3487_v41 }
  0xaa   :  { %v268_v59 = vadd.f32 1e-12, %v239_v50 }
  0xac   :  { %2998 = vrsqrt.f32 %v268_v59  ;;  %664 = vadd.xlane.f32.xlu1 %v638_v47 }
  0xad   :  { %v241_v62 = vpop.xlane.xlu1 %240  ;;  %v3657_v3 = vpop.xlane.xlu0 %160  ;;  %3000 = vrsqrt.f32 %v173_v58 }
  0xae   :  { %v2991_v6 = vpop.eup %2990  ;;  %v269_v14 = vadd.f32 1e-12, %v241_v62 }
  0xaf   :  { %v3663_v19 = vmul.f32 %v2991_v6, %v3398_v16  ;;  %v2993_v63 = vpop.eup %2992  ;;  %v175_v16 = vadd.f32 1e-12, %v149_v7 }
  0xb0   :  { %3002 = vrsqrt.f32 %v269_v14  ;;  %668 = vadd.xlane.f32.xlu1 %v640_v54  ;;  %v3675_v38 = vmul.f32 %v2993_v63, %v3361_v5  ;;  %v579_v5 = vld [vmem:[%s5259_s2 + $0x78] sm:$0xff]  ;;  %v177_v14 = vadd.f32 1e-12, %v3627_v15  ;;  %v875_v15 = vld [vmem:[%s5260_s3 + $0x8] sm:$0xff] }
  0xb1   :  { %2683 = vmatprep.mubr.f32.mxu1 %v3663_v19  ;;  %v243_v26 = vpop.xlane.xlu1 %242  ;;  %v3667_v27 = vpop.xlane.xlu0 %162  ;;  %v2876_v31 = vpack.i.bf16 %v3663_v19, %v3635_v23  ;;  %3004 = vrsqrt.f32 %v174_v11  ;;  %v643_v62 = vmul.f32 %v579_v5, %v3501_v45 }
  0xb2   :  { %v2995_v34 = vpop.eup %2994  ;;  %v270_v35 = vadd.f32 1e-12, %v243_v26 }
  0xb3   :  { %2877 = vxpose.xlu0.b32.start [1/16] %v2876_v31, 128  ;;  %v3678_v39 = vmul.f32 %v2995_v34, %v3412_v20  ;;  %v2997_v42 = vpop.eup %2996  ;;  %v176_v20 = vadd.f32 1e-12, %v3629_v18 }
  0xb4   :  { %3006 = vrsqrt.f32 %v270_v35  ;;  %670 = vadd.xlane.f32.xlu1 %v641_v22  ;;  %v3690_v58 = vmul.f32 %v2997_v42, %v3342_v0  ;;  %v874_v0 = vld [vmem:[%s5260_s3] sm:$0xff]  ;;  %v178_v42 = vadd.f32 1e-12, %v3638_v30 }
  0xb5   :  { %v245_v46 = vpop.xlane.xlu1 %244  ;;  %v3681_v47 = vpop.xlane.xlu0 %164  ;;  %v2878_v7 = vpack.i.bf16 %v3678_v39, %v3675_v38  ;;  %3008 = vrsqrt.f32 %v175_v16  ;;  %v906_v31 = vmul.f32 %v874_v0, %v874_v0 }
  0xb6   :  { %v2999_v50 = vpop.eup %2998  ;;  %v271_v55 = vadd.f32 1e-12, %v245_v46 }
  0xb7   :  { %2879 = vxpose.xlu0.b32.cont [2/16] %v2878_v7, 128  ;;  %v3693_v59 = vmul.f32 %v2999_v50, %v3426_v24  ;;  %v3001_v54 = vpop.eup %3000  ;;  %v907_v7 = vmul.f32 %v875_v15, %v875_v15 }
  0xb8   :  { %3010 = vrsqrt.f32 %v271_v55  ;;  %672 = vadd.xlane.f32.xlu1 %v642_v43  ;;  %v3705_v63 = vmul.f32 %v3001_v54, %v3352_v2 }
  0xb9   :  { %v247_v4 = vpop.xlane.xlu1 %246  ;;  %v3696_v6 = vpop.xlane.xlu0 %166  ;;  %v2880_v11 = vpack.i.bf16 %v3693_v59, %v3690_v58  ;;  %3012 = vrsqrt.f32 %v176_v20 }
  0xba   :  { %v3003_v18 = vpop.eup %3002  ;;  %v272_v24 = vadd.f32 1e-12, %v247_v4 }
  0xbb   :  { %2881 = vxpose.xlu0.b32.cont [3/16] %v2880_v11, 128  ;;  %v3708_v22 = vmul.f32 %v3003_v18, %v3440_v28  ;;  %v3005_v26 = vpop.eup %3004 }
  0xbc   :  { %3014 = vrsqrt.f32 %v272_v24  ;;  %674 = vadd.xlane.f32.xlu1 %v643_v62  ;;  %v3718_v28 = vmul.f32 %v3005_v26, %v3375_v9  ;;  %v876_v9 = vld [vmem:[%s5260_s3 + $0x10] sm:$0xff] }
  0xbd   :  { %v249_v10 = vpop.xlane.xlu1 %248  ;;  %v3710_v34 = vpop.xlane.xlu0 %168  ;;  %v2882_v16 = vpack.i.bf16 %v3708_v22, %v3705_v63  ;;  %3016 = vrsqrt.f32 %v177_v14  ;;  %v908_v0 = vmul.f32 %v876_v9, %v876_v9 }
  0xbe   :  { %v3007_v2 = vpop.eup %3006  ;;  %v273_v35 = vadd.f32 1e-12, %v249_v10 }
  0xbf   :  { %2883 = vxpose.xlu0.b32.cont [4/16] %v2882_v16, 128  ;;  %v3722_v43 = vmul.f32 %v3007_v2, %v3454_v32  ;;  %v3009_v46 = vpop.eup %3008  ;;  %v179_v32 = vadd.f32 1e-12, %v3645_v1 }
  0xc0   :  { %3018 = vrsqrt.f32 %v273_v35  ;;  %922 = vadd.xlane.f32.xlu1 %v906_v31  ;;  %v3730_v62 = vmul.f32 %v3009_v46, %v3370_v8  ;;  %v877_v8 = vld [vmem:[%s5260_s3 + $0x18] sm:$0xff] }
  0xc1   :  { %v253_v5 = vpop.xlane.xlu1 %252  ;;  %v251_v50 = vpop.xlane.xlu0 %250  ;;  %v2884_v20 = vpack.i.bf16 %v3722_v43, %v3718_v28  ;;  %3020 = vrsqrt.f32 %v178_v42  ;;  %v909_v15 = vmul.f32 %v877_v8, %v877_v8  ;;  %v880_v8 = vld [vmem:[%s5260_s3 + $0x30] sm:$0xff] }
  0xc2   :  { %v3011_v55 = vpop.eup %3010  ;;  %v275_v54 = vadd.f32 1e-12, %v253_v5  ;;  %v274_v30 = vadd.f32 1e-12, %v251_v50 }
  0xc3   :  { %2885 = vxpose.xlu0.b32.cont [5/16] %v2884_v20, 128  ;;  %v3734_v4 = vmul.f32 %v3011_v55, %v3468_v36  ;;  %v3013_v11 = vpop.eup %3012  ;;  %v180_v36 = vadd.f32 1e-12, %v3651_v51 }
  0xc4   :  { %3022 = vrsqrt.f32 %v275_v54  ;;  %924 = vadd.xlane.f32.xlu1 %v907_v7  ;;  %v3742_v31 = vmul.f32 %v3013_v11, %v3389_v13  ;;  %v878_v13 = vld [vmem:[%s5260_s3 + $0x20] sm:$0xff] }
  0xc5   :  { %3024 = vrsqrt.f32 %v274_v30  ;;  %v257_v18 = vpop.xlane.xlu1 %256  ;;  %v255_v14 = vpop.xlane.xlu0 %254  ;;  %v2886_v24 = vpack.i.bf16 %v3734_v4, %v3730_v62  ;;  %v910_v50 = vmul.f32 %v878_v13, %v878_v13  ;;  %v184_v13 = vadd.f32 1e-12, %v3696_v6 }
  0xc6   :  { %v3015_v26 = vpop.eup %3014  ;;  %v276_v1 = vadd.f32 1e-12, %v255_v14  ;;  %3026 = vrsqrt.f32 %v179_v32  ;;  %v277_v2 = vadd.f32 1e-12, %v257_v18 }
  0xc7   :  { %2887 = vxpose.xlu0.b32.cont [6/16] %v2886_v24, 128  ;;  %v3746_v10 = vmul.f32 %v3015_v26, %v3482_v40  ;;  %v3017_v16 = vpop.eup %3016  ;;  %v181_v40 = vadd.f32 1e-12, %v3657_v3  ;;  %v182_v3 = vadd.f32 1e-12, %v3667_v27 }
  0xc8   :  { %926 = vadd.xlane.f32.xlu1 %v908_v0  ;;  %3028 = vrsqrt.f32 %v276_v1  ;;  %v3754_v51 = vmul.f32 %v3017_v16, %v3384_v12  ;;  %v879_v12 = vld [vmem:[%s5260_s3 + $0x28] sm:$0xff]  ;;  %v912_v16 = vmul.f32 %v880_v8, %v880_v8 }
  0xc9   :  { %v261_v35 = vpop.xlane.xlu1 %260  ;;  %v2888_v42 = vpack.i.bf16 %v3746_v10, %v3742_v31  ;;  %v259_v7 = vpop.xlane.xlu0 %258  ;;  %3030 = vrsqrt.f32 %v180_v36  ;;  %v911_v0 = vmul.f32 %v879_v12, %v879_v12 }
  0xca   :  { %v3019_v46 = vpop.eup %3018  ;;  %3032 = vrsqrt.f32 %v277_v2  ;;  %v278_v9 = vadd.f32 1e-12, %v259_v7  ;;  %v279_v14 = vadd.f32 1e-12, %v261_v35 }
  0xcb   :  { %2889 = vxpose.xlu0.b32.cont [7/16] %v2888_v42, 128  ;;  %v3758_v5 = vmul.f32 %v3019_v46, %v3496_v44  ;;  %v3021_v20 = vpop.eup %3020  ;;  %3034 = vrsqrt.f32 %v181_v40 }
  0xcc   :  { %928 = vadd.xlane.f32.xlu1 %v909_v15  ;;  %v3767_v44 = vmul.f32 %v3021_v20, %v3403_v17  ;;  %3036 = vrsqrt.f32 %v278_v9 }
  0xcd   :  { %v265_v55 = vpop.xlane.xlu1 %264  ;;  %v2890_v54 = vpack.i.bf16 %v3758_v5, %v3754_v51  ;;  %v263_v26 = vpop.xlane.xlu0 %262  ;;  %3038 = vrsqrt.f32 %v182_v3  ;;  %v886_v3 = vld [vmem:[%s5260_s3 + $0x60] sm:$0xff] }
  0xce   :  { %v3023_v30 = vpop.eup %3022  ;;  %3040 = vrsqrt.f32 %v279_v14  ;;  %v280_v2 = vadd.f32 1e-12, %v263_v26  ;;  %v918_v14 = vmul.f32 %v886_v3, %v886_v3 }
  0xcf   :  { %v3025_v32 = vpop.eup %3024  ;;  %2891 = vxpose.xlu0.b32.cont [8/16] %v2890_v54, 128  ;;  %v3780_v17 = vmul.f32 %v3023_v30, %v3510_v48  ;;  %v882_v48 = vld [vmem:[%s5260_s3 + $0x40] sm:$0xff]  ;;  %v185_v54 = vadd.f32 1e-12, %v3710_v34 }
  0xd0   :  { %930 = vadd.xlane.f32.xlu1 %v910_v50  ;;  %v3770_v11 = vmul.f32 %v3025_v32, %v3515_v49  ;;  %v3027_v18 = vpop.eup %3026  ;;  %v183_v49 = vadd.f32 1e-12, %v3681_v47  ;;  %v914_v7 = vmul.f32 %v882_v48, %v882_v48  ;;  %v281_v50 = vadd.f32 1e-12, %v265_v55  ;;  %v890_v48 = vld [vmem:[%s5261_s4] sm:$0xff] }
  0xd1   :  { %v3772_v24 = vpop.xlane.xlu1 %596  ;;  %v3784_v36 = vmul.f32 %v3027_v18, %v3417_v21 }
  0xd2   :  { %v2892_v27 = vpack.i.bf16 %v3770_v11, %v3767_v44  ;;  %v3029_v1 = vpop.eup %3028  ;;  %3042 = vrsqrt.f32 %v183_v49 }
  0xd3   :  { %v3031_v15 = vpop.eup %3030  ;;  %v2894_v42 = vpack.i.bf16 %v3780_v17, %v3784_v36  ;;  %v3794_v47 = vmul.f32 %v3029_v1, %v3529_v53  ;;  %3044 = vrsqrt.f32 %v280_v2  ;;  %v884_v53 = vld [vmem:[%s5260_s3 + $0x50] sm:$0xff] }
  0xd4   :  { %2893 = vxpose.xlu0.b32.cont [9/16] %v2892_v27, 128  ;;  %932 = vadd.xlane.f32.xlu1 %v911_v0  ;;  %v3033_v21 = vpop.eup %3032  ;;  %v3798_v46 = vmul.f32 %v3031_v15, %v3431_v25  ;;  %3046 = vrsqrt.f32 %v184_v13  ;;  %v916_v55 = vmul.f32 %v884_v53, %v884_v53  ;;  %v888_v27 = vld [vmem:[%s5260_s3 + $0x70] sm:$0xff]  ;;  %v954_v13 = vmul.f32 %v890_v48, %v890_v48 }
  0xd5   :  { %v3786_v35 = vpop.xlane.xlu1 %598  ;;  %5319 = vst [vmem:[#allocation6_spill] sm:$0xff] %v3794_v47  ;;  %v3035_v40 = vpop.eup %3034  ;;  %v3808_v6 = vmul.f32 %v3033_v21, %v3524_v52  ;;  %3048 = vrsqrt.f32 %v281_v50  ;;  %v892_v50 = vld [vmem:[%s5261_s4 + $0x10] sm:$0xff] }
  0xd6   :  { %5320 = vst [vmem:[#allocation7_spill] sm:$0xff] %v3798_v46  ;;  %v2896_v9 = vpack.i.bf16 %v3794_v47, %v3798_v46  ;;  %v3037_v25 = vpop.eup %3036  ;;  %v3812_v12 = vmul.f32 %v3035_v40, %v3445_v29  ;;  %3050 = vrsqrt.f32 %v185_v54  ;;  %v894_v54 = vld [vmem:[%s5261_s4 + $0x20] sm:$0xff] }
  0xd7   :  { %5321 = vst [vmem:[#allocation8_spill] sm:$0xff] %v3808_v6  ;;  %v3039_v30 = vpop.eup %3038  ;;  %v3822_v0 = vmul.f32 %v3037_v25, %v3543_v57 }
  0xd8   :  { %2895 = vxpose.xlu0.b32.cont [10/16] %v2894_v42, 128  ;;  %934 = vadd.xlane.f32.xlu1 %v912_v16  ;;  %5322 = vst [vmem:[#allocation9_spill] sm:$0xff] %v3812_v12  ;;  %v2898_v52 = vpack.i.bf16 %v3808_v6, %v3812_v12  ;;  %v3041_v34 = vpop.eup %3040  ;;  %v3825_v18 = vmul.f32 %v3039_v30, %v3459_v33 }
  0xd9   :  { %v3800_v20 = vpop.xlane.xlu1 %600  ;;  %5323 = vst [vmem:[#allocation10_spill] sm:$0xff] %v3822_v0  ;;  %v3835_v57 = vmul.f32 %v3041_v34, %v3538_v56  ;;  %v920_v16 = vmul.f32 %v888_v27, %v888_v27  ;;  %v958_v30 = vmul.f32 %v894_v54, %v894_v54  ;;  %v898_v34 = vld [vmem:[%s5261_s4 + $0x40] sm:$0xff]  ;;  %v900_v27 = vld [vmem:[%s5261_s4 + $0x50] sm:$0xff] }
  0xda   :  { %5324 = vst [vmem:[#allocation11_spill] sm:$0xff] %v3825_v18  ;;  %v2900_v1 = vpack.i.bf16 %v3822_v0, %v3825_v18 }
  0xdb   :  { %5325 = vst [vmem:[#allocation12_spill] sm:$0xff] %v3835_v57 }
  0xdc   :  { %2897 = vxpose.xlu0.b32.cont [11/16] %v2896_v9, 128  ;;  %938 = vadd.xlane.f32.xlu1 %v914_v7  ;;  %v3043_v8 = vpop.eup %3042 }
  0xdd   :  { %v3814_v32 = vpop.xlane.xlu1 %602  ;;  %v3045_v49 = vpop.eup %3044  ;;  %v3838_v33 = vmul.f32 %v3043_v8, %v3473_v37 }
  0xde   :  { %v3047_v15 = vpop.eup %3046  ;;  %v3848_v56 = vmul.f32 %v3045_v49, %v3557_v61 }
  0xdf   :  { %5326 = vst [vmem:[#allocation13_spill] sm:$0xff] %v3838_v33  ;;  %v2902_v42 = vpack.i.bf16 %v3835_v57, %v3838_v33  ;;  %v3049_v21 = vpop.eup %3048  ;;  %v3851_v37 = vmul.f32 %v3047_v15, %v3487_v41  ;;  %v956_v41 = vmul.f32 %v892_v50, %v892_v50  ;;  %v1139_v50 = vmul.f32 %v3635_v23, %v3635_v23 }
  0xe0   :  { %2899 = vxpose.xlu0.b32.cont [12/16] %v2898_v52, 128  ;;  %942 = vadd.xlane.f32.xlu1 %v916_v55  ;;  %5327 = vst [vmem:[#allocation14_spill] sm:$0xff] %v3848_v56  ;;  %v3051_v7 = vpop.eup %3050  ;;  %v3861_v61 = vmul.f32 %v3049_v21, %v3552_v60 }
  0xe1   :  { %v3827_v26 = vpop.xlane.xlu1 %604  ;;  %5328 = vst [vmem:[#allocation15_spill] sm:$0xff] %v3851_v37  ;;  %v2904_v53 = vpack.i.bf16 %v3848_v56, %v3851_v37  ;;  %v3864_v9 = vmul.f32 %v3051_v7, %v3501_v45  ;;  %v896_v45 = vld [vmem:[%s5261_s4 + $0x30] sm:$0xff] }
  0xe2   :  { %5329 = vst [vmem:[#allocation16_spill] sm:$0xff] %v3861_v61  ;;  %v960_v3 = vmul.f32 %v896_v45, %v896_v45 }
  0xe3   :  { %5330 = vst [vmem:[#allocation17_spill] sm:$0xff] %v3864_v9  ;;  %v2906_v55 = vpack.i.bf16 %v3861_v61, %v3864_v9 }
  0xe4   :  { %2901 = vxpose.xlu0.b32.cont [13/16] %v2900_v1, 128  ;;  %946 = vadd.xlane.f32.xlu1 %v918_v14  ;;  %v962_v14 = vmul.f32 %v898_v34, %v898_v34  ;;  %v964_v1 = vmul.f32 %v900_v27, %v900_v27  ;;  %v1145_v27 = vmul.f32 %v3742_v31, %v3742_v31 }
  0xe5   :  { %v3840_v2 = vpop.xlane.xlu1 %606 }
  0xe8   :  { %2903 = vxpose.xlu0.b32.cont [14/16] %v2902_v42, 128  ;;  %950 = vadd.xlane.f32.xlu1 %v920_v16  ;;  %v902_v16 = vld [vmem:[%s5261_s4 + $0x60] sm:$0xff]  ;;  %v904_v42 = vld [vmem:[%s5261_s4 + $0x70] sm:$0xff] }
  0xe9   :  { %v3853_v40 = vpop.xlane.xlu1 %608  ;;  %v966_v15 = vmul.f32 %v902_v16, %v902_v16  ;;  %v968_v21 = vmul.f32 %v904_v42, %v904_v42 }
  0xec   :  { %2905 = vxpose.xlu0.b32.cont [15/16] %v2904_v53, 128  ;;  %970 = vadd.xlane.f32.xlu1 %v954_v13 }
  0xed   :  { %v3866_v25 = vpop.xlane.xlu1 %610 }
  0xf0   :  { %2907 = vxpose.xlu0.b32.end [16/16] %v2906_v55, 128  ;;  %974 = vadd.xlane.f32.xlu1 %v956_v41  ;;  %v1141_v41 = vmul.f32 %v3690_v58, %v3690_v58 }
  0xf1   :  { %v3873_v60 = vpop.xlane.xlu1 %612 }
  0xf4   :  { %978 = vadd.xlane.f32.xlu1 %v958_v30  ;;  %v1143_v30 = vmul.f32 %v3718_v28, %v3718_v28 }
  0xf5   :  { %v3878_v52 = vpop.xlane.xlu1 %614 }
  0xf8   :  { %982 = vadd.xlane.f32.xlu1 %v960_v3 }
  0xf9   :  { %v3883_v8 = vpop.xlane.xlu1 %616 }
  0xfc   :  { %986 = vadd.xlane.f32.xlu1 %v962_v14 }
  0xfd   :  { %v3888_v49 = vpop.xlane.xlu1 %618 }
  0xfe   :  { %5331 = vst [vmem:[#allocation18_spill] sm:$0xff] %v3888_v49 }
 0x100   :  { %990 = vadd.xlane.f32.xlu1 %v964_v1  ;;  %v575_v1 = vld [vmem:[%s5259_s2 + $0x58] sm:$0xff] }
 0x101   :  { %v3893_v48 = vpop.xlane.xlu1 %620  ;;  %v639_v42 = vmul.f32 %v575_v1, %v3445_v29 }
 0x102   :  { %5332 = vst [vmem:[#allocation19_spill] sm:$0xff] %v3893_v48 }
 0x104   :  { %994 = vadd.xlane.f32.xlu1 %v966_v15 }
 0x105   :  { %v3898_v13 = vpop.xlane.xlu1 %622 }
 0x106   :  { %5333 = vst [vmem:[#allocation20_spill] sm:$0xff] %v3898_v13 }
 0x108   :  { %998 = vadd.xlane.f32.xlu1 %v968_v21 }
 0x109   :  { %v3900_v7 = vpop.xlane.xlu1 %624 }
 0x10a   :  { %5334 = vst [vmem:[#allocation21_spill] sm:$0xff] %v3900_v7 }
 0x10c   :  { %1155 = vadd.xlane.f32.xlu1 %v1139_v50 }
 0x10d   :  { %v3904_v53 = vpop.xlane.xlu1 %626 }
 0x10e   :  { %5335 = vst [vmem:[#allocation22_spill] sm:$0xff] %v3904_v53 }
 0x110   :  { %1159 = vadd.xlane.f32.xlu1 %v1141_v41  ;;  %v881_v41 = vld [vmem:[%s5260_s3 + $0x38] sm:$0xff] }
 0x111   :  { %v645_v54 = vpop.xlane.xlu1 %644 }
 0x112   :  { %v3909_v55 = vsub.f32 %v645_v54, %v3772_v24 }
 0x114   :  { %v692_v45 = vand.u32 2147483647, %v3909_v55  ;;  %1163 = vadd.xlane.f32.xlu1 %v1143_v30 }
 0x115   :  { %v647_v3 = vpop.xlane.xlu1 %646 }
 0x116   :  { %v708_v34 = vsub.f32 0.0, %v692_v45  ;;  %v3915_v14 = vsub.f32 %v647_v3, %v3786_v35  ;;  %v1147_v35 = vmul.f32 %v3767_v44, %v3767_v44  ;;  %v913_v3 = vmul.f32 %v881_v41, %v881_v41 }
 0x118   :  { %v724_v24 = vmul.f32 1.442695, %v708_v34  ;;  %v693_v16 = vand.u32 2147483647, %v3915_v14  ;;  %1167 = vadd.xlane.f32.xlu1 %v1145_v27  ;;  %v883_v27 = vld [vmem:[%s5260_s3 + $0x48] sm:$0xff]  ;;  %v805_v13 = vmax.f32 %v3915_v14, 0.0 }
 0x119   :  { %v649_v15 = vpop.xlane.xlu1 %648 }
 0x11a   :  { %3052 = vpow2.f32 %v724_v24  ;;  %v709_v21 = vsub.f32 0.0, %v693_v16  ;;  %v3925_v50 = vsub.f32 %v649_v15, %v3800_v20  ;;  %v1149_v20 = vmul.f32 %v3798_v46, %v3798_v46 }
 0x11b   :  { %v915_v15 = vmul.f32 %v883_v27, %v883_v27  ;;  %v1153_v27 = vmul.f32 %v3851_v37, %v3851_v37 }
 0x11c   :  { %v726_v54 = vmul.f32 1.442695, %v709_v21  ;;  %v694_v30 = vand.u32 2147483647, %v3925_v50  ;;  %1171 = vadd.xlane.f32.xlu1 %v1147_v35  ;;  %v885_v35 = vld [vmem:[%s5260_s3 + $0x58] sm:$0xff] }
 0x11d   :  { %666 = vadd.xlane.f32.xlu0 %v639_v42  ;;  %v651_v45 = vpop.xlane.xlu1 %650 }
 0x11e   :  { %3054 = vpow2.f32 %v726_v54  ;;  %v710_v29 = vsub.f32 0.0, %v694_v30  ;;  %v3934_v34 = vsub.f32 %v651_v45, %v3814_v32  ;;  %v1151_v32 = vmul.f32 %v3825_v18, %v3825_v18 }
 0x120   :  { %v728_v1 = vmul.f32 1.442695, %v710_v29  ;;  %v695_v24 = vand.u32 2147483647, %v3934_v34  ;;  %1175 = vadd.xlane.f32.xlu1 %v1149_v20  ;;  %v917_v29 = vmul.f32 %v885_v35, %v885_v35 }
 0x121   :  { %936 = vadd.xlane.f32.xlu0 %v913_v3  ;;  %v653_v16 = vpop.xlane.xlu1 %652 }
 0x122   :  { %3056 = vpow2.f32 %v728_v1  ;;  %v711_v42 = vsub.f32 0.0, %v695_v24  ;;  %v3943_v21 = vsub.f32 %v653_v16, %v3827_v26  ;;  %v887_v1 = vld [vmem:[%s5260_s3 + $0x68] sm:$0xff] }
 0x123   :  { %v919_v35 = vmul.f32 %v887_v1, %v887_v1 }
 0x124   :  { %v3053_v41 = vpop.eup %3052  ;;  %v730_v54 = vmul.f32 1.442695, %v711_v42  ;;  %v696_v30 = vand.u32 2147483647, %v3943_v21  ;;  %1179 = vadd.xlane.f32.xlu1 %v1151_v32 }
 0x125   :  { %v756_v45 = vadd.f32 1.0, %v3053_v41  ;;  %940 = vadd.xlane.f32.xlu0 %v915_v15  ;;  %v655_v3 = vpop.xlane.xlu1 %654 }
 0x126   :  { %3058 = vpow2.f32 %v730_v54  ;;  %v712_v20 = vsub.f32 0.0, %v696_v30  ;;  %v3952_v26 = vsub.f32 %v655_v3, %v3840_v2  ;;  %v1203_v54 = vmul.f32 %v3663_v19, %v3663_v19  ;;  %v889_v30 = vld [vmem:[%s5260_s3 + $0x78] sm:$0xff] }
 0x127   :  { %3060 = vlog2.f32 %v756_v45  ;;  %v921_v1 = vmul.f32 %v889_v30, %v889_v30  ;;  %v804_v30 = vmax.f32 %v3909_v55, 0.0 }
 0x128   :  { %v3055_v24 = vpop.eup %3054  ;;  %v732_v16 = vmul.f32 1.442695, %v712_v20  ;;  %v697_v42 = vand.u32 2147483647, %v3952_v26  ;;  %1183 = vadd.xlane.f32.xlu1 %v1153_v27 }
 0x129   :  { %v757_v15 = vadd.f32 1.0, %v3055_v24  ;;  %944 = vadd.xlane.f32.xlu0 %v917_v29  ;;  %v657_v32 = vpop.xlane.xlu1 %656 }
 0x12a   :  { %3062 = vpow2.f32 %v732_v16  ;;  %v713_v2 = vsub.f32 0.0, %v697_v42  ;;  %v3961_v41 = vsub.f32 %v657_v32, %v3853_v40  ;;  %v1205_v16 = vmul.f32 %v3693_v59, %v3693_v59  ;;  %v891_v42 = vld [vmem:[%s5261_s4 + $0x8] sm:$0xff] }
 0x12b   :  { %3064 = vlog2.f32 %v757_v15 }
 0x12c   :  { %v3057_v45 = vpop.eup %3056  ;;  %v734_v3 = vmul.f32 1.442695, %v713_v2  ;;  %v698_v20 = vand.u32 2147483647, %v3961_v41  ;;  %1219 = vadd.xlane.f32.xlu1 %v1203_v54 }
 0x12d   :  { %v758_v29 = vadd.f32 1.0, %v3057_v45  ;;  %948 = vadd.xlane.f32.xlu0 %v919_v35  ;;  %v659_v27 = vpop.xlane.xlu1 %658  ;;  %v893_v35 = vld [vmem:[%s5261_s4 + $0x18] sm:$0xff] }
 0x12e   :  { %3066 = vpow2.f32 %v734_v3  ;;  %v714_v40 = vsub.f32 0.0, %v698_v20  ;;  %v3970_v24 = vsub.f32 %v659_v27, %v3866_v25  ;;  %v895_v25 = vld [vmem:[%s5261_s4 + $0x28] sm:$0xff]  ;;  %v1207_v20 = vmul.f32 %v3722_v43, %v3722_v43 }
 0x12f   :  { %3068 = vlog2.f32 %v758_v29  ;;  %v955_v29 = vmul.f32 %v891_v42, %v891_v42  ;;  %v957_v49 = vmul.f32 %v893_v35, %v893_v35  ;;  %v959_v53 = vmul.f32 %v895_v25, %v895_v25 }
 0x130   :  { %v3059_v15 = vpop.eup %3058  ;;  %v736_v32 = vmul.f32 1.442695, %v714_v40  ;;  %v699_v2 = vand.u32 2147483647, %v3970_v24  ;;  %1223 = vadd.xlane.f32.xlu1 %v1205_v16  ;;  %v1209_v42 = vmul.f32 %v3746_v10, %v3746_v10 }
 0x131   :  { %v3061_v54 = vpop.eup %3060  ;;  %v759_v45 = vadd.f32 1.0, %v3059_v15  ;;  %952 = vadd.xlane.f32.xlu0 %v921_v1  ;;  %v661_v3 = vpop.xlane.xlu1 %660 }
 0x132   :  { %v773_v27 = vmul.f32 0.6931472, %v3061_v54  ;;  %3070 = vpow2.f32 %v736_v32  ;;  %v715_v40 = vsub.f32 0.0, %v699_v2  ;;  %v3988_v16 = vsub.f32 %v661_v3, %v3873_v60  ;;  %v897_v32 = vld [vmem:[%s5261_s4 + $0x38] sm:$0xff] }
 0x133   :  { %3072 = vlog2.f32 %v759_v45  ;;  %v806_v3 = vmax.f32 %v3925_v50, 0.0 }
 0x134   :  { %v3063_v7 = vpop.eup %3062  ;;  %v738_v55 = vmul.f32 1.442695, %v715_v40  ;;  %v700_v1 = vand.u32 2147483647, %v3988_v16  ;;  %v2908_v15 = vpop.trf.xlu0  ;;  %1227 = vadd.xlane.f32.xlu1 %v1207_v20  ;;  %v820_v2 = vadd.f32 %v804_v30, %v773_v27  ;;  %v1211_v20 = vmul.f32 %v3770_v11, %v3770_v11 }
 0x135   :  { %v3065_v60 = vpop.eup %3064  ;;  %v760_v54 = vadd.f32 1.0, %v3063_v7  ;;  %972 = vadd.xlane.f32.xlu0 %v955_v29  ;;  %v663_v35 = vpop.xlane.xlu1 %662  ;;  %v961_v40 = vmul.f32 %v897_v32, %v897_v32  ;;  %v2912_v30 = vunpack.i.h.bf16 %v2908_v15 }
 0x136   :  { %v775_v25 = vmul.f32 0.6931472, %v3065_v60  ;;  %3074 = vpow2.f32 %v738_v55  ;;  %v716_v14 = vsub.f32 0.0, %v700_v1  ;;  %v3998_v45 = vsub.f32 %v663_v35, %v3878_v52  ;;  %v899_v52 = vld [vmem:[%s5261_s4 + $0x48] sm:$0xff] }
 0x137   :  { %3076 = vlog2.f32 %v760_v54 }
 0x138   :  { %v3067_v61 = vpop.eup %3066  ;;  %v821_v48 = vadd.f32 %v805_v13, %v775_v25  ;;  %v740_v56 = vmul.f32 1.442695, %v716_v14  ;;  %v701_v7 = vand.u32 2147483647, %v3998_v45  ;;  %v2913_v29 = vpop.trf.xlu0  ;;  %1231 = vadd.xlane.f32.xlu1 %v1209_v42 }
 0x139   :  { %v3069_v27 = vpop.eup %3068  ;;  %v761_v55 = vadd.f32 1.0, %v3067_v61  ;;  %v2917_v1 = vunpack.i.h.bf16 %v2913_v29  ;;  %976 = vadd.xlane.f32.xlu0 %v957_v49  ;;  %v665_v54 = vpop.xlane.xlu1 %664  ;;  %v2914_v42 = vunpack.i.l.bf16 %v2913_v29  ;;  %v807_v49 = vmax.f32 %v3934_v34, 0.0 }
 0x13a   :  { %v852_v50 = vadd.f32 %v821_v48, %v820_v2  ;;  %v777_v60 = vmul.f32 0.6931472, %v3069_v27  ;;  %3078 = vpow2.f32 %v740_v56  ;;  %v717_v32 = vsub.f32 0.0, %v701_v7 }
 0x13b   :  { %3080 = vlog2.f32 %v761_v55  ;;  %v4007_v13 = vpack.c.bf16 %v2917_v1, %v2912_v30  ;;  %v4010_v35 = vsub.f32 %v665_v54, %v3883_v8  ;;  %v963_v48 = vmul.f32 %v899_v52, %v899_v52 }
 0x13c   :  { %v3071_v25 = vpop.eup %3070  ;;  %v822_v61 = vadd.f32 %v806_v3, %v777_v60  ;;  %v742_v14 = vmul.f32 1.442695, %v717_v32  ;;  %v4013_v37 = vpop.trf.xlu0  ;;  %1235 = vadd.xlane.f32.xlu1 %v1211_v20  ;;  %v2909_v30 = vunpack.i.l.bf16 %v2908_v15  ;;  %v1213_v8 = vmul.f32 %v3794_v47, %v3794_v47 }
 0x13d   :  { %v3073_v2 = vpop.eup %3072  ;;  %v762_v56 = vadd.f32 1.0, %v3071_v25  ;;  %v702_v7 = vand.u32 2147483647, %v4010_v35  ;;  %980 = vadd.xlane.f32.xlu0 %v959_v53  ;;  %2796 = vmatprep.subr.bf16.mxu1 %v4007_v13  ;;  %v808_v52 = vmax.f32 %v3943_v21, 0.0  ;;  %v2922_v53 = vunpack.i.h.bf16 %v4013_v37  ;;  %v901_v21 = vld [vmem:[%s5261_s4 + $0x58] sm:$0xff] }
 0x13e   :  { %v838_v29 = vmul.f32 0.0, %v822_v61  ;;  %v779_v3 = vmul.f32 0.6931472, %v3073_v2  ;;  %3082 = vpow2.f32 %v742_v14  ;;  %2798 = vmatpush3.bf16.msra.mxu1 %v4007_v13  ;;  %v2763_v20 = vpack.c.bf16 %v2914_v42, %v2909_v30 }
 0x13f   :  { %3084 = vlog2.f32 %v762_v56  ;;  %v718_v34 = vsub.f32 0.0, %v702_v7  ;;  %v1268_v42 = vmul.f32 %v3678_v39, %v3675_v38  ;;  %v809_v7 = vmax.f32 %v3952_v26, 0.0 }
 0x140   :  { %v3075_v27 = vpop.eup %3074  ;;  %v853_v55 = vadd.f32 %v852_v50, %v838_v29  ;;  %v823_v1 = vadd.f32 %v807_v49, %v779_v3  ;;  %v2923_v15 = vpop.trf.xlu0  ;;  %1239 = vadd.xlane.f32.xlu1 %v1213_v8  ;;  %2764 = vmatprep.subr.bf16.mxu0 %v2763_v20  ;;  %v965_v29 = vmul.f32 %v901_v21, %v901_v21  ;;  %v903_v3 = vld [vmem:[%s5261_s4 + $0x68] sm:$0xff]  ;;  %v2919_v26 = vunpack.i.l.bf16 %v4013_v37 }
 0x141   :  { %v3077_v60 = vpop.eup %3076  ;;  %v763_v32 = vadd.f32 1.0, %v3075_v27  ;;  %v744_v54 = vmul.f32 1.442695, %v718_v34  ;;  %v2927_v25 = vunpack.i.h.bf16 %v2923_v15  ;;  %984 = vadd.xlane.f32.xlu0 %v961_v40  ;;  %2766 = vmatpush3.bf16.msra.mxu0 %v2763_v20  ;;  %v2924_v27 = vunpack.i.l.bf16 %v2923_v15  ;;  %v905_v15 = vld [vmem:[%s5261_s4 + $0x78] sm:$0xff] }
 0x142   :  { %v839_v61 = vmul.f32 0.0, %v823_v1  ;;  %v781_v14 = vmul.f32 0.6931472, %v3077_v60  ;;  %v967_v60 = vmul.f32 %v903_v3, %v903_v3 }
 0x143   :  { %3086 = vlog2.f32 %v763_v32  ;;  %v4027_v50 = vpack.c.bf16 %v2927_v25, %v2922_v53 }
 0x144   :  { %v3079_v49 = vpop.eup %3078  ;;  %v854_v2 = vadd.f32 %v853_v55, %v839_v61  ;;  %v824_v56 = vadd.f32 %v808_v52, %v781_v14  ;;  %3088 = vpow2.f32 %v744_v54  ;;  %v2928_v40 = vpop.trf.xlu0  ;;  %1285 = vadd.xlane.f32.xlu1 %v1268_v42  ;;  %v2767_v61 = vpack.c.bf16 %v2924_v27, %v2919_v26 }
 0x145   :  { %v3081_v30 = vpop.eup %3080  ;;  %v764_v8 = vadd.f32 1.0, %v3079_v49  ;;  %988 = vadd.xlane.f32.xlu0 %v963_v48  ;;  %2800 = vmatprep.subr.bf16.mxu1 %v4027_v50  ;;  %v810_v48 = vmax.f32 %v3961_v41, 0.0  ;;  %v2932_v25 = vunpack.i.h.bf16 %v2928_v40  ;;  %v2929_v27 = vunpack.i.l.bf16 %v2928_v40 }
 0x146   :  { %v840_v34 = vmul.f32 0.0, %v824_v56  ;;  %v783_v20 = vmul.f32 0.6931472, %v3081_v30  ;;  %2802 = vmatpush3.bf16.msra.mxu1 %v4027_v50  ;;  %2768 = vmatprep.subr.bf16.mxu0 %v2767_v61  ;;  %v969_v30 = vmul.f32 %v905_v15, %v905_v15 }
 0x147   :  { %3090 = vlog2.f32 %v764_v8  ;;  %2770 = vmatpush3.bf16.msra.mxu0 %v2767_v61 }
 0x148   :  { %v3083_v55 = vpop.eup %3082  ;;  %v855_v1 = vadd.f32 %v854_v2, %v840_v34  ;;  %v825_v52 = vadd.f32 %v809_v7, %v783_v20  ;;  %v2933_v53 = vpop.trf.xlu0  ;;  %v811_v2 = vmax.f32 %v3970_v24, 0.0 }
 0x149   :  { %v3085_v32 = vpop.eup %3084  ;;  %v765_v54 = vadd.f32 1.0, %v3083_v55  ;;  %v2937_v14 = vunpack.i.h.bf16 %v2933_v53  ;;  %992 = vadd.xlane.f32.xlu0 %v965_v29  ;;  %v2934_v34 = vunpack.i.l.bf16 %v2933_v53  ;;  %v1140_v53 = vmul.f32 %v3675_v38, %v3675_v38 }
 0x14a   :  { %v841_v42 = vmul.f32 0.0, %v825_v52  ;;  %v785_v21 = vmul.f32 0.6931472, %v3085_v32 }
 0x14b   :  { %3092 = vlog2.f32 %v765_v54  ;;  %v4040_v37 = vpack.c.bf16 %v2937_v14, %v2932_v25 }
 0x14c   :  { %v856_v49 = vadd.f32 %v855_v1, %v841_v42  ;;  %v826_v41 = vadd.f32 %v810_v48, %v785_v21  ;;  %v2938_v56 = vpop.trf.xlu0  ;;  %v812_v1 = vmax.f32 %v3988_v16, 0.0  ;;  %v813_v16 = vmax.f32 %v3998_v45, 0.0 }
 0x14d   :  { %v3087_v7 = vpop.eup %3086  ;;  %996 = vadd.xlane.f32.xlu0 %v967_v60  ;;  %2804 = vmatprep.subr.bf16.mxu1 %v4040_v37  ;;  %v2942_v48 = vunpack.i.h.bf16 %v2938_v56  ;;  %v2771_v60 = vpack.c.bf16 %v2934_v34, %v2929_v27  ;;  %v2939_v15 = vunpack.i.l.bf16 %v2938_v56 }
 0x14e   :  { %v3089_v8 = vpop.eup %3088  ;;  %v842_v29 = vmul.f32 0.0, %v826_v41  ;;  %v787_v3 = vmul.f32 0.6931472, %v3087_v7  ;;  %2806 = vmatpush3.bf16.msra.mxu1 %v4040_v37 }
 0x14f   :  { %v766_v20 = vadd.f32 1.0, %v3089_v8  ;;  %2772 = vmatprep.subr.bf16.mxu0 %v2771_v60 }
 0x150   :  { %v857_v26 = vadd.f32 %v856_v49, %v842_v29  ;;  %v827_v55 = vadd.f32 %v811_v2, %v787_v3  ;;  %v2943_v24 = vpop.trf.xlu0  ;;  %2774 = vmatpush3.bf16.msra.mxu0 %v2771_v60 }
 0x151   :  { %v3091_v52 = vpop.eup %3090  ;;  %3094 = vlog2.f32 %v766_v20  ;;  %v2947_v32 = vunpack.i.h.bf16 %v2943_v24  ;;  %1000 = vadd.xlane.f32.xlu0 %v969_v30  ;;  %v2944_v40 = vunpack.i.l.bf16 %v2943_v24  ;;  %v1142_v30 = vmul.f32 %v3705_v63, %v3705_v63 }
 0x152   :  { %v843_v54 = vmul.f32 0.0, %v827_v55  ;;  %v789_v25 = vmul.f32 0.6931472, %v3091_v52  ;;  %v814_v20 = vmax.f32 %v4010_v35, 0.0  ;;  %v1144_v24 = vmul.f32 %v3730_v62, %v3730_v62 }
 0x153   :  { %v4046_v61 = vpack.c.bf16 %v2947_v32, %v2942_v48  ;;  %v2775_v7 = vpack.c.bf16 %v2944_v40, %v2939_v15  ;;  %v1146_v35 = vmul.f32 %v3754_v51, %v3754_v51 }
 0x154   :  { %v858_v14 = vadd.f32 %v857_v26, %v843_v54  ;;  %v828_v42 = vadd.f32 %v812_v1, %v789_v25  ;;  %v2948_v21 = vpop.trf.xlu0 }
 0x155   :  { %v3093_v49 = vpop.eup %3092  ;;  %1157 = vadd.xlane.f32.xlu0 %v1140_v53  ;;  %2808 = vmatprep.subr.bf16.mxu1 %v4046_v61  ;;  %v2952_v45 = vunpack.i.h.bf16 %v2948_v21  ;;  %v2949_v26 = vunpack.i.l.bf16 %v2948_v21 }
 0x156   :  { %v844_v41 = vmul.f32 0.0, %v828_v42  ;;  %v791_v2 = vmul.f32 0.6931472, %v3093_v49  ;;  %2810 = vmatpush3.bf16.msra.mxu1 %v4046_v61  ;;  %2776 = vmatprep.subr.bf16.mxu0 %v2775_v7  ;;  %v1148_v49 = vmul.f32 %v3784_v36, %v3784_v36 }
 0x157   :  { %2778 = vmatpush3.bf16.msra.mxu0 %v2775_v7 }
 0x158   :  { %v859_v8 = vadd.f32 %v858_v14, %v844_v41  ;;  %v829_v29 = vadd.f32 %v813_v16, %v791_v2  ;;  %v2953_v3 = vpop.trf.xlu0  ;;  %v5269_v41 = vmov 0.0  }
 0x159   :  { %v2957_v34 = vunpack.i.h.bf16 %v2953_v3  ;;  %1161 = vadd.xlane.f32.xlu0 %v1142_v30  ;;  %v2954_v27 = vunpack.i.l.bf16 %v2953_v3  ;;  %442 = vst [vmem:[%s5262_s5] sm:$0x1] %v5269_v41  ;;  %v1150_v30 = vmul.f32 %v3812_v12, %v3812_v12 }
 0x15a   :  { %v845_v56 = vmul.f32 0.0, %v829_v29 }
 0x15b   :  { %v3095_v55 = vpop.eup %3094  ;;  %v4056_v1 = vpack.c.bf16 %v2957_v34, %v2952_v45  ;;  %v2779_v32 = vpack.c.bf16 %v2954_v27, %v2949_v26 }
 0x15c   :  { %v860_v52 = vadd.f32 %v859_v8, %v845_v56  ;;  %v793_v48 = vmul.f32 0.6931472, %v3095_v55  ;;  %v2958_v60 = vpop.trf.xlu0  ;;  %v1154_v55 = vmul.f32 %v3864_v9, %v3864_v9 }
 0x15d   :  { %1165 = vadd.xlane.f32.xlu0 %v1144_v24  ;;  %2812 = vmatprep.subr.bf16.mxu1 %v4056_v1  ;;  %v2962_v40 = vunpack.i.h.bf16 %v2958_v60  ;;  %v2959_v21 = vunpack.i.l.bf16 %v2958_v60 }
 0x15e   :  { %v830_v54 = vadd.f32 %v814_v20, %v793_v48  ;;  %2780 = vmatprep.subr.bf16.mxu0 %v2779_v32  ;;  %2814 = vmatpush3.bf16.msra.mxu1 %v4056_v1  ;;  %v1152_v20 = vmul.f32 %v3838_v33, %v3838_v33 }
 0x15f   :  { %2782 = vmatpush3.bf16.msra.mxu0 %v2779_v32 }
 0x160   :  { %v846_v25 = vmul.f32 0.0, %v830_v54  ;;  %v2963_v53 = vpop.trf.xlu0 }
 0x161   :  { %v2967_v14 = vunpack.i.h.bf16 %v2963_v53  ;;  %1169 = vadd.xlane.f32.xlu0 %v1146_v35  ;;  %v2964_v16 = vunpack.i.l.bf16 %v2963_v53  ;;  %v1204_v35 = vmul.f32 %v3678_v39, %v3678_v39  ;;  %v1206_v53 = vmul.f32 %v3708_v22, %v3708_v22 }
 0x162   :  { %v4064_v42 = vadd.f32 %v860_v52, %v846_v25 }
 0x163   :  { %v4066_v15 = vpack.c.bf16 %v2967_v14, %v2962_v40  ;;  %v2783_v7 = vpack.c.bf16 %v2964_v16, %v2959_v21  ;;  %v1208_v40 = vmul.f32 %v3734_v4, %v3734_v4  ;;  %v5337_v16 = vld [vmem:[#allocation14_spill] sm:$0xff]  ;;  %v1270_v21 = vmul.f32 %v3708_v22, %v3705_v63 }
 0x164   :  { %v2968_v2 = vpop.trf.xlu0 }
 0x165   :  { %1173 = vadd.xlane.f32.xlu0 %v1148_v49  ;;  %2816 = vmatprep.subr.bf16.mxu1 %v4066_v15  ;;  %v2972_v8 = vunpack.i.h.bf16 %v2968_v2  ;;  %v2969_v3 = vunpack.i.l.bf16 %v2968_v2  ;;  %v5339_v2 = vld [vmem:[#allocation16_spill] sm:$0xff] }
 0x166   :  { %2784 = vmatprep.subr.bf16.mxu0 %v2783_v7  ;;  %2818 = vmatpush3.bf16.msra.mxu1 %v4066_v15 }
 0x167   :  { %2786 = vmatpush3.bf16.msra.mxu0 %v2783_v7  ;;  %v5340_v7 = vld [vmem:[#allocation20_spill] sm:$0xff] }
 0x168   :  { %v2973_v29 = vpop.trf.xlu0 }
 0x169   :  { %v2977_v45 = vunpack.i.h.bf16 %v2973_v29  ;;  %1177 = vadd.xlane.f32.xlu0 %v1150_v30  ;;  %v2974_v34 = vunpack.i.l.bf16 %v2973_v29  ;;  %v5341_v29 = vld [vmem:[#allocation21_spill] sm:$0xff] }
 0x16b   :  { %v4078_v56 = vpack.c.bf16 %v2977_v45, %v2972_v8  ;;  %v2787_v27 = vpack.c.bf16 %v2974_v34, %v2969_v3 }
 0x16c   :  { %v2978_v26 = vpop.trf.xlu0 }
 0x16d   :  { %1181 = vadd.xlane.f32.xlu0 %v1152_v20  ;;  %2788 = vmatprep.subr.bf16.mxu0 %v2787_v27  ;;  %v2982_v24 = vunpack.i.h.bf16 %v2978_v26  ;;  %v2979_v48 = vunpack.i.l.bf16 %v2978_v26 }
 0x16e   :  { %2820 = vmatprep.subr.bf16.mxu1 %v4078_v56  ;;  %2790 = vmatpush3.bf16.msra.mxu0 %v2787_v27 }
 0x16f   :  { %2822 = vmatpush3.bf16.msra.mxu1 %v4078_v56 }
 0x170   :  { %v2983_v52 = vpop.trf.xlu0 }
 0x171   :  { %v2987_v60 = vunpack.i.h.bf16 %v2983_v52  ;;  %1185 = vadd.xlane.f32.xlu0 %v1154_v55  ;;  %v2984_v32 = vunpack.i.l.bf16 %v2983_v52 }
 0x173   :  { %v4086_v54 = vpack.c.bf16 %v2987_v60, %v2982_v24  ;;  %v2791_v25 = vpack.c.bf16 %v2984_v32, %v2979_v48  ;;  %v5343_v48 = vld [vmem:[#allocation18_spill] sm:$0xff] }
 0x175   :  { %1221 = vadd.xlane.f32.xlu0 %v1204_v35  ;;  %2792 = vmatprep.subr.bf16.mxu0 %v2791_v25 }
 0x176   :  { %2824 = vmatprep.subr.bf16.mxu1 %v4086_v54  ;;  %2794 = vmatpush3.bf16.msra.mxu0 %v2791_v25 }
 0x177   :  { %2826 = vmatpush3.bf16.msra.mxu1 %v4086_v54  ;;  %2828 = vmatprep.subr.bf16.mxu0 %v4007_v13 }
 0x178   :  { %2859 = vmatprep.subr.bf16.mxu1 %v4007_v13 }
 0x179   :  { %1225 = vadd.xlane.f32.xlu0 %v1206_v53  ;;  %2628 = vmatmul.mubr.f32.vlgmr.msra.gmra.mrb[0].mxu0 %v3675_v38 }
 0x17a   :  { %2684 = vmatmul.mubr.f32.vlgmr.msra.gmra.mrb[0].mxu1 %v3678_v39  ;;  %2630 = vmatprep.mubr.f32.mxu0 %v3690_v58  ;;  %v1210_v39 = vmul.f32 %v3758_v5, %v3758_v5 }
 0x17b   :  { %2686 = vmatprep.mubr.f32.mxu1 %v3693_v59  ;;  %2830 = vmatpush3.bf16.msra.mxu0 %v4007_v13 }
 0x17c   :  { %2867 = vmatpush3.bf16.msra.mxu1 %v4007_v13  ;;  %2832 = vmatprep.subr.bf16.mxu0 %v4027_v50  ;;  %v1212_v13 = vmul.f32 %v3780_v17, %v3780_v17 }
 0x17d   :  { %2860 = vmatprep.subr.bf16.mxu1 %v4027_v50  ;;  %1229 = vadd.xlane.f32.xlu0 %v1208_v40 }
 0x17e   :  { %2631 = vmatmul.mubr.f32.gmra.mrb[2].mxu0 %v3705_v63  ;;  %2687 = vmatmul.mubr.f32.gmra.mrb[2].mxu1 %v3708_v22  ;;  %v1271_v22 = vmul.f32 %v3722_v43, %v3718_v28 }
 0x17f   :  { %2633 = vmatprep.mubr.f32.mxu0 %v3718_v28  ;;  %2689 = vmatprep.mubr.f32.mxu1 %v3722_v43  ;;  %v1272_v43 = vmul.f32 %v3734_v4, %v3730_v62 }
 0x180   :  { %2834 = vmatpush3.bf16.msra.mxu0 %v4027_v50  ;;  %2868 = vmatpush3.bf16.msra.mxu1 %v4027_v50  ;;  %v1214_v50 = vmul.f32 %v3808_v6, %v3808_v6 }
 0x181   :  { %2836 = vmatprep.subr.bf16.mxu0 %v4040_v37  ;;  %2861 = vmatprep.subr.bf16.mxu1 %v4040_v37 }
 0x182   :  { %1233 = vadd.xlane.f32.xlu0 %v1210_v39  ;;  %2634 = vmatmul.mubr.f32.gmra.mrb[4].mxu0 %v3730_v62 }
 0x183   :  { %2690 = vmatmul.mubr.f32.gmra.mrb[4].mxu1 %v3734_v4  ;;  %2636 = vmatprep.mubr.f32.mxu0 %v3742_v31 }
 0x184   :  { %2692 = vmatprep.mubr.f32.mxu1 %v3746_v10  ;;  %2838 = vmatpush3.bf16.msra.mxu0 %v4040_v37 }
 0x185   :  { %2869 = vmatpush3.bf16.msra.mxu1 %v4040_v37  ;;  %2840 = vmatprep.subr.bf16.mxu0 %v4046_v61  ;;  %v669_v37 = vpop.xlane.xlu1 %668 }
 0x186   :  { %2862 = vmatprep.subr.bf16.mxu1 %v4046_v61  ;;  %1237 = vadd.xlane.f32.xlu0 %v1212_v13 }
 0x187   :  { %2637 = vmatmul.mubr.f32.gmra.mrb[6].mxu0 %v3754_v51  ;;  %2693 = vmatmul.mubr.f32.gmra.mrb[6].mxu1 %v3758_v5 }
 0x188   :  { %2639 = vmatprep.mubr.f32.mxu0 %v3767_v44  ;;  %2695 = vmatprep.mubr.f32.mxu1 %v3770_v11 }
 0x189   :  { %2842 = vmatpush3.bf16.msra.mxu0 %v4046_v61  ;;  %2870 = vmatpush3.bf16.msra.mxu1 %v4046_v61  ;;  %v1267_v61 = vmul.f32 %v3663_v19, %v3635_v23  ;;  %v671_v14 = vpop.xlane.xlu1 %670  ;;  %v1269_v19 = vmul.f32 %v3693_v59, %v3690_v58  ;;  %v5338_v59 = vld [vmem:[#allocation19_spill] sm:$0xff] }
 0x18a   :  { %2844 = vmatprep.subr.bf16.mxu0 %v4056_v1  ;;  %2863 = vmatprep.subr.bf16.mxu1 %v4056_v1  ;;  %v4167_v49 = vsub.f32 %v669_v37, %v5338_v59  ;;  %v4176_v30 = vsub.f32 %v671_v14, %v5340_v7 }
 0x18b   :  { %1241 = vadd.xlane.f32.xlu0 %v1214_v50  ;;  %2640 = vmatmul.mubr.f32.gmra.mrb[8].mxu0 %v3784_v36 }
 0x18c   :  { %2696 = vmatmul.mubr.f32.gmra.mrb[8].mxu1 %v3780_v17  ;;  %2642 = vmatprep.mubr.f32.mxu0 %v3798_v46  ;;  %v704_v8 = vand.u32 2147483647, %v4167_v49 }
 0x18d   :  { %2698 = vmatprep.mubr.f32.mxu1 %v3794_v47  ;;  %2846 = vmatpush3.bf16.msra.mxu0 %v4056_v1 }
 0x18e   :  { %2871 = vmatpush3.bf16.msra.mxu1 %v4056_v1  ;;  %2848 = vmatprep.subr.bf16.mxu0 %v4066_v15  ;;  %v5336_v1 = vld [vmem:[#allocation15_spill] sm:$0xff]  ;;  %v720_v20 = vsub.f32 0.0, %v704_v8  ;;  %v817_v8 = vmax.f32 %v4176_v30, 0.0 }
 0x18f   :  { %2864 = vmatprep.subr.bf16.mxu1 %v4066_v15  ;;  %1283 = vadd.xlane.f32.xlu0 %v1267_v61 }
 0x190   :  { %2643 = vmatmul.mubr.f32.gmra.mrb[10].mxu0 %v3812_v12  ;;  %2699 = vmatmul.mubr.f32.gmra.mrb[10].mxu1 %v3808_v6  ;;  %v748_v26 = vmul.f32 1.442695, %v720_v20 }
 0x191   :  { %2645 = vmatprep.mubr.f32.mxu0 %v3825_v18  ;;  %2701 = vmatprep.mubr.f32.mxu1 %v3822_v0 }
 0x192   :  { %2850 = vmatpush3.bf16.msra.mxu0 %v4066_v15  ;;  %2872 = vmatpush3.bf16.msra.mxu1 %v4066_v15  ;;  %v673_v15 = vpop.xlane.xlu1 %672  ;;  %3096 = vpow2.f32 %v748_v26 }
 0x193   :  { %2852 = vmatprep.subr.bf16.mxu0 %v4078_v56  ;;  %2865 = vmatprep.subr.bf16.mxu1 %v4078_v56  ;;  %v4182_v3 = vsub.f32 %v673_v15, %v5341_v29  ;;  %v816_v15 = vmax.f32 %v4167_v49, 0.0 }
 0x194   :  { %1287 = vadd.xlane.f32.xlu0 %v1269_v19  ;;  %2646 = vmatmul.mubr.f32.gmra.mrb[12].mxu0 %v3838_v33 }
 0x195   :  { %2702 = vmatmul.mubr.f32.gmra.mrb[12].mxu1 %v3835_v57  ;;  %2648 = vmatprep.mubr.f32.mxu0 %v5336_v1  ;;  %v706_v27 = vand.u32 2147483647, %v4182_v3 }
 0x196   :  { %2704 = vmatprep.mubr.f32.mxu1 %v5337_v16  ;;  %2854 = vmatpush3.bf16.msra.mxu0 %v4078_v56  ;;  %v675_v45 = vpop.xlane.xlu1 %674 }
 0x197   :  { %2873 = vmatpush3.bf16.msra.mxu1 %v4078_v56  ;;  %2856 = vmatprep.subr.bf16.mxu0 %v4086_v54  ;;  %v705_v56 = vand.u32 2147483647, %v4176_v30  ;;  %v722_v55 = vsub.f32 0.0, %v706_v27 }
 0x198   :  { %2866 = vmatprep.subr.bf16.mxu1 %v4086_v54  ;;  %1289 = vadd.xlane.f32.xlu0 %v1270_v21 }
 0x199   :  { %2649 = vmatmul.mubr.f32.gmra.mrb[14].mxu0 %v3864_v9  ;;  %2705 = vmatmul.mubr.f32.gmra.mrb[14].mxu1 %v5339_v2  ;;  %v721_v4 = vsub.f32 0.0, %v705_v56  ;;  %v818_v56 = vmax.f32 %v4182_v3, 0.0 }
 0x19a   :  { %2858 = vmatpush3.bf16.msra.mxu0 %v4086_v54  ;;  %2739 = vmatprep.mubr.f32.mxu0 %v3635_v23  ;;  %v5342_v23 = vld [vmem:[#allocation22_spill] sm:$0xff]  ;;  %v4216_v3 = vpop.xlane.xlu1 %922 }
 0x19b   :  { %2874 = vmatpush3.bf16.msra.mxu1 %v4086_v54  ;;  %2751 = vmatprep.mubr.f32.mxu1 %v3767_v44  ;;  %v4186_v34 = vsub.f32 %v675_v45, %v5342_v23  ;;  %5345 = vst [vmem:[#allocation20_spill] sm:$0xff] %v4216_v3 }
 0x19c   :  { %1291 = vadd.xlane.f32.xlu0 %v1271_v22 }
 0x19d   :  { %2740 = vmatmul.mubr.f32.vlgmr.msra.gmra.mrb[16].mxu0 %v3675_v38  ;;  %v707_v38 = vand.u32 2147483647, %v4186_v34 }
 0x19e   :  { %2752 = vmatmul.mubr.f32.vlgmr.msra.gmra.mrb[16].mxu1 %v3784_v36  ;;  %2742 = vmatprep.mubr.f32.mxu0 %v3690_v58  ;;  %v1273_v58 = vmul.f32 %v3746_v10, %v3742_v31 }
 0x19f   :  { %2754 = vmatprep.mubr.f32.mxu1 %v3798_v46  ;;  %v723_v24 = vsub.f32 0.0, %v707_v38 }
 0x1a0   :  { %1293 = vadd.xlane.f32.xlu0 %v1272_v43 }
 0x1a1   :  { %2743 = vmatmul.mubr.f32.gmra.mrb[18].mxu0 %v3705_v63  ;;  %v750_v63 = vmul.f32 1.442695, %v721_v4  ;;  %v754_v10 = vmul.f32 1.442695, %v723_v24 }
 0x1a2   :  { %2755 = vmatmul.mubr.f32.gmra.mrb[18].mxu1 %v3812_v12  ;;  %2745 = vmatprep.mubr.f32.mxu0 %v3718_v28  ;;  %v752_v28 = vmul.f32 1.442695, %v722_v55 }
 0x1a3   :  { %2757 = vmatprep.mubr.f32.mxu1 %v3825_v18  ;;  %3098 = vpow2.f32 %v750_v63 }
 0x1a4   :  { %1295 = vadd.xlane.f32.xlu0 %v1273_v58  ;;  %3100 = vpow2.f32 %v752_v28  ;;  %v819_v58 = vmax.f32 %v4186_v34, 0.0  ;;  %v4220_v34 = vpop.xlane.xlu1 %924 }
 0x1a5   :  { %2746 = vmatmul.mubr.f32.gmra.mrb[20].mxu0 %v3730_v62  ;;  %3102 = vpow2.f32 %v754_v10  ;;  %5347 = vst [vmem:[#allocation22_spill] sm:$0xff] %v4220_v34 }
 0x1a6   :  { %2758 = vmatmul.mubr.f32.gmra.mrb[20].mxu1 %v3838_v33  ;;  %2748 = vmatprep.mubr.f32.mxu0 %v3742_v31  ;;  %v3097_v31 = vpop.eup %3096 }
 0x1a7   :  { %2760 = vmatprep.mubr.f32.mxu1 %v5336_v1  ;;  %v768_v25 = vadd.f32 1.0, %v3097_v31 }
 0x1a8   :  { %v4224_v31 = vpop.xlane.xlu1 %926 }
 0x1a9   :  { %2749 = vmatmul.mubr.f32.gmra.mrb[22].mxu0 %v3754_v51  ;;  %5349 = vst [vmem:[#allocation23_spill] sm:$0xff] %v4224_v31 }
 0x1aa   :  { %2761 = vmatmul.mubr.f32.gmra.mrb[22].mxu1 %v3864_v9  ;;  %v667_v52 = vpop.xlane.xlu0 %666 }
 0x1ab   :  { %v687_v60 = vsub.f32 %v667_v52, %v5343_v48 }
 0x1ad   :  { %v703_v62 = vand.u32 2147483647, %v687_v60  ;;  %v3099_v35 = vpop.eup %3098  ;;  %v815_v29 = vmax.f32 %v687_v60, 0.0 }
 0x1ae   :  { %v3101_v53 = vpop.eup %3100  ;;  %v769_v39 = vadd.f32 1.0, %v3099_v35 }
 0x1af   :  { %v719_v32 = vsub.f32 0.0, %v703_v62  ;;  %v3103_v40 = vpop.eup %3102  ;;  %v770_v13 = vadd.f32 1.0, %v3101_v53 }
 0x1b0   :  { %v771_v50 = vadd.f32 1.0, %v3103_v40 }
 0x1b1   :  { %v746_v54 = vmul.f32 1.442695, %v719_v32  ;;  %v4218_v32 = vpop.xlane.xlu0 %936 }
 0x1b2   :  { %5346 = vst [vmem:[#allocation21_spill] sm:$0xff] %v4218_v32 }
 0x1b3   :  { %3104 = vpow2.f32 %v746_v54 }
 0x1b4   :  { %3106 = vlog2.f32 %v768_v25 }
 0x1b5   :  { %3108 = vlog2.f32 %v769_v39  ;;  %v4222_v54 = vpop.xlane.xlu0 %940 }
 0x1b6   :  { %3110 = vlog2.f32 %v770_v13  ;;  %5348 = vst [vmem:[#allocation18_spill] sm:$0xff] %v4222_v54 }
 0x1b7   :  { %3112 = vlog2.f32 %v771_v50 }
 0x1b9   :  { %v4226_v35 = vpop.xlane.xlu0 %944 }
 0x1ba   :  { %5350 = vst [vmem:[#allocation24_spill] sm:$0xff] %v4226_v35 }
 0x1bd   :  { %v3105_v37 = vpop.eup %3104  ;;  %v4230_v25 = vpop.xlane.xlu0 %948 }
 0x1be   :  { %v767_v61 = vadd.f32 1.0, %v3105_v37  ;;  %v3107_v14 = vpop.eup %3106  ;;  %5352 = vst [vmem:[#allocation26_spill] sm:$0xff] %v4230_v25 }
 0x1bf   :  { %v3109_v19 = vpop.eup %3108  ;;  %v797_v21 = vmul.f32 0.6931472, %v3107_v14 }
 0x1c0   :  { %3114 = vlog2.f32 %v767_v61  ;;  %v3111_v59 = vpop.eup %3110  ;;  %v799_v7 = vmul.f32 0.6931472, %v3109_v19 }
 0x1c1   :  { %v3113_v22 = vpop.eup %3112  ;;  %v832_v23 = vadd.f32 %v816_v15, %v797_v21  ;;  %v801_v43 = vmul.f32 0.6931472, %v3111_v59  ;;  %v4234_v40 = vpop.xlane.xlu0 %952  ;;  %v527_v59 = vlaneseq }
 0x1c2   :  { %v833_v27 = vadd.f32 %v817_v8, %v799_v7  ;;  %v803_v38 = vmul.f32 0.6931472, %v3113_v22  ;;  %5354 = vst [vmem:[#allocation28_spill] sm:$0xff] %v4234_v40 }
 0x1c3   :  { %v848_v26 = vmul.f32 0.0, %v832_v23  ;;  %v834_v55 = vadd.f32 %v818_v56, %v801_v43  ;;  %v4256_v7 = vand.u32 127, %v527_v59 }
 0x1c4   :  { %v849_v24 = vmul.f32 0.0, %v833_v27  ;;  %v835_v63 = vadd.f32 %v819_v58, %v803_v38 }
 0x1c5   :  { %v850_v30 = vmul.f32 0.0, %v834_v55  ;;  %v4238_v13 = vpop.xlane.xlu0 %972  ;;  %5365 = vst [vmem:[#allocation39_spill] sm:$0xff] %v4256_v7  ;;  %vm529_vm0 = vcmp.lt.s32.totalorder %v4256_v7, 16 }
 0x1c6   :  { %v851_v52 = vmul.f32 0.0, %v835_v63  ;;  %5356 = vst [vmem:[#allocation30_spill] sm:$0xff] %v4238_v13 }
 0x1c9   :  { %v4242_v37 = vpop.xlane.xlu0 %976 }
 0x1ca   :  { %v3115_v45 = vpop.eup %3114  ;;  %5358 = vst [vmem:[#allocation32_spill] sm:$0xff] %v4242_v37 }
 0x1cb   :  { %v795_v20 = vmul.f32 0.6931472, %v3115_v45 }
 0x1cd   :  { %v831_v4 = vadd.f32 %v815_v29, %v795_v20  ;;  %v4246_v14 = vpop.xlane.xlu0 %980 }
 0x1ce   :  { %5360 = vst [vmem:[#allocation34_spill] sm:$0xff] %v4246_v14 }
 0x1cf   :  { %v847_v49 = vmul.f32 0.0, %v831_v4 }
 0x1d1   :  { %v862_v28 = vadd.f32 %v4064_v42, %v847_v49  ;;  %v4228_v42 = vpop.xlane.xlu1 %928  ;;  %v4250_v21 = vpop.xlane.xlu0 %984 }
 0x1d2   :  { %5351 = vst [vmem:[#allocation25_spill] sm:$0xff] %v4228_v42  ;;  %5362 = vst [vmem:[#allocation36_spill] sm:$0xff] %v4250_v21 }
 0x1d3   :  { %v863_v10 = vadd.f32 %v862_v28, %v848_v26 }
 0x1d5   :  { %v864_v48 = vadd.f32 %v863_v10, %v849_v24  ;;  %v4232_v53 = vpop.xlane.xlu1 %930  ;;  %v4254_v22 = vpop.xlane.xlu0 %988 }
 0x1d6   :  { %5353 = vst [vmem:[#allocation27_spill] sm:$0xff] %v4232_v53  ;;  %5364 = vst [vmem:[#allocation38_spill] sm:$0xff] %v4254_v22 }
 0x1d7   :  { %v865_v60 = vadd.f32 %v864_v48, %v850_v30 }
 0x1d9   :  { %v4214_v62 = vadd.f32 %v865_v60, %v851_v52  ;;  %v4236_v39 = vpop.xlane.xlu1 %932  ;;  %v4265_v58 = vpop.xlane.xlu0 %992 }
 0x1da   :  { %5355 = vst [vmem:[#allocation29_spill] sm:$0xff] %v4236_v39  ;;  %5367 = vst [vmem:[#allocation41_spill] sm:$0xff] %v4265_v58 }
 0x1db   :  { %5344 = vst [vmem:[#allocation19_spill] sm:$0xff] %v4214_v62 }
 0x1dd   :  { %v4240_v50 = vpop.xlane.xlu1 %934 }
 0x1de   :  { %5357 = vst [vmem:[#allocation31_spill] sm:$0xff] %v4240_v50 }
 0x1e1   :  { %v4244_v61 = vpop.xlane.xlu1 %938 }
 0x1e2   :  { %5359 = vst [vmem:[#allocation33_spill] sm:$0xff] %v4244_v61 }
 0x1e5   :  { %v4248_v19 = vpop.xlane.xlu1 %942 }
 0x1e6   :  { %5361 = vst [vmem:[#allocation35_spill] sm:$0xff] %v4248_v19 }
 0x1e9   :  { %v4252_v15 = vpop.xlane.xlu1 %946 }
 0x1ea   :  { %5363 = vst [vmem:[#allocation37_spill] sm:$0xff] %v4252_v15 }
 0x1ed   :  { %v4258_v8 = vpop.xlane.xlu1 %950 }
 0x1ee   :  { %5366 = vst [vmem:[#allocation40_spill] sm:$0xff] %v4258_v8 }
 0x1f1   :  { %v4273_v28 = vpop.xlane.xlu1 %970 }
 0x1f2   :  { %5368 = vst [vmem:[#allocation42_spill] sm:$0xff] %v4273_v28 }
 0x24c   :  { %v2629_v29 = vpop.f32.mrb[0].mxu0 }
 0x24d   :  { %v1477_v45 = vmul.f32 5.0, %v2629_v29  ;;  %v2685_v23 = vpop.f32.mrb[0].mxu1  ;;  %v1397_v43 = vpop.f32.mrb[1].mxu0 }
 0x24e   :  { %v1832_v56 = vmul.f32 5.0, %v2685_v23  ;;  %v1752_v20 = vpop.f32.mrb[1].mxu1  ;;  %v1476_v4 = vmul.f32 5.0, %v1397_v43 }
 0x24f   :  { %v1831_v27 = vmul.f32 5.0, %v1752_v20  ;;  %v4263_v38 = vsel %vm529_vm0, %v1477_v45, -1e+30 }
 0x250   :  { %v4269_v26 = vsel %vm529_vm0, %v1832_v56, -1e+30  ;;  %1512 = vmax.xlane.f32.xlu0 %v4263_v38  ;;  %v4282_v48 = vsel %vm529_vm0, %v1476_v4, -1e+30  ;;  %v4289_v56 = vpop.xlane.xlu0 %996  ;;  %v4296_v4 = vpop.xlane.xlu1 %974 }
 0x251   :  { %1865 = vmax.xlane.f32.xlu1 %v4269_v26  ;;  %v2688_v55 = vpop.f32.mrb[2].mxu1  ;;  %v2632_v49 = vpop.f32.mrb[2].mxu0  ;;  %v4277_v10 = vsel %vm529_vm0, %v1831_v27, -1e+30  ;;  %5369 = vst [vmem:[#allocation43_spill] sm:$0xff] %v4289_v56  ;;  %5370 = vst [vmem:[#allocation44_spill] sm:$0xff] %v4296_v4 }
 0x252   :  { %v1407_v24 = vpop.f32.mrb[3].mxu0  ;;  %v1762_v63 = vpop.f32.mrb[3].mxu1  ;;  %v1834_v30 = vmul.f32 5.0, %v2688_v55  ;;  %v1479_v52 = vmul.f32 5.0, %v2632_v49 }
 0x253   :  { %v1833_v45 = vmul.f32 5.0, %v1762_v63  ;;  %v1478_v20 = vmul.f32 5.0, %v1407_v24 }
 0x254   :  { %1863 = vmax.xlane.f32.xlu0 %v4277_v10  ;;  %v4287_v43 = vsel %vm529_vm0, %v1834_v30, -1e+30  ;;  %v4294_v27 = vsel %vm529_vm0, %v1479_v52, -1e+30  ;;  %v4309_v40 = vpop.xlane.xlu0 %1000  ;;  %v4320_v58 = vpop.xlane.xlu1 %978 }
 0x255   :  { %1510 = vmax.xlane.f32.xlu1 %v4282_v48  ;;  %v2635_v60 = vpop.f32.mrb[4].mxu0  ;;  %v4301_v30 = vsel %vm529_vm0, %v1833_v45, -1e+30  ;;  %v4306_v52 = vsel %vm529_vm0, %v1478_v20, -1e+30  ;;  %5371 = vst [vmem:[#allocation45_spill] sm:$0xff] %v4309_v40 }
 0x256   :  { %v2691_v59 = vpop.f32.mrb[4].mxu1  ;;  %v1417_v29 = vpop.f32.mrb[5].mxu0  ;;  %v1481_v24 = vmul.f32 5.0, %v2635_v60  ;;  %5372 = vst [vmem:[#allocation46_spill] sm:$0xff] %v4320_v58 }
 0x257   :  { %v1772_v23 = vpop.f32.mrb[5].mxu1  ;;  %v1836_v63 = vmul.f32 5.0, %v2691_v59  ;;  %v1480_v56 = vmul.f32 5.0, %v1417_v29 }
 0x258   :  { %1869 = vmax.xlane.f32.xlu0 %v4287_v43  ;;  %v1835_v45 = vmul.f32 5.0, %v1772_v23  ;;  %v4318_v20 = vsel %vm529_vm0, %v1481_v24, -1e+30  ;;  %v4334_v24 = vpop.xlane.xlu0 %1157 }
 0x259   :  { %1516 = vmax.xlane.f32.xlu1 %v4294_v27  ;;  %v4313_v15 = vsel %vm529_vm0, %v1836_v63, -1e+30  ;;  %v4325_v19 = vsel %vm529_vm0, %v1480_v56, -1e+30  ;;  %5373 = vst [vmem:[#allocation47_spill] sm:$0xff] %v4334_v24 }
 0x25a   :  { %v2694_v55 = vpop.f32.mrb[6].mxu1  ;;  %v2638_v49 = vpop.f32.mrb[6].mxu0  ;;  %v4331_v54 = vsel %vm529_vm0, %v1835_v45, -1e+30 }
 0x25b   :  { %v1427_v41 = vpop.f32.mrb[7].mxu0  ;;  %v1782_v62 = vpop.f32.mrb[7].mxu1  ;;  %v1838_v40 = vmul.f32 5.0, %v2694_v55  ;;  %v1483_v63 = vmul.f32 5.0, %v2638_v49 }
 0x25c   :  { %1867 = vmax.xlane.f32.xlu0 %v4301_v30  ;;  %v4337_v55 = vpop.xlane.xlu1 %982  ;;  %v1482_v61 = vmul.f32 5.0, %v1427_v41  ;;  %v1837_v49 = vmul.f32 5.0, %v1782_v62  ;;  %v4357_v41 = vpop.xlane.xlu0 %1161 }
 0x25d   :  { %1514 = vmax.xlane.f32.xlu1 %v4306_v52  ;;  %5374 = vst [vmem:[#allocation48_spill] sm:$0xff] %v4337_v55  ;;  %v4343_v56 = vsel %vm529_vm0, %v1838_v40, -1e+30  ;;  %v4352_v24 = vsel %vm529_vm0, %v1483_v63, -1e+30  ;;  %5375 = vst [vmem:[#allocation49_spill] sm:$0xff] %v4357_v41 }
 0x25e   :  { %v2641_v8 = vpop.f32.mrb[8].mxu0  ;;  %v4361_v62 = vsel %vm529_vm0, %v1482_v61, -1e+30  ;;  %v4369_v63 = vsel %vm529_vm0, %v1837_v49, -1e+30 }
 0x25f   :  { %v2697_v59 = vpop.f32.mrb[8].mxu1  ;;  %v1437_v25 = vpop.f32.mrb[9].mxu0  ;;  %v1485_v40 = vmul.f32 5.0, %v2641_v8 }
 0x260   :  { %v1792_v60 = vpop.f32.mrb[9].mxu1  ;;  %1873 = vmax.xlane.f32.xlu0 %v4313_v15  ;;  %v1840_v55 = vmul.f32 5.0, %v2697_v59  ;;  %v4377_v59 = vpop.xlane.xlu1 %986  ;;  %v1484_v61 = vmul.f32 5.0, %v1437_v25 }
 0x261   :  { %1520 = vmax.xlane.f32.xlu1 %v4318_v20  ;;  %5376 = vst [vmem:[#allocation50_spill] sm:$0xff] %v4377_v59  ;;  %v1839_v8 = vmul.f32 5.0, %v1792_v60  ;;  %v4386_v49 = vsel %vm529_vm0, %v1485_v40, -1e+30  ;;  %v4389_v4 = vpop.xlane.xlu0 %1165 }
 0x262   :  { %v4381_v41 = vsel %vm529_vm0, %v1840_v55, -1e+30  ;;  %5377 = vst [vmem:[#allocation51_spill] sm:$0xff] %v4389_v4  ;;  %v4393_v55 = vsel %vm529_vm0, %v1484_v61, -1e+30 }
 0x263   :  { %v2700_v29 = vpop.f32.mrb[10].mxu1  ;;  %v2644_v35 = vpop.f32.mrb[10].mxu0  ;;  %v4397_v40 = vsel %vm529_vm0, %v1839_v8, -1e+30 }
 0x264   :  { %v4327_v23 = vpop.f32.mrb[11].mxu0  ;;  %v1802_v22 = vpop.f32.mrb[11].mxu1  ;;  %1518 = vmax.xlane.f32.xlu0 %v4325_v19  ;;  %v1842_v25 = vmul.f32 5.0, %v2700_v29  ;;  %v1487_v28 = vmul.f32 5.0, %v2644_v35 }
 0x265   :  { %1871 = vmax.xlane.f32.xlu1 %v4331_v54  ;;  %v4403_v1 = vpop.xlane.xlu1 %990  ;;  %v1841_v8 = vmul.f32 5.0, %v1802_v22 }
 0x266   :  { %5378 = vst [vmem:[#allocation52_spill] sm:$0xff] %v4403_v1 }
 0x267   :  { %v4339_v21 = vpop.f32.mrb[12].mxu0 }
 0x268   :  { %v4345_v32 = vpop.f32.mrb[12].mxu1  ;;  %v4347_v45 = vpop.f32.mrb[13].mxu0  ;;  %1877 = vmax.xlane.f32.xlu0 %v4343_v56 }
 0x269   :  { %v4354_v50 = vpop.f32.mrb[13].mxu1  ;;  %1524 = vmax.xlane.f32.xlu1 %v4352_v24 }
 0x26a   :  { %v1843_v57 = vmul.f32 5.0, %v4354_v50 }
 0x26c   :  { %v4363_v14 = vpop.f32.mrb[14].mxu1  ;;  %v4365_v39 = vpop.f32.mrb[14].mxu0  ;;  %1522 = vmax.xlane.f32.xlu0 %v4361_v62 }
 0x26d   :  { %v4372_v58 = vpop.f32.mrb[15].mxu0  ;;  %v4374_v53 = vpop.f32.mrb[15].mxu1  ;;  %1875 = vmax.xlane.f32.xlu1 %v4369_v63 }
 0x270   :  { %v2741_v37 = vpop.f32.mrb[16].mxu0  ;;  %1881 = vmax.xlane.f32.xlu0 %v4381_v41 }
 0x271   :  { %v2753_v42 = vpop.f32.mrb[16].mxu1  ;;  %v2185_v13 = vmul.f32 5.0, %v2741_v37  ;;  %v2105_v34 = vpop.f32.mrb[17].mxu0  ;;  %1528 = vmax.xlane.f32.xlu1 %v4386_v49 }
 0x272   :  { %v2193_v60 = vmul.f32 5.0, %v2753_v42  ;;  %v2184_v59 = vmul.f32 5.0, %v2105_v34  ;;  %v2145_v31 = vpop.f32.mrb[17].mxu1 }
 0x273   :  { %v2192_v3 = vmul.f32 5.0, %v2145_v31  ;;  %v4401_v37 = vsel %vm529_vm0, %v2185_v13, -1e+30 }
 0x274   :  { %v2744_v29 = vpop.f32.mrb[18].mxu0  ;;  %1526 = vmax.xlane.f32.xlu0 %v4393_v55  ;;  %v4408_v34 = vsel %vm529_vm0, %v2184_v59, -1e+30  ;;  %v4412_v31 = vsel %vm529_vm0, %v2193_v60, -1e+30  ;;  %v1486_v60 = vmul.f32 5.0, %v4327_v23 }
 0x275   :  { %v2756_v35 = vpop.f32.mrb[18].mxu1  ;;  %v2187_v42 = vmul.f32 5.0, %v2744_v29  ;;  %v2115_v61 = vpop.f32.mrb[19].mxu0  ;;  %1879 = vmax.xlane.f32.xlu1 %v4397_v40  ;;  %v4417_v13 = vsel %vm529_vm0, %v2192_v3, -1e+30 }
 0x276   :  { %v2195_v4 = vmul.f32 5.0, %v2756_v35  ;;  %v2186_v1 = vmul.f32 5.0, %v2115_v61  ;;  %v2155_v33 = vpop.f32.mrb[19].mxu1  ;;  %v4421_v59 = vsel %vm529_vm0, %v1842_v25, -1e+30  ;;  %v4432_v3 = vpop.xlane.xlu0 %1169 }
 0x277   :  { %v2194_v18 = vmul.f32 5.0, %v2155_v33  ;;  %v4426_v29 = vsel %vm529_vm0, %v1487_v28, -1e+30  ;;  %v4430_v6 = vsel %vm529_vm0, %v2187_v42, -1e+30  ;;  %5379 = vst [vmem:[#allocation53_spill] sm:$0xff] %v4432_v3  ;;  %v4448_v61 = vpop.xlane.xlu1 %994 }
 0x278   :  { %v2747_v22 = vpop.f32.mrb[20].mxu0  ;;  %1885 = vmax.xlane.f32.xlu0 %v4421_v59  ;;  %v4437_v25 = vsel %vm529_vm0, %v2186_v1, -1e+30  ;;  %v4441_v33 = vsel %vm529_vm0, %v2195_v4, -1e+30  ;;  %5380 = vst [vmem:[#allocation54_spill] sm:$0xff] %v4448_v61 }
 0x279   :  { %v2759_v23 = vpop.f32.mrb[20].mxu1  ;;  %v2189_v28 = vmul.f32 5.0, %v2747_v22  ;;  %v2125_v35 = vpop.f32.mrb[21].mxu0  ;;  %1532 = vmax.xlane.f32.xlu1 %v4426_v29  ;;  %v4446_v42 = vsel %vm529_vm0, %v2194_v18, -1e+30  ;;  %v1844_v4 = vmul.f32 5.0, %v4345_v32 }
 0x27a   :  { %v2197_v3 = vmul.f32 5.0, %v2759_v23  ;;  %v2188_v12 = vmul.f32 5.0, %v2125_v35  ;;  %v2165_v9 = vpop.f32.mrb[21].mxu1  ;;  %v4452_v1 = vsel %vm529_vm0, %v1841_v8, -1e+30  ;;  %v1489_v61 = vmul.f32 5.0, %v4339_v21 }
 0x27b   :  { %v2196_v2 = vmul.f32 5.0, %v2165_v9  ;;  %v4457_v22 = vsel %vm529_vm0, %v1486_v60, -1e+30  ;;  %v4461_v18 = vsel %vm529_vm0, %v2189_v28, -1e+30  ;;  %v1488_v21 = vmul.f32 5.0, %v4347_v45 }
 0x27c   :  { %v2750_v23 = vpop.f32.mrb[22].mxu0  ;;  %1530 = vmax.xlane.f32.xlu0 %v4457_v22  ;;  %v4467_v8 = vsel %vm529_vm0, %v2188_v12, -1e+30  ;;  %v4471_v9 = vsel %vm529_vm0, %v2197_v3, -1e+30  ;;  %v4479_v12 = vpop.xlane.xlu0 %1173 }
 0x27d   :  { %v2762_v32 = vpop.f32.mrb[22].mxu1  ;;  %v2191_v60 = vmul.f32 5.0, %v2750_v23  ;;  %v2135_v35 = vpop.f32.mrb[23].mxu0  ;;  %1883 = vmax.xlane.f32.xlu1 %v4452_v1  ;;  %v4476_v28 = vsel %vm529_vm0, %v2196_v2, -1e+30  ;;  %5381 = vst [vmem:[#allocation55_spill] sm:$0xff] %v4479_v12 }
 0x27e   :  { %v2199_v47 = vmul.f32 5.0, %v2762_v32  ;;  %v2190_v46 = vmul.f32 5.0, %v2135_v35  ;;  %v2175_v16 = vpop.f32.mrb[23].mxu1  ;;  %v4484_v23 = vsel %vm529_vm0, %v1844_v4, -1e+30  ;;  %v4490_v2 = vpop.xlane.xlu1 %998  ;;  %v1846_v32 = vmul.f32 5.0, %v4363_v14 }
 0x27f   :  { %v2198_v3 = vmul.f32 5.0, %v2175_v16  ;;  %v4488_v0 = vsel %vm529_vm0, %v2191_v60, -1e+30  ;;  %5382 = vst [vmem:[#allocation56_spill] sm:$0xff] %v4490_v2  ;;  %v4495_v45 = vsel %vm529_vm0, %v1489_v61, -1e+30 }
 0x280   :  { %1889 = vmax.xlane.f32.xlu0 %v4484_v23  ;;  %v4499_v50 = vsel %vm529_vm0, %v2190_v46, -1e+30  ;;  %v4503_v16 = vsel %vm529_vm0, %v2199_v47, -1e+30  ;;  %v4513_v61 = vsel %vm529_vm0, %v1488_v21, -1e+30  ;;  %v4521_v47 = vpop.xlane.xlu0 %1177 }
 0x281   :  { %1536 = vmax.xlane.f32.xlu1 %v4495_v45  ;;  %v4508_v4 = vsel %vm529_vm0, %v2198_v3, -1e+30  ;;  %v1491_v60 = vmul.f32 5.0, %v4365_v39  ;;  %v4518_v46 = vsel %vm529_vm0, %v1843_v57, -1e+30  ;;  %5383 = vst [vmem:[#allocation57_spill] sm:$0xff] %v4521_v47 }
 0x282   :  { %v4524_v35 = vpop.xlane.xlu1 %1155  ;;  %v1490_v14 = vmul.f32 5.0, %v4372_v58  ;;  %v4529_v21 = vsel %vm529_vm0, %v1846_v32, -1e+30  ;;  %v1845_v39 = vmul.f32 5.0, %v4374_v53 }
 0x283   :  { %5384 = vst [vmem:[#allocation58_spill] sm:$0xff] %v4524_v35  ;;  %v4535_v57 = vsel %vm529_vm0, %v1491_v60, -1e+30 }
 0x284   :  { %1534 = vmax.xlane.f32.xlu0 %v4513_v61  ;;  %v4538_v3 = vpop.xlane.xlu0 %1181  ;;  %v4542_v47 = vsel %vm529_vm0, %v1490_v14, -1e+30  ;;  %v4548_v32 = vsel %vm529_vm0, %v1845_v39, -1e+30 }
 0x285   :  { %1887 = vmax.xlane.f32.xlu1 %v4518_v46  ;;  %5385 = vst [vmem:[#allocation59_spill] sm:$0xff] %v4538_v3 }
 0x286   :  { %v4544_v58 = vpop.xlane.xlu1 %1159 }
 0x287   :  { %5386 = vst [vmem:[#allocation60_spill] sm:$0xff] %v4544_v58 }
 0x288   :  { %1893 = vmax.xlane.f32.xlu0 %v4529_v21  ;;  %v4553_v53 = vpop.xlane.xlu0 %1185 }
 0x289   :  { %1540 = vmax.xlane.f32.xlu1 %v4535_v57  ;;  %5387 = vst [vmem:[#allocation61_spill] sm:$0xff] %v4553_v53 }
 0x28a   :  { %v4556_v60 = vpop.xlane.xlu1 %1163 }
 0x28b   :  { %5388 = vst [vmem:[#allocation62_spill] sm:$0xff] %v4556_v60 }
 0x28c   :  { %1538 = vmax.xlane.f32.xlu0 %v4542_v47  ;;  %v4560_v14 = vpop.xlane.xlu0 %1221 }
 0x28d   :  { %1891 = vmax.xlane.f32.xlu1 %v4548_v32  ;;  %5389 = vst [vmem:[#allocation63_spill] sm:$0xff] %v4560_v14 }
 0x28e   :  { %v4562_v39 = vpop.xlane.xlu1 %1167 }
 0x28f   :  { %5390 = vst [vmem:[#allocation64_spill] sm:$0xff] %v4562_v39 }
 0x290   :  { %2218 = vmax.xlane.f32.xlu0 %v4401_v37  ;;  %v4567_v7 = vpop.xlane.xlu0 %1225 }
 0x291   :  { %2216 = vmax.xlane.f32.xlu1 %v4408_v34  ;;  %5391 = vst [vmem:[#allocation65_spill] sm:$0xff] %v4567_v7 }
 0x292   :  { %v4570_v53 = vpop.xlane.xlu1 %1171 }
 0x293   :  { %5392 = vst [vmem:[#allocation66_spill] sm:$0xff] %v4570_v53  ;;  %v1274_v53 = vmul.f32 %v3758_v5, %v3754_v51 }
 0x294   :  { %2234 = vmax.xlane.f32.xlu0 %v4412_v31  ;;  %v4574_v3 = vpop.xlane.xlu0 %1229 }
 0x295   :  { %2232 = vmax.xlane.f32.xlu1 %v4417_v13  ;;  %5393 = vst [vmem:[#allocation67_spill] sm:$0xff] %v4574_v3 }
 0x296   :  { %v4576_v14 = vpop.xlane.xlu1 %1175 }
 0x297   :  { %5394 = vst [vmem:[#allocation68_spill] sm:$0xff] %v4576_v14 }
 0x298   :  { %2222 = vmax.xlane.f32.xlu0 %v4430_v6  ;;  %v4581_v12 = vpop.xlane.xlu0 %1233 }
 0x299   :  { %2220 = vmax.xlane.f32.xlu1 %v4437_v25  ;;  %5395 = vst [vmem:[#allocation69_spill] sm:$0xff] %v4581_v12 }
 0x29a   :  { %v4584_v7 = vpop.xlane.xlu1 %1179 }
 0x29b   :  { %5396 = vst [vmem:[#allocation70_spill] sm:$0xff] %v4584_v7 }
 0x29c   :  { %2238 = vmax.xlane.f32.xlu0 %v4441_v33  ;;  %v4589_v3 = vpop.xlane.xlu0 %1237 }
 0x29d   :  { %2236 = vmax.xlane.f32.xlu1 %v4446_v42  ;;  %5397 = vst [vmem:[#allocation71_spill] sm:$0xff] %v4589_v3 }
 0x29e   :  { %v4591_v14 = vpop.xlane.xlu1 %1183 }
 0x29f   :  { %5398 = vst [vmem:[#allocation72_spill] sm:$0xff] %v4591_v14 }
 0x2a0   :  { %2226 = vmax.xlane.f32.xlu0 %v4461_v18  ;;  %v4594_v39 = vpop.xlane.xlu0 %1241 }
 0x2a1   :  { %2224 = vmax.xlane.f32.xlu1 %v4467_v8  ;;  %5399 = vst [vmem:[#allocation73_spill] sm:$0xff] %v4594_v39 }
 0x2a2   :  { %v4596_v60 = vpop.xlane.xlu1 %1219 }
 0x2a3   :  { %5400 = vst [vmem:[#allocation74_spill] sm:$0xff] %v4596_v60 }
 0x2a4   :  { %2242 = vmax.xlane.f32.xlu0 %v4471_v9  ;;  %v4598_v12 = vpop.xlane.xlu0 %1283 }
 0x2a5   :  { %2240 = vmax.xlane.f32.xlu1 %v4476_v28  ;;  %5401 = vst [vmem:[#allocation75_spill] sm:$0xff] %v4598_v12 }
 0x2a6   :  { %v4600_v58 = vpop.xlane.xlu1 %1223 }
 0x2a7   :  { %5402 = vst [vmem:[#allocation76_spill] sm:$0xff] %v4600_v58 }
 0x2a8   :  { %2230 = vmax.xlane.f32.xlu0 %v4488_v0  ;;  %v4602_v7 = vpop.xlane.xlu0 %1287 }
 0x2a9   :  { %2228 = vmax.xlane.f32.xlu1 %v4499_v50  ;;  %5403 = vst [vmem:[#allocation77_spill] sm:$0xff] %v4602_v7 }
 0x2aa   :  { %v4604_v51 = vpop.xlane.xlu1 %1227 }
 0x2ab   :  { %5404 = vst [vmem:[#allocation78_spill] sm:$0xff] %v4604_v51 }
 0x2ac   :  { %1297 = vadd.xlane.f32.xlu0 %v1274_v53  ;;  %v4606_v5 = vpop.xlane.xlu0 %1289 }
 0x2ad   :  { %2244 = vmax.xlane.f32.xlu1 %v4508_v4  ;;  %5405 = vst [vmem:[#allocation79_spill] sm:$0xff] %v4606_v5 }
 0x2ae   :  { %v4608_v53 = vpop.xlane.xlu1 %1231 }
 0x2af   :  { %5406 = vst [vmem:[#allocation80_spill] sm:$0xff] %v4608_v53 }
 0x2b0   :  { %2246 = vmax.xlane.f32.xlu0 %v4503_v16  ;;  %v4610_v3 = vpop.xlane.xlu0 %1291 }
 0x2b1   :  { %5407 = vst [vmem:[#allocation81_spill] sm:$0xff] %v4610_v3 }
 0x2b2   :  { %v4612_v14 = vpop.xlane.xlu1 %1235 }
 0x2b3   :  { %5408 = vst [vmem:[#allocation82_spill] sm:$0xff] %v4612_v14 }
 0x2b4   :  { %v4614_v35 = vpop.xlane.xlu0 %1293 }
 0x2b5   :  { %5409 = vst [vmem:[#allocation83_spill] sm:$0xff] %v4614_v35 }
 0x2b6   :  { %v4616_v39 = vpop.xlane.xlu1 %1239 }
 0x2b7   :  { %5410 = vst [vmem:[#allocation84_spill] sm:$0xff] %v4616_v39 }
 0x2b8   :  { %v4618_v60 = vpop.xlane.xlu0 %1295 }
 0x2b9   :  { %5411 = vst [vmem:[#allocation85_spill] sm:$0xff] %v4618_v60 }
 0x2ba   :  { %v4620_v12 = vpop.xlane.xlu1 %1285 }
 0x2bb   :  { %5412 = vst [vmem:[#allocation86_spill] sm:$0xff] %v4620_v12 }
 0x2dd   :  { %v4622_v58 = vpop.xlane.xlu0 %1512 }
 0x2de   :  { %v4624_v7 = vpop.xlane.xlu1 %1865  ;;  %v1543_v5 = vsub.f32 %v4263_v38, %v4622_v58 }
 0x2df   :  { %v1896_v3 = vsub.f32 %v4269_v26, %v4624_v7 }
 0x2e0   :  { %v1560_v53 = vmul.f32 1.442695, %v1543_v5 }
 0x2e1   :  { %v1913_v14 = vmul.f32 1.442695, %v1896_v3  ;;  %v4630_v51 = vpop.xlane.xlu0 %1863 }
 0x2e2   :  { %5413 = vst [vmem:[#allocation87_spill] sm:$0xff] %v4630_v51  ;;  %3116 = vpow2.f32 %v1560_v53  ;;  %v1895_v60 = vsub.f32 %v4277_v10, %v4630_v51  ;;  %v4634_v35 = vpop.xlane.xlu1 %1510 }
 0x2e3   :  { %3118 = vpow2.f32 %v1913_v14  ;;  %v1542_v12 = vsub.f32 %v4282_v48, %v4634_v35 }
 0x2e4   :  { %v1911_v39 = vmul.f32 1.442695, %v1895_v60 }
 0x2e5   :  { %v1558_v2 = vmul.f32 1.442695, %v1542_v12  ;;  %v4638_v38 = vpop.xlane.xlu0 %1869 }
 0x2e6   :  { %5414 = vst [vmem:[#allocation88_spill] sm:$0xff] %v4638_v38  ;;  %3120 = vpow2.f32 %v1911_v39  ;;  %v1898_v26 = vsub.f32 %v4287_v43, %v4638_v38  ;;  %v4642_v3 = vpop.xlane.xlu1 %1516 }
 0x2e7   :  { %3122 = vpow2.f32 %v1558_v2  ;;  %v1545_v10 = vsub.f32 %v4294_v27, %v4642_v3 }
 0x2e8   :  { %v1917_v5 = vmul.f32 1.442695, %v1898_v26 }
 0x2e9   :  { %v1564_v53 = vmul.f32 1.442695, %v1545_v10  ;;  %v4646_v14 = vpop.xlane.xlu0 %1867 }
 0x2ea   :  { %3124 = vpow2.f32 %v1917_v5  ;;  %v1897_v48 = vsub.f32 %v4301_v30, %v4646_v14  ;;  %v4650_v12 = vpop.xlane.xlu1 %1514 }
 0x2eb   :  { %3126 = vpow2.f32 %v1564_v53  ;;  %v1544_v43 = vsub.f32 %v4306_v52, %v4650_v12 }
 0x2ec   :  { %v3117_v60 = vpop.eup %3116  ;;  %v1915_v39 = vmul.f32 1.442695, %v1897_v48 }
 0x2ed   :  { %v3119_v2 = vpop.eup %3118  ;;  %v1562_v38 = vmul.f32 1.442695, %v1544_v43  ;;  %v4654_v51 = vpop.xlane.xlu0 %1873  ;;  %1592 = vadd.xlane.f32.xlu0 %v3117_v60 }
 0x2ee   :  { %3128 = vpow2.f32 %v1915_v39  ;;  %v1900_v27 = vsub.f32 %v4313_v15, %v4654_v51  ;;  %v4658_v26 = vpop.xlane.xlu1 %1520  ;;  %1945 = vadd.xlane.f32.xlu1 %v3119_v2 }
 0x2ef   :  { %3130 = vpow2.f32 %v1562_v38  ;;  %v1547_v30 = vsub.f32 %v4318_v20, %v4658_v26 }
 0x2f0   :  { %v3121_v10 = vpop.eup %3120  ;;  %v1921_v52 = vmul.f32 1.442695, %v1900_v27 }
 0x2f1   :  { %v3123_v5 = vpop.eup %3122  ;;  %v1568_v53 = vmul.f32 1.442695, %v1547_v30  ;;  %v4662_v48 = vpop.xlane.xlu0 %1518  ;;  %1943 = vadd.xlane.f32.xlu0 %v3121_v10 }
 0x2f2   :  { %3132 = vpow2.f32 %v1921_v52  ;;  %v4664_v43 = vpop.xlane.xlu1 %1871  ;;  %v1546_v15 = vsub.f32 %v4325_v19, %v4662_v48  ;;  %1590 = vadd.xlane.f32.xlu1 %v3123_v5 }
 0x2f3   :  { %3134 = vpow2.f32 %v1568_v53  ;;  %v1899_v38 = vsub.f32 %v4331_v54, %v4664_v43 }
 0x2f4   :  { %v3125_v60 = vpop.eup %3124  ;;  %v1566_v20 = vmul.f32 1.442695, %v1546_v15 }
 0x2f5   :  { %v3127_v39 = vpop.eup %3126  ;;  %v1919_v2 = vmul.f32 1.442695, %v1899_v38  ;;  %v4670_v27 = vpop.xlane.xlu0 %1877  ;;  %1949 = vadd.xlane.f32.xlu0 %v3125_v60 }
 0x2f6   :  { %3136 = vpow2.f32 %v1566_v20  ;;  %v1902_v30 = vsub.f32 %v4343_v56, %v4670_v27  ;;  %v4674_v10 = vpop.xlane.xlu1 %1524  ;;  %1596 = vadd.xlane.f32.xlu1 %v3127_v39 }
 0x2f7   :  { %3138 = vpow2.f32 %v1919_v2  ;;  %v1549_v19 = vsub.f32 %v4352_v24, %v4674_v10 }
 0x2f8   :  { %v3129_v52 = vpop.eup %3128  ;;  %v1925_v54 = vmul.f32 1.442695, %v1902_v30 }
 0x2f9   :  { %v3131_v5 = vpop.eup %3130  ;;  %v1572_v53 = vmul.f32 1.442695, %v1549_v19  ;;  %v4678_v15 = vpop.xlane.xlu0 %1522  ;;  %1947 = vadd.xlane.f32.xlu0 %v3129_v52 }
 0x2fa   :  { %3140 = vpow2.f32 %v1925_v54  ;;  %v4680_v38 = vpop.xlane.xlu1 %1875  ;;  %v1548_v56 = vsub.f32 %v4361_v62, %v4678_v15  ;;  %1594 = vadd.xlane.f32.xlu1 %v3131_v5 }
 0x2fb   :  { %3142 = vpow2.f32 %v1572_v53  ;;  %v1901_v60 = vsub.f32 %v4369_v63, %v4680_v38 }
 0x2fc   :  { %v3133_v20 = vpop.eup %3132  ;;  %v1570_v24 = vmul.f32 1.442695, %v1548_v56 }
 0x2fd   :  { %v3135_v39 = vpop.eup %3134  ;;  %v1923_v2 = vmul.f32 1.442695, %v1901_v60  ;;  %v4686_v30 = vpop.xlane.xlu0 %1881  ;;  %1953 = vadd.xlane.f32.xlu0 %v3133_v20 }
 0x2fe   :  { %5415 = vst [vmem:[#allocation89_spill] sm:$0xff] %v4686_v30  ;;  %3144 = vpow2.f32 %v1570_v24  ;;  %v1904_v19 = vsub.f32 %v4381_v41, %v4686_v30  ;;  %v4690_v52 = vpop.xlane.xlu1 %1528  ;;  %1600 = vadd.xlane.f32.xlu1 %v3135_v39  ;;  %v5486_v30 = vld [vmem:[#allocation28_spill] sm:$0xff] }
 0x2ff   :  { %5416 = vst [vmem:[#allocation90_spill] sm:$0xff] %v4690_v52  ;;  %3146 = vpow2.f32 %v1923_v2  ;;  %v1551_v62 = vsub.f32 %v4386_v49, %v4690_v52 }
 0x300   :  { %v3137_v54 = vpop.eup %3136  ;;  %v1929_v63 = vmul.f32 1.442695, %v1904_v19 }
 0x301   :  { %v3139_v5 = vpop.eup %3138  ;;  %v1576_v53 = vmul.f32 1.442695, %v1551_v62  ;;  %v4694_v56 = vpop.xlane.xlu0 %1526  ;;  %1598 = vadd.xlane.f32.xlu0 %v3137_v54 }
 0x302   :  { %5417 = vst [vmem:[#allocation91_spill] sm:$0xff] %v4694_v56  ;;  %3148 = vpow2.f32 %v1929_v63  ;;  %v4696_v60 = vpop.xlane.xlu1 %1879  ;;  %v1550_v41 = vsub.f32 %v4393_v55, %v4694_v56  ;;  %1951 = vadd.xlane.f32.xlu1 %v3139_v5 }
 0x303   :  { %5418 = vst [vmem:[#allocation92_spill] sm:$0xff] %v4696_v60  ;;  %3150 = vpow2.f32 %v1576_v53  ;;  %v1903_v20 = vsub.f32 %v4397_v40, %v4696_v60 }
 0x304   :  { %v3141_v24 = vpop.eup %3140  ;;  %v1574_v49 = vmul.f32 1.442695, %v1550_v41 }
 0x305   :  { %v3143_v39 = vpop.eup %3142  ;;  %v1927_v2 = vmul.f32 1.442695, %v1903_v20  ;;  %v4702_v19 = vpop.xlane.xlu0 %1885  ;;  %1957 = vadd.xlane.f32.xlu0 %v3141_v24 }
 0x306   :  { %5419 = vst [vmem:[#allocation93_spill] sm:$0xff] %v4702_v19  ;;  %3152 = vpow2.f32 %v1574_v49  ;;  %v1906_v62 = vsub.f32 %v4421_v59, %v4702_v19  ;;  %v4706_v54 = vpop.xlane.xlu1 %1532  ;;  %1604 = vadd.xlane.f32.xlu1 %v3143_v39 }
 0x307   :  { %5420 = vst [vmem:[#allocation94_spill] sm:$0xff] %v4706_v54  ;;  %3154 = vpow2.f32 %v1927_v2  ;;  %v1553_v55 = vsub.f32 %v4426_v29, %v4706_v54  ;;  %v5479_v54 = vld [vmem:[#allocation37_spill] sm:$0xff] }
 0x308   :  { %v3145_v63 = vpop.eup %3144  ;;  %v1933_v40 = vmul.f32 1.442695, %v1906_v62 }
 0x309   :  { %v3147_v5 = vpop.eup %3146  ;;  %v1580_v53 = vmul.f32 1.442695, %v1553_v55  ;;  %v4710_v41 = vpop.xlane.xlu0 %1530  ;;  %1602 = vadd.xlane.f32.xlu0 %v3145_v63 }
 0x30a   :  { %5421 = vst [vmem:[#allocation95_spill] sm:$0xff] %v4710_v41  ;;  %3156 = vpow2.f32 %v1933_v40  ;;  %v4712_v20 = vpop.xlane.xlu1 %1883  ;;  %v1552_v59 = vsub.f32 %v4457_v22, %v4710_v41  ;;  %1955 = vadd.xlane.f32.xlu1 %v3147_v5  ;;  %v5478_v41 = vld [vmem:[#allocation41_spill] sm:$0xff] }
 0x30b   :  { %5422 = vst [vmem:[#allocation96_spill] sm:$0xff] %v4712_v20  ;;  %3158 = vpow2.f32 %v1580_v53  ;;  %v1905_v24 = vsub.f32 %v4452_v1, %v4712_v20  ;;  %v5475_v20 = vld [vmem:[#allocation35_spill] sm:$0xff] }
 0x30c   :  { %v3149_v49 = vpop.eup %3148  ;;  %v1578_v29 = vmul.f32 1.442695, %v1552_v59 }
 0x30d   :  { %v3151_v39 = vpop.eup %3150  ;;  %v1931_v2 = vmul.f32 1.442695, %v1905_v24  ;;  %v4718_v62 = vpop.xlane.xlu0 %1889  ;;  %1961 = vadd.xlane.f32.xlu0 %v3149_v49 }
 0x30e   :  { %5423 = vst [vmem:[#allocation97_spill] sm:$0xff] %v4718_v62  ;;  %3160 = vpow2.f32 %v1578_v29  ;;  %v1908_v55 = vsub.f32 %v4484_v23, %v4718_v62  ;;  %v4722_v63 = vpop.xlane.xlu1 %1536  ;;  %1608 = vadd.xlane.f32.xlu1 %v3151_v39  ;;  %v5470_v62 = vld [vmem:[#allocation36_spill] sm:$0xff] }
 0x30f   :  { %5424 = vst [vmem:[#allocation98_spill] sm:$0xff] %v4722_v63  ;;  %3162 = vpow2.f32 %v1931_v2  ;;  %v1555_v22 = vsub.f32 %v4495_v45, %v4722_v63 }
 0x310   :  { %v3153_v40 = vpop.eup %3152  ;;  %v1937_v1 = vmul.f32 1.442695, %v1908_v55 }
 0x311   :  { %v3155_v5 = vpop.eup %3154  ;;  %v1584_v53 = vmul.f32 1.442695, %v1555_v22  ;;  %v4726_v59 = vpop.xlane.xlu0 %1534  ;;  %1606 = vadd.xlane.f32.xlu0 %v3153_v40 }
 0x312   :  { %5425 = vst [vmem:[#allocation99_spill] sm:$0xff] %v4726_v59  ;;  %3164 = vpow2.f32 %v1937_v1  ;;  %v4728_v24 = vpop.xlane.xlu1 %1887  ;;  %v1554_v23 = vsub.f32 %v4513_v61, %v4726_v59  ;;  %1959 = vadd.xlane.f32.xlu1 %v3155_v5  ;;  %v5471_v59 = vld [vmem:[#allocation33_spill] sm:$0xff] }
 0x313   :  { %5426 = vst [vmem:[#allocation100_spill] sm:$0xff] %v4728_v24  ;;  %3166 = vpow2.f32 %v1584_v53  ;;  %v1907_v49 = vsub.f32 %v4518_v46, %v4728_v24  ;;  %v5467_v24 = vld [vmem:[#allocation31_spill] sm:$0xff] }
 0x314   :  { %v3157_v29 = vpop.eup %3156  ;;  %v1582_v45 = vmul.f32 1.442695, %v1554_v23 }
 0x315   :  { %v3159_v39 = vpop.eup %3158  ;;  %v1935_v2 = vmul.f32 1.442695, %v1907_v49  ;;  %v4734_v55 = vpop.xlane.xlu0 %1893  ;;  %1965 = vadd.xlane.f32.xlu0 %v3157_v29 }
 0x316   :  { %5427 = vst [vmem:[#allocation101_spill] sm:$0xff] %v4734_v55  ;;  %3168 = vpow2.f32 %v1582_v45  ;;  %v4736_v22 = vpop.xlane.xlu1 %1540  ;;  %1612 = vadd.xlane.f32.xlu1 %v3159_v39 }
 0x317   :  { %5428 = vst [vmem:[#allocation102_spill] sm:$0xff] %v4736_v22  ;;  %3170 = vpow2.f32 %v1935_v2 }
 0x318   :  { %v3161_v40 = vpop.eup %3160 }
 0x319   :  { %v3163_v1 = vpop.eup %3162  ;;  %v4738_v61 = vpop.xlane.xlu0 %1538 }
 0x31a   :  { %5429 = vst [vmem:[#allocation103_spill] sm:$0xff] %v4738_v61  ;;  %v4740_v5 = vpop.xlane.xlu1 %1891  ;;  %1610 = vadd.xlane.f32.xlu1 %v3161_v40  ;;  %1963 = vadd.xlane.f32.xlu0 %v3163_v1  ;;  %v1556_v46 = vsub.f32 %v4542_v47, %v4738_v61 }
 0x31b   :  { %5430 = vst [vmem:[#allocation104_spill] sm:$0xff] %v4740_v5  ;;  %v1909_v53 = vsub.f32 %v4548_v32, %v4740_v5 }
 0x31c   :  { %v3165_v23 = vpop.eup %3164  ;;  %v1586_v49 = vmul.f32 1.442695, %v1556_v46 }
 0x31d   :  { %v3167_v29 = vpop.eup %3166  ;;  %v1939_v45 = vmul.f32 1.442695, %v1909_v53  ;;  %v4746_v39 = vpop.xlane.xlu0 %2218 }
 0x31e   :  { %3172 = vpow2.f32 %v1586_v49  ;;  %v4748_v2 = vpop.xlane.xlu1 %2216  ;;  %1616 = vadd.xlane.f32.xlu1 %v3167_v29  ;;  %1969 = vadd.xlane.f32.xlu0 %v3165_v23  ;;  %v2249_v40 = vsub.f32 %v4401_v37, %v4746_v39 }
 0x31f   :  { %3174 = vpow2.f32 %v1939_v45  ;;  %v2248_v32 = vsub.f32 %v4408_v34, %v4748_v2 }
 0x320   :  { %v3169_v1 = vpop.eup %3168  ;;  %v2266_v47 = vmul.f32 1.442695, %v2249_v40 }
 0x321   :  { %v3171_v61 = vpop.eup %3170  ;;  %v4754_v46 = vpop.xlane.xlu0 %2234  ;;  %v2264_v29 = vmul.f32 1.442695, %v2248_v32 }
 0x322   :  { %5431 = vst [vmem:[#allocation105_spill] sm:$0xff] %v4754_v46  ;;  %3176 = vpow2.f32 %v2266_v47  ;;  %v4756_v53 = vpop.xlane.xlu1 %2232  ;;  %1614 = vadd.xlane.f32.xlu1 %v3169_v1  ;;  %1967 = vadd.xlane.f32.xlu0 %v3171_v61  ;;  %v2257_v23 = vsub.f32 %v4412_v31, %v4754_v46 }
 0x323   :  { %5432 = vst [vmem:[#allocation106_spill] sm:$0xff] %v4756_v53  ;;  %v2256_v45 = vsub.f32 %v4417_v13, %v4756_v53  ;;  %v5474_v53 = vld [vmem:[#allocation38_spill] sm:$0xff] }
 0x324   :  { %v2282_v49 = vmul.f32 1.442695, %v2257_v23 }
 0x325   :  { %v4760_v37 = vpop.xlane.xlu0 %2222  ;;  %v2280_v31 = vmul.f32 1.442695, %v2256_v45 }
 0x326   :  { %3178 = vpow2.f32 %v2282_v49  ;;  %v2251_v34 = vsub.f32 %v4430_v6, %v4760_v37  ;;  %v4766_v40 = vpop.xlane.xlu1 %2220 }
 0x327   :  { %3180 = vpow2.f32 %v2264_v29 }
 0x328   :  { %v3173_v47 = vpop.eup %3172  ;;  %v2270_v5 = vmul.f32 1.442695, %v2251_v34  ;;  %v2250_v34 = vsub.f32 %v4437_v25, %v4766_v40  ;;  %v1910_v25 = vsub.f32 %v4529_v21, %v4734_v55 }
 0x329   :  { %v3175_v1 = vpop.eup %3174  ;;  %1618 = vadd.xlane.f32.xlu1 %v3173_v47  ;;  %v4768_v61 = vpop.xlane.xlu0 %2238 }
 0x32a   :  { %5433 = vst [vmem:[#allocation107_spill] sm:$0xff] %v4768_v61  ;;  %3182 = vpow2.f32 %v2270_v5  ;;  %1971 = vadd.xlane.f32.xlu0 %v3175_v1  ;;  %v2259_v32 = vsub.f32 %v4441_v33, %v4768_v61  ;;  %v4772_v23 = vpop.xlane.xlu1 %2236  ;;  %v2268_v1 = vmul.f32 1.442695, %v2250_v34 }
 0x32b   :  { %5434 = vst [vmem:[#allocation108_spill] sm:$0xff] %v4772_v23  ;;  %3184 = vpow2.f32 %v2280_v31  ;;  %v2258_v47 = vsub.f32 %v4446_v42, %v4772_v23  ;;  %v5468_v23 = vld [vmem:[#allocation48_spill] sm:$0xff] }
 0x32c   :  { %v3177_v13 = vpop.eup %3176  ;;  %v2286_v49 = vmul.f32 1.442695, %v2259_v32 }
 0x32d   :  { %v4774_v6 = vpop.xlane.xlu0 %2226 }
 0x32e   :  { %5435 = vst [vmem:[#allocation109_spill] sm:$0xff] %v4774_v6  ;;  %2298 = vadd.xlane.f32.xlu0 %v3177_v13  ;;  %v2253_v29 = vsub.f32 %v4461_v18, %v4774_v6  ;;  %3186 = vpow2.f32 %v2286_v49  ;;  %v4784_v31 = vpop.xlane.xlu1 %2224  ;;  %v2284_v13 = vmul.f32 1.442695, %v2258_v47 }
 0x32f   :  { %5437 = vst [vmem:[#allocation111_spill] sm:$0xff] %v4784_v31  ;;  %v2252_v21 = vsub.f32 %v4467_v8, %v4784_v31  ;;  %v5476_v31 = vld [vmem:[#allocation52_spill] sm:$0xff] }
 0x330   :  { %v3179_v45 = vpop.eup %3178  ;;  %v2274_v5 = vmul.f32 1.442695, %v2253_v29 }
 0x331   :  { %2314 = vadd.xlane.f32.xlu1 %v3179_v45  ;;  %v4782_v33 = vpop.xlane.xlu0 %2242  ;;  %v3181_v32 = vpop.eup %3180  ;;  %v1941_v45 = vmul.f32 1.442695, %v1910_v25 }
 0x332   :  { %5436 = vst [vmem:[#allocation110_spill] sm:$0xff] %v4782_v33  ;;  %3188 = vpow2.f32 %v2274_v5  ;;  %v2261_v42 = vsub.f32 %v4471_v9, %v4782_v33  ;;  %v4794_v5 = vpop.xlane.xlu1 %2240  ;;  %v2272_v9 = vmul.f32 1.442695, %v2252_v21  ;;  %v5465_v33 = vld [vmem:[#allocation29_spill] sm:$0xff] }
 0x333   :  { %3190 = vpow2.f32 %v2268_v1  ;;  %5439 = vst [vmem:[#allocation113_spill] sm:$0xff] %v4794_v5 }
 0x334   :  { %v3183_v61 = vpop.eup %3182  ;;  %3192 = vpow2.f32 %v2284_v13 }
 0x335   :  { %2296 = vadd.xlane.f32.xlu1 %v3181_v32  ;;  %2302 = vadd.xlane.f32.xlu0 %v3183_v61  ;;  %v4788_v18 = vpop.xlane.xlu0 %2230  ;;  %v3185_v34 = vpop.eup %3184  ;;  %v2290_v61 = vmul.f32 1.442695, %v2261_v42 }
 0x336   :  { %5438 = vst [vmem:[#allocation112_spill] sm:$0xff] %v4788_v18  ;;  %v2255_v49 = vsub.f32 %v4488_v0, %v4788_v18  ;;  %v2260_v0 = vsub.f32 %v4476_v28, %v4794_v5  ;;  %v4800_v32 = vpop.xlane.xlu1 %2228 }
 0x337   :  { %5440 = vst [vmem:[#allocation114_spill] sm:$0xff] %v4800_v32  ;;  %v2254_v42 = vsub.f32 %v4499_v50, %v4800_v32  ;;  %v5472_v32 = vld [vmem:[#allocation50_spill] sm:$0xff] }
 0x338   :  { %v2278_v29 = vmul.f32 1.442695, %v2255_v49  ;;  %v3187_v47 = vpop.eup %3186  ;;  %v2288_v8 = vmul.f32 1.442695, %v2260_v0 }
 0x339   :  { %2312 = vadd.xlane.f32.xlu1 %v3185_v34  ;;  %v4802_v13 = vpop.xlane.xlu0 %1297  ;;  %v2276_v28 = vmul.f32 1.442695, %v2254_v42 }
 0x33a   :  { %3194 = vpow2.f32 %v2278_v29  ;;  %v1557_v29 = vsub.f32 %v4535_v57, %v4736_v22  ;;  %v4814_v0 = vpop.xlane.xlu1 %2244  ;;  %v5466_v22 = vld [vmem:[#allocation34_spill] sm:$0xff] }
 0x33b   :  { %3196 = vpow2.f32 %v1941_v45  ;;  %5442 = vst [vmem:[#allocation116_spill] sm:$0xff] %v4814_v0  ;;  %v2262_v42 = vsub.f32 %v4508_v4, %v4814_v0  ;;  %v5446_v4 = vld [vmem:[#allocation7_spill] sm:$0xff] }
 0x33c   :  { %v3189_v1 = vpop.eup %3188  ;;  %3198 = vpow2.f32 %v2290_v61 }
 0x33d   :  { %2318 = vadd.xlane.f32.xlu1 %v3187_v47  ;;  %2306 = vadd.xlane.f32.xlu0 %v3189_v1  ;;  %v3191_v25 = vpop.eup %3190  ;;  %3200 = vpow2.f32 %v2272_v9  ;;  %v4808_v21 = vpop.xlane.xlu0 %2246  ;;  %v1588_v47 = vmul.f32 1.442695, %v1557_v29  ;;  %v1275_v1 = vmul.f32 %v3770_v11, %v3767_v44 }
 0x33e   :  { %v3193_v49 = vpop.eup %3192  ;;  %3202 = vpow2.f32 %v2288_v8  ;;  %5441 = vst [vmem:[#allocation115_spill] sm:$0xff] %v4808_v21  ;;  %v2263_v50 = vsub.f32 %v4503_v16, %v4808_v21  ;;  %v5443_v16 = vld [vmem:[#allocation10_spill] sm:$0xff] }
 0x33f   :  { %3204 = vpow2.f32 %v2276_v28  ;;  %v1215_v44 = vmul.f32 %v5443_v16, %v5443_v16 }
 0x340   :  { %3206 = vpow2.f32 %v1588_v47  ;;  %v2294_v57 = vmul.f32 1.442695, %v2263_v50  ;;  %v5448_v50 = vld [vmem:[#allocation16_spill] sm:$0xff] }
 0x341   :  { %2300 = vadd.xlane.f32.xlu1 %v3191_v25  ;;  %v1276_v25 = vmul.f32 %v3780_v17, %v3784_v36  ;;  %v5445_v17 = vld [vmem:[#allocation14_spill] sm:$0xff] }
 0x342   :  { %3208 = vpow2.f32 %v2294_v57  ;;  %v1217_v36 = vmul.f32 %v5445_v17, %v5445_v17 }
 0x344   :  { %v3195_v34 = vpop.eup %3194 }
 0x345   :  { %2316 = vadd.xlane.f32.xlu1 %v3193_v49  ;;  %2310 = vadd.xlane.f32.xlu0 %v3195_v34  ;;  %v3197_v45 = vpop.eup %3196  ;;  %v2292_v49 = vmul.f32 1.442695, %v2262_v42  ;;  %v5444_v34 = vld [vmem:[#allocation12_spill] sm:$0xff] }
 0x346   :  { %v3199_v61 = vpop.eup %3198  ;;  %v1216_v29 = vmul.f32 %v5444_v34, %v5444_v34  ;;  %v5451_v42 = vld [vmem:[#allocation8_spill] sm:$0xff] }
 0x347   :  { %v3201_v9 = vpop.eup %3200  ;;  %3210 = vpow2.f32 %v2292_v49 }
 0x348   :  { %v3203_v8 = vpop.eup %3202 }
 0x349   :  { %2322 = vadd.xlane.f32.xlu1 %v3199_v61  ;;  %1973 = vadd.xlane.f32.xlu0 %v3197_v45  ;;  %v3205_v11 = vpop.eup %3204  ;;  %v5447_v61 = vld [vmem:[#allocation6_spill] sm:$0xff] }
 0x34a   :  { %v3207_v28 = vpop.eup %3206  ;;  %v1277_v47 = vmul.f32 %v5447_v61, %v5446_v4 }
 0x34c   :  { %v3209_v45 = vpop.eup %3208 }
 0x34d   :  { %2304 = vadd.xlane.f32.xlu1 %v3201_v9  ;;  %1299 = vadd.xlane.f32.xlu0 %v1275_v1  ;;  %v1218_v1 = vmul.f32 %v5448_v50, %v5448_v50  ;;  %v5449_v9 = vld [vmem:[#allocation17_spill] sm:$0xff] }
 0x34e   :  { %v1282_v57 = vmul.f32 %v5448_v50, %v5449_v9  ;;  %v5456_v50 = vld [vmem:[#allocation42_spill] sm:$0xff]  ;;  %v5457_v9 = vld [vmem:[#allocation23_spill] sm:$0xff] }
 0x351   :  { %2320 = vadd.xlane.f32.xlu1 %v3203_v8  ;;  %1301 = vadd.xlane.f32.xlu0 %v1276_v25  ;;  %v3211_v25 = vpop.eup %3210  ;;  %v5450_v8 = vld [vmem:[#allocation9_spill] sm:$0xff] }
 0x355   :  { %2308 = vadd.xlane.f32.xlu1 %v3205_v11  ;;  %1243 = vadd.xlane.f32.xlu0 %v1215_v44  ;;  %v1278_v44 = vmul.f32 %v5451_v42, %v5450_v8  ;;  %v5452_v11 = vld [vmem:[#allocation11_spill] sm:$0xff]  ;;  %v5460_v8 = vld [vmem:[#allocation30_spill] sm:$0xff] }
 0x356   :  { %v1279_v49 = vmul.f32 %v5443_v16, %v5452_v11  ;;  %v5459_v16 = vld [vmem:[#allocation22_spill] sm:$0xff] }
 0x357   :  { %v1003_v42 = vadd.f32 %v5460_v8, %v5459_v16 }
 0x359   :  { %1620 = vadd.xlane.f32.xlu1 %v3207_v28  ;;  %1245 = vadd.xlane.f32.xlu0 %v1216_v29  ;;  %v5453_v29 = vld [vmem:[#allocation13_spill] sm:$0xff] }
 0x35a   :  { %v1280_v28 = vmul.f32 %v5444_v34, %v5453_v29  ;;  %v5461_v29 = vld [vmem:[#allocation25_spill] sm:$0xff] }
 0x35d   :  { %2326 = vadd.xlane.f32.xlu1 %v3209_v45  ;;  %1247 = vadd.xlane.f32.xlu0 %v1217_v36  ;;  %v5454_v36 = vld [vmem:[#allocation15_spill] sm:$0xff] }
 0x35e   :  { %v1281_v45 = vmul.f32 %v5445_v17, %v5454_v36 }
 0x361   :  { %1303 = vadd.xlane.f32.xlu1 %v1277_v47  ;;  %1249 = vadd.xlane.f32.xlu0 %v1218_v1  ;;  %v5455_v47 = vld [vmem:[#allocation20_spill] sm:$0xff] }
 0x362   :  { %v1002_v1 = vadd.f32 %v5456_v50, %v5455_v47  ;;  %v5463_v50 = vld [vmem:[#allocation27_spill] sm:$0xff] }
 0x364   :  { %v1018_v11 = vmul.f32 0.5, %v1002_v1 }
 0x365   :  { %2324 = vadd.xlane.f32.xlu1 %v3211_v25  ;;  %1313 = vadd.xlane.f32.xlu0 %v1282_v57  ;;  %v5458_v57 = vld [vmem:[#allocation44_spill] sm:$0xff] }
 0x366   :  { %v1004_v25 = vadd.f32 %v5458_v57, %v5457_v9  ;;  %v5464_v9 = vld [vmem:[#allocation46_spill] sm:$0xff] }
 0x367   :  { %v1006_v57 = vadd.f32 %v5464_v9, %v5463_v50  ;;  %v1008_v50 = vadd.f32 %v5468_v23, %v5467_v24  ;;  %v1010_v24 = vadd.f32 %v5472_v32, %v5471_v59  ;;  %v1012_v59 = vadd.f32 %v5476_v31, %v5475_v20 }
 0x368   :  { %v1020_v17 = vmul.f32 0.5, %v1004_v25 }
 0x369   :  { %1305 = vadd.xlane.f32.xlu1 %v1278_v44  ;;  %v1022_v1 = vmul.f32 0.5, %v1006_v57  ;;  %v1024_v57 = vmul.f32 0.5, %v1008_v50  ;;  %v1026_v50 = vmul.f32 0.5, %v1010_v24  ;;  %v1028_v24 = vmul.f32 0.5, %v1012_v59 }
 0x36a   :  { %v1036_v47 = vmul.f32 0.0, %v1020_v17 }
 0x36b   :  { %v1038_v17 = vmul.f32 0.0, %v1022_v1  ;;  %v1040_v1 = vmul.f32 0.0, %v1024_v57  ;;  %v1042_v57 = vmul.f32 0.0, %v1026_v50  ;;  %v1044_v6 = vmul.f32 0.0, %v1028_v24  ;;  %v5480_v50 = vld [vmem:[#allocation54_spill] sm:$0xff]  ;;  %v5484_v24 = vld [vmem:[#allocation56_spill] sm:$0xff] }
 0x36c   :  { %v1014_v19 = vadd.f32 %v5480_v50, %v5479_v54 }
 0x36d   :  { %1307 = vadd.xlane.f32.xlu1 %v1279_v49  ;;  %v1019_v49 = vmul.f32 0.5, %v1003_v42 }
 0x36f   :  { %v1050_v21 = vadd.f32 %v1019_v49, %v1018_v11 }
 0x371   :  { %1309 = vadd.xlane.f32.xlu1 %v1280_v28  ;;  %v5462_v28 = vld [vmem:[#allocation32_spill] sm:$0xff]  ;;  %v1051_v25 = vadd.f32 %v1050_v21, %v1036_v47 }
 0x372   :  { %v1005_v36 = vadd.f32 %v5462_v28, %v5461_v29  ;;  %v1007_v29 = vadd.f32 %v5466_v22, %v5465_v33 }
 0x374   :  { %v1021_v16 = vmul.f32 0.5, %v1005_v36  ;;  %v1023_v49 = vmul.f32 0.5, %v1007_v29 }
 0x375   :  { %1311 = vadd.xlane.f32.xlu1 %v1281_v45 }
 0x376   :  { %v1037_v42 = vmul.f32 0.0, %v1021_v16  ;;  %v1039_v47 = vmul.f32 0.0, %v1023_v49  ;;  %v5469_v16 = vld [vmem:[#allocation21_spill] sm:$0xff]  ;;  %v5473_v49 = vld [vmem:[#allocation18_spill] sm:$0xff] }
 0x377   :  { %v1009_v22 = vadd.f32 %v5470_v62, %v5469_v16  ;;  %v1011_v62 = vadd.f32 %v5474_v53, %v5473_v49 }
 0x378   :  { %v1052_v11 = vadd.f32 %v1051_v25, %v1037_v42 }
 0x379   :  { %v1025_v25 = vmul.f32 0.5, %v1009_v22 }
 0x37a   :  { %v4840_v4 = vpop.xlane.xlu0 %1592  ;;  %v1053_v21 = vadd.f32 %v1052_v11, %v1038_v17 }
 0x37b   :  { %v4842_v61 = vpop.xlane.xlu1 %1945  ;;  %v1041_v11 = vmul.f32 0.0, %v1025_v25  ;;  %v5477_v25 = vld [vmem:[#allocation24_spill] sm:$0xff]  ;;  %3212 = vlog2.f32 %v4840_v4 }
 0x37c   :  { %v1054_v23 = vadd.f32 %v1053_v21, %v1039_v47  ;;  %v1027_v21 = vmul.f32 0.5, %v1011_v62  ;;  %v1013_v53 = vadd.f32 %v5478_v41, %v5477_v25  ;;  %v5483_v25 = vld [vmem:[#allocation40_spill] sm:$0xff]  ;;  %3214 = vlog2.f32 %v4842_v61  ;;  %v5492_v61 = vld [vmem:[#allocation58_spill] sm:$0xff] }
 0x37d   :  { %v1016_v56 = vadd.f32 %v5484_v24, %v5483_v25 }
 0x37e   :  { %v4850_v44 = vpop.xlane.xlu0 %1943  ;;  %v1055_v17 = vadd.f32 %v1054_v23, %v1040_v1  ;;  %v1043_v23 = vmul.f32 0.0, %v1027_v21  ;;  %v1029_v20 = vmul.f32 0.5, %v1013_v53 }
 0x37f   :  { %v4852_v34 = vpop.xlane.xlu1 %1590  ;;  %3216 = vlog2.f32 %v4850_v44  ;;  %v5493_v44 = vld [vmem:[#allocation60_spill] sm:$0xff] }
 0x380   :  { %v1056_v32 = vadd.f32 %v1055_v17, %v1041_v11  ;;  %v1030_v11 = vmul.f32 0.5, %v1014_v19  ;;  %v1045_v59 = vmul.f32 0.0, %v1029_v20  ;;  %v5487_v19 = vld [vmem:[#allocation45_spill] sm:$0xff]  ;;  %3218 = vlog2.f32 %v4852_v34  ;;  %v5494_v34 = vld [vmem:[#allocation62_spill] sm:$0xff] }
 0x381   :  { %v4942_v25 = vmul.f32 5.0, %v5493_v44  ;;  %v4945_v24 = vmul.f32 5.0, %v5494_v34 }
 0x382   :  { %v4856_v45 = vpop.xlane.xlu0 %1949  ;;  %v1057_v1 = vadd.f32 %v1056_v32, %v1042_v57  ;;  %v5481_v57 = vld [vmem:[#allocation26_spill] sm:$0xff]  ;;  %v5482_v32 = vld [vmem:[#allocation43_spill] sm:$0xff]  ;;  %v1046_v41 = vmul.f32 0.0, %v1030_v11 }
 0x383   :  { %v4858_v0 = vpop.xlane.xlu1 %1596  ;;  %v1015_v21 = vadd.f32 %v5482_v32, %v5481_v57  ;;  %3220 = vlog2.f32 %v4856_v45  ;;  %v4939_v32 = vmul.f32 5.0, %v5492_v61  ;;  %v5502_v61 = vld [vmem:[#allocation72_spill] sm:$0xff] }
 0x384   :  { %v1058_v60 = vadd.f32 %v1057_v1, %v1043_v23  ;;  %v1032_v23 = vmul.f32 0.5, %v1016_v56  ;;  %3222 = vlog2.f32 %v4858_v0  ;;  %v5496_v0 = vld [vmem:[#allocation66_spill] sm:$0xff]  ;;  %v4961_v44 = vmul.f32 5.0, %v5502_v61 }
 0x385   :  { %v1031_v54 = vmul.f32 0.5, %v1015_v21 }
 0x386   :  { %v4862_v8 = vpop.xlane.xlu0 %1947  ;;  %v1059_v62 = vadd.f32 %v1058_v60, %v1044_v6  ;;  %v1017_v60 = vadd.f32 %v5487_v19, %v5486_v30  ;;  %v1048_v11 = vmul.f32 0.0, %v1032_v23  ;;  %v5498_v19 = vld [vmem:[#allocation68_spill] sm:$0xff]  ;;  %5503 = vst [vmem:[#allocation8_spill] sm:$0xff] %v4961_v44 }
 0x387   :  { %v4864_v55 = vpop.xlane.xlu1 %1594  ;;  %v1047_v50 = vmul.f32 0.0, %v1031_v54 }
 0x388   :  { %v1060_v52 = vadd.f32 %v1059_v62, %v1045_v59  ;;  %v1033_v62 = vmul.f32 0.5, %v1017_v60  ;;  %v4954_v60 = vmul.f32 5.0, %v5498_v19  ;;  %v5507_v19 = vld [vmem:[#allocation76_spill] sm:$0xff] }
 0x38a   :  { %v4868_v28 = vpop.xlane.xlu0 %1953  ;;  %v1061_v53 = vadd.f32 %v1060_v52, %v1046_v41  ;;  %v1049_v59 = vmul.f32 0.0, %v1033_v62  ;;  %v3213_v41 = vpop.eup %3212  ;;  %5499 = vst [vmem:[#allocation17_spill] sm:$0xff] %v4954_v60  ;;  %v4971_v60 = vmul.f32 5.0, %v5507_v19 }
 0x38b   :  { %v4870_v5 = vpop.xlane.xlu1 %1600  ;;  %v3215_v23 = vpop.eup %3214  ;;  %v1625_v19 = vmul.f32 0.6931472, %v3213_v41 }
 0x38c   :  { %v1062_v57 = vadd.f32 %v1061_v53, %v1047_v50  ;;  %v5495_v53 = vld [vmem:[#allocation64_spill] sm:$0xff]  ;;  %v4951_v50 = vmul.f32 5.0, %v5496_v0 }
 0x38d   :  { %v4948_v45 = vmul.f32 5.0, %v5495_v53  ;;  %v5506_v53 = vld [vmem:[#allocation19_spill] sm:$0xff] }
 0x38e   :  { %v4874_v36 = vpop.xlane.xlu0 %1598  ;;  %v1063_v30 = vadd.f32 %v1062_v57, %v1048_v11  ;;  %5497 = vst [vmem:[#allocation16_spill] sm:$0xff] %v4951_v50  ;;  %v3217_v11 = vpop.eup %3216  ;;  %v5500_v57 = vld [vmem:[#allocation70_spill] sm:$0xff]  ;;  %v867_v0 = vrot.slane %v5506_v53, 4 }
 0x38f   :  { %v4876_v9 = vpop.xlane.xlu1 %1951  ;;  %v4958_v62 = vmul.f32 5.0, %v5500_v57  ;;  %v3219_v34 = vpop.eup %3218  ;;  %v5509_v57 = vld [vmem:[#allocation80_spill] sm:$0xff] }
 0x390   :  { %v1064_v54 = vadd.f32 %v1063_v30, %v1049_v59  ;;  %v5504_v30 = vld [vmem:[#allocation74_spill] sm:$0xff]  ;;  %v4978_v61 = vmul.f32 5.0, %v5509_v57 }
 0x391   :  { %5501 = vst [vmem:[#allocation9_spill] sm:$0xff] %v4958_v62  ;;  %v4964_v59 = vmul.f32 5.0, %v5504_v30  ;;  %v5511_v30 = vld [vmem:[#allocation82_spill] sm:$0xff]  ;;  %v5513_v62 = vld [vmem:[#allocation84_spill] sm:$0xff] }
 0x392   :  { %v4880_v33 = vpop.xlane.xlu0 %1957  ;;  %5510 = vst [vmem:[#allocation13_spill] sm:$0xff] %v4978_v61  ;;  %v4981_v44 = vmul.f32 5.0, %v5511_v30  ;;  %v4985_v50 = vmul.f32 5.0, %v5513_v62  ;;  %v3221_v30 = vpop.eup %3220  ;;  %v5518_v62 = vld [vmem:[#allocation49_spill] sm:$0xff] }
 0x393   :  { %v4882_v46 = vpop.xlane.xlu1 %1604  ;;  %v3223_v41 = vpop.eup %3222 }
 0x394   :  { %5512 = vst [vmem:[#allocation15_spill] sm:$0xff] %v4981_v44  ;;  %5514 = vst [vmem:[#allocation20_spill] sm:$0xff] %v4985_v50  ;;  %v4993_v44 = vadd.f32 %v867_v0, %v5506_v53  ;;  %v4997_v50 = vmul.f32 5.0, %v5518_v62  ;;  %v5522_v53 = vld [vmem:[#allocation55_spill] sm:$0xff]  ;;  %v1655_v62 = vadd.f32 %v1625_v19, %v4622_v58 }
 0x395   :  { %v5009_v0 = vmul.f32 5.0, %v5522_v53 }
 0x396   :  { %v4886_v42 = vpop.xlane.xlu0 %1602  ;;  %5516 = vst [vmem:[#allocation42_spill] sm:$0xff] %v4993_v44  ;;  %v1982_v44 = vmul.f32 0.6931472, %v3221_v30  ;;  %v5533_v30 = vld [vmem:[#allocation65_spill] sm:$0xff] }
 0x397   :  { %v4888_v29 = vpop.xlane.xlu1 %1955  ;;  %5523 = vst [vmem:[#allocation44_spill] sm:$0xff] %v5009_v0  ;;  %v5528_v0 = vld [vmem:[#allocation63_spill] sm:$0xff] }
 0x39a   :  { %v4892_v16 = vpop.xlane.xlu0 %1961 }
 0x39b   :  { %v4894_v63 = vpop.xlane.xlu1 %1608 }
 0x39e   :  { %v4898_v47 = vpop.xlane.xlu0 %1606 }
 0x39f   :  { %v4900_v22 = vpop.xlane.xlu1 %1959 }
 0x3a2   :  { %v4904_v49 = vpop.xlane.xlu0 %1965 }
 0x3a3   :  { %v4908_v31 = vpop.xlane.xlu1 %1612 }
 0x3a7   :  { %v4910_v17 = vpop.xlane.xlu0 %1963  ;;  %v4914_v18 = vpop.xlane.xlu1 %1610 }
 0x3ab   :  { %v4918_v1 = vpop.xlane.xlu0 %1969  ;;  %v4922_v6 = vpop.xlane.xlu1 %1616 }
 0x3ac   :  { %5485 = vst [vmem:[#allocation10_spill] sm:$0xff] %v4918_v1 }
 0x3af   :  { %v4926_v20 = vpop.xlane.xlu0 %1967  ;;  %v4930_v52 = vpop.xlane.xlu1 %1614 }
 0x3b0   :  { %5488 = vst [vmem:[#allocation12_spill] sm:$0xff] %v4926_v20  ;;  %5489 = vst [vmem:[#allocation14_spill] sm:$0xff] %v4930_v52 }
 0x3b6   :  { %v4936_v4 = vpop.xlane.xlu1 %1618 }
 0x3b7   :  { %v4932_v56 = vpop.xlane.xlu0 %1971  ;;  %5491 = vst [vmem:[#allocation6_spill] sm:$0xff] %v4936_v4  ;;  %v1978_v4 = vmul.f32 0.6931472, %v3215_v23  ;;  %v5520_v23 = vld [vmem:[#allocation51_spill] sm:$0xff] }
 0x3b8   :  { %5490 = vst [vmem:[#allocation7_spill] sm:$0xff] %v4932_v56 }
 0x3bb   :  { %v2299_v21 = vpop.xlane.xlu0 %2298 }
 0x3bc   :  { %3224 = vlog2.f32 %v2299_v21 }
 0x3bd   :  { %3226 = vlog2.f32 %v4862_v8  ;;  %v5508_v8 = vld [vmem:[#allocation78_spill] sm:$0xff] }
 0x3be   :  { %3228 = vlog2.f32 %v4864_v55  ;;  %v4967_v21 = vpop.xlane.xlu1 %2314  ;;  %v4974_v56 = vmul.f32 5.0, %v5508_v8  ;;  %v1065_v55 = vrot.slane %v1064_v54, 4  ;;  %v5515_v8 = vld [vmem:[#allocation86_spill] sm:$0xff] }
 0x3bf   :  { %5505 = vst [vmem:[#allocation11_spill] sm:$0xff] %v4967_v21  ;;  %3230 = vlog2.f32 %v4868_v28  ;;  %v4989_v20 = vmul.f32 5.0, %v5515_v8  ;;  %v1623_v28 = vmul.f32 0.6931472, %v3219_v34  ;;  %v1976_v21 = vmul.f32 0.6931472, %v3217_v11 }
 0x3c0   :  { %3232 = vlog2.f32 %v4870_v5  ;;  %v5517_v5 = vld [vmem:[#allocation47_spill] sm:$0xff]  ;;  %v5002_v8 = vmul.f32 5.0, %v5520_v23  ;;  %v5521_v11 = vld [vmem:[#allocation53_spill] sm:$0xff] }
 0x3c1   :  { %3234 = vlog2.f32 %v4880_v33  ;;  %v1188_v52 = vmul.f32 5.0, %v5517_v5  ;;  %v4999_v33 = vadd.f32 %v1065_v55, %v1064_v54  ;;  %v5005_v34 = vmul.f32 5.0, %v5521_v11 }
 0x3c2   :  { %3236 = vlog2.f32 %v4882_v46  ;;  %v2297_v57 = vpop.xlane.xlu1 %2296  ;;  %v2303_v46 = vpop.xlane.xlu0 %2302  ;;  %v2008_v5 = vadd.f32 %v1978_v4, %v4624_v7  ;;  %v1654_v55 = vadd.f32 %v1623_v28, %v4634_v35  ;;  %v1252_v7 = vmul.f32 5.0, %v5528_v0  ;;  %v5531_v35 = vld [vmem:[#allocation61_spill] sm:$0xff] }
 0x3c3   :  { %3238 = vlog2.f32 %v2297_v57  ;;  %5519 = vst [vmem:[#allocation23_spill] sm:$0xff] %v4999_v33  ;;  %v5524_v57 = vld [vmem:[#allocation87_spill] sm:$0xff]  ;;  %v5526_v33 = vld [vmem:[#allocation57_spill] sm:$0xff]  ;;  %v1629_v4 = vmul.f32 0.6931472, %v3223_v41  ;;  %v5027_v28 = vmul.f32 5.0, %v5531_v35  ;;  %v1671_v41 = vsub.f32 %v1655_v62, %v1188_v52 }
 0x3c4   :  { %3240 = vlog2.f32 %v4874_v36  ;;  %v2007_v23 = vadd.f32 %v1976_v21, %v5524_v57  ;;  %v5020_v53 = vmul.f32 5.0, %v5526_v33  ;;  %v5031_v57 = vmul.f32 5.0, %v5533_v30  ;;  %v5534_v33 = vld [vmem:[#allocation67_spill] sm:$0xff] }
 0x3c5   :  { %3242 = vlog2.f32 %v4876_v9  ;;  %v5529_v9 = vld [vmem:[#allocation59_spill] sm:$0xff]  ;;  %5532 = vst [vmem:[#allocation32_spill] sm:$0xff] %v5027_v28  ;;  %v2024_v0 = vsub.f32 %v2008_v5, %v1252_v7  ;;  %v5536_v28 = vld [vmem:[#allocation88_spill] sm:$0xff] }
 0x3c6   :  { %v3225_v54 = vpop.eup %3224  ;;  %3244 = vlog2.f32 %v4886_v42  ;;  %v5017_v11 = vpop.xlane.xlu1 %2312  ;;  %5527 = vst [vmem:[#allocation30_spill] sm:$0xff] %v5020_v53  ;;  %v5024_v19 = vmul.f32 5.0, %v5529_v9  ;;  %v5034_v53 = vmul.f32 5.0, %v5534_v33  ;;  %v1670_v9 = vsub.f32 %v1654_v55, %v4939_v32  ;;  %v5539_v33 = vld [vmem:[#allocation73_spill] sm:$0xff]  ;;  %v5541_v52 = vld [vmem:[#allocation75_spill] sm:$0xff] }
 0x3c7   :  { %5525 = vst [vmem:[#allocation22_spill] sm:$0xff] %v5017_v11  ;;  %v3227_v36 = vpop.eup %3226  ;;  %3246 = vlog2.f32 %v2303_v46  ;;  %v2331_v42 = vmul.f32 0.6931472, %v3225_v54  ;;  %v5535_v11 = vld [vmem:[#allocation69_spill] sm:$0xff]  ;;  %v2023_v35 = vsub.f32 %v2007_v23, %v4964_v59  ;;  %v5050_v5 = vmul.f32 5.0, %v5539_v33 }
 0x3c8   :  { %v3229_v58 = vpop.eup %3228  ;;  %5530 = vst [vmem:[#allocation25_spill] sm:$0xff] %v5024_v19  ;;  %3248 = vlog2.f32 %v4888_v29  ;;  %v5037_v1 = vmul.f32 5.0, %v5535_v11  ;;  %v5042_v29 = vadd.f32 %v1982_v44, %v5536_v28  ;;  %v5538_v19 = vld [vmem:[#allocation71_spill] sm:$0xff]  ;;  %v1315_v62 = vmul.f32 5.0, %v5541_v52  ;;  %v5542_v55 = vld [vmem:[#allocation77_spill] sm:$0xff] }
 0x3c9   :  { %v3231_v21 = vpop.eup %3230  ;;  %v5047_v61 = vmul.f32 5.0, %v5538_v19  ;;  %5540 = vst [vmem:[#allocation46_spill] sm:$0xff] %v5050_v5  ;;  %v5054_v11 = vadd.f32 %v1629_v4, %v4642_v3  ;;  %v5057_v59 = vmul.f32 5.0, %v5542_v55  ;;  %v1980_v44 = vmul.f32 0.6931472, %v3227_v36  ;;  %v5543_v19 = vld [vmem:[#allocation79_spill] sm:$0xff] }
 0x3ca   :  { %v3233_v46 = vpop.eup %3232  ;;  %v5044_v54 = vpop.xlane.xlu1 %2318  ;;  %3250 = vlog2.f32 %v4892_v16  ;;  %v2361_v23 = vadd.f32 %v2331_v42, %v4746_v39  ;;  %v5062_v28 = vmul.f32 5.0, %v5543_v19  ;;  %v2393_v33 = vadd.f32 %v2024_v0, %v1671_v41 }
 0x3cb   :  { %5537 = vst [vmem:[#allocation27_spill] sm:$0xff] %v5044_v54  ;;  %v3235_v30 = vpop.eup %3234  ;;  %v1627_v5 = vmul.f32 0.6931472, %v3229_v58  ;;  %3252 = vlog2.f32 %v4894_v63  ;;  %v2392_v3 = vadd.f32 %v2023_v35, %v1670_v9  ;;  %v2026_v4 = vsub.f32 %v5042_v29, %v5031_v57  ;;  %v2307_v55 = vpop.xlane.xlu0 %2306 }
 0x3cc   :  { %v3237_v32 = vpop.eup %3236  ;;  %3254 = vlog2.f32 %v4898_v47  ;;  %v1673_v39 = vsub.f32 %v5054_v11, %v4997_v50  ;;  %v1990_v19 = vmul.f32 0.6931472, %v3235_v30  ;;  %v2009_v63 = vadd.f32 %v1980_v44, %v4646_v14 }
 0x3cd   :  { %v3239_v7 = vpop.eup %3238  ;;  %v1637_v42 = vmul.f32 0.6931472, %v3237_v32  ;;  %v2377_v0 = vsub.f32 %v2361_v23, %v4989_v20  ;;  %v1656_v41 = vadd.f32 %v1627_v5, %v4650_v12  ;;  %v1633_v9 = vmul.f32 0.6931472, %v3233_v46 }
 0x3ce   :  { %v3241_v52 = vpop.eup %3240  ;;  %v2329_v36 = vmul.f32 0.6931472, %v3239_v7  ;;  %v2301_v16 = vpop.xlane.xlu1 %2300  ;;  %v1986_v35 = vmul.f32 0.6931472, %v3231_v21  ;;  %v5544_v7 = vld [vmem:[#allocation83_spill] sm:$0xff] }
 0x3cf   :  { %v3243_v54 = vpop.eup %3242  ;;  %3256 = vlog2.f32 %v2301_v16  ;;  %v1631_v30 = vmul.f32 0.6931472, %v3241_v52  ;;  %v1661_v20 = vadd.f32 %v1637_v42, %v4674_v10  ;;  %v2409_v12 = vadd.f32 %v2393_v33, %v2377_v0 }
 0x3d0   :  { %v3245_v58 = vpop.eup %3244  ;;  %3258 = vlog2.f32 %v4900_v22  ;;  %v2360_v57 = vadd.f32 %v2329_v36, %v4748_v2  ;;  %v1984_v29 = vmul.f32 0.6931472, %v3243_v54  ;;  %v2014_v2 = vadd.f32 %v1990_v19, %v4670_v27 }
 0x3d1   :  { %v3247_v47 = vpop.eup %3246  ;;  %3260 = vlog2.f32 %v4904_v49  ;;  %v1635_v32 = vmul.f32 0.6931472, %v3245_v58  ;;  %v1672_v49 = vsub.f32 %v1656_v41, %v4942_v25  ;;  %v2025_v54 = vsub.f32 %v2009_v63, %v4971_v60 }
 0x3d2   :  { %v3249_v50 = vpop.eup %3248  ;;  %3262 = vlog2.f32 %v4908_v31  ;;  %v2376_v11 = vsub.f32 %v2360_v57, %v1315_v62  ;;  %v5077_v14 = vpop.xlane.xlu1 %2316  ;;  %v2335_v21 = vmul.f32 0.6931472, %v3247_v47  ;;  %v5084_v31 = vadd.f32 %v1986_v35, %v4654_v51  ;;  %v5545_v35 = vld [vmem:[#allocation13_spill] sm:$0xff] }
 0x3d3   :  { %v2311_v22 = vpop.xlane.xlu0 %2310  ;;  %3264 = vlog2.f32 %v2307_v55  ;;  %v1988_v5 = vmul.f32 0.6931472, %v3249_v50  ;;  %v5087_v44 = vadd.f32 %v1633_v9, %v4658_v26  ;;  %v5090_v27 = vadd.f32 %v1631_v30, %v4662_v48 }
 0x3d4   :  { %v2408_v46 = vadd.f32 %v2392_v3, %v2376_v11  ;;  %3266 = vlog2.f32 %v2311_v22  ;;  %v3251_v62 = vpop.eup %3250  ;;  %v5100_v51 = vmul.f32 5.0, %v5544_v7  ;;  %v5103_v33 = vadd.f32 %v1984_v29, %v4664_v43  ;;  %v5546_v29 = vld [vmem:[#allocation89_spill] sm:$0xff]  ;;  %v5547_v22 = vld [vmem:[#allocation10_spill] sm:$0xff] }
 0x3d5   :  { %3268 = vlog2.f32 %v4914_v18  ;;  %v3253_v60 = vpop.eup %3252  ;;  %v1677_v26 = vsub.f32 %v1661_v20, %v5005_v34  ;;  %v2030_v48 = vsub.f32 %v2014_v2, %v5037_v1  ;;  %v5108_v18 = vmul.f32 5.0, %v4802_v13 }
 0x3d6   :  { %v5093_v10 = vadd.f32 %v2409_v12, %v2408_v46  ;;  %v5095_v23 = vpop.xlane.xlu1 %2322  ;;  %v3255_v52 = vpop.eup %3254  ;;  %v5111_v3 = vadd.f32 %v1635_v32, %v4678_v15  ;;  %3270 = vlog2.f32 %v4910_v17  ;;  %v2363_v36 = vadd.f32 %v2335_v21, %v4760_v37  ;;  %v5548_v12 = vld [vmem:[#allocation22_spill] sm:$0xff] }
 0x3d7   :  { %v5097_v25 = vpop.xlane.xlu0 %1973  ;;  %v2395_v16 = vadd.f32 %v2026_v4, %v1673_v39  ;;  %v2394_v42 = vadd.f32 %v2025_v54, %v1672_v49  ;;  %v5116_v43 = vadd.f32 %v1988_v5, %v4680_v38  ;;  %v1994_v34 = vmul.f32 0.6931472, %v3251_v62  ;;  %v5549_v46 = vld [vmem:[#allocation90_spill] sm:$0xff]  ;;  %v5551_v62 = vld [vmem:[#allocation11_spill] sm:$0xff] }
 0x3d8   :  { %v1675_v1 = vsub.f32 %v5087_v44, %v5002_v8  ;;  %v2028_v13 = vsub.f32 %v5084_v31, %v5034_v53  ;;  %v1674_v15 = vsub.f32 %v5090_v27, %v4945_v24  ;;  %v2027_v38 = vsub.f32 %v5103_v33, %v4974_v56  ;;  %v5550_v49 = vld [vmem:[#allocation14_spill] sm:$0xff] }
 0x3d9   :  { %v3257_v55 = vpop.eup %3256  ;;  %v2399_v39 = vadd.f32 %v2030_v48, %v1677_v26  ;;  %v1641_v63 = vmul.f32 0.6931472, %v3253_v60  ;;  %v1676_v57 = vsub.f32 %v5111_v3, %v4948_v45  ;;  %v2379_v47 = vsub.f32 %v2363_v36, %v5062_v28  ;;  %v5552_v36 = vld [vmem:[#allocation91_spill] sm:$0xff]  ;;  %v5572_v3 = vld [vmem:[#allocation17_spill] sm:$0xff] }
 0x3da   :  { %v3259_v19 = vpop.eup %3258  ;;  %v2333_v17 = vmul.f32 0.6931472, %v3257_v55  ;;  %v2305_v58 = vpop.xlane.xlu1 %2304  ;;  %v2029_v50 = vsub.f32 %v5116_v43, %v5545_v35  ;;  %v5136_v30 = vadd.f32 %v1994_v34, %v5546_v29  ;;  %v1639_v11 = vmul.f32 0.6931472, %v3255_v52  ;;  %v5553_v55 = vld [vmem:[#allocation12_spill] sm:$0xff]  ;;  %v5558_v29 = vld [vmem:[#allocation6_spill] sm:$0xff] }
 0x3db   :  { %v5124_v37 = vpop.xlane.xlu0 %1299  ;;  %v3261_v4 = vpop.eup %3260  ;;  %3272 = vlog2.f32 %v2305_v58  ;;  %v1992_v2 = vmul.f32 0.6931472, %v3259_v19  ;;  %v2411_v60 = vadd.f32 %v2395_v16, %v2379_v47  ;;  %v5554_v34 = vld [vmem:[#allocation112_spill] sm:$0xff] }
 0x3dc   :  { %v3263_v0 = vpop.eup %3262  ;;  %3274 = vlog2.f32 %v4922_v6  ;;  %v2362_v41 = vadd.f32 %v2333_v17, %v4766_v40  ;;  %v1998_v32 = vmul.f32 0.6931472, %v3261_v4  ;;  %v1663_v40 = vadd.f32 %v1641_v63, %v5549_v46  ;;  %v5555_v58 = vld [vmem:[#allocation92_spill] sm:$0xff]  ;;  %v5556_v63 = vld [vmem:[#allocation93_spill] sm:$0xff] }
 0x3dd   :  { %v3265_v9 = vpop.eup %3264  ;;  %3276 = vlog2.f32 %v5547_v22  ;;  %v1645_v21 = vmul.f32 0.6931472, %v3263_v0  ;;  %v2032_v52 = vsub.f32 %v5136_v30, %v5047_v61  ;;  %v2015_v4 = vadd.f32 %v1992_v2, %v5555_v58  ;;  %v5568_v58 = vld [vmem:[#allocation85_spill] sm:$0xff]  ;;  %v5573_v35 = vld [vmem:[#allocation20_spill] sm:$0xff] }
 0x3de   :  { %v3267_v20 = vpop.eup %3266  ;;  %3278 = vlog2.f32 %v5548_v12  ;;  %v2378_v6 = vsub.f32 %v2362_v41, %v5057_v59  ;;  %v2321_v28 = vpop.xlane.xlu1 %2320  ;;  %v2339_v7 = vmul.f32 0.6931472, %v3265_v9  ;;  %v1662_v59 = vadd.f32 %v1639_v11, %v5552_v36  ;;  %v5559_v11 = vld [vmem:[#allocation109_spill] sm:$0xff]  ;;  %v5560_v12 = vld [vmem:[#allocation44_spill] sm:$0xff] }
 0x3df   :  { %3280 = vlog2.f32 %v5550_v49  ;;  %v2343_v54 = vmul.f32 0.6931472, %v3267_v20  ;;  %v3269_v5 = vpop.eup %3268  ;;  %v5144_v48 = vpop.xlane.xlu0 %1301  ;;  %v2018_v0 = vadd.f32 %v1998_v32, %v5556_v63  ;;  %v2427_v30 = vmul.f32 0.0, %v2411_v60 }
 0x3e0   :  { %3282 = vlog2.f32 %v5551_v62  ;;  %v2410_v26 = vadd.f32 %v2394_v42, %v2378_v6  ;;  %v3271_v17 = vpop.eup %3270  ;;  %v5557_v42 = vld [vmem:[#allocation94_spill] sm:$0xff]  ;;  %v1643_v9 = vmul.f32 0.6931472, %v3269_v5  ;;  %v2365_v22 = vadd.f32 %v2339_v7, %v5559_v11  ;;  %v5561_v6 = vld [vmem:[#allocation16_spill] sm:$0xff] }
 0x3e1   :  { %3284 = vlog2.f32 %v5553_v55  ;;  %v2367_v19 = vadd.f32 %v2343_v54, %v5554_v34  ;;  %v1665_v47 = vadd.f32 %v1645_v21, %v5557_v42  ;;  %v1679_v32 = vsub.f32 %v1663_v40, %v5560_v12  ;;  %v5562_v54 = vld [vmem:[#allocation15_spill] sm:$0xff]  ;;  %v5565_v34 = vld [vmem:[#allocation30_spill] sm:$0xff] }
 0x3e2   :  { %v2426_v41 = vmul.f32 0.0, %v2410_v26  ;;  %3286 = vlog2.f32 %v5077_v14  ;;  %v2309_v16 = vpop.xlane.xlu1 %2308  ;;  %v1678_v46 = vsub.f32 %v1662_v59, %v5561_v6  ;;  %v1996_v14 = vmul.f32 0.6931472, %v3271_v17  ;;  %v5567_v17 = vld [vmem:[#allocation7_spill] sm:$0xff]  ;;  %v5574_v12 = vld [vmem:[#allocation98_spill] sm:$0xff] }
 0x3e3   :  { %v2383_v61 = vsub.f32 %v2367_v19, %v5108_v18  ;;  %3288 = vlog2.f32 %v2309_v16  ;;  %v2031_v5 = vsub.f32 %v2015_v4, %v5562_v54  ;;  %v5563_v18 = vld [vmem:[#allocation27_spill] sm:$0xff]  ;;  %v5165_v60 = vpop.xlane.xlu0 %1243  ;;  %v1681_v40 = vsub.f32 %v1665_v47, %v5565_v34  ;;  %v5566_v19 = vld [vmem:[#allocation46_spill] sm:$0xff] }
 0x3e4   :  { %3290 = vlog2.f32 %v5558_v29  ;;  %v2441_v20 = vadd.f32 %v5093_v10, %v2426_v41  ;;  %v5564_v10 = vld [vmem:[#allocation81_spill] sm:$0xff]  ;;  %v2034_v59 = vsub.f32 %v2018_v0, %v5566_v19  ;;  %v5172_v63 = vmul.f32 5.0, %v5568_v58  ;;  %v5569_v4 = vld [vmem:[#allocation95_spill] sm:$0xff] }
 0x3e5   :  { %v3273_v2 = vpop.eup %3272  ;;  %v5161_v49 = vadd.f32 %v2399_v39, %v2383_v61  ;;  %3292 = vlog2.f32 %v5563_v18  ;;  %v1319_v55 = vmul.f32 5.0, %v5564_v10  ;;  %v5175_v41 = vadd.f32 %v1643_v9, %v5569_v4  ;;  %v5570_v42 = vld [vmem:[#allocation111_spill] sm:$0xff]  ;;  %v5571_v9 = vld [vmem:[#allocation96_spill] sm:$0xff]  ;;  %v5578_v19 = vld [vmem:[#allocation105_spill] sm:$0xff] }
 0x3e6   :  { %v3275_v21 = vpop.eup %3274  ;;  %v2337_v62 = vmul.f32 0.6931472, %v3273_v2  ;;  %v2442_v26 = vadd.f32 %v2441_v20, %v2427_v30  ;;  %v1621_v7 = vpop.xlane.xlu1 %1620  ;;  %3294 = vlog2.f32 %v5567_v17  ;;  %v2381_v16 = vsub.f32 %v2365_v22, %v5100_v51 }
 0x3e7   :  { %v3277_v36 = vpop.eup %3276  ;;  %v2397_v0 = vadd.f32 %v2028_v13, %v1675_v1  ;;  %v2396_v47 = vadd.f32 %v2027_v38, %v1674_v15  ;;  %v2398_v51 = vadd.f32 %v2029_v50, %v1676_v57  ;;  %v2017_v8 = vadd.f32 %v1996_v14, %v5571_v9  ;;  %v1246_v38 = vpop.xlane.xlu0 %1245 }
 0x3e8   :  { %v3279_v39 = vpop.eup %3278  ;;  %v2364_v61 = vadd.f32 %v2337_v62, %v5570_v42  ;;  %v2400_v53 = vadd.f32 %v2031_v5, %v1678_v46  ;;  %3296 = vlog2.f32 %v2321_v28  ;;  %v5198_v31 = vadd.f32 %v2032_v52, %v1679_v32  ;;  %v5575_v46 = vld [vmem:[#allocation106_spill] sm:$0xff]  ;;  %v5579_v42 = vld [vmem:[#allocation97_spill] sm:$0xff] }
 0x3e9   :  { %v3281_v29 = vpop.eup %3280  ;;  %v1649_v1 = vmul.f32 0.6931472, %v3275_v21  ;;  %v2345_v56 = vmul.f32 0.6931472, %v3279_v39  ;;  %3298 = vlog2.f32 %v5095_v23  ;;  %v5201_v33 = vadd.f32 %v2034_v59, %v1681_v40 }
 0x3ea   :  { %v3283_v44 = vpop.eup %3282  ;;  %v2380_v30 = vsub.f32 %v2364_v61, %v1319_v55  ;;  %v2327_v24 = vpop.xlane.xlu1 %2326  ;;  %v1680_v43 = vsub.f32 %v5175_v41, %v5572_v3  ;;  %v2413_v13 = vadd.f32 %v2397_v0, %v2381_v16  ;;  %3300 = vlog2.f32 %v1621_v7  ;;  %v5577_v55 = vld [vmem:[#allocation99_spill] sm:$0xff] }
 0x3eb   :  { %v3285_v27 = vpop.eup %3284  ;;  %v2033_v50 = vsub.f32 %v2017_v8, %v5573_v35  ;;  %v1647_v28 = vmul.f32 0.6931472, %v3281_v29  ;;  %v2347_v52 = vmul.f32 0.6931472, %v3283_v44  ;;  %3302 = vlog2.f32 %v5097_v25  ;;  %v5576_v25 = vld [vmem:[#allocation114_spill] sm:$0xff]  ;;  %v1248_v58 = vpop.xlane.xlu0 %1247 }
 0x3ec   :  { %v3287_v45 = vpop.eup %3286  ;;  %v2412_v15 = vadd.f32 %v2396_v47, %v2380_v30  ;;  %v1323_v23 = vmul.f32 5.0, %v5124_v37  ;;  %3304 = vlog2.f32 %v2327_v24  ;;  %v5209_v32 = vadd.f32 %v1649_v1, %v5574_v12  ;;  %v5580_v47 = vld [vmem:[#allocation108_spill] sm:$0xff]  ;;  %v5581_v30 = vld [vmem:[#allocation9_spill] sm:$0xff] }
 0x3ed   :  { %v3289_v57 = vpop.eup %3288  ;;  %v2002_v6 = vmul.f32 0.6931472, %v3277_v36  ;;  %v2368_v14 = vadd.f32 %v2345_v56, %v5575_v46  ;;  %v1324_v21 = vmul.f32 5.0, %v5144_v48  ;;  %v2429_v5 = vmul.f32 0.0, %v2413_v13  ;;  %v5583_v56 = vld [vmem:[#allocation25_spill] sm:$0xff]  ;;  %v5584_v13 = vld [vmem:[#allocation103_spill] sm:$0xff] }
 0x3ee   :  { %v3291_v11 = vpop.eup %3290  ;;  %v2428_v22 = vmul.f32 0.0, %v2412_v15  ;;  %v2341_v20 = vmul.f32 0.6931472, %v3289_v57  ;;  %v1304_v2 = vpop.xlane.xlu1 %1303  ;;  %v2349_v18 = vmul.f32 0.6931472, %v3287_v45  ;;  %v1666_v37 = vadd.f32 %v1647_v28, %v5577_v55  ;;  %v5587_v55 = vld [vmem:[#allocation113_spill] sm:$0xff] }
 0x3ef   :  { %v3293_v54 = vpop.eup %3292  ;;  %v2000_v34 = vmul.f32 0.6931472, %v3285_v27  ;;  %v1651_v40 = vmul.f32 0.6931472, %v3291_v11  ;;  %v2369_v59 = vadd.f32 %v2347_v52, %v5578_v19  ;;  %v2384_v17 = vsub.f32 %v2368_v14, %v1323_v23  ;;  %v5582_v27 = vld [vmem:[#allocation100_spill] sm:$0xff]  ;;  %v5585_v11 = vld [vmem:[#allocation107_spill] sm:$0xff]  ;;  %v1250_v46 = vpop.xlane.xlu0 %1249 }
 0x3f0   :  { %v2443_v62 = vadd.f32 %v2442_v26, %v2428_v22  ;;  %v2366_v7 = vadd.f32 %v2341_v20, %v5576_v25  ;;  %v3295_v10 = vpop.eup %3294  ;;  %v1325_v4 = vmul.f32 5.0, %v1304_v2  ;;  %v2351_v41 = vmul.f32 0.6931472, %v3293_v54 }
 0x3f1   :  { %v2385_v16 = vsub.f32 %v2369_v59, %v1324_v21  ;;  %v2020_v26 = vadd.f32 %v2002_v6, %v5579_v42  ;;  %v2004_v29 = vmul.f32 0.6931472, %v3295_v10  ;;  %v2370_v9 = vadd.f32 %v2349_v18, %v5580_v47 }
 0x3f2   :  { %v2382_v36 = vsub.f32 %v2366_v7, %v5172_v63  ;;  %v2444_v39 = vadd.f32 %v2443_v62, %v2429_v5  ;;  %v2325_v48 = vpop.xlane.xlu1 %2324  ;;  %v3297_v61 = vpop.eup %3296  ;;  %v2402_v8 = vadd.f32 %v2033_v50, %v1680_v43  ;;  %v1682_v24 = vsub.f32 %v1666_v37, %v5581_v30 }
 0x3f3   :  { %3306 = vlog2.f32 %v2325_v48  ;;  %v3299_v44 = vpop.eup %3298  ;;  %v2019_v63 = vadd.f32 %v2000_v34, %v5582_v27  ;;  %v1263_v1 = vmul.f32 5.0, %v5165_v60  ;;  %v1683_v45 = vsub.f32 %v5209_v32, %v5583_v56  ;;  %v5586_v32 = vld [vmem:[#allocation104_spill] sm:$0xff]  ;;  %v5589_v48 = vld [vmem:[#allocation110_spill] sm:$0xff]  ;;  %v1314_v47 = vpop.xlane.xlu0 %1313 }
 0x3f4   :  { %v2414_v0 = vadd.f32 %v2398_v51, %v2382_v36  ;;  %v3301_v3 = vpop.eup %3300  ;;  %v5225_v15 = vadd.f32 %v1651_v40, %v5584_v13  ;;  %v2416_v57 = vadd.f32 %v2400_v53, %v2384_v17  ;;  %v2386_v51 = vsub.f32 %v2370_v9, %v1325_v4  ;;  %v5588_v36 = vld [vmem:[#allocation102_spill] sm:$0xff] }
 0x3f5   :  { %v3303_v52 = vpop.eup %3302  ;;  %v2353_v43 = vmul.f32 0.6931472, %v3297_v61  ;;  %v2417_v50 = vadd.f32 %v5198_v31, %v2385_v16  ;;  %v2371_v22 = vadd.f32 %v2351_v41, %v5585_v11  ;;  %v2431_v60 = vmul.f32 0.0, %v5161_v49  ;;  %v5590_v61 = vld [vmem:[#allocation101_spill] sm:$0xff] }
 0x3f6   :  { %v2430_v35 = vmul.f32 0.0, %v2414_v0  ;;  %v1306_v28 = vpop.xlane.xlu1 %1305  ;;  %v3305_v20 = vpop.eup %3304  ;;  %v1264_v12 = vmul.f32 5.0, %v1246_v38  ;;  %v2021_v6 = vadd.f32 %v2004_v29, %v5586_v32  ;;  %v2355_v14 = vmul.f32 0.6931472, %v3299_v44 }
 0x3f7   :  { %v1326_v23 = vmul.f32 5.0, %v1306_v28  ;;  %v2035_v53 = vsub.f32 %v2019_v63, %v1263_v1  ;;  %v1653_v21 = vmul.f32 0.6931472, %v3301_v3  ;;  %v2006_v5 = vmul.f32 0.6931472, %v3303_v52  ;;  %v5592_v1 = vld [vmem:[#allocation32_spill] sm:$0xff] }
 0x3f8   :  { %v2445_v2 = vadd.f32 %v2444_v39, %v2430_v35  ;;  %v2432_v18 = vmul.f32 0.0, %v2416_v57  ;;  %v2418_v62 = vadd.f32 %v2402_v8, %v2386_v51  ;;  %v2433_v7 = vmul.f32 0.0, %v2417_v50  ;;  %v5593_v35 = vld [vmem:[#allocation23_spill] sm:$0xff]  ;;  %v5594_v28 = vld [vmem:[#allocation8_spill] sm:$0xff] }
 0x3f9   :  { %v2387_v54 = vsub.f32 %v2371_v22, %v1326_v23  ;;  %v2359_v10 = vmul.f32 0.6931472, %v3305_v20  ;;  %v2372_v37 = vadd.f32 %v2353_v43, %v5587_v55  ;;  %v2036_v49 = vsub.f32 %v2020_v26, %v1264_v12  ;;  %v5591_v26 = vld [vmem:[#allocation115_spill] sm:$0xff]  ;;  %v5595_v20 = vld [vmem:[#allocation116_spill] sm:$0xff] }
 0x3fa   :  { %v2446_v25 = vadd.f32 %v2445_v2, %v2431_v60  ;;  %v1308_v31 = vpop.xlane.xlu1 %1307  ;;  %v1265_v40 = vmul.f32 5.0, %v1248_v58  ;;  %v2404_v17 = vadd.f32 %v2035_v53, %v1682_v24  ;;  %v1669_v39 = vadd.f32 %v1653_v21, %v5588_v36 }
 0x3fb   :  { %v1327_v34 = vmul.f32 5.0, %v1308_v31  ;;  %v2419_v19 = vadd.f32 %v5201_v33, %v2387_v54  ;;  %v2373_v41 = vadd.f32 %v2355_v14, %v5589_v48  ;;  %v2434_v16 = vmul.f32 0.0, %v2418_v62  ;;  %v5596_v14 = vld [vmem:[#allocation42_spill] sm:$0xff] }
 0x3fc   :  { %v2447_v38 = vadd.f32 %v2446_v25, %v2432_v18  ;;  %v2022_v29 = vadd.f32 %v2006_v5, %v5590_v61  ;;  %v1266_v0 = vmul.f32 5.0, %v1250_v46  ;;  %v2375_v58 = vadd.f32 %v2359_v10, %v5591_v26 }
 0x3fd   :  { %v3307_v59 = vpop.eup %3306  ;;  %v2388_v4 = vsub.f32 %v2372_v37, %v1327_v34  ;;  %v2405_v33 = vadd.f32 %v2036_v49, %v1683_v45  ;;  %v2037_v27 = vsub.f32 %v2021_v6, %v1265_v40  ;;  %v2435_v63 = vmul.f32 0.0, %v2419_v19 }
 0x3fe   :  { %v2448_v42 = vadd.f32 %v2447_v38, %v2433_v7  ;;  %v1310_v9 = vpop.xlane.xlu1 %1309  ;;  %v2357_v8 = vmul.f32 0.6931472, %v3307_v59  ;;  %v1685_v56 = vsub.f32 %v1669_v39, %v5592_v1  ;;  %v1330_v3 = vmul.f32 5.0, %v1314_v47  ;;  %v5597_v59 = vld [vmem:[#allocation39_spill] sm:$0xff] }
 0x3ff   :  { %v2420_v44 = vadd.f32 %v2404_v17, %v2388_v4  ;;  %v1328_v30 = vmul.f32 5.0, %v1310_v9  ;;  %v1067_v51 = vrot.slane %v5593_v35, 2  ;;  %v1684_v52 = vsub.f32 %v5225_v15, %v5594_v28 }
 0x400   :  { %v2449_v24 = vadd.f32 %v2448_v42, %v2434_v16  ;;  %v2038_v43 = vsub.f32 %v2022_v29, %v1266_v0  ;;  %v2391_v22 = vsub.f32 %v2375_v58, %v1330_v3  ;;  %v2374_v45 = vadd.f32 %v2357_v8, %v5595_v20  ;;  %v2463_v58 = vld [vmem:[%s5262_s5] sm:$0x1] }
 0x401   :  { %v2436_v13 = vmul.f32 0.0, %v2420_v44  ;;  %v2389_v57 = vsub.f32 %v2373_v41, %v1328_v30  ;;  %v2406_v2 = vadd.f32 %v2037_v27, %v1684_v52  ;;  %v869_v53 = vrot.slane %v5596_v14, 2 }
 0x402   :  { %v2450_v50 = vadd.f32 %v2449_v24, %v2435_v63  ;;  %v1312_v11 = vpop.xlane.xlu1 %1311  ;;  %v2407_v12 = vadd.f32 %v2038_v43, %v1685_v56  ;;  %v1068_v21 = vadd.f32 %v1067_v51, %v5593_v35  ;;  %vm2464_vm1 = vcmp.eq.s32.totalorder %v5597_v59, 0 }
 0x403   :  { %v2421_v23 = vadd.f32 %v2405_v33, %v2389_v57  ;;  %v1329_v60 = vmul.f32 5.0, %v1312_v11  ;;  %v870_v62 = vadd.f32 %v869_v53, %v5596_v14  ;;  %vm2467_vm2 = vcmp.eq.s32.totalorder %v5597_v59, 1 }
 0x404   :  { %v2451_v32 = vadd.f32 %v2450_v50, %v2436_v13  ;;  %v2423_v54 = vadd.f32 %v2407_v12, %v2391_v22  ;;  %v1069_v25 = vrot.slane %v1068_v21, 1  ;;  %v5598_v48 = vmov 0.0  }
 0x405   :  { %v2437_v6 = vmul.f32 0.0, %v2421_v23  ;;  %v2390_v46 = vsub.f32 %v2374_v45, %v1329_v60  ;;  %v871_v55 = vrot.slane %v870_v62, 1  ;;  %v2465_v41 = vsel %vm2464_vm1, 1.0, %v5598_v48 }
 0x406   :  { %v2439_v31 = vmul.f32 0.0, %v2423_v54  ;;  %v1070_v37 = vadd.f32 %v1069_v25, %v1068_v21  ;;  %v2468_v16 = vsel %vm2467_vm2, 1.0, %v5598_v48  ;;  %vm2471_vm3 = vcmp.eq.s32.totalorder %v5597_v59, 2 }
 0x407   :  { %v2422_v5 = vadd.f32 %v2406_v2, %v2390_v46  ;;  %v2452_v15 = vadd.f32 %v2451_v32, %v2437_v6  ;;  %v872_v40 = vadd.f32 %v871_v55, %v870_v62  ;;  %v2472_v47 = vsel %vm2471_vm3, 1.0, %v5598_v48 }
 0x408   :  { %v1071_v38 = vmul.f32 0.0001, %v1070_v37 }
 0x409   :  { %v2438_v18 = vmul.f32 0.0, %v2422_v5  ;;  %v873_v36 = vmul.f32 0.0625, %v872_v40 }
 0x40a   :  { %v1072_v39 = vmul.f32 0.0625, %v1071_v38 }
 0x40b   :  { %v2453_v7 = vadd.f32 %v2452_v15, %v2438_v18  ;;  %v2466_v61 = vmul.f32 %v2465_v41, %v873_v36 }
 0x40c   :  { %v2469_v29 = vmul.f32 %v2468_v16, %v1072_v39 }
 0x40d   :  { %v2454_v10 = vadd.f32 %v2453_v7, %v2439_v31 }
 0x40e   :  { %v2470_v8 = vadd.f32 %v2469_v29, %v2466_v61 }
 0x40f   :  { %v2455_v34 = vrot.slane %v2454_v10, 4 }
 0x411   :  { %v2456_v49 = vadd.f32 %v2455_v34, %v2454_v10 }
 0x413   :  { %v2457_v19 = vrot.slane %v2456_v49, 2 }
 0x415   :  { %v2458_v17 = vadd.f32 %v2457_v19, %v2456_v49 }
 0x417   :  { %v2459_v4 = vrot.slane %v2458_v17, 1 }
 0x419   :  { %v2460_v42 = vadd.f32 %v2459_v4, %v2458_v17 }
 0x41b   :  { %v2461_v0 = vmul.f32 0.1, %v2460_v42 }
 0x41d   :  { %v2462_v9 = vmul.f32 0.0625, %v2461_v0 }
 0x41f   :  { %v2473_v26 = vmul.f32 %v2472_v47, %v2462_v9 }
 0x421   :  { %v2474_v44 = vadd.f32 %v2473_v26, %v2470_v8 }
 0x423   :  { %v2475_v30 = vadd.f32 %v2474_v44, %v2463_v58 }
 0x425   :  { %2476 = vst [vmem:[%s5262_s5] sm:$0x1] %v2475_v30 }

</bundles_post_ra>
